<compile_context>
chip_gen: v6e
topology: v6e:2x2x1
jax: 0.10.0
libtpu: 0.0.40
codegen_flags: <defaults>
</compile_context>

<pallas_src>
import functools
import math

import jax
import jax.numpy as jnp
from jax import lax
from jax.experimental import pallas as pl
from jax.experimental.pallas import tpu as pltpu

F32 = jnp.float32
BF16 = jnp.bfloat16
VMEM_SPEC = pl.BlockSpec(memory_space=pltpu.MemorySpace.VMEM)


# ----------------------------------------------------------------------------
# Fused kernel: embedding DMA-gather -> GRU -> q_net -> dual Att_3 ->
#               gv_net -> joint -> per-variant BN -> classifier -> CL loss
# ----------------------------------------------------------------------------
def _model_kernel(tok_ref,                                   # SMEM (NBT,) int32
                  emb_hbm,                                   # HBM  (V, Ep) f32
                  v_ref,                                     # VMEM (B*K, Vdp) f32
                  wi_ref, bi_ref, wh_ref, bh_ref,            # GRU (bf16 W, f32 b)
                  wqn_ref, bqn_ref,                          # q_net
                  wv_ref, bv_ref, wq_ref, bq_ref, wl_ref,    # dual Att_3 (stacked)
                  wgv_ref, bgv_ref,                          # gv_net
                  wc1_ref, bc1_ref, wc2_ref, bc2_ref,        # classifier
                  logits_ref, loss_ref,                      # outputs
                  wbuf, xw_ref, gsem,                        # scratch
                  *, nvar, temperature, tau_plus, beta, estimator):
    NBT, Ep = wbuf.shape                  # T*4B, padded emb_dim
    NB = logits_ref.shape[0]              # 4B
    Hp = wqn_ref.shape[0]                 # padded num_hid
    T = NBT // NB
    B = NB // nvar
    BK, Vdp = v_ref.shape
    K = BK // B
    H2 = wv_ref.shape[1]                  # 2 * Hp (both attention heads)

    # ---- 1. embedding gather: one row DMA per token, HBM -> VMEM scratch ----
    @pl.loop(0, NBT)
    def _issue(i):
        pltpu.make_async_copy(emb_hbm.at[tok_ref[i]], wbuf.at[i], gsem).start()

    @pl.loop(0, NBT)
    def _drain(i):
        # All rows have identical size; each wait retires one row's DMA.
        pltpu.make_async_copy(emb_hbm.at[0], wbuf.at[0], gsem).wait()

    # ---- 2. GRU: hoisted input projection + unrolled recurrence -------------
    w_emb = wbuf[...].astype(BF16)                                   # (NBT, Ep)
    xw_ref[...] = (jnp.dot(w_emb, wi_ref[...],
                           preferred_element_type=F32) + bi_ref[...])  # (NBT, 3Hp)

    wh = wh_ref[...]                      # (Hp, 3Hp) bf16
    bh = bh_ref[...]                      # (1, 3Hp)  f32

    def gru_step(t, h):
        off = pl.multiple_of(t * NB, NB)
        x_t = xw_ref[pl.ds(off, NB), :]                              # (NB, 3Hp)
        gh = jnp.dot(h.astype(BF16), wh, preferred_element_type=F32) + bh
        r = jax.nn.sigmoid(x_t[:, :Hp] + gh[:, :Hp])
        z = jax.nn.sigmoid(x_t[:, Hp:2 * Hp] + gh[:, Hp:2 * Hp])
        n = jnp.tanh(x_t[:, 2 * Hp:] + r * gh[:, 2 * Hp:])
        return (1.0 - z) * n + z * h

    q_emb = lax.fori_loop(0, T, gru_step, jnp.zeros((NB, Hp), F32), unroll=True)
    q_emb_b = q_emb.astype(BF16)
    q_repr = jnp.maximum(
        jnp.dot(q_emb_b, wqn_ref[...], preferred_element_type=F32) + bqn_ref[...],
        0.0)                                                         # (NB, Hp)

    # ---- 3. dual Att_3 (shared visual projection, no variant replication) ---
    v_flat = v_ref[...]                                              # (B*K, Vdp) f32
    vp = jnp.maximum(
        jnp.dot(v_flat.astype(BF16), wv_ref[...],
                preferred_element_type=F32) + bv_ref[...], 0.0)      # (B*K, 2Hp)
    vp3 = vp.reshape(B, K, H2)
    v3 = v_flat.reshape(B, K, Vdp)

    qp = jnp.maximum(
        jnp.dot(q_emb_b, wq_ref[...], preferred_element_type=F32) + bq_ref[...],
        0.0)                                                         # (NB, 2Hp)
    # Fold the per-head scoring weight into qp; the per-head bias is constant
    # over regions and therefore softmax-invariant -> dropped.
    qw = qp * wl_ref[...]                                            # (NB, 2Hp)

    def softmax_last(x):
        m = jnp.max(x, axis=-1, keepdims=True)
        e = jnp.exp(x - m)
        return e / jnp.sum(e, axis=-1, keepdims=True)

    gv_list = []
    for n in range(nvar):                        # static 4-iteration loop
        qw_n = qw[n * B:(n + 1) * B]                                 # (B, 2Hp)
        prod = vp3 * qw_n[:, None, :]                                # (B, K, 2Hp)
        l1 = jnp.sum(prod[:, :, :Hp], axis=2)                        # (B, K)
        l2 = jnp.sum(prod[:, :, Hp:], axis=2)                        # (B, K)
        att = softmax_last(l1) + softmax_last(l2)                    # att_1 + att_2
        gv_list.append(jnp.sum(att[:, :, None] * v3, axis=1))        # (B, Vdp)
    gv_emb = jnp.concatenate(gv_list, axis=0)                        # (NB, Vdp)

    # ---- 4. gv_net + joint + per-variant BatchNorm (batch stats) ------------
    gv_repr = jnp.maximum(
        jnp.dot(gv_emb.astype(BF16), wgv_ref[...],
                preferred_element_type=F32) + bgv_ref[...], 0.0)     # (NB, Hp)
    joint = q_repr * gv_repr

    jr = joint.reshape(nvar, B, Hp)
    mean = jnp.mean(jr, axis=1, keepdims=True)
    var = jnp.mean((jr - mean) ** 2, axis=1, keepdims=True)          # biased var
    jbn = ((jr - mean) * lax.rsqrt(var + 1e-5)).reshape(NB, Hp)

    # ---- 5. classifier -------------------------------------------------------
    hidden = jnp.maximum(
        jnp.dot(jbn.astype(BF16), wc1_ref[...],
                preferred_element_type=F32) + bc1_ref[...], 0.0)
    logits_ref[...] = (jnp.dot(hidden.astype(BF16), wc2_ref[...],
                               preferred_element_type=F32) + bc2_ref[...])

    # ---- 6. contrastive criterion: variant 0 (original) vs last (positive) --
    eps = 1e-12
    x1 = jbn[0:B]
    x2 = jbn[(nvar - 1) * B: nvar * B]
    n1 = x1 / jnp.maximum(jnp.sqrt(jnp.sum(x1 * x1, axis=-1, keepdims=True)), eps)
    n2 = x2 / jnp.maximum(jnp.sqrt(jnp.sum(x2 * x2, axis=-1, keepdims=True)), eps)
    out = jnp.concatenate([n1, n2], axis=0)                          # (2B, Hp)
    sim = jnp.einsum("ih,jh->ij", out, out,
                     preferred_element_type=F32) / temperature       # (2B, 2B)
    neg = jnp.exp(sim)

    twob = 2 * B
    row = lax.broadcasted_iota(jnp.int32, (twob, twob), 0)
    col = lax.broadcasted_iota(jnp.int32, (twob, twob), 1)
    rb = row % B
    keep = jnp.logical_and(col != rb, col != rb + B)                 # negative mask

    pos = jnp.exp(jnp.sum(n1 * n2, axis=-1, keepdims=True) / temperature)
    pos = jnp.concatenate([pos, pos], axis=0)                        # (2B, 1)

    if estimator == "easy":
        Ng = jnp.sum(jnp.where(keep, neg, 0.0), axis=-1, keepdims=True)
    else:  # 'hard'
        N = B * 2 - 2
        imp = jnp.where(keep, jnp.exp(beta * sim), 0.0)              # neg**beta
        reweight = (jnp.sum(imp * neg, axis=-1, keepdims=True)
                    / (jnp.sum(imp, axis=-1, keepdims=True) / N))
        Ng = (-tau_plus * N * pos + reweight) / (1.0 - tau_plus)
        Ng = jnp.maximum(Ng, N * math.e ** (-1.0 / temperature))

    loss = -jnp.log(pos / (pos + Ng))
    loss_ref[...] = jnp.sum(loss, axis=0, keepdims=True) / float(twob)


# ----------------------------------------------------------------------------
# Parameters (PyTorch-like layout) + packing into padded bf16 kernel layout
# ----------------------------------------------------------------------------
def init_params(key, ntokens, emb_dim, num_hid, v_dim, ans_dim):
    keys = list(jax.random.split(key, 64))
    it = iter(keys)

    def w(shape, scale=0.08):
        return (scale * jax.random.normal(next(it), shape)).astype(F32)

    def zeros(shape):
        return jnp.zeros(shape, F32)

    emb = w((ntokens + 1, emb_dim))
    emb = emb.at[ntokens].set(0.0)                 # padding_idx = ntokens

    gru = dict(
        wir=w((emb_dim, num_hid)), wiz=w((emb_dim, num_hid)), win=w((emb_dim, num_hid)),
        whr=w((num_hid, num_hid)), whz=w((num_hid, num_hid)), whn=w((num_hid, num_hid)),
        bir=zeros((1, num_hid)), biz=zeros((1, num_hid)), bin=zeros((1, num_hid)),
        bhr=zeros((1, num_hid)), bhz=zeros((1, num_hid)), bhn=zeros((1, num_hid)),
    )

    def att_params():
        return dict(
            wv=w((v_dim, num_hid)), bv=zeros((1, num_hid)),
            wq=w((num_hid, num_hid)), bq=zeros((1, num_hid)),
            wl=w((1, num_hid)), bl=zeros((1, 1)),
        )

    return dict(
        emb=emb, gru=gru,
        q_net_w=w((num_hid, num_hid)), q_net_b=zeros((1, num_hid)),
        gv_net_w=w((v_dim, num_hid)), gv_net_b=zeros((1, num_hid)),
        att1=att_params(), att2=att_params(),
        cls_w1=w((num_hid, 2 * num_hid)), cls_b1=zeros((1, 2 * num_hid)),
        cls_w2=w((2 * num_hid, ans_dim)), cls_b2=zeros((1, ans_dim)),
    )


def _rup(n, m=128):
    return ((n + m - 1) // m) * m


def _pad2(x, rows, cols, dtype):
    out = jnp.zeros((rows, cols), dtype)
    return out.at[:x.shape[0], :x.shape[1]].set(x.astype(dtype))


def _pack_blocks(blocks, block_w, rows_pad, dtype):
    """Place block i at column offset i*block_w inside a zero-padded matrix."""
    w = jnp.zeros((rows_pad, block_w * len(blocks)), dtype)
    for i, b in enumerate(blocks):
        w = w.at[:b.shape[0], i * block_w:i * block_w + b.shape[1]].set(b.astype(dtype))
    return w


def pack_params(p):
    emb_dim = p["emb"].shape[1]
    num_hid = p["q_net_w"].shape[0]
    v_dim = p["gv_net_w"].shape[0]
    ans_dim = p["cls_w2"].shape[1]
    Ep, Hp, Vdp, Ap = _rup(emb_dim), _rup(num_hid), _rup(v_dim), _rup(ans_dim)
    Ch = _rup(2 * num_hid)                         # classifier hidden width
    g = p["gru"]
    a1, a2 = p["att1"], p["att2"]
    return dict(
        # Embedding table stays f32 (exact gather, like nn.Embedding); HBM-resident.
        emb=_pad2(p["emb"], p["emb"].shape[0], Ep, F32),
        # GRU gates concatenated along the lane dim in Hp-wide blocks (r|z|n).
        wi=_pack_blocks([g["wir"], g["wiz"], g["win"]], Hp, Ep, BF16),
        bi=_pack_blocks([g["bir"], g["biz"], g["bin"]], Hp, 1, F32),
        wh=_pack_blocks([g["whr"], g["whz"], g["whn"]], Hp, Hp, BF16),
        bh=_pack_blocks([g["bhr"], g["bhz"], g["bhn"]], Hp, 1, F32),
        wqnet=_pad2(p["q_net_w"], Hp, Hp, BF16),
        bqnet=_pad2(p["q_net_b"], 1, Hp, F32),
        # Both Att_3 heads stacked along the lane dim in Hp-wide blocks.
        wv=_pack_blocks([a1["wv"], a2["wv"]], Hp, Vdp, BF16),
        bv=_pack_blocks([a1["bv"], a2["bv"]], Hp, 1, F32),
        wq=_pack_blocks([a1["wq"], a2["wq"]], Hp, Hp, BF16),
        bq=_pack_blocks([a1["bq"], a2["bq"]], Hp, 1, F32),
        # Per-head scoring weight folded into one (1, 2Hp) row (bias dropped:
        # it is constant over regions, hence softmax-invariant).
        wl=_pack_blocks([a1["wl"].reshape(1, num_hid),
                         a2["wl"].reshape(1, num_hid)], Hp, 1, F32),
        wgv=_pad2(p["gv_net_w"], Vdp, Hp, BF16),
        bgv=_pad2(p["gv_net_b"], 1, Hp, F32),
        wc1=_pad2(p["cls_w1"], Hp, Ch, BF16),
        bc1=_pad2(p["cls_b1"], 1, Ch, F32),
        wc2=_pad2(p["cls_w2"], Ch, Ap, BF16),
        bc2=_pad2(p["cls_b2"], 1, Ap, F32),
    )


# ----------------------------------------------------------------------------
# Full forward (ONE pallas_call)
# ----------------------------------------------------------------------------
def model_forward(packed, q, shuffling_q, removal_q, positive_q, gv_ori, *,
                  ans_dim, temperature, estimator, tau_plus, beta):
    nvar = 4
    B, T = q.shape
    K, v_dim = gv_ori.shape[1], gv_ori.shape[2]
    Ep = packed["emb"].shape[1]
    Vdp = packed["wv"].shape[0]
    Ap = packed["wc2"].shape[1]
    NB = nvar * B

    tokens = jnp.concatenate([q, shuffling_q, removal_q, positive_q], axis=0)  # (4B, T)
    tok_flat = jnp.transpose(tokens, (1, 0)).reshape(NB * T).astype(jnp.int32)  # time-major
    v_flat = gv_ori.reshape(B * K, v_dim).astype(F32)
    v_flat = jnp.pad(v_flat, ((0, 0), (0, Vdp - v_dim)))                        # lane-pad

    kernel = functools.partial(
        _model_kernel, nvar=nvar, temperature=float(temperature),
        tau_plus=float(tau_plus), beta=float(beta), estimator=estimator)

    logits_pad, loss = pl.pallas_call(
        kernel,
        out_shape=(jax.ShapeDtypeStruct((NB, Ap), F32),
                   jax.ShapeDtypeStruct((1, 1), F32)),
        grid_spec=pltpu.PrefetchScalarGridSpec(
            num_scalar_prefetch=1,                     # token ids -> SMEM
            grid=(1,),
            in_specs=[pl.BlockSpec(memory_space=pl.ANY)]   # emb stays in HBM
                     + [VMEM_SPEC] * 18,
            out_specs=[VMEM_SPEC, VMEM_SPEC],
            scratch_shapes=[
                pltpu.VMEM((NB * T, Ep), F32),             # gathered embeddings
                pltpu.VMEM((NB * T, packed["wi"].shape[1]), F32),  # hoisted GRU xW
                pltpu.SemaphoreType.DMA,                   # gather DMA semaphore
            ]),
        compiler_params=pltpu.CompilerParams(
            dimension_semantics=("arbitrary",),
            vmem_limit_bytes=32 * 1024 * 1024),
    )(tok_flat, packed["emb"], v_flat,
      packed["wi"], packed["bi"], packed["wh"], packed["bh"],
      packed["wqnet"], packed["bqnet"],
      packed["wv"], packed["bv"], packed["wq"], packed["bq"], packed["wl"],
      packed["wgv"], packed["bgv"],
      packed["wc1"], packed["bc1"], packed["wc2"], packed["bc2"])

    logits = logits_pad[:, :ans_dim]
    return (logits[0:B], logits[B:2 * B], logits[2 * B:3 * B], logits[3 * B:4 * B],
            loss[0, 0])


# ----------------------------------------------------------------------------
if __name__ == "__main__":
    key = jax.random.PRNGKey(0)
    B, T, K = 8, 8, 16
    ntokens, emb_dim, num_hid, v_dim, ans_dim = 100, 300, 64, 64, 32

    pkey, qkey, vkey, poskey = jax.random.split(key, 4)
    params = init_params(pkey, ntokens, emb_dim, num_hid, v_dim, ans_dim)
    packed = pack_params(params)

    q = jax.random.randint(qkey, (B, T), 0, ntokens, dtype=jnp.int32)
    shuffling_q = jnp.flip(q, axis=1)                     # shuffled tokens
    removal_q = q.at[:, T // 2:].set(ntokens)             # removed -> pad idx
    positive_q = jax.random.randint(poskey, (B, T), 0, ntokens, dtype=jnp.int32)
    gv_ori = (0.5 * jax.random.normal(vkey, (B, K, v_dim))).astype(F32)

    # Hyper-parameters are closed over (compile-time constants), not jit-static args.
    fwd = jax.jit(functools.partial(model_forward, ans_dim=ans_dim,
                                    temperature=0.5, estimator="easy",
                                    tau_plus=0.1, beta=1.0))
    outs = fwd(packed, q, shuffling_q, removal_q, positive_q, gv_ori)
    outs = jax.block_until_ready(outs)

    for o in outs[:4]:
        assert o.shape == (B, ans_dim)
        assert bool(jnp.all(jnp.isfinite(o)))
    assert outs[4].shape == ()
    assert bool(jnp.isfinite(outs[4]))
    print("KERNEL_OK")
</pallas_src>

<mosaic_0001>
module attributes {stable_mosaic.version = 11 : i64} {
  func.func @_model_kernel(%arg0: i32, %arg1: memref<256xi32, #tpu.memory_space<smem>>, %arg2: memref<101x384xf32, #tpu.memory_space<any>>, %arg3: memref<128x128xf32, #tpu.memory_space<vmem>>, %arg4: memref<384x384xbf16, #tpu.memory_space<vmem>>, %arg5: memref<1x384xf32, #tpu.memory_space<vmem>>, %arg6: memref<128x384xbf16, #tpu.memory_space<vmem>>, %arg7: memref<1x384xf32, #tpu.memory_space<vmem>>, %arg8: memref<128x128xbf16, #tpu.memory_space<vmem>>, %arg9: memref<1x128xf32, #tpu.memory_space<vmem>>, %arg10: memref<128x256xbf16, #tpu.memory_space<vmem>>, %arg11: memref<1x256xf32, #tpu.memory_space<vmem>>, %arg12: memref<128x256xbf16, #tpu.memory_space<vmem>>, %arg13: memref<1x256xf32, #tpu.memory_space<vmem>>, %arg14: memref<1x256xf32, #tpu.memory_space<vmem>>, %arg15: memref<128x128xbf16, #tpu.memory_space<vmem>>, %arg16: memref<1x128xf32, #tpu.memory_space<vmem>>, %arg17: memref<128x128xbf16, #tpu.memory_space<vmem>>, %arg18: memref<1x128xf32, #tpu.memory_space<vmem>>, %arg19: memref<128x128xbf16, #tpu.memory_space<vmem>>, %arg20: memref<1x128xf32, #tpu.memory_space<vmem>>, %arg21: memref<32x128xf32, #tpu.memory_space<vmem>>, %arg22: memref<1x1xf32, #tpu.memory_space<vmem>>, %arg23: memref<256x384xf32, #tpu.memory_space<vmem>>, %arg24: memref<256x384xf32, #tpu.memory_space<vmem>>, %arg25: memref<!tpu.dma_semaphore, #tpu.memory_space<semaphore_mem>>) attributes {dimension_semantics = [#tpu.dimension_semantics<arbitrary>], iteration_bounds = array<i64: 1>, scalar_prefetch = 1 : i64, scratch_operands = 3 : i64, tpu.core_type = #tpu.core_type<tc>, window_params = [{}, {pipeline_mode = #tpu.pipeline_mode<synchronous>, transform_indices = @transform_1, window_bounds = array<i64: 128, 128>}, {pipeline_mode = #tpu.pipeline_mode<synchronous>, transform_indices = @transform_2, window_bounds = array<i64: 384, 384>}, {pipeline_mode = #tpu.pipeline_mode<synchronous>, transform_indices = @transform_3, window_bounds = array<i64: 1, 384>}, {pipeline_mode = #tpu.pipeline_mode<synchronous>, transform_indices = @transform_4, window_bounds = array<i64: 128, 384>}, {pipeline_mode = #tpu.pipeline_mode<synchronous>, transform_indices = @transform_5, window_bounds = array<i64: 1, 384>}, {pipeline_mode = #tpu.pipeline_mode<synchronous>, transform_indices = @transform_6, window_bounds = array<i64: 128, 128>}, {pipeline_mode = #tpu.pipeline_mode<synchronous>, transform_indices = @transform_7, window_bounds = array<i64: 1, 128>}, {pipeline_mode = #tpu.pipeline_mode<synchronous>, transform_indices = @transform_8, window_bounds = array<i64: 128, 256>}, {pipeline_mode = #tpu.pipeline_mode<synchronous>, transform_indices = @transform_9, window_bounds = array<i64: 1, 256>}, {pipeline_mode = #tpu.pipeline_mode<synchronous>, transform_indices = @transform_10, window_bounds = array<i64: 128, 256>}, {pipeline_mode = #tpu.pipeline_mode<synchronous>, transform_indices = @transform_11, window_bounds = array<i64: 1, 256>}, {pipeline_mode = #tpu.pipeline_mode<synchronous>, transform_indices = @transform_12, window_bounds = array<i64: 1, 256>}, {pipeline_mode = #tpu.pipeline_mode<synchronous>, transform_indices = @transform_13, window_bounds = array<i64: 128, 128>}, {pipeline_mode = #tpu.pipeline_mode<synchronous>, transform_indices = @transform_14, window_bounds = array<i64: 1, 128>}, {pipeline_mode = #tpu.pipeline_mode<synchronous>, transform_indices = @transform_15, window_bounds = array<i64: 128, 128>}, {pipeline_mode = #tpu.pipeline_mode<synchronous>, transform_indices = @transform_16, window_bounds = array<i64: 1, 128>}, {pipeline_mode = #tpu.pipeline_mode<synchronous>, transform_indices = @transform_17, window_bounds = array<i64: 128, 128>}, {pipeline_mode = #tpu.pipeline_mode<synchronous>, transform_indices = @transform_18, window_bounds = array<i64: 1, 128>}, {pipeline_mode = #tpu.pipeline_mode<synchronous>, transform_indices = @transform_19, window_bounds = array<i64: 32, 128>}, {pipeline_mode = #tpu.pipeline_mode<synchronous>, transform_indices = @transform_20, window_bounds = array<i64: 1, 1>}]} {
    %c0_i32 = arith.constant 0 : i32
    %c256_i32 = arith.constant 256 : i32
    %0 = arith.addi %c0_i32, %c256_i32 : i32
    %c1_i32 = arith.constant 1 : i32
    scf.for %arg26 = %c0_i32 to %0 step %c1_i32  : i32 {
      %c1_i32_161 = arith.constant 1 : i32
      %550 = arith.muli %arg26, %c1_i32_161 : i32
      %c0_i32_162 = arith.constant 0 : i32
      %551 = arith.addi %c0_i32_162, %550 : i32
      %552 = arith.index_cast %551 : i32 to index
      %553 = memref.load %arg1[%552] : memref<256xi32, #tpu.memory_space<smem>>
      %c0_i32_163 = arith.constant 0 : i32
      %554 = tpu.memref_slice %arg2[%553, %c0_i32_163] : memref<101x384xf32, #tpu.memory_space<any>> -> memref<1x384xf32, #tpu.memory_space<any>>
      %555 = tpu.memref_squeeze %554 : memref<1x384xf32, #tpu.memory_space<any>> -> memref<384xf32, #tpu.memory_space<any>>
      %c0_i32_164 = arith.constant 0 : i32
      %556 = tpu.memref_slice %arg23[%551, %c0_i32_164] : memref<256x384xf32, #tpu.memory_space<vmem>> -> memref<1x384xf32, #tpu.memory_space<vmem>>
      %557 = tpu.memref_squeeze %556 : memref<1x384xf32, #tpu.memory_space<vmem>> -> memref<384xf32, #tpu.memory_space<vmem>>
      tpu.enqueue_dma source(%555 : memref<384xf32, #tpu.memory_space<any>>) target(%557 : memref<384xf32, #tpu.memory_space<vmem>>) target_semaphore(%arg25 : memref<!tpu.dma_semaphore, #tpu.memory_space<semaphore_mem>>)
    }
    %c256_i32_0 = arith.constant 256 : i32
    %c0_i32_1 = arith.constant 0 : i32
    %c256_i32_2 = arith.constant 256 : i32
    %1 = arith.addi %c0_i32_1, %c256_i32_2 : i32
    %c1_i32_3 = arith.constant 1 : i32
    scf.for %arg26 = %c0_i32_1 to %1 step %c1_i32_3  : i32 {
      %c0_i32_161 = arith.constant 0 : i32
      %c0_i32_162 = arith.constant 0 : i32
      %c0_i32_163 = arith.constant 0 : i32
      %550 = tpu.memref_slice %arg2[%c0_i32_161, %c0_i32_163] : memref<101x384xf32, #tpu.memory_space<any>> -> memref<1x384xf32, #tpu.memory_space<any>>
      %551 = tpu.memref_squeeze %550 : memref<1x384xf32, #tpu.memory_space<any>> -> memref<384xf32, #tpu.memory_space<any>>
      %c0_i32_164 = arith.constant 0 : i32
      %552 = tpu.memref_slice %arg23[%c0_i32_162, %c0_i32_164] : memref<256x384xf32, #tpu.memory_space<vmem>> -> memref<1x384xf32, #tpu.memory_space<vmem>>
      %553 = tpu.memref_squeeze %552 : memref<1x384xf32, #tpu.memory_space<vmem>> -> memref<384xf32, #tpu.memory_space<vmem>>
      tpu.wait_dma2 semaphore(%arg25 : memref<!tpu.dma_semaphore, #tpu.memory_space<semaphore_mem>>) src(%551 : memref<384xf32, #tpu.memory_space<any>>) dst(%553 : memref<384xf32, #tpu.memory_space<vmem>>)
    }
    %c0 = arith.constant 0 : index
    %c0_4 = arith.constant 0 : index
    %2 = vector.load %arg23[%c0, %c0_4] : memref<256x384xf32, #tpu.memory_space<vmem>>, vector<256x384xf32>
    %3 = arith.truncf %2 : vector<256x384xf32> to vector<256x384xbf16>
    %c0_5 = arith.constant 0 : index
    %c0_6 = arith.constant 0 : index
    %4 = vector.load %arg4[%c0_5, %c0_6] : memref<384x384xbf16, #tpu.memory_space<vmem>>, vector<384x384xbf16>
    %cst = arith.constant dense<0.000000e+00> : vector<256x384xf32>
    %5 = tpu.matmul %3, %4, %cst {dimension_numbers = #tpu.dot_dimension_numbers<[1], [0], [0], [1], [0, 0, 1, 1], [], []>} : vector<256x384xbf16>, vector<384x384xbf16>, vector<256x384xf32> -> vector<256x384xf32>
    %c0_7 = arith.constant 0 : index
    %c0_8 = arith.constant 0 : index
    %6 = vector.load %arg5[%c0_7, %c0_8] : memref<1x384xf32, #tpu.memory_space<vmem>>, vector<1x384xf32>
    %7 = vector.broadcast %6 : vector<1x384xf32> to vector<256x384xf32>
    %8 = arith.addf %5, %7 : vector<256x384xf32>
    %c0_9 = arith.constant 0 : index
    %c0_10 = arith.constant 0 : index
    %9 = vector.load %arg24[%c0_9, %c0_10] : memref<256x384xf32, #tpu.memory_space<vmem>>, vector<256x384xf32>
    tpu.vector_store %arg24[%c0_9, %c0_10], %8 {strides = array<i32>} : memref<256x384xf32, #tpu.memory_space<vmem>>, vector<256x384xf32>,
    %c0_11 = arith.constant 0 : index
    %c0_12 = arith.constant 0 : index
    %10 = vector.load %arg6[%c0_11, %c0_12] : memref<128x384xbf16, #tpu.memory_space<vmem>>, vector<128x384xbf16>
    %c0_13 = arith.constant 0 : index
    %c0_14 = arith.constant 0 : index
    %11 = vector.load %arg7[%c0_13, %c0_14] : memref<1x384xf32, #tpu.memory_space<vmem>>, vector<1x384xf32>
    %cst_15 = arith.constant 0.000000e+00 : f32
    %12 = vector.broadcast %cst_15 : f32 to vector<32x128xf32>
    %c0_i32_16 = arith.constant 0 : i32
    %c32_i32 = arith.constant 32 : i32
    %13 = arith.muli %c0_i32_16, %c32_i32 : i32
    %14 = tpu.assume_multiple %13, 32 : i32
    %15 = arith.index_cast %14 : i32 to index
    %c0_17 = arith.constant 0 : index
    %16 = vector.load %arg24[%15, %c0_17] : memref<256x384xf32, #tpu.memory_space<vmem>>, vector<32x384xf32>
    %17 = arith.truncf %12 : vector<32x128xf32> to vector<32x128xbf16>
    %cst_18 = arith.constant dense<0.000000e+00> : vector<32x384xf32>
    %18 = tpu.matmul %17, %10, %cst_18 {dimension_numbers = #tpu.dot_dimension_numbers<[1], [0], [0], [1], [0, 0, 1, 1], [], []>} : vector<32x128xbf16>, vector<128x384xbf16>, vector<32x384xf32> -> vector<32x384xf32>
    %19 = vector.broadcast %11 : vector<1x384xf32> to vector<32x384xf32>
    %20 = arith.addf %18, %19 : vector<32x384xf32>
    %21 = vector.extract_strided_slice %16 {offsets = [0, 0], sizes = [32, 128], strides = [1, 1]} : vector<32x384xf32> to vector<32x128xf32>
    %22 = vector.extract_strided_slice %20 {offsets = [0, 0], sizes = [32, 128], strides = [1, 1]} : vector<32x384xf32> to vector<32x128xf32>
    %23 = arith.addf %21, %22 : vector<32x128xf32>
    %24 = arith.negf %23 : vector<32x128xf32>
    %25 = math.exp %24 : vector<32x128xf32>
    %cst_19 = arith.constant 1.000000e+00 : f32
    %26 = vector.broadcast %cst_19 : f32 to vector<32x128xf32>
    %27 = arith.addf %26, %25 : vector<32x128xf32>
    %28 = arith.divf %26, %27 : vector<32x128xf32>
    %29 = vector.extract_strided_slice %16 {offsets = [0, 128], sizes = [32, 128], strides = [1, 1]} : vector<32x384xf32> to vector<32x128xf32>
    %30 = vector.extract_strided_slice %20 {offsets = [0, 128], sizes = [32, 128], strides = [1, 1]} : vector<32x384xf32> to vector<32x128xf32>
    %31 = arith.addf %29, %30 : vector<32x128xf32>
    %32 = arith.negf %31 : vector<32x128xf32>
    %33 = math.exp %32 : vector<32x128xf32>
    %cst_20 = arith.constant 1.000000e+00 : f32
    %34 = vector.broadcast %cst_20 : f32 to vector<32x128xf32>
    %35 = arith.addf %34, %33 : vector<32x128xf32>
    %36 = arith.divf %34, %35 : vector<32x128xf32>
    %37 = vector.extract_strided_slice %16 {offsets = [0, 256], sizes = [32, 128], strides = [1, 1]} : vector<32x384xf32> to vector<32x128xf32>
    %38 = vector.extract_strided_slice %20 {offsets = [0, 256], sizes = [32, 128], strides = [1, 1]} : vector<32x384xf32> to vector<32x128xf32>
    %39 = arith.mulf %28, %38 : vector<32x128xf32>
    %40 = arith.addf %37, %39 : vector<32x128xf32>
    %41 = math.tanh %40 : vector<32x128xf32>
    %cst_21 = arith.constant 1.000000e+00 : f32
    %42 = vector.broadcast %cst_21 : f32 to vector<32x128xf32>
    %43 = arith.subf %42, %36 : vector<32x128xf32>
    %44 = arith.mulf %43, %41 : vector<32x128xf32>
    %45 = arith.mulf %36, %12 : vector<32x128xf32>
    %46 = arith.addf %44, %45 : vector<32x128xf32>
    %c1_i32_22 = arith.constant 1 : i32
    %c32_i32_23 = arith.constant 32 : i32
    %47 = arith.muli %c1_i32_22, %c32_i32_23 : i32
    %48 = tpu.assume_multiple %47, 32 : i32
    %49 = arith.index_cast %48 : i32 to index
    %c0_24 = arith.constant 0 : index
    %50 = vector.load %arg24[%49, %c0_24] : memref<256x384xf32, #tpu.memory_space<vmem>>, vector<32x384xf32>
    %51 = arith.truncf %46 : vector<32x128xf32> to vector<32x128xbf16>
    %cst_25 = arith.constant dense<0.000000e+00> : vector<32x384xf32>
    %52 = tpu.matmul %51, %10, %cst_25 {dimension_numbers = #tpu.dot_dimension_numbers<[1], [0], [0], [1], [0, 0, 1, 1], [], []>} : vector<32x128xbf16>, vector<128x384xbf16>, vector<32x384xf32> -> vector<32x384xf32>
    %53 = vector.broadcast %11 : vector<1x384xf32> to vector<32x384xf32>
    %54 = arith.addf %52, %53 : vector<32x384xf32>
    %55 = vector.extract_strided_slice %50 {offsets = [0, 0], sizes = [32, 128], strides = [1, 1]} : vector<32x384xf32> to vector<32x128xf32>
    %56 = vector.extract_strided_slice %54 {offsets = [0, 0], sizes = [32, 128], strides = [1, 1]} : vector<32x384xf32> to vector<32x128xf32>
    %57 = arith.addf %55, %56 : vector<32x128xf32>
    %58 = arith.negf %57 : vector<32x128xf32>
    %59 = math.exp %58 : vector<32x128xf32>
    %cst_26 = arith.constant 1.000000e+00 : f32
    %60 = vector.broadcast %cst_26 : f32 to vector<32x128xf32>
    %61 = arith.addf %60, %59 : vector<32x128xf32>
    %62 = arith.divf %60, %61 : vector<32x128xf32>
    %63 = vector.extract_strided_slice %50 {offsets = [0, 128], sizes = [32, 128], strides = [1, 1]} : vector<32x384xf32> to vector<32x128xf32>
    %64 = vector.extract_strided_slice %54 {offsets = [0, 128], sizes = [32, 128], strides = [1, 1]} : vector<32x384xf32> to vector<32x128xf32>
    %65 = arith.addf %63, %64 : vector<32x128xf32>
    %66 = arith.negf %65 : vector<32x128xf32>
    %67 = math.exp %66 : vector<32x128xf32>
    %cst_27 = arith.constant 1.000000e+00 : f32
    %68 = vector.broadcast %cst_27 : f32 to vector<32x128xf32>
    %69 = arith.addf %68, %67 : vector<32x128xf32>
    %70 = arith.divf %68, %69 : vector<32x128xf32>
    %71 = vector.extract_strided_slice %50 {offsets = [0, 256], sizes = [32, 128], strides = [1, 1]} : vector<32x384xf32> to vector<32x128xf32>
    %72 = vector.extract_strided_slice %54 {offsets = [0, 256], sizes = [32, 128], strides = [1, 1]} : vector<32x384xf32> to vector<32x128xf32>
    %73 = arith.mulf %62, %72 : vector<32x128xf32>
    %74 = arith.addf %71, %73 : vector<32x128xf32>
    %75 = math.tanh %74 : vector<32x128xf32>
    %cst_28 = arith.constant 1.000000e+00 : f32
    %76 = vector.broadcast %cst_28 : f32 to vector<32x128xf32>
    %77 = arith.subf %76, %70 : vector<32x128xf32>
    %78 = arith.mulf %77, %75 : vector<32x128xf32>
    %79 = arith.mulf %70, %46 : vector<32x128xf32>
    %80 = arith.addf %78, %79 : vector<32x128xf32>
    %c2_i32 = arith.constant 2 : i32
    %c32_i32_29 = arith.constant 32 : i32
    %81 = arith.muli %c2_i32, %c32_i32_29 : i32
    %82 = tpu.assume_multiple %81, 32 : i32
    %83 = arith.index_cast %82 : i32 to index
    %c0_30 = arith.constant 0 : index
    %84 = vector.load %arg24[%83, %c0_30] : memref<256x384xf32, #tpu.memory_space<vmem>>, vector<32x384xf32>
    %85 = arith.truncf %80 : vector<32x128xf32> to vector<32x128xbf16>
    %cst_31 = arith.constant dense<0.000000e+00> : vector<32x384xf32>
    %86 = tpu.matmul %85, %10, %cst_31 {dimension_numbers = #tpu.dot_dimension_numbers<[1], [0], [0], [1], [0, 0, 1, 1], [], []>} : vector<32x128xbf16>, vector<128x384xbf16>, vector<32x384xf32> -> vector<32x384xf32>
    %87 = vector.broadcast %11 : vector<1x384xf32> to vector<32x384xf32>
    %88 = arith.addf %86, %87 : vector<32x384xf32>
    %89 = vector.extract_strided_slice %84 {offsets = [0, 0], sizes = [32, 128], strides = [1, 1]} : vector<32x384xf32> to vector<32x128xf32>
    %90 = vector.extract_strided_slice %88 {offsets = [0, 0], sizes = [32, 128], strides = [1, 1]} : vector<32x384xf32> to vector<32x128xf32>
    %91 = arith.addf %89, %90 : vector<32x128xf32>
    %92 = arith.negf %91 : vector<32x128xf32>
    %93 = math.exp %92 : vector<32x128xf32>
    %cst_32 = arith.constant 1.000000e+00 : f32
    %94 = vector.broadcast %cst_32 : f32 to vector<32x128xf32>
    %95 = arith.addf %94, %93 : vector<32x128xf32>
    %96 = arith.divf %94, %95 : vector<32x128xf32>
    %97 = vector.extract_strided_slice %84 {offsets = [0, 128], sizes = [32, 128], strides = [1, 1]} : vector<32x384xf32> to vector<32x128xf32>
    %98 = vector.extract_strided_slice %88 {offsets = [0, 128], sizes = [32, 128], strides = [1, 1]} : vector<32x384xf32> to vector<32x128xf32>
    %99 = arith.addf %97, %98 : vector<32x128xf32>
    %100 = arith.negf %99 : vector<32x128xf32>
    %101 = math.exp %100 : vector<32x128xf32>
    %cst_33 = arith.constant 1.000000e+00 : f32
    %102 = vector.broadcast %cst_33 : f32 to vector<32x128xf32>
    %103 = arith.addf %102, %101 : vector<32x128xf32>
    %104 = arith.divf %102, %103 : vector<32x128xf32>
    %105 = vector.extract_strided_slice %84 {offsets = [0, 256], sizes = [32, 128], strides = [1, 1]} : vector<32x384xf32> to vector<32x128xf32>
    %106 = vector.extract_strided_slice %88 {offsets = [0, 256], sizes = [32, 128], strides = [1, 1]} : vector<32x384xf32> to vector<32x128xf32>
    %107 = arith.mulf %96, %106 : vector<32x128xf32>
    %108 = arith.addf %105, %107 : vector<32x128xf32>
    %109 = math.tanh %108 : vector<32x128xf32>
    %cst_34 = arith.constant 1.000000e+00 : f32
    %110 = vector.broadcast %cst_34 : f32 to vector<32x128xf32>
    %111 = arith.subf %110, %104 : vector<32x128xf32>
    %112 = arith.mulf %111, %109 : vector<32x128xf32>
    %113 = arith.mulf %104, %80 : vector<32x128xf32>
    %114 = arith.addf %112, %113 : vector<32x128xf32>
    %c3_i32 = arith.constant 3 : i32
    %c32_i32_35 = arith.constant 32 : i32
    %115 = arith.muli %c3_i32, %c32_i32_35 : i32
    %116 = tpu.assume_multiple %115, 32 : i32
    %117 = arith.index_cast %116 : i32 to index
    %c0_36 = arith.constant 0 : index
    %118 = vector.load %arg24[%117, %c0_36] : memref<256x384xf32, #tpu.memory_space<vmem>>, vector<32x384xf32>
    %119 = arith.truncf %114 : vector<32x128xf32> to vector<32x128xbf16>
    %cst_37 = arith.constant dense<0.000000e+00> : vector<32x384xf32>
    %120 = tpu.matmul %119, %10, %cst_37 {dimension_numbers = #tpu.dot_dimension_numbers<[1], [0], [0], [1], [0, 0, 1, 1], [], []>} : vector<32x128xbf16>, vector<128x384xbf16>, vector<32x384xf32> -> vector<32x384xf32>
    %121 = vector.broadcast %11 : vector<1x384xf32> to vector<32x384xf32>
    %122 = arith.addf %120, %121 : vector<32x384xf32>
    %123 = vector.extract_strided_slice %118 {offsets = [0, 0], sizes = [32, 128], strides = [1, 1]} : vector<32x384xf32> to vector<32x128xf32>
    %124 = vector.extract_strided_slice %122 {offsets = [0, 0], sizes = [32, 128], strides = [1, 1]} : vector<32x384xf32> to vector<32x128xf32>
    %125 = arith.addf %123, %124 : vector<32x128xf32>
    %126 = arith.negf %125 : vector<32x128xf32>
    %127 = math.exp %126 : vector<32x128xf32>
    %cst_38 = arith.constant 1.000000e+00 : f32
    %128 = vector.broadcast %cst_38 : f32 to vector<32x128xf32>
    %129 = arith.addf %128, %127 : vector<32x128xf32>
    %130 = arith.divf %128, %129 : vector<32x128xf32>
    %131 = vector.extract_strided_slice %118 {offsets = [0, 128], sizes = [32, 128], strides = [1, 1]} : vector<32x384xf32> to vector<32x128xf32>
    %132 = vector.extract_strided_slice %122 {offsets = [0, 128], sizes = [32, 128], strides = [1, 1]} : vector<32x384xf32> to vector<32x128xf32>
    %133 = arith.addf %131, %132 : vector<32x128xf32>
    %134 = arith.negf %133 : vector<32x128xf32>
    %135 = math.exp %134 : vector<32x128xf32>
    %cst_39 = arith.constant 1.000000e+00 : f32
    %136 = vector.broadcast %cst_39 : f32 to vector<32x128xf32>
    %137 = arith.addf %136, %135 : vector<32x128xf32>
    %138 = arith.divf %136, %137 : vector<32x128xf32>
    %139 = vector.extract_strided_slice %118 {offsets = [0, 256], sizes = [32, 128], strides = [1, 1]} : vector<32x384xf32> to vector<32x128xf32>
    %140 = vector.extract_strided_slice %122 {offsets = [0, 256], sizes = [32, 128], strides = [1, 1]} : vector<32x384xf32> to vector<32x128xf32>
    %141 = arith.mulf %130, %140 : vector<32x128xf32>
    %142 = arith.addf %139, %141 : vector<32x128xf32>
    %143 = math.tanh %142 : vector<32x128xf32>
    %cst_40 = arith.constant 1.000000e+00 : f32
    %144 = vector.broadcast %cst_40 : f32 to vector<32x128xf32>
    %145 = arith.subf %144, %138 : vector<32x128xf32>
    %146 = arith.mulf %145, %143 : vector<32x128xf32>
    %147 = arith.mulf %138, %114 : vector<32x128xf32>
    %148 = arith.addf %146, %147 : vector<32x128xf32>
    %c4_i32 = arith.constant 4 : i32
    %c32_i32_41 = arith.constant 32 : i32
    %149 = arith.muli %c4_i32, %c32_i32_41 : i32
    %150 = tpu.assume_multiple %149, 32 : i32
    %151 = arith.index_cast %150 : i32 to index
    %c0_42 = arith.constant 0 : index
    %152 = vector.load %arg24[%151, %c0_42] : memref<256x384xf32, #tpu.memory_space<vmem>>, vector<32x384xf32>
    %153 = arith.truncf %148 : vector<32x128xf32> to vector<32x128xbf16>
    %cst_43 = arith.constant dense<0.000000e+00> : vector<32x384xf32>
    %154 = tpu.matmul %153, %10, %cst_43 {dimension_numbers = #tpu.dot_dimension_numbers<[1], [0], [0], [1], [0, 0, 1, 1], [], []>} : vector<32x128xbf16>, vector<128x384xbf16>, vector<32x384xf32> -> vector<32x384xf32>
    %155 = vector.broadcast %11 : vector<1x384xf32> to vector<32x384xf32>
    %156 = arith.addf %154, %155 : vector<32x384xf32>
    %157 = vector.extract_strided_slice %152 {offsets = [0, 0], sizes = [32, 128], strides = [1, 1]} : vector<32x384xf32> to vector<32x128xf32>
    %158 = vector.extract_strided_slice %156 {offsets = [0, 0], sizes = [32, 128], strides = [1, 1]} : vector<32x384xf32> to vector<32x128xf32>
    %159 = arith.addf %157, %158 : vector<32x128xf32>
    %160 = arith.negf %159 : vector<32x128xf32>
    %161 = math.exp %160 : vector<32x128xf32>
    %cst_44 = arith.constant 1.000000e+00 : f32
    %162 = vector.broadcast %cst_44 : f32 to vector<32x128xf32>
    %163 = arith.addf %162, %161 : vector<32x128xf32>
    %164 = arith.divf %162, %163 : vector<32x128xf32>
    %165 = vector.extract_strided_slice %152 {offsets = [0, 128], sizes = [32, 128], strides = [1, 1]} : vector<32x384xf32> to vector<32x128xf32>
    %166 = vector.extract_strided_slice %156 {offsets = [0, 128], sizes = [32, 128], strides = [1, 1]} : vector<32x384xf32> to vector<32x128xf32>
    %167 = arith.addf %165, %166 : vector<32x128xf32>
    %168 = arith.negf %167 : vector<32x128xf32>
    %169 = math.exp %168 : vector<32x128xf32>
    %cst_45 = arith.constant 1.000000e+00 : f32
    %170 = vector.broadcast %cst_45 : f32 to vector<32x128xf32>
    %171 = arith.addf %170, %169 : vector<32x128xf32>
    %172 = arith.divf %170, %171 : vector<32x128xf32>
    %173 = vector.extract_strided_slice %152 {offsets = [0, 256], sizes = [32, 128], strides = [1, 1]} : vector<32x384xf32> to vector<32x128xf32>
    %174 = vector.extract_strided_slice %156 {offsets = [0, 256], sizes = [32, 128], strides = [1, 1]} : vector<32x384xf32> to vector<32x128xf32>
    %175 = arith.mulf %164, %174 : vector<32x128xf32>
    %176 = arith.addf %173, %175 : vector<32x128xf32>
    %177 = math.tanh %176 : vector<32x128xf32>
    %cst_46 = arith.constant 1.000000e+00 : f32
    %178 = vector.broadcast %cst_46 : f32 to vector<32x128xf32>
    %179 = arith.subf %178, %172 : vector<32x128xf32>
    %180 = arith.mulf %179, %177 : vector<32x128xf32>
    %181 = arith.mulf %172, %148 : vector<32x128xf32>
    %182 = arith.addf %180, %181 : vector<32x128xf32>
    %c5_i32 = arith.constant 5 : i32
    %c32_i32_47 = arith.constant 32 : i32
    %183 = arith.muli %c5_i32, %c32_i32_47 : i32
    %184 = tpu.assume_multiple %183, 32 : i32
    %185 = arith.index_cast %184 : i32 to index
    %c0_48 = arith.constant 0 : index
    %186 = vector.load %arg24[%185, %c0_48] : memref<256x384xf32, #tpu.memory_space<vmem>>, vector<32x384xf32>
    %187 = arith.truncf %182 : vector<32x128xf32> to vector<32x128xbf16>
    %cst_49 = arith.constant dense<0.000000e+00> : vector<32x384xf32>
    %188 = tpu.matmul %187, %10, %cst_49 {dimension_numbers = #tpu.dot_dimension_numbers<[1], [0], [0], [1], [0, 0, 1, 1], [], []>} : vector<32x128xbf16>, vector<128x384xbf16>, vector<32x384xf32> -> vector<32x384xf32>
    %189 = vector.broadcast %11 : vector<1x384xf32> to vector<32x384xf32>
    %190 = arith.addf %188, %189 : vector<32x384xf32>
    %191 = vector.extract_strided_slice %186 {offsets = [0, 0], sizes = [32, 128], strides = [1, 1]} : vector<32x384xf32> to vector<32x128xf32>
    %192 = vector.extract_strided_slice %190 {offsets = [0, 0], sizes = [32, 128], strides = [1, 1]} : vector<32x384xf32> to vector<32x128xf32>
    %193 = arith.addf %191, %192 : vector<32x128xf32>
    %194 = arith.negf %193 : vector<32x128xf32>
    %195 = math.exp %194 : vector<32x128xf32>
    %cst_50 = arith.constant 1.000000e+00 : f32
    %196 = vector.broadcast %cst_50 : f32 to vector<32x128xf32>
    %197 = arith.addf %196, %195 : vector<32x128xf32>
    %198 = arith.divf %196, %197 : vector<32x128xf32>
    %199 = vector.extract_strided_slice %186 {offsets = [0, 128], sizes = [32, 128], strides = [1, 1]} : vector<32x384xf32> to vector<32x128xf32>
    %200 = vector.extract_strided_slice %190 {offsets = [0, 128], sizes = [32, 128], strides = [1, 1]} : vector<32x384xf32> to vector<32x128xf32>
    %201 = arith.addf %199, %200 : vector<32x128xf32>
    %202 = arith.negf %201 : vector<32x128xf32>
    %203 = math.exp %202 : vector<32x128xf32>
    %cst_51 = arith.constant 1.000000e+00 : f32
    %204 = vector.broadcast %cst_51 : f32 to vector<32x128xf32>
    %205 = arith.addf %204, %203 : vector<32x128xf32>
    %206 = arith.divf %204, %205 : vector<32x128xf32>
    %207 = vector.extract_strided_slice %186 {offsets = [0, 256], sizes = [32, 128], strides = [1, 1]} : vector<32x384xf32> to vector<32x128xf32>
    %208 = vector.extract_strided_slice %190 {offsets = [0, 256], sizes = [32, 128], strides = [1, 1]} : vector<32x384xf32> to vector<32x128xf32>
    %209 = arith.mulf %198, %208 : vector<32x128xf32>
    %210 = arith.addf %207, %209 : vector<32x128xf32>
    %211 = math.tanh %210 : vector<32x128xf32>
    %cst_52 = arith.constant 1.000000e+00 : f32
    %212 = vector.broadcast %cst_52 : f32 to vector<32x128xf32>
    %213 = arith.subf %212, %206 : vector<32x128xf32>
    %214 = arith.mulf %213, %211 : vector<32x128xf32>
    %215 = arith.mulf %206, %182 : vector<32x128xf32>
    %216 = arith.addf %214, %215 : vector<32x128xf32>
    %c6_i32 = arith.constant 6 : i32
    %c32_i32_53 = arith.constant 32 : i32
    %217 = arith.muli %c6_i32, %c32_i32_53 : i32
    %218 = tpu.assume_multiple %217, 32 : i32
    %219 = arith.index_cast %218 : i32 to index
    %c0_54 = arith.constant 0 : index
    %220 = vector.load %arg24[%219, %c0_54] : memref<256x384xf32, #tpu.memory_space<vmem>>, vector<32x384xf32>
    %221 = arith.truncf %216 : vector<32x128xf32> to vector<32x128xbf16>
    %cst_55 = arith.constant dense<0.000000e+00> : vector<32x384xf32>
    %222 = tpu.matmul %221, %10, %cst_55 {dimension_numbers = #tpu.dot_dimension_numbers<[1], [0], [0], [1], [0, 0, 1, 1], [], []>} : vector<32x128xbf16>, vector<128x384xbf16>, vector<32x384xf32> -> vector<32x384xf32>
    %223 = vector.broadcast %11 : vector<1x384xf32> to vector<32x384xf32>
    %224 = arith.addf %222, %223 : vector<32x384xf32>
    %225 = vector.extract_strided_slice %220 {offsets = [0, 0], sizes = [32, 128], strides = [1, 1]} : vector<32x384xf32> to vector<32x128xf32>
    %226 = vector.extract_strided_slice %224 {offsets = [0, 0], sizes = [32, 128], strides = [1, 1]} : vector<32x384xf32> to vector<32x128xf32>
    %227 = arith.addf %225, %226 : vector<32x128xf32>
    %228 = arith.negf %227 : vector<32x128xf32>
    %229 = math.exp %228 : vector<32x128xf32>
    %cst_56 = arith.constant 1.000000e+00 : f32
    %230 = vector.broadcast %cst_56 : f32 to vector<32x128xf32>
    %231 = arith.addf %230, %229 : vector<32x128xf32>
    %232 = arith.divf %230, %231 : vector<32x128xf32>
    %233 = vector.extract_strided_slice %220 {offsets = [0, 128], sizes = [32, 128], strides = [1, 1]} : vector<32x384xf32> to vector<32x128xf32>
    %234 = vector.extract_strided_slice %224 {offsets = [0, 128], sizes = [32, 128], strides = [1, 1]} : vector<32x384xf32> to vector<32x128xf32>
    %235 = arith.addf %233, %234 : vector<32x128xf32>
    %236 = arith.negf %235 : vector<32x128xf32>
    %237 = math.exp %236 : vector<32x128xf32>
    %cst_57 = arith.constant 1.000000e+00 : f32
    %238 = vector.broadcast %cst_57 : f32 to vector<32x128xf32>
    %239 = arith.addf %238, %237 : vector<32x128xf32>
    %240 = arith.divf %238, %239 : vector<32x128xf32>
    %241 = vector.extract_strided_slice %220 {offsets = [0, 256], sizes = [32, 128], strides = [1, 1]} : vector<32x384xf32> to vector<32x128xf32>
    %242 = vector.extract_strided_slice %224 {offsets = [0, 256], sizes = [32, 128], strides = [1, 1]} : vector<32x384xf32> to vector<32x128xf32>
    %243 = arith.mulf %232, %242 : vector<32x128xf32>
    %244 = arith.addf %241, %243 : vector<32x128xf32>
    %245 = math.tanh %244 : vector<32x128xf32>
    %cst_58 = arith.constant 1.000000e+00 : f32
    %246 = vector.broadcast %cst_58 : f32 to vector<32x128xf32>
    %247 = arith.subf %246, %240 : vector<32x128xf32>
    %248 = arith.mulf %247, %245 : vector<32x128xf32>
    %249 = arith.mulf %240, %216 : vector<32x128xf32>
    %250 = arith.addf %248, %249 : vector<32x128xf32>
    %c7_i32 = arith.constant 7 : i32
    %c32_i32_59 = arith.constant 32 : i32
    %251 = arith.muli %c7_i32, %c32_i32_59 : i32
    %252 = tpu.assume_multiple %251, 32 : i32
    %253 = arith.index_cast %252 : i32 to index
    %c0_60 = arith.constant 0 : index
    %254 = vector.load %arg24[%253, %c0_60] : memref<256x384xf32, #tpu.memory_space<vmem>>, vector<32x384xf32>
    %255 = arith.truncf %250 : vector<32x128xf32> to vector<32x128xbf16>
    %cst_61 = arith.constant dense<0.000000e+00> : vector<32x384xf32>
    %256 = tpu.matmul %255, %10, %cst_61 {dimension_numbers = #tpu.dot_dimension_numbers<[1], [0], [0], [1], [0, 0, 1, 1], [], []>} : vector<32x128xbf16>, vector<128x384xbf16>, vector<32x384xf32> -> vector<32x384xf32>
    %257 = vector.broadcast %11 : vector<1x384xf32> to vector<32x384xf32>
    %258 = arith.addf %256, %257 : vector<32x384xf32>
    %259 = vector.extract_strided_slice %254 {offsets = [0, 0], sizes = [32, 128], strides = [1, 1]} : vector<32x384xf32> to vector<32x128xf32>
    %260 = vector.extract_strided_slice %258 {offsets = [0, 0], sizes = [32, 128], strides = [1, 1]} : vector<32x384xf32> to vector<32x128xf32>
    %261 = arith.addf %259, %260 : vector<32x128xf32>
    %262 = arith.negf %261 : vector<32x128xf32>
    %263 = math.exp %262 : vector<32x128xf32>
    %cst_62 = arith.constant 1.000000e+00 : f32
    %264 = vector.broadcast %cst_62 : f32 to vector<32x128xf32>
    %265 = arith.addf %264, %263 : vector<32x128xf32>
    %266 = arith.divf %264, %265 : vector<32x128xf32>
    %267 = vector.extract_strided_slice %254 {offsets = [0, 128], sizes = [32, 128], strides = [1, 1]} : vector<32x384xf32> to vector<32x128xf32>
    %268 = vector.extract_strided_slice %258 {offsets = [0, 128], sizes = [32, 128], strides = [1, 1]} : vector<32x384xf32> to vector<32x128xf32>
    %269 = arith.addf %267, %268 : vector<32x128xf32>
    %270 = arith.negf %269 : vector<32x128xf32>
    %271 = math.exp %270 : vector<32x128xf32>
    %cst_63 = arith.constant 1.000000e+00 : f32
    %272 = vector.broadcast %cst_63 : f32 to vector<32x128xf32>
    %273 = arith.addf %272, %271 : vector<32x128xf32>
    %274 = arith.divf %272, %273 : vector<32x128xf32>
    %275 = vector.extract_strided_slice %254 {offsets = [0, 256], sizes = [32, 128], strides = [1, 1]} : vector<32x384xf32> to vector<32x128xf32>
    %276 = vector.extract_strided_slice %258 {offsets = [0, 256], sizes = [32, 128], strides = [1, 1]} : vector<32x384xf32> to vector<32x128xf32>
    %277 = arith.mulf %266, %276 : vector<32x128xf32>
    %278 = arith.addf %275, %277 : vector<32x128xf32>
    %279 = math.tanh %278 : vector<32x128xf32>
    %cst_64 = arith.constant 1.000000e+00 : f32
    %280 = vector.broadcast %cst_64 : f32 to vector<32x128xf32>
    %281 = arith.subf %280, %274 : vector<32x128xf32>
    %282 = arith.mulf %281, %279 : vector<32x128xf32>
    %283 = arith.mulf %274, %250 : vector<32x128xf32>
    %284 = arith.addf %282, %283 : vector<32x128xf32>
    %c8_i32 = arith.constant 8 : i32
    %285 = arith.truncf %284 : vector<32x128xf32> to vector<32x128xbf16>
    %c0_65 = arith.constant 0 : index
    %c0_66 = arith.constant 0 : index
    %286 = vector.load %arg8[%c0_65, %c0_66] : memref<128x128xbf16, #tpu.memory_space<vmem>>, vector<128x128xbf16>
    %cst_67 = arith.constant dense<0.000000e+00> : vector<32x128xf32>
    %287 = tpu.matmul %285, %286, %cst_67 {dimension_numbers = #tpu.dot_dimension_numbers<[1], [0], [0], [1], [0, 0, 1, 1], [], []>} : vector<32x128xbf16>, vector<128x128xbf16>, vector<32x128xf32> -> vector<32x128xf32>
    %c0_68 = arith.constant 0 : index
    %c0_69 = arith.constant 0 : index
    %288 = vector.load %arg9[%c0_68, %c0_69] : memref<1x128xf32, #tpu.memory_space<vmem>>, vector<1x128xf32>
    %289 = vector.broadcast %288 : vector<1x128xf32> to vector<32x128xf32>
    %290 = arith.addf %287, %289 : vector<32x128xf32>
    %cst_70 = arith.constant 0.000000e+00 : f32
    %291 = vector.broadcast %cst_70 : f32 to vector<32x128xf32>
    %292 = arith.maximumf %290, %291 : vector<32x128xf32>
    %c0_71 = arith.constant 0 : index
    %c0_72 = arith.constant 0 : index
    %293 = vector.load %arg3[%c0_71, %c0_72] : memref<128x128xf32, #tpu.memory_space<vmem>>, vector<128x128xf32>
    %294 = arith.truncf %293 : vector<128x128xf32> to vector<128x128xbf16>
    %c0_73 = arith.constant 0 : index
    %c0_74 = arith.constant 0 : index
    %295 = vector.load %arg10[%c0_73, %c0_74] : memref<128x256xbf16, #tpu.memory_space<vmem>>, vector<128x256xbf16>
    %cst_75 = arith.constant dense<0.000000e+00> : vector<128x256xf32>
    %296 = tpu.matmul %294, %295, %cst_75 {dimension_numbers = #tpu.dot_dimension_numbers<[1], [0], [0], [1], [0, 0, 1, 1], [], []>} : vector<128x128xbf16>, vector<128x256xbf16>, vector<128x256xf32> -> vector<128x256xf32>
    %c0_76 = arith.constant 0 : index
    %c0_77 = arith.constant 0 : index
    %297 = vector.load %arg11[%c0_76, %c0_77] : memref<1x256xf32, #tpu.memory_space<vmem>>, vector<1x256xf32>
    %298 = vector.broadcast %297 : vector<1x256xf32> to vector<128x256xf32>
    %299 = arith.addf %296, %298 : vector<128x256xf32>
    %cst_78 = arith.constant 0.000000e+00 : f32
    %300 = vector.broadcast %cst_78 : f32 to vector<128x256xf32>
    %301 = arith.maximumf %299, %300 : vector<128x256xf32>
    %302 = vector.shape_cast %301 : vector<128x256xf32> to vector<8x16x256xf32>
    %303 = vector.shape_cast %293 : vector<128x128xf32> to vector<8x16x128xf32>
    %c0_79 = arith.constant 0 : index
    %c0_80 = arith.constant 0 : index
    %304 = vector.load %arg12[%c0_79, %c0_80] : memref<128x256xbf16, #tpu.memory_space<vmem>>, vector<128x256xbf16>
    %cst_81 = arith.constant dense<0.000000e+00> : vector<32x256xf32>
    %305 = tpu.matmul %285, %304, %cst_81 {dimension_numbers = #tpu.dot_dimension_numbers<[1], [0], [0], [1], [0, 0, 1, 1], [], []>} : vector<32x128xbf16>, vector<128x256xbf16>, vector<32x256xf32> -> vector<32x256xf32>
    %c0_82 = arith.constant 0 : index
    %c0_83 = arith.constant 0 : index
    %306 = vector.load %arg13[%c0_82, %c0_83] : memref<1x256xf32, #tpu.memory_space<vmem>>, vector<1x256xf32>
    %307 = vector.broadcast %306 : vector<1x256xf32> to vector<32x256xf32>
    %308 = arith.addf %305, %307 : vector<32x256xf32>
    %cst_84 = arith.constant 0.000000e+00 : f32
    %309 = vector.broadcast %cst_84 : f32 to vector<32x256xf32>
    %310 = arith.maximumf %308, %309 : vector<32x256xf32>
    %c0_85 = arith.constant 0 : index
    %c0_86 = arith.constant 0 : index
    %311 = vector.load %arg14[%c0_85, %c0_86] : memref<1x256xf32, #tpu.memory_space<vmem>>, vector<1x256xf32>
    %312 = vector.broadcast %311 : vector<1x256xf32> to vector<32x256xf32>
    %313 = arith.mulf %310, %312 : vector<32x256xf32>
    %314 = vector.extract_strided_slice %313 {offsets = [0, 0], sizes = [8, 256], strides = [1, 1]} : vector<32x256xf32> to vector<8x256xf32>
    %315 = vector.shape_cast %314 : vector<8x256xf32> to vector<8x1x256xf32>
    %316 = vector.broadcast %315 : vector<8x1x256xf32> to vector<8x16x256xf32>
    %317 = arith.mulf %302, %316 : vector<8x16x256xf32>
    %318 = vector.extract_strided_slice %317 {offsets = [0, 0, 0], sizes = [8, 16, 128], strides = [1, 1, 1]} : vector<8x16x256xf32> to vector<8x16x128xf32>
    %cst_87 = arith.constant dense<0.000000e+00> : vector<8x16xf32>
    %319 = vector.multi_reduction <add>, %318, %cst_87 [2] : vector<8x16x128xf32> to vector<8x16xf32>
    %320 = vector.extract_strided_slice %317 {offsets = [0, 0, 128], sizes = [8, 16, 128], strides = [1, 1, 1]} : vector<8x16x256xf32> to vector<8x16x128xf32>
    %cst_88 = arith.constant dense<0.000000e+00> : vector<8x16xf32>
    %321 = vector.multi_reduction <add>, %320, %cst_88 [2] : vector<8x16x128xf32> to vector<8x16xf32>
    %cst_89 = arith.constant dense<0xFF800000> : vector<8xf32>
    %322 = vector.multi_reduction <maximumf>, %319, %cst_89 [1] : vector<8x16xf32> to vector<8xf32>
    %323 = vector.shape_cast %322 : vector<8xf32> to vector<8x1xf32>
    %324 = vector.broadcast %323 : vector<8x1xf32> to vector<8x16xf32>
    %325 = arith.subf %319, %324 : vector<8x16xf32>
    %326 = math.exp %325 : vector<8x16xf32>
    %cst_90 = arith.constant dense<0.000000e+00> : vector<8xf32>
    %327 = vector.multi_reduction <add>, %326, %cst_90 [1] : vector<8x16xf32> to vector<8xf32>
    %328 = vector.shape_cast %327 : vector<8xf32> to vector<8x1xf32>
    %329 = vector.broadcast %328 : vector<8x1xf32> to vector<8x16xf32>
    %330 = arith.divf %326, %329 : vector<8x16xf32>
    %cst_91 = arith.constant dense<0xFF800000> : vector<8xf32>
    %331 = vector.multi_reduction <maximumf>, %321, %cst_91 [1] : vector<8x16xf32> to vector<8xf32>
    %332 = vector.shape_cast %331 : vector<8xf32> to vector<8x1xf32>
    %333 = vector.broadcast %332 : vector<8x1xf32> to vector<8x16xf32>
    %334 = arith.subf %321, %333 : vector<8x16xf32>
    %335 = math.exp %334 : vector<8x16xf32>
    %cst_92 = arith.constant dense<0.000000e+00> : vector<8xf32>
    %336 = vector.multi_reduction <add>, %335, %cst_92 [1] : vector<8x16xf32> to vector<8xf32>
    %337 = vector.shape_cast %336 : vector<8xf32> to vector<8x1xf32>
    %338 = vector.broadcast %337 : vector<8x1xf32> to vector<8x16xf32>
    %339 = arith.divf %335, %338 : vector<8x16xf32>
    %340 = arith.addf %330, %339 : vector<8x16xf32>
    %341 = vector.shape_cast %340 : vector<8x16xf32> to vector<8x16x1xf32>
    %342 = vector.broadcast %341 : vector<8x16x1xf32> to vector<8x16x128xf32>
    %343 = arith.mulf %342, %303 : vector<8x16x128xf32>
    %cst_93 = arith.constant dense<0.000000e+00> : vector<8x128xf32>
    %344 = vector.multi_reduction <add>, %343, %cst_93 [1] : vector<8x16x128xf32> to vector<8x128xf32>
    %345 = vector.extract_strided_slice %313 {offsets = [8, 0], sizes = [8, 256], strides = [1, 1]} : vector<32x256xf32> to vector<8x256xf32>
    %346 = vector.shape_cast %345 : vector<8x256xf32> to vector<8x1x256xf32>
    %347 = vector.broadcast %346 : vector<8x1x256xf32> to vector<8x16x256xf32>
    %348 = arith.mulf %302, %347 : vector<8x16x256xf32>
    %349 = vector.extract_strided_slice %348 {offsets = [0, 0, 0], sizes = [8, 16, 128], strides = [1, 1, 1]} : vector<8x16x256xf32> to vector<8x16x128xf32>
    %cst_94 = arith.constant dense<0.000000e+00> : vector<8x16xf32>
    %350 = vector.multi_reduction <add>, %349, %cst_94 [2] : vector<8x16x128xf32> to vector<8x16xf32>
    %351 = vector.extract_strided_slice %348 {offsets = [0, 0, 128], sizes = [8, 16, 128], strides = [1, 1, 1]} : vector<8x16x256xf32> to vector<8x16x128xf32>
    %cst_95 = arith.constant dense<0.000000e+00> : vector<8x16xf32>
    %352 = vector.multi_reduction <add>, %351, %cst_95 [2] : vector<8x16x128xf32> to vector<8x16xf32>
    %cst_96 = arith.constant dense<0xFF800000> : vector<8xf32>
    %353 = vector.multi_reduction <maximumf>, %350, %cst_96 [1] : vector<8x16xf32> to vector<8xf32>
    %354 = vector.shape_cast %353 : vector<8xf32> to vector<8x1xf32>
    %355 = vector.broadcast %354 : vector<8x1xf32> to vector<8x16xf32>
    %356 = arith.subf %350, %355 : vector<8x16xf32>
    %357 = math.exp %356 : vector<8x16xf32>
    %cst_97 = arith.constant dense<0.000000e+00> : vector<8xf32>
    %358 = vector.multi_reduction <add>, %357, %cst_97 [1] : vector<8x16xf32> to vector<8xf32>
    %359 = vector.shape_cast %358 : vector<8xf32> to vector<8x1xf32>
    %360 = vector.broadcast %359 : vector<8x1xf32> to vector<8x16xf32>
    %361 = arith.divf %357, %360 : vector<8x16xf32>
    %cst_98 = arith.constant dense<0xFF800000> : vector<8xf32>
    %362 = vector.multi_reduction <maximumf>, %352, %cst_98 [1] : vector<8x16xf32> to vector<8xf32>
    %363 = vector.shape_cast %362 : vector<8xf32> to vector<8x1xf32>
    %364 = vector.broadcast %363 : vector<8x1xf32> to vector<8x16xf32>
    %365 = arith.subf %352, %364 : vector<8x16xf32>
    %366 = math.exp %365 : vector<8x16xf32>
    %cst_99 = arith.constant dense<0.000000e+00> : vector<8xf32>
    %367 = vector.multi_reduction <add>, %366, %cst_99 [1] : vector<8x16xf32> to vector<8xf32>
    %368 = vector.shape_cast %367 : vector<8xf32> to vector<8x1xf32>
    %369 = vector.broadcast %368 : vector<8x1xf32> to vector<8x16xf32>
    %370 = arith.divf %366, %369 : vector<8x16xf32>
    %371 = arith.addf %361, %370 : vector<8x16xf32>
    %372 = vector.shape_cast %371 : vector<8x16xf32> to vector<8x16x1xf32>
    %373 = vector.broadcast %372 : vector<8x16x1xf32> to vector<8x16x128xf32>
    %374 = arith.mulf %373, %303 : vector<8x16x128xf32>
    %cst_100 = arith.constant dense<0.000000e+00> : vector<8x128xf32>
    %375 = vector.multi_reduction <add>, %374, %cst_100 [1] : vector<8x16x128xf32> to vector<8x128xf32>
    %376 = vector.extract_strided_slice %313 {offsets = [16, 0], sizes = [8, 256], strides = [1, 1]} : vector<32x256xf32> to vector<8x256xf32>
    %377 = vector.shape_cast %376 : vector<8x256xf32> to vector<8x1x256xf32>
    %378 = vector.broadcast %377 : vector<8x1x256xf32> to vector<8x16x256xf32>
    %379 = arith.mulf %302, %378 : vector<8x16x256xf32>
    %380 = vector.extract_strided_slice %379 {offsets = [0, 0, 0], sizes = [8, 16, 128], strides = [1, 1, 1]} : vector<8x16x256xf32> to vector<8x16x128xf32>
    %cst_101 = arith.constant dense<0.000000e+00> : vector<8x16xf32>
    %381 = vector.multi_reduction <add>, %380, %cst_101 [2] : vector<8x16x128xf32> to vector<8x16xf32>
    %382 = vector.extract_strided_slice %379 {offsets = [0, 0, 128], sizes = [8, 16, 128], strides = [1, 1, 1]} : vector<8x16x256xf32> to vector<8x16x128xf32>
    %cst_102 = arith.constant dense<0.000000e+00> : vector<8x16xf32>
    %383 = vector.multi_reduction <add>, %382, %cst_102 [2] : vector<8x16x128xf32> to vector<8x16xf32>
    %cst_103 = arith.constant dense<0xFF800000> : vector<8xf32>
    %384 = vector.multi_reduction <maximumf>, %381, %cst_103 [1] : vector<8x16xf32> to vector<8xf32>
    %385 = vector.shape_cast %384 : vector<8xf32> to vector<8x1xf32>
    %386 = vector.broadcast %385 : vector<8x1xf32> to vector<8x16xf32>
    %387 = arith.subf %381, %386 : vector<8x16xf32>
    %388 = math.exp %387 : vector<8x16xf32>
    %cst_104 = arith.constant dense<0.000000e+00> : vector<8xf32>
    %389 = vector.multi_reduction <add>, %388, %cst_104 [1] : vector<8x16xf32> to vector<8xf32>
    %390 = vector.shape_cast %389 : vector<8xf32> to vector<8x1xf32>
    %391 = vector.broadcast %390 : vector<8x1xf32> to vector<8x16xf32>
    %392 = arith.divf %388, %391 : vector<8x16xf32>
    %cst_105 = arith.constant dense<0xFF800000> : vector<8xf32>
    %393 = vector.multi_reduction <maximumf>, %383, %cst_105 [1] : vector<8x16xf32> to vector<8xf32>
    %394 = vector.shape_cast %393 : vector<8xf32> to vector<8x1xf32>
    %395 = vector.broadcast %394 : vector<8x1xf32> to vector<8x16xf32>
    %396 = arith.subf %383, %395 : vector<8x16xf32>
    %397 = math.exp %396 : vector<8x16xf32>
    %cst_106 = arith.constant dense<0.000000e+00> : vector<8xf32>
    %398 = vector.multi_reduction <add>, %397, %cst_106 [1] : vector<8x16xf32> to vector<8xf32>
    %399 = vector.shape_cast %398 : vector<8xf32> to vector<8x1xf32>
    %400 = vector.broadcast %399 : vector<8x1xf32> to vector<8x16xf32>
    %401 = arith.divf %397, %400 : vector<8x16xf32>
    %402 = arith.addf %392, %401 : vector<8x16xf32>
    %403 = vector.shape_cast %402 : vector<8x16xf32> to vector<8x16x1xf32>
    %404 = vector.broadcast %403 : vector<8x16x1xf32> to vector<8x16x128xf32>
    %405 = arith.mulf %404, %303 : vector<8x16x128xf32>
    %cst_107 = arith.constant dense<0.000000e+00> : vector<8x128xf32>
    %406 = vector.multi_reduction <add>, %405, %cst_107 [1] : vector<8x16x128xf32> to vector<8x128xf32>
    %407 = vector.extract_strided_slice %313 {offsets = [24, 0], sizes = [8, 256], strides = [1, 1]} : vector<32x256xf32> to vector<8x256xf32>
    %408 = vector.shape_cast %407 : vector<8x256xf32> to vector<8x1x256xf32>
    %409 = vector.broadcast %408 : vector<8x1x256xf32> to vector<8x16x256xf32>
    %410 = arith.mulf %302, %409 : vector<8x16x256xf32>
    %411 = vector.extract_strided_slice %410 {offsets = [0, 0, 0], sizes = [8, 16, 128], strides = [1, 1, 1]} : vector<8x16x256xf32> to vector<8x16x128xf32>
    %cst_108 = arith.constant dense<0.000000e+00> : vector<8x16xf32>
    %412 = vector.multi_reduction <add>, %411, %cst_108 [2] : vector<8x16x128xf32> to vector<8x16xf32>
    %413 = vector.extract_strided_slice %410 {offsets = [0, 0, 128], sizes = [8, 16, 128], strides = [1, 1, 1]} : vector<8x16x256xf32> to vector<8x16x128xf32>
    %cst_109 = arith.constant dense<0.000000e+00> : vector<8x16xf32>
    %414 = vector.multi_reduction <add>, %413, %cst_109 [2] : vector<8x16x128xf32> to vector<8x16xf32>
    %cst_110 = arith.constant dense<0xFF800000> : vector<8xf32>
    %415 = vector.multi_reduction <maximumf>, %412, %cst_110 [1] : vector<8x16xf32> to vector<8xf32>
    %416 = vector.shape_cast %415 : vector<8xf32> to vector<8x1xf32>
    %417 = vector.broadcast %416 : vector<8x1xf32> to vector<8x16xf32>
    %418 = arith.subf %412, %417 : vector<8x16xf32>
    %419 = math.exp %418 : vector<8x16xf32>
    %cst_111 = arith.constant dense<0.000000e+00> : vector<8xf32>
    %420 = vector.multi_reduction <add>, %419, %cst_111 [1] : vector<8x16xf32> to vector<8xf32>
    %421 = vector.shape_cast %420 : vector<8xf32> to vector<8x1xf32>
    %422 = vector.broadcast %421 : vector<8x1xf32> to vector<8x16xf32>
    %423 = arith.divf %419, %422 : vector<8x16xf32>
    %cst_112 = arith.constant dense<0xFF800000> : vector<8xf32>
    %424 = vector.multi_reduction <maximumf>, %414, %cst_112 [1] : vector<8x16xf32> to vector<8xf32>
    %425 = vector.shape_cast %424 : vector<8xf32> to vector<8x1xf32>
    %426 = vector.broadcast %425 : vector<8x1xf32> to vector<8x16xf32>
    %427 = arith.subf %414, %426 : vector<8x16xf32>
    %428 = math.exp %427 : vector<8x16xf32>
    %cst_113 = arith.constant dense<0.000000e+00> : vector<8xf32>
    %429 = vector.multi_reduction <add>, %428, %cst_113 [1] : vector<8x16xf32> to vector<8xf32>
    %430 = vector.shape_cast %429 : vector<8xf32> to vector<8x1xf32>
    %431 = vector.broadcast %430 : vector<8x1xf32> to vector<8x16xf32>
    %432 = arith.divf %428, %431 : vector<8x16xf32>
    %433 = arith.addf %423, %432 : vector<8x16xf32>
    %434 = vector.shape_cast %433 : vector<8x16xf32> to vector<8x16x1xf32>
    %435 = vector.broadcast %434 : vector<8x16x1xf32> to vector<8x16x128xf32>
    %436 = arith.mulf %435, %303 : vector<8x16x128xf32>
    %cst_114 = arith.constant dense<0.000000e+00> : vector<8x128xf32>
    %437 = vector.multi_reduction <add>, %436, %cst_114 [1] : vector<8x16x128xf32> to vector<8x128xf32>
    %438 = tpu.concatenate %344, %375, %406, %437 in 0 : vector<8x128xf32>, vector<8x128xf32>, vector<8x128xf32>, vector<8x128xf32> -> vector<32x128xf32>
    %439 = arith.truncf %438 : vector<32x128xf32> to vector<32x128xbf16>
    %c0_115 = arith.constant 0 : index
    %c0_116 = arith.constant 0 : index
    %440 = vector.load %arg15[%c0_115, %c0_116] : memref<128x128xbf16, #tpu.memory_space<vmem>>, vector<128x128xbf16>
    %cst_117 = arith.constant dense<0.000000e+00> : vector<32x128xf32>
    %441 = tpu.matmul %439, %440, %cst_117 {dimension_numbers = #tpu.dot_dimension_numbers<[1], [0], [0], [1], [0, 0, 1, 1], [], []>} : vector<32x128xbf16>, vector<128x128xbf16>, vector<32x128xf32> -> vector<32x128xf32>
    %c0_118 = arith.constant 0 : index
    %c0_119 = arith.constant 0 : index
    %442 = vector.load %arg16[%c0_118, %c0_119] : memref<1x128xf32, #tpu.memory_space<vmem>>, vector<1x128xf32>
    %443 = vector.broadcast %442 : vector<1x128xf32> to vector<32x128xf32>
    %444 = arith.addf %441, %443 : vector<32x128xf32>
    %cst_120 = arith.constant 0.000000e+00 : f32
    %445 = vector.broadcast %cst_120 : f32 to vector<32x128xf32>
    %446 = arith.maximumf %444, %445 : vector<32x128xf32>
    %447 = arith.mulf %292, %446 : vector<32x128xf32>
    %448 = vector.shape_cast %447 : vector<32x128xf32> to vector<4x8x128xf32>
    %cst_121 = arith.constant dense<0.000000e+00> : vector<4x128xf32>
    %449 = vector.multi_reduction <add>, %448, %cst_121 [1] : vector<4x8x128xf32> to vector<4x128xf32>
    %450 = vector.shape_cast %449 : vector<4x128xf32> to vector<4x1x128xf32>
    %cst_122 = arith.constant 8.000000e+00 : f32
    %451 = vector.broadcast %cst_122 : f32 to vector<4x1x128xf32>
    %452 = arith.divf %450, %451 : vector<4x1x128xf32>
    %453 = vector.broadcast %452 : vector<4x1x128xf32> to vector<4x8x128xf32>
    %454 = arith.subf %448, %453 : vector<4x8x128xf32>
    %455 = arith.mulf %454, %454 : vector<4x8x128xf32>
    %cst_123 = arith.constant dense<0.000000e+00> : vector<4x128xf32>
    %456 = vector.multi_reduction <add>, %455, %cst_123 [1] : vector<4x8x128xf32> to vector<4x128xf32>
    %457 = vector.shape_cast %456 : vector<4x128xf32> to vector<4x1x128xf32>
    %cst_124 = arith.constant 8.000000e+00 : f32
    %458 = vector.broadcast %cst_124 : f32 to vector<4x1x128xf32>
    %459 = arith.divf %457, %458 : vector<4x1x128xf32>
    %460 = vector.broadcast %452 : vector<4x1x128xf32> to vector<4x8x128xf32>
    %461 = arith.subf %448, %460 : vector<4x8x128xf32>
    %cst_125 = arith.constant 9.99999974E-6 : f32
    %462 = vector.broadcast %cst_125 : f32 to vector<4x1x128xf32>
    %463 = arith.addf %459, %462 : vector<4x1x128xf32>
    %464 = math.rsqrt %463 : vector<4x1x128xf32>
    %465 = vector.broadcast %464 : vector<4x1x128xf32> to vector<4x8x128xf32>
    %466 = arith.mulf %461, %465 : vector<4x8x128xf32>
    %467 = vector.shape_cast %466 : vector<4x8x128xf32> to vector<32x128xf32>
    %468 = arith.truncf %467 : vector<32x128xf32> to vector<32x128xbf16>
    %c0_126 = arith.constant 0 : index
    %c0_127 = arith.constant 0 : index
    %469 = vector.load %arg17[%c0_126, %c0_127] : memref<128x128xbf16, #tpu.memory_space<vmem>>, vector<128x128xbf16>
    %cst_128 = arith.constant dense<0.000000e+00> : vector<32x128xf32>
    %470 = tpu.matmul %468, %469, %cst_128 {dimension_numbers = #tpu.dot_dimension_numbers<[1], [0], [0], [1], [0, 0, 1, 1], [], []>} : vector<32x128xbf16>, vector<128x128xbf16>, vector<32x128xf32> -> vector<32x128xf32>
    %c0_129 = arith.constant 0 : index
    %c0_130 = arith.constant 0 : index
    %471 = vector.load %arg18[%c0_129, %c0_130] : memref<1x128xf32, #tpu.memory_space<vmem>>, vector<1x128xf32>
    %472 = vector.broadcast %471 : vector<1x128xf32> to vector<32x128xf32>
    %473 = arith.addf %470, %472 : vector<32x128xf32>
    %cst_131 = arith.constant 0.000000e+00 : f32
    %474 = vector.broadcast %cst_131 : f32 to vector<32x128xf32>
    %475 = arith.maximumf %473, %474 : vector<32x128xf32>
    %476 = arith.truncf %475 : vector<32x128xf32> to vector<32x128xbf16>
    %c0_132 = arith.constant 0 : index
    %c0_133 = arith.constant 0 : index
    %477 = vector.load %arg19[%c0_132, %c0_133] : memref<128x128xbf16, #tpu.memory_space<vmem>>, vector<128x128xbf16>
    %cst_134 = arith.constant dense<0.000000e+00> : vector<32x128xf32>
    %478 = tpu.matmul %476, %477, %cst_134 {dimension_numbers = #tpu.dot_dimension_numbers<[1], [0], [0], [1], [0, 0, 1, 1], [], []>} : vector<32x128xbf16>, vector<128x128xbf16>, vector<32x128xf32> -> vector<32x128xf32>
    %c0_135 = arith.constant 0 : index
    %c0_136 = arith.constant 0 : index
    %479 = vector.load %arg20[%c0_135, %c0_136] : memref<1x128xf32, #tpu.memory_space<vmem>>, vector<1x128xf32>
    %480 = vector.broadcast %479 : vector<1x128xf32> to vector<32x128xf32>
    %481 = arith.addf %478, %480 : vector<32x128xf32>
    %c0_137 = arith.constant 0 : index
    %c0_138 = arith.constant 0 : index
    %482 = vector.load %arg21[%c0_137, %c0_138] : memref<32x128xf32, #tpu.memory_space<vmem>>, vector<32x128xf32>
    tpu.vector_store %arg21[%c0_137, %c0_138], %481 {strides = array<i32>} : memref<32x128xf32, #tpu.memory_space<vmem>>, vector<32x128xf32>,
    %483 = vector.extract_strided_slice %467 {offsets = [0, 0], sizes = [8, 128], strides = [1, 1]} : vector<32x128xf32> to vector<8x128xf32>
    %484 = vector.extract_strided_slice %467 {offsets = [24, 0], sizes = [8, 128], strides = [1, 1]} : vector<32x128xf32> to vector<8x128xf32>
    %485 = arith.mulf %483, %483 : vector<8x128xf32>
    %cst_139 = arith.constant dense<0.000000e+00> : vector<8xf32>
    %486 = vector.multi_reduction <add>, %485, %cst_139 [1] : vector<8x128xf32> to vector<8xf32>
    %487 = vector.shape_cast %486 : vector<8xf32> to vector<8x1xf32>
    %488 = math.sqrt %487 : vector<8x1xf32>
    %cst_140 = arith.constant 9.99999996E-13 : f32
    %489 = vector.broadcast %cst_140 : f32 to vector<8x1xf32>
    %490 = arith.maximumf %488, %489 : vector<8x1xf32>
    %491 = vector.broadcast %490 : vector<8x1xf32> to vector<8x128xf32>
    %492 = arith.divf %483, %491 : vector<8x128xf32>
    %493 = arith.mulf %484, %484 : vector<8x128xf32>
    %cst_141 = arith.constant dense<0.000000e+00> : vector<8xf32>
    %494 = vector.multi_reduction <add>, %493, %cst_141 [1] : vector<8x128xf32> to vector<8xf32>
    %495 = vector.shape_cast %494 : vector<8xf32> to vector<8x1xf32>
    %496 = math.sqrt %495 : vector<8x1xf32>
    %cst_142 = arith.constant 9.99999996E-13 : f32
    %497 = vector.broadcast %cst_142 : f32 to vector<8x1xf32>
    %498 = arith.maximumf %496, %497 : vector<8x1xf32>
    %499 = vector.broadcast %498 : vector<8x1xf32> to vector<8x128xf32>
    %500 = arith.divf %484, %499 : vector<8x128xf32>
    %501 = tpu.concatenate %492, %500 in 0 : vector<8x128xf32>, vector<8x128xf32> -> vector<16x128xf32>
    "tpu.trace_start"() <{level = 10 : i32, message = "ih,jh->ij"}> : () -> ()
    %cst_143 = arith.constant dense<0.000000e+00> : vector<16x16xf32>
    %502 = tpu.matmul %501, %501, %cst_143 {dimension_numbers = #tpu.dot_dimension_numbers<[1], [1], [0], [0], [0, 0, 1, 0], [], []>} : vector<16x128xf32>, vector<16x128xf32>, vector<16x16xf32> -> vector<16x16xf32>
    "tpu.trace_stop"() : () -> ()
    %cst_144 = arith.constant 5.000000e-01 : f32
    %503 = vector.broadcast %cst_144 : f32 to vector<16x16xf32>
    %504 = arith.divf %502, %503 : vector<16x16xf32>
    %505 = math.exp %504 : vector<16x16xf32>
    %506 = tpu.iota {dimensions = array<i32: 0>} : vector<16x16xi32>
    %507 = tpu.iota {dimensions = array<i32: 1>} : vector<16x16xi32>
    %c8_i32_145 = arith.constant 8 : i32
    %c0_i32_146 = arith.constant 0 : i32
    %508 = arith.cmpi eq, %c8_i32_145, %c0_i32_146 : i32
    %c1_i32_147 = arith.constant 1 : i32
    %509 = arith.select %508, %c1_i32_147, %c8_i32_145 : i32
    %510 = vector.broadcast %509 : i32 to vector<16x16xi32>
    %511 = arith.remsi %506, %510 : vector<16x16xi32>
    %c0_i32_148 = arith.constant 0 : i32
    %512 = vector.broadcast %c0_i32_148 : i32 to vector<16x16xi32>
    %513 = arith.cmpi ne, %511, %512 : vector<16x16xi32>
    %c0_i32_149 = arith.constant 0 : i32
    %514 = vector.broadcast %c0_i32_149 : i32 to vector<16x16xi32>
    %515 = arith.cmpi slt, %511, %514 : vector<16x16xi32>
    %c0_i32_150 = arith.constant 0 : i32
    %516 = arith.cmpi slt, %509, %c0_i32_150 : i32
    %517 = vector.broadcast %516 : i1 to vector<16x16xi1>
    %518 = vector.broadcast %517 : vector<16x16xi1> to vector<16x16xi1>
    %519 = arith.xori %515, %518 : vector<16x16xi1>
    %520 = arith.andi %519, %513 : vector<16x16xi1>
    %521 = vector.broadcast %509 : i32 to vector<16x16xi32>
    %522 = arith.addi %511, %521 : vector<16x16xi32>
    %523 = arith.select %520, %522, %511 : vector<16x16xi1>, vector<16x16xi32>
    %524 = arith.cmpi ne, %507, %523 : vector<16x16xi32>
    %c8_i32_151 = arith.constant 8 : i32
    %525 = vector.broadcast %c8_i32_151 : i32 to vector<16x16xi32>
    %526 = arith.addi %523, %525 : vector<16x16xi32>
    %527 = arith.cmpi ne, %507, %526 : vector<16x16xi32>
    %528 = arith.andi %524, %527 : vector<16x16xi1>
    %529 = arith.mulf %492, %500 : vector<8x128xf32>
    %cst_152 = arith.constant dense<0.000000e+00> : vector<8xf32>
    %530 = vector.multi_reduction <add>, %529, %cst_152 [1] : vector<8x128xf32> to vector<8xf32>
    %531 = vector.shape_cast %530 : vector<8xf32> to vector<8x1xf32>
    %cst_153 = arith.constant 5.000000e-01 : f32
    %532 = vector.broadcast %cst_153 : f32 to vector<8x1xf32>
    %533 = arith.divf %531, %532 : vector<8x1xf32>
    %534 = math.exp %533 : vector<8x1xf32>
    %535 = tpu.concatenate %534, %534 in 0 : vector<8x1xf32>, vector<8x1xf32> -> vector<16x1xf32>
    %cst_154 = arith.constant 0.000000e+00 : f32
    %536 = vector.broadcast %cst_154 : f32 to vector<16x16xf32>
    %537 = arith.select %528, %505, %536 : vector<16x16xi1>, vector<16x16xf32>
    %cst_155 = arith.constant dense<0.000000e+00> : vector<16xf32>
    %538 = vector.multi_reduction <add>, %537, %cst_155 [1] : vector<16x16xf32> to vector<16xf32>
    %539 = vector.shape_cast %538 : vector<16xf32> to vector<16x1xf32>
    %540 = arith.addf %535, %539 : vector<16x1xf32>
    %541 = arith.divf %535, %540 : vector<16x1xf32>
    %542 = math.log %541 : vector<16x1xf32>
    %cst_156 = arith.constant 0.000000e+00 : f32
    %543 = vector.broadcast %cst_156 : f32 to vector<16x1xf32>
    %544 = arith.subf %543, %542 : vector<16x1xf32>
    %cst_157 = arith.constant dense<0.000000e+00> : vector<1xf32>
    %545 = vector.multi_reduction <add>, %544, %cst_157 [0] : vector<16x1xf32> to vector<1xf32>
    %546 = vector.shape_cast %545 : vector<1xf32> to vector<1x1xf32>
    %cst_158 = arith.constant 1.600000e+01 : f32
    %547 = vector.broadcast %cst_158 : f32 to vector<1x1xf32>
    %548 = arith.divf %546, %547 : vector<1x1xf32>
    %c0_159 = arith.constant 0 : index
    %c0_160 = arith.constant 0 : index
    %549 = vector.load %arg22[%c0_159, %c0_160] : memref<1x1xf32, #tpu.memory_space<vmem>>, vector<1x1xf32>
    tpu.vector_store %arg22[%c0_159, %c0_160], %548 {strides = array<i32>} : memref<1x1xf32, #tpu.memory_space<vmem>>, vector<1x1xf32>,
    return
  }
  func.func @transform_1(%arg0: i32, %arg1: memref<256xi32, #tpu.memory_space<smem>>) -> (i32, i32) {
    %c0_i32 = arith.constant 0 : i32
    %c0_i32_0 = arith.constant 0 : i32
    %c0_i32_1 = arith.constant 0 : i32
    return %c0_i32, %c0_i32_0 : i32, i32
  }
  func.func @transform_2(%arg0: i32, %arg1: memref<256xi32, #tpu.memory_space<smem>>) -> (i32, i32) {
    %c0_i32 = arith.constant 0 : i32
    %c0_i32_0 = arith.constant 0 : i32
    %c0_i32_1 = arith.constant 0 : i32
    return %c0_i32, %c0_i32_0 : i32, i32
  }
  func.func @transform_3(%arg0: i32, %arg1: memref<256xi32, #tpu.memory_space<smem>>) -> (i32, i32) {
    %c0_i32 = arith.constant 0 : i32
    %c0_i32_0 = arith.constant 0 : i32
    %c0_i32_1 = arith.constant 0 : i32
    return %c0_i32, %c0_i32_0 : i32, i32
  }
  func.func @transform_4(%arg0: i32, %arg1: memref<256xi32, #tpu.memory_space<smem>>) -> (i32, i32) {
    %c0_i32 = arith.constant 0 : i32
    %c0_i32_0 = arith.constant 0 : i32
    %c0_i32_1 = arith.constant 0 : i32
    return %c0_i32, %c0_i32_0 : i32, i32
  }
  func.func @transform_5(%arg0: i32, %arg1: memref<256xi32, #tpu.memory_space<smem>>) -> (i32, i32) {
    %c0_i32 = arith.constant 0 : i32
    %c0_i32_0 = arith.constant 0 : i32
    %c0_i32_1 = arith.constant 0 : i32
    return %c0_i32, %c0_i32_0 : i32, i32
  }
  func.func @transform_6(%arg0: i32, %arg1: memref<256xi32, #tpu.memory_space<smem>>) -> (i32, i32) {
    %c0_i32 = arith.constant 0 : i32
    %c0_i32_0 = arith.constant 0 : i32
    %c0_i32_1 = arith.constant 0 : i32
    return %c0_i32, %c0_i32_0 : i32, i32
  }
  func.func @transform_7(%arg0: i32, %arg1: memref<256xi32, #tpu.memory_space<smem>>) -> (i32, i32) {
    %c0_i32 = arith.constant 0 : i32
    %c0_i32_0 = arith.constant 0 : i32
    %c0_i32_1 = arith.constant 0 : i32
    return %c0_i32, %c0_i32_0 : i32, i32
  }
  func.func @transform_8(%arg0: i32, %arg1: memref<256xi32, #tpu.memory_space<smem>>) -> (i32, i32) {
    %c0_i32 = arith.constant 0 : i32
    %c0_i32_0 = arith.constant 0 : i32
    %c0_i32_1 = arith.constant 0 : i32
    return %c0_i32, %c0_i32_0 : i32, i32
  }
  func.func @transform_9(%arg0: i32, %arg1: memref<256xi32, #tpu.memory_space<smem>>) -> (i32, i32) {
    %c0_i32 = arith.constant 0 : i32
    %c0_i32_0 = arith.constant 0 : i32
    %c0_i32_1 = arith.constant 0 : i32
    return %c0_i32, %c0_i32_0 : i32, i32
  }
  func.func @transform_10(%arg0: i32, %arg1: memref<256xi32, #tpu.memory_space<smem>>) -> (i32, i32) {
    %c0_i32 = arith.constant 0 : i32
    %c0_i32_0 = arith.constant 0 : i32
    %c0_i32_1 = arith.constant 0 : i32
    return %c0_i32, %c0_i32_0 : i32, i32
  }
  func.func @transform_11(%arg0: i32, %arg1: memref<256xi32, #tpu.memory_space<smem>>) -> (i32, i32) {
    %c0_i32 = arith.constant 0 : i32
    %c0_i32_0 = arith.constant 0 : i32
    %c0_i32_1 = arith.constant 0 : i32
    return %c0_i32, %c0_i32_0 : i32, i32
  }
  func.func @transform_12(%arg0: i32, %arg1: memref<256xi32, #tpu.memory_space<smem>>) -> (i32, i32) {
    %c0_i32 = arith.constant 0 : i32
    %c0_i32_0 = arith.constant 0 : i32
    %c0_i32_1 = arith.constant 0 : i32
    return %c0_i32, %c0_i32_0 : i32, i32
  }
  func.func @transform_13(%arg0: i32, %arg1: memref<256xi32, #tpu.memory_space<smem>>) -> (i32, i32) {
    %c0_i32 = arith.constant 0 : i32
    %c0_i32_0 = arith.constant 0 : i32
    %c0_i32_1 = arith.constant 0 : i32
    return %c0_i32, %c0_i32_0 : i32, i32
  }
  func.func @transform_14(%arg0: i32, %arg1: memref<256xi32, #tpu.memory_space<smem>>) -> (i32, i32) {
    %c0_i32 = arith.constant 0 : i32
    %c0_i32_0 = arith.constant 0 : i32
    %c0_i32_1 = arith.constant 0 : i32
    return %c0_i32, %c0_i32_0 : i32, i32
  }
  func.func @transform_15(%arg0: i32, %arg1: memref<256xi32, #tpu.memory_space<smem>>) -> (i32, i32) {
    %c0_i32 = arith.constant 0 : i32
    %c0_i32_0 = arith.constant 0 : i32
    %c0_i32_1 = arith.constant 0 : i32
    return %c0_i32, %c0_i32_0 : i32, i32
  }
  func.func @transform_16(%arg0: i32, %arg1: memref<256xi32, #tpu.memory_space<smem>>) -> (i32, i32) {
    %c0_i32 = arith.constant 0 : i32
    %c0_i32_0 = arith.constant 0 : i32
    %c0_i32_1 = arith.constant 0 : i32
    return %c0_i32, %c0_i32_0 : i32, i32
  }
  func.func @transform_17(%arg0: i32, %arg1: memref<256xi32, #tpu.memory_space<smem>>) -> (i32, i32) {
    %c0_i32 = arith.constant 0 : i32
    %c0_i32_0 = arith.constant 0 : i32
    %c0_i32_1 = arith.constant 0 : i32
    return %c0_i32, %c0_i32_0 : i32, i32
  }
  func.func @transform_18(%arg0: i32, %arg1: memref<256xi32, #tpu.memory_space<smem>>) -> (i32, i32) {
    %c0_i32 = arith.constant 0 : i32
    %c0_i32_0 = arith.constant 0 : i32
    %c0_i32_1 = arith.constant 0 : i32
    return %c0_i32, %c0_i32_0 : i32, i32
  }
  func.func @transform_19(%arg0: i32, %arg1: memref<256xi32, #tpu.memory_space<smem>>) -> (i32, i32) {
    %c0_i32 = arith.constant 0 : i32
    %c0_i32_0 = arith.constant 0 : i32
    %c0_i32_1 = arith.constant 0 : i32
    return %c0_i32, %c0_i32_0 : i32, i32
  }
  func.func @transform_20(%arg0: i32, %arg1: memref<256xi32, #tpu.memory_space<smem>>) -> (i32, i32) {
    %c0_i32 = arith.constant 0 : i32
    %c0_i32_0 = arith.constant 0 : i32
    %c0_i32_1 = arith.constant 0 : i32
    return %c0_i32, %c0_i32_0 : i32, i32
  }
}

</mosaic_0001>

<bundles_post_ra>
// kernel: model_forward.1
= control target key start
LH: loop header
LB: loop body
LE: loop exit
PB: predicated region body
PF: predicated region fallthrough
CT: control target
= control target key end

     0   :  { %s17055_s0 = inlined_call_operand.vmem [shape: s32[256], index: 0, kind: input, shape index: {}]   ;;  %s17056_s1 = inlined_call_operand.vmem [shape: f32[101,384], index: 1, kind: input, shape index: {}]   ;;  %s17057_s2 = inlined_call_operand.vmem [shape: f32[128,128], index: 2, kind: input, shape index: {}]   ;;  %s17058_s3 = inlined_call_operand.hbm [shape: bf16[384,384], index: 3, kind: input, shape index: {}]   ;;  %s17059_s4 = inlined_call_operand.hbm [shape: f32[1,384], index: 4, kind: input, shape index: {}]   ;;  %s17060_s5 = inlined_call_operand.hbm [shape: bf16[128,384], index: 5, kind: input, shape index: {}]   ;;  %s17061_s6 = inlined_call_operand.hbm [shape: f32[1,384], index: 6, kind: input, shape index: {}]   ;;  %s17062_s7 = inlined_call_operand.vmem [shape: bf16[128,128], index: 7, kind: input, shape index: {}]   ;;  %s17063_s8 = inlined_call_operand.hbm [shape: f32[1,128], index: 8, kind: input, shape index: {}]   ;;  %s17064_s9 = inlined_call_operand.hbm [shape: bf16[128,256], index: 9, kind: input, shape index: {}]   ;;  %s17065_s10 = inlined_call_operand.hbm [shape: f32[1,256], index: 10, kind: input, shape index: {}]   ;;  %s17066_s11 = inlined_call_operand.hbm [shape: bf16[128,256], index: 11, kind: input, shape index: {}]   ;;  %s17067_s12 = inlined_call_operand.hbm [shape: f32[1,256], index: 12, kind: input, shape index: {}]   ;;  %s17068_s13 = inlined_call_operand.hbm [shape: f32[1,256], index: 13, kind: input, shape index: {}]   ;;  %s17069_s14 = inlined_call_operand.hbm [shape: bf16[128,128], index: 14, kind: input, shape index: {}]   ;;  %s17070_s15 = inlined_call_operand.hbm [shape: f32[1,128], index: 15, kind: input, shape index: {}]   ;;  %s17071_s16 = inlined_call_operand.hbm [shape: bf16[128,128], index: 16, kind: input, shape index: {}]   ;;  %s17072_s17 = inlined_call_operand.hbm [shape: f32[1,128], index: 17, kind: input, shape index: {}]   ;;  %s17073_s18 = inlined_call_operand.hbm [shape: bf16[128,128], index: 18, kind: input, shape index: {}]   ;;  %s17074_s19 = inlined_call_operand.hbm [shape: f32[1,128], index: 19, kind: input, shape index: {}]   ;;  %s17075_s20 = inlined_call_operand.vmem [shape: f32[32,128], index: 20, kind: output, shape index: {0}]   ;;  %s17076_s21 = inlined_call_operand.hbm [shape: f32[1,1], index: 21, kind: output, shape index: {1}]  }
   0x1   :  { %17336 = sst [smem:[#allocation187_spill]] %s17055_s0 }
   0x2   :  { %17337 = sst [smem:[#allocation188_spill]] %s17056_s1 }
   0x3   :  { %17338 = sst [smem:[#allocation189_spill]] %s17057_s2 }
   0x4   :  { %17339 = sst [smem:[#allocation190_spill]] %s17058_s3 }
   0x5   :  { %17340 = sst [smem:[#allocation191_spill]] %s17059_s4 }
   0x6   :  { %17341 = sst [smem:[#allocation192_spill]] %s17060_s5 }
   0x7   :  { %17342 = sst [smem:[#allocation193_spill]] %s17062_s7 }
   0x8   :  { %s17343_s26 = sld [smem:[#allocation187_spill]] }
   0xe   :  { %s27_s7 = sshll.u32 %s17343_s26, 4  ;;  %s28_s7 = int_to_ptr.vmem [resolvable:$true] %s27_s7 }
   0xf   :  { %s11587_s27 = scalar_lea.vmem %s28_s7, 32  ;;  %p11592_p1 = scmp.lt.s32.totalorder %s28_s7, %s28_s7 }
  0x10   :  { %p11588_p0 = scmp.ne.s32.totalorder %s28_s7, %s11587_s27  ;;  %p11593_p2 = scmp.lt.s32.totalorder %s11587_s27, %s11587_s27 }
  0x12   :  { %p11594_p3 = por %p11593_p2, %p11592_p1 }
  0x14   :  { %p11595_p4 = pnand %p11594_p3, %p11588_p0 }
  0x16   :  { %11598 = shalt.err (!%p11595_p4)  }
  0x17   :  { %s11979_s3 = smov [#allocation6]  }
  0x18   :  { %30 = dma.vmem_to_smem %s28_s7, 32, %s11979_s3, [#allocation5] }
  0x19   :  { %11947 = dma.done.wait [#allocation5], 32 }
  0x1a   :  { %11948 = vsyncadd [#allocation5], 4294967264 }
  0x1b   :  { %32 = sfence }
  0x1c   :  { %33 = vsyncpa [#allocation8], 0 }
  0x1d   :  { %34 = vsyncpa [#allocation11], 0 }
  0x1e   :  { %35 = vsyncpa [#allocation14], 0 }
  0x1f   :  { %36 = vsyncpa [#allocation17], 0 }
  0x20   :  { %37 = vsyncpa [#allocation20], 0 }
  0x21   :  { %38 = vsyncpa [#allocation23], 0 }
  0x22   :  { %39 = vsyncpa [#allocation26], 0 }
  0x23   :  { %40 = vsyncpa [#allocation29], 0 }
  0x24   :  { %41 = vsyncpa [#allocation32], 0 }
  0x25   :  { %42 = vsyncpa [#allocation9], 0  ;;  %s11980_s28 = smov [#allocation10]   ;;  %s11981_s0 = smov [#allocation13]  }
  0x26   :  { %s63_s29 = sshll.u32 %s11980_s28, 4  ;;  %s85_s4 = sshll.u32 %s11981_s0, 4  ;;  %s64_s29 = int_to_ptr.vmem [resolvable:$true] %s63_s29  ;;  %s86_s4 = int_to_ptr.vmem [resolvable:$true] %s85_s4 }
  0x27   :  { %s11607_s7 = scalar_lea.vmem %s64_s29, 48  ;;  %s11611_s30 = scalar_lea.vmem %s64_s29, 64 }
  0x28   :  { %p11608_p5 = scmp.ne.s32.totalorder %s64_s29, %s11607_s7  ;;  %p11612_p6 = scmp.lt.s32.totalorder %s64_s29, %s64_s29 }
  0x29   :  { %p11613_p7 = scmp.lt.s32.totalorder %s11611_s30, %s11607_s7 }
  0x2b   :  { %p11614_p8 = por %p11613_p7, %p11612_p6 }
  0x2d   :  { %p11615_p9 = pnand %p11614_p8, %p11608_p5 }
  0x2f   :  { %11618 = shalt.err (!%p11615_p9)
}
  0x30   :  { %s17344_s23 = sld [smem:[#allocation191_spill]]  ;;  %s11627_s1 = scalar_lea.vmem %s86_s4, 48 }
  0x31   :  { %p11628_p10 = scmp.ne.s32.totalorder %s86_s4, %s11627_s1  ;;  %s11631_s24 = scalar_lea.vmem %s86_s4, 64 }
  0x32   :  { %p11632_p11 = scmp.lt.s32.totalorder %s86_s4, %s86_s4  ;;  %p11633_p12 = scmp.lt.s32.totalorder %s11631_s24, %s11627_s1 }
  0x34   :  { %p11634_p13 = por %p11633_p12, %p11632_p11 }
  0x36   :  { %66 = dma.hbm_to_vmem [thread:$0]  %s17344_s23, 48, %s64_s29, [#allocation11]  }
  0x37   :  { %p11635_p0 = pnand %p11634_p13, %p11628_p10 }
  0x39   :  { %11638 = shalt.err (!%p11635_p0)
}
  0x3a   :  { %88 = dma.hbm_to_vmem [thread:$0]  %s17061_s6, 48, %s86_s4, [#allocation14]  }
  0x3b   :  { %s11982_s26 = smov [#allocation16]  }
  0x3c   :  { %s106_s27 = sshll.u32 %s11982_s26, 4  ;;  %s107_s27 = int_to_ptr.vmem [resolvable:$true] %s106_s27 }
  0x3d   :  { %s11647_s3 = scalar_lea.vmem %s107_s27, 2048  ;;  %p11652_p2 = scmp.lt.s32.totalorder %s107_s27, %s107_s27 }
  0x3e   :  { %p11648_p1 = scmp.ne.s32.totalorder %s107_s27, %s11647_s3  ;;  %p11653_p3 = scmp.lt.s32.totalorder %s11647_s3, %s11647_s3 }
  0x40   :  { %p11654_p4 = por %p11653_p3, %p11652_p2 }
  0x42   :  { %p11655_p5 = pnand %p11654_p4, %p11648_p1 }
  0x44   :  { %11658 = shalt.err (!%p11655_p5)
}
  0x45   :  { %s11983_s28 = smov 128   ;;  %s11984_s29 = smov 8  }
  0x46   :  { %112 = dma.hbm_to_vmem [thread:$0]  %s17064_s9, 2048, %s107_s27, [#allocation17], %s11983_s28, %s11983_s28, %s11984_s29  }
  0x47   :  { %s11985_s30 = smov [#allocation19]   ;;  %s11986_s6 = smov [#allocation22]  }
  0x48   :  { %s128_s5 = sshll.u32 %s11985_s30, 4  ;;  %s151_s4 = sshll.u32 %s11986_s6, 4  ;;  %s129_s5 = int_to_ptr.vmem [resolvable:$true] %s128_s5  ;;  %s152_s4 = int_to_ptr.vmem [resolvable:$true] %s151_s4 }
  0x49   :  { %s11667_s22 = scalar_lea.vmem %s129_s5, 2048  ;;  %p11672_p7 = scmp.lt.s32.totalorder %s129_s5, %s129_s5 }
  0x4a   :  { %p11668_p6 = scmp.ne.s32.totalorder %s129_s5, %s11667_s22  ;;  %p11673_p8 = scmp.lt.s32.totalorder %s11667_s22, %s11667_s22 }
  0x4c   :  { %p11674_p9 = por %p11673_p8, %p11672_p7 }
  0x4e   :  { %p11675_p10 = pnand %p11674_p9, %p11668_p6 }
  0x50   :  { %11678 = shalt.err (!%p11675_p10)
}
  0x51   :  { %134 = dma.hbm_to_vmem [thread:$0]  %s17066_s11, 2048, %s129_s5, [#allocation20], %s11983_s28, %s11983_s28, %s11984_s29  }
  0x52   :  { %s11687_s24 = scalar_lea.vmem %s152_s4, 32  ;;  %p11692_p12 = scmp.lt.s32.totalorder %s152_s4, %s152_s4 }
  0x53   :  { %p11688_p11 = scmp.ne.s32.totalorder %s152_s4, %s11687_s24  ;;  %p11693_p13 = scmp.lt.s32.totalorder %s11687_s24, %s11687_s24 }
  0x55   :  { %p11694_p0 = por %p11693_p13, %p11692_p12 }
  0x57   :  { %p11695_p1 = pnand %p11694_p0, %p11688_p11 }
  0x59   :  { %11698 = shalt.err (!%p11695_p1)
}
  0x5a   :  { %154 = dma.hbm_to_vmem [thread:$0]  %s17068_s13, 32, %s152_s4, [#allocation23]  }
  0x5b   :  { %s11987_s25 = smov [#allocation25]   ;;  %s11988_s27 = smov [#allocation28]  }
  0x5c   :  { %s173_s26 = sshll.u32 %s11987_s25, 4  ;;  %s195_s3 = sshll.u32 %s11988_s27, 4  ;;  %s174_s26 = int_to_ptr.vmem [resolvable:$true] %s173_s26  ;;  %s196_s3 = int_to_ptr.vmem [resolvable:$true] %s195_s3 }
  0x5d   :  { %s11707_s0 = scalar_lea.vmem %s174_s26, 16  ;;  %s11711_s11 = scalar_lea.vmem %s174_s26, 32 }
  0x5e   :  { %p11708_p2 = scmp.ne.s32.totalorder %s174_s26, %s11707_s0  ;;  %p11712_p3 = scmp.lt.s32.totalorder %s174_s26, %s174_s26 }
  0x5f   :  { %p11713_p4 = scmp.lt.s32.totalorder %s11711_s11, %s11707_s0 }
  0x61   :  { %p11714_p5 = por %p11713_p4, %p11712_p3 }
  0x63   :  { %p11715_p6 = pnand %p11714_p5, %p11708_p2 }
  0x65   :  { %11718 = shalt.err (!%p11715_p6)
}
  0x66   :  { %176 = dma.hbm_to_vmem [thread:$0]  %s17070_s15, 16, %s174_s26, [#allocation26]  }
  0x67   :  { %s11727_s7 = scalar_lea.vmem %s196_s3, 16  ;;  %s11731_s13 = scalar_lea.vmem %s196_s3, 32 }
  0x68   :  { %p11728_p7 = scmp.ne.s32.totalorder %s196_s3, %s11727_s7  ;;  %p11732_p8 = scmp.lt.s32.totalorder %s196_s3, %s196_s3 }
  0x69   :  { %p11733_p9 = scmp.lt.s32.totalorder %s11731_s13, %s11727_s7 }
  0x6b   :  { %p11734_p10 = por %p11733_p9, %p11732_p8 }
  0x6d   :  { %p11735_p11 = pnand %p11734_p10, %p11728_p7 }
  0x6f   :  { %11738 = shalt.err (!%p11735_p11)
}
  0x70   :  { %198 = dma.hbm_to_vmem [thread:$0]  %s17072_s17, 16, %s196_s3, [#allocation29]  }
  0x71   :  { %s11989_s6 = smov [#allocation7]  }
  0x72   :  { %s50_s4 = sshll.u32 %s11989_s6, 4  ;;  %s51_s4 = int_to_ptr.vmem [resolvable:$true] %s50_s4 }
  0x73   :  { %s11747_s22 = scalar_lea.vmem %s51_s4, 9216  ;;  %p11752_p13 = scmp.lt.s32.totalorder %s51_s4, %s51_s4 }
  0x74   :  { %p11748_p12 = scmp.ne.s32.totalorder %s51_s4, %s11747_s22  ;;  %p11753_p0 = scmp.lt.s32.totalorder %s11747_s22, %s11747_s22 }
  0x76   :  { %p11754_p1 = por %p11753_p0, %p11752_p13 }
  0x78   :  { %p11755_p2 = pnand %p11754_p1, %p11748_p12 }
  0x7a   :  { %11758 = shalt.err (!%p11755_p2)
}
  0x7b   :  { %s11990_s15 = smov 192   ;;  %s11991_s23 = smov 12  }
  0x7c   :  { %s17345_s9 = sld [smem:[#allocation190_spill]]  ;;  %s11992_s2 = smov [#allocation12]  }
  0x7d   :  { %s72_s25 = sshll.u32 %s11992_s2, 4  ;;  %s11993_s26 = smov [#allocation15]   ;;  %s73_s25 = int_to_ptr.vmem [resolvable:$true] %s72_s25 }
  0x7e   :  { %s97_s17 = sshll.u32 %s11993_s26, 4  ;;  %s11767_s27 = scalar_lea.vmem %s73_s25, 3072  ;;  %s98_s17 = int_to_ptr.vmem [resolvable:$true] %s97_s17 }
  0x7f   :  { %p11768_p3 = scmp.ne.s32.totalorder %s73_s25, %s11767_s27  ;;  %p11772_p4 = scmp.lt.s32.totalorder %s73_s25, %s73_s25 }
  0x80   :  { %p11773_p5 = scmp.lt.s32.totalorder %s11767_s27, %s11767_s27 }
  0x82   :  { %56 = dma.hbm_to_vmem [thread:$0]  %s17345_s9, 9216, %s51_s4, [#allocation8], %s11990_s15, %s11990_s15, %s11991_s23  }
  0x83   :  { %p11774_p6 = por %p11773_p5, %p11772_p4 }
  0x85   :  { %p11775_p7 = pnand %p11774_p6, %p11768_p3 }
  0x87   :  { %11778 = shalt.err (!%p11775_p7)
}
  0x88   :  { %s17346_s11 = sld [smem:[#allocation192_spill]]  ;;  %s11787_s28 = scalar_lea.vmem %s98_s17, 16 }
  0x89   :  { %p11788_p8 = scmp.ne.s32.totalorder %s98_s17, %s11787_s28  ;;  %s11791_s29 = scalar_lea.vmem %s98_s17, 32 }
  0x8a   :  { %p11792_p9 = scmp.lt.s32.totalorder %s98_s17, %s98_s17  ;;  %p11793_p10 = scmp.lt.s32.totalorder %s11791_s29, %s11787_s28 }
  0x8c   :  { %p11794_p11 = por %p11793_p10, %p11792_p9 }
  0x8e   :  { %78 = dma.hbm_to_vmem [thread:$0]  %s17346_s11, 3072, %s73_s25, [#allocation11], %s11990_s15, %s11990_s15, %s11991_s23  }
  0x8f   :  { %p11795_p12 = pnand %p11794_p11, %p11788_p8 }
  0x91   :  { %11798 = shalt.err (!%p11795_p12)
}
  0x92   :  { %100 = dma.hbm_to_vmem [thread:$0]  %s17063_s8, 16, %s98_s17, [#allocation14]  }
  0x93   :  { %s11994_s30 = smov [#allocation18]   ;;  %s11995_s6 = smov [#allocation21]  }
  0x94   :  { %s119_s5 = sshll.u32 %s11994_s30, 4  ;;  %s141_s4 = sshll.u32 %s11995_s6, 4  ;;  %s120_s5 = int_to_ptr.vmem [resolvable:$true] %s119_s5  ;;  %s142_s4 = int_to_ptr.vmem [resolvable:$true] %s141_s4 }
  0x95   :  { %s11807_s22 = scalar_lea.vmem %s120_s5, 32  ;;  %p11812_p0 = scmp.lt.s32.totalorder %s120_s5, %s120_s5 }
  0x96   :  { %p11808_p13 = scmp.ne.s32.totalorder %s120_s5, %s11807_s22  ;;  %p11813_p1 = scmp.lt.s32.totalorder %s11807_s22, %s11807_s22 }
  0x98   :  { %p11814_p2 = por %p11813_p1, %p11812_p0 }
  0x9a   :  { %p11815_p3 = pnand %p11814_p2, %p11808_p13 }
  0x9c   :  { %11818 = shalt.err (!%p11815_p3)
}
  0x9d   :  { %122 = dma.hbm_to_vmem [thread:$0]  %s17065_s10, 32, %s120_s5, [#allocation17]  }
  0x9e   :  { %s11827_s1 = scalar_lea.vmem %s142_s4, 32  ;;  %p11832_p5 = scmp.lt.s32.totalorder %s142_s4, %s142_s4 }
  0x9f   :  { %p11828_p4 = scmp.ne.s32.totalorder %s142_s4, %s11827_s1  ;;  %p11833_p6 = scmp.lt.s32.totalorder %s11827_s1, %s11827_s1 }
  0xa1   :  { %p11834_p7 = por %p11833_p6, %p11832_p5 }
  0xa3   :  { %p11835_p8 = pnand %p11834_p7, %p11828_p4 }
  0xa5   :  { %11838 = shalt.err (!%p11835_p8)
}
  0xa6   :  { %144 = dma.hbm_to_vmem [thread:$0]  %s17067_s12, 32, %s142_s4, [#allocation20]  }
  0xa7   :  { %s11996_s9 = smov [#allocation24]  }
  0xa8   :  { %s160_s2 = sshll.u32 %s11996_s9, 4  ;;  %s161_s2 = int_to_ptr.vmem [resolvable:$true] %s160_s2 }
  0xa9   :  { %s11847_s25 = scalar_lea.vmem %s161_s2, 1024  ;;  %p11852_p10 = scmp.lt.s32.totalorder %s161_s2, %s161_s2 }
  0xaa   :  { %p11848_p9 = scmp.ne.s32.totalorder %s161_s2, %s11847_s25  ;;  %p11853_p11 = scmp.lt.s32.totalorder %s11847_s25, %s11847_s25 }
  0xac   :  { %p11854_p12 = por %p11853_p11, %p11852_p10 }
  0xae   :  { %p11855_p13 = pnand %p11854_p12, %p11848_p9 }
  0xb0   :  { %11858 = shalt.err (!%p11855_p13)
}
  0xb1   :  { %s11997_s10 = smov 64   ;;  %s11998_s26 = smov 4  }
  0xb2   :  { %166 = dma.hbm_to_vmem [thread:$0]  %s17069_s14, 1024, %s161_s2, [#allocation23], %s11997_s10, %s11997_s10, %s11998_s26  }
  0xb3   :  { %s11999_s3 = smov [#allocation27]   ;;  %s12000_s12 = smov [#allocation30]  }
  0xb4   :  { %s182_s0 = sshll.u32 %s11999_s3, 4  ;;  %s204_s11 = sshll.u32 %s12000_s12, 4  ;;  %s183_s0 = int_to_ptr.vmem [resolvable:$true] %s182_s0  ;;  %s205_s11 = int_to_ptr.vmem [resolvable:$true] %s204_s11 }
  0xb5   :  { %s11867_s28 = scalar_lea.vmem %s183_s0, 1024  ;;  %p11872_p1 = scmp.lt.s32.totalorder %s183_s0, %s183_s0 }
  0xb6   :  { %p11868_p0 = scmp.ne.s32.totalorder %s183_s0, %s11867_s28  ;;  %p11873_p2 = scmp.lt.s32.totalorder %s11867_s28, %s11867_s28 }
  0xb8   :  { %p11874_p3 = por %p11873_p2, %p11872_p1 }
  0xba   :  { %p11875_p4 = pnand %p11874_p3, %p11868_p0 }
  0xbc   :  { %11878 = shalt.err (!%p11875_p4)
}
  0xbd   :  { %188 = dma.hbm_to_vmem [thread:$0]  %s17071_s16, 1024, %s183_s0, [#allocation26], %s11997_s10, %s11997_s10, %s11998_s26  }
  0xbe   :  { %s11887_s13 = scalar_lea.vmem %s205_s11, 1024  ;;  %p11892_p6 = scmp.lt.s32.totalorder %s205_s11, %s205_s11 }
  0xbf   :  { %p11888_p5 = scmp.ne.s32.totalorder %s205_s11, %s11887_s13  ;;  %p11893_p7 = scmp.lt.s32.totalorder %s11887_s13, %s11887_s13 }
  0xc1   :  { %p11894_p8 = por %p11893_p7, %p11892_p6 }
  0xc3   :  { %p11895_p9 = pnand %p11894_p8, %p11888_p5 }
  0xc5   :  { %11898 = shalt.err (!%p11895_p9)
}
  0xc6   :  { %210 = dma.hbm_to_vmem [thread:$0]  %s17073_s18, 1024, %s205_s11, [#allocation29], %s11997_s10, %s11997_s10, %s11998_s26  }
  0xc7   :  { %s12001_s5 = smov [#allocation31]  }
  0xc8   :  { %s217_s6 = sshll.u32 %s12001_s5, 4  ;;  %s218_s6 = int_to_ptr.vmem [resolvable:$true] %s217_s6 }
  0xc9   :  { %s11907_s4 = scalar_lea.vmem %s218_s6, 16  ;;  %s11911_s22 = scalar_lea.vmem %s218_s6, 32 }
  0xca   :  { %p11908_p10 = scmp.ne.s32.totalorder %s218_s6, %s11907_s4  ;;  %p11912_p11 = scmp.lt.s32.totalorder %s218_s6, %s218_s6 }
  0xcb   :  { %p11913_p12 = scmp.lt.s32.totalorder %s11911_s22, %s11907_s4 }
  0xcd   :  { %p11914_p13 = por %p11913_p12, %p11912_p11 }
  0xcf   :  { %p11915_p0 = pnand %p11914_p13, %p11908_p10 }
  0xd1   :  { %11918 = shalt.err (!%p11915_p0)
}
  0xd2   :  { %220 = dma.hbm_to_vmem [thread:$0]  %s17074_s19, 16, %s218_s6, [#allocation32]  }
  0xd3   :  { %11949 = dma.done.wait [#allocation8], 9216  }
  0xd4   :  { %11950 = vsyncadd [#allocation8], 4294958080 }
  0xd5   :  { %11951 = dma.done.wait [#allocation11], 3120  }
  0xd6   :  { %11952 = vsyncadd [#allocation11], 4294964176 }
  0xd7   :  { %11953 = dma.done.wait [#allocation14], 64  }
  0xd8   :  { %11954 = vsyncadd [#allocation14], 4294967232 }
  0xd9   :  { %11955 = dma.done.wait [#allocation17], 2080  }
  0xda   :  { %11956 = vsyncadd [#allocation17], 4294965216 }
  0xdb   :  { %11957 = dma.done.wait [#allocation20], 2080  }
  0xdc   :  { %11958 = vsyncadd [#allocation20], 4294965216 }
  0xdd   :  { %11959 = dma.done.wait [#allocation23], 1056  }
  0xde   :  { %11960 = vsyncadd [#allocation23], 4294966240 }
  0xdf   :  { %11961 = dma.done.wait [#allocation26], 1040  }
  0xe0   :  { %11962 = vsyncadd [#allocation26], 4294966256 }
  0xe1   :  { %11963 = dma.done.wait [#allocation29], 1040  }
  0xe2   :  { %11964 = vsyncadd [#allocation29], 4294966256 }
  0xe3   :  { %11965 = dma.done.wait [#allocation32], 16  }
  0xe4   :  { %11966 = vsyncadd [#allocation32], 4294967280  ;;  %s11971_s18 = smov 0  }
  0xe5 LB: > { %s276_s19 = sld [smem:[#allocation6 + %s11973_s18]]  ;;  %s282_s23 = sshrl.u32 %s11973_s18, 3  ;;  %s11973_s18 = sphi %s11971_s18, %s275_s18  }
  0xe6   : > { %s284_s1 = smul.u32 24, %s282_s23  ;;  %s283_s8 = sand.u32 7, %s11973_s18  }
  0xe7   : > { %s17347_s27 = sld [smem:[#allocation188_spill]] }
  0xe8   : > { %s285_s24 = sadd.s32 %s284_s1, %s283_s8 }
  0xe9   : > { %s286_s0 = scalar_lea.vmem [#allocation2], %s285_s24 }
  0xeb   : > { %s277_s9 = sshrl.u32 %s276_s19, 3  ;;  %s278_s2 = sand.u32 7, %s276_s19  }
  0xec   : > { %s279_s25 = smul.u32 24, %s277_s9 }
  0xee   : > { %s280_s10 = sadd.s32 %s279_s25, %s278_s2 }
  0xef   : > { %s281_s3 = scalar_lea.vmem %s17347_s27, %s280_s10 }
  0xf0   : > { %v305_v0 = vld [vmem:[%s281_s3] sm:$0x1]  ;;  %v307_v1 = vld [vmem:[%s281_s3 + $0x8] sm:$0x1]  ;;  %v309_v2 = vld [vmem:[%s281_s3 + $0x10] sm:$0x1] }
  0xf1   : > { %306 = vst [vmem:[%s286_s0] sm:$0x1] %v305_v0  ;;  %308 = vst [vmem:[%s286_s0 + $0x8] sm:$0x1] %v307_v1 }
  0xf2   : > { %310 = vst [vmem:[%s286_s0 + $0x10] sm:$0x1] %v309_v2 }
  0xf3   : > { %340 = vsyncadd [#allocation4], 48  ;;  %s275_s18 = sadd.s32 1, %s11973_s18  }
  0xf4   : > { %p272_p1 = scmp.ge.s32.totalorder %s275_s18, 256  }
  0xf5   :  { %s11975_s12 = smov (%p272_p1), 0  }
  0xf6   :  { %274 = sbr.rel (!%p272_p1) target bundleno = 229 (0xe5), region = 228 }
  0xfb LB: > { %11967 = dma.done.wait [#allocation4], 48  ;;  %s11977_s12 = sphi %s11975_s12, %s346_s12  }
  0xfc   : > { %11968 = vsyncadd [#allocation4], 4294967248  ;;  %s346_s12 = sadd.s32 1, %s11977_s12  }
  0xfd   : > { %p343_p2 = scmp.ge.s32.totalorder %s346_s12, 256  }
  0xfe   :  { %v10581_v3 = vld [vmem:[#allocation7 + $0xac] ss:$12 sps:$4 sm:$0xff] (%p343_p2)   ;;  %v17080_v5 = vmov (%p343_p2), 0   ;;  %v10585_v6 = vld [vmem:[#allocation7 + $0xa8] ss:$12 sps:$4 sm:$0xff] (%p343_p2)   ;;  %v353_v44 = vld [vmem:[#allocation2 + $0x20] sm:$0xff] (%p343_p2) }
  0xff   :  { %345 = sbr.rel (!%p343_p2) target bundleno = 251 (0xfb), region = 239  ;;  %v10583_v4 = vld [vmem:[#allocation7 + $0x22c] ss:$12 sps:$4 sm:$0xff] (%p343_p2)   ;;  %1215 = vmatprep.mubr.bf16.mxu1 (%p343_p2), %v17080_v5  ;;  %10579 = vset.pattern.permute.xlu1 (%p343_p2), %v17080_v5  ;;  %v10586_v7 = vld [vmem:[#allocation7 + $0x228] ss:$12 sps:$4 sm:$0xff] (%p343_p2)   ;;  %v357_v45 = vld [vmem:[#allocation2 + $0x40] sm:$0xff] (%p343_p2) }
 0x100   :  { %990 = vmatprep.subr.bf16.mxu0 (%p343_p2), %v10581_v3  ;;  %10580 = vset.pattern.permute.xlu0 (%p343_p2), %v17080_v5  ;;  %v10587_v8 = vld [vmem:[#allocation7 + $0x94] ss:$12 sps:$4 sm:$0xff] (%p343_p2)   ;;  %v10591_v10 = vld [vmem:[#allocation7 + $0x90] ss:$12 sps:$4 sm:$0xff] (%p343_p2)   ;;  %v10597_v14 = vld [vmem:[#allocation7 + $0x78] ss:$12 sps:$4 sm:$0xff] (%p343_p2)  }
 0x101   :  { %1183 = vmatprep.subr.bf16.mxu1 (%p343_p2), %v10583_v4  ;;  %991 = vmatpush1.bf16.msra.mxu0 (%p343_p2), %v10585_v6  ;;  %v10589_v9 = vld [vmem:[#allocation7 + $0x214] ss:$12 sps:$4 sm:$0xff] (%p343_p2)   ;;  %v10592_v11 = vld [vmem:[#allocation7 + $0x210] ss:$12 sps:$4 sm:$0xff] (%p343_p2)   ;;  %v10598_v15 = vld [vmem:[#allocation7 + $0x1f8] ss:$12 sps:$4 sm:$0xff] (%p343_p2)  }
 0x102   :  { %1184 = vmatpush1.bf16.msra.mxu1 (%p343_p2), %v10586_v7  ;;  %992 = vmatprep.subr.bf16.mxu0 (%p343_p2), %v10587_v8  ;;  %v10593_v12 = vld [vmem:[#allocation7 + $0x7c] ss:$12 sps:$4 sm:$0xff] (%p343_p2)   ;;  %v10599_v16 = vld [vmem:[#allocation7 + $0x64] ss:$12 sps:$4 sm:$0xff] (%p343_p2)   ;;  %v10603_v18 = vld [vmem:[#allocation7 + $0x60] ss:$12 sps:$4 sm:$0xff] (%p343_p2)  }
 0x103   :  { %1185 = vmatprep.subr.bf16.mxu1 (%p343_p2), %v10589_v9  ;;  %v10595_v13 = vld [vmem:[#allocation7 + $0x1fc] ss:$12 sps:$4 sm:$0xff] (%p343_p2)   ;;  %v10601_v17 = vld [vmem:[#allocation7 + $0x1e4] ss:$12 sps:$4 sm:$0xff] (%p343_p2)   ;;  %v10604_v19 = vld [vmem:[#allocation7 + $0x1e0] ss:$12 sps:$4 sm:$0xff] (%p343_p2)  }
 0x104   :  { %v10605_v20 = vld [vmem:[#allocation7 + $0x4c] ss:$12 sps:$4 sm:$0xff]   ;;  %v10609_v22 = vld [vmem:[#allocation7 + $0x48] ss:$12 sps:$4 sm:$0xff]   ;;  %v10615_v26 = vld [vmem:[#allocation7 + $0x30] ss:$12 sps:$4 sm:$0xff]  }
 0x105   :  { %993 = vmatpush1.bf16.msra.mxu0 %v10591_v10  ;;  %v10607_v21 = vld [vmem:[#allocation7 + $0x1cc] ss:$12 sps:$4 sm:$0xff]   ;;  %v10610_v23 = vld [vmem:[#allocation7 + $0x1c8] ss:$12 sps:$4 sm:$0xff]   ;;  %v10616_v27 = vld [vmem:[#allocation7 + $0x1b0] ss:$12 sps:$4 sm:$0xff]  }
 0x106   :  { %1186 = vmatpush1.bf16.msra.mxu1 %v10592_v11  ;;  %994 = vmatprep.subr.bf16.mxu0 %v10593_v12  ;;  %v10611_v24 = vld [vmem:[#allocation7 + $0x34] ss:$12 sps:$4 sm:$0xff]   ;;  %v10617_v28 = vld [vmem:[#allocation7 + $0x1c] ss:$12 sps:$4 sm:$0xff]   ;;  %v10621_v30 = vld [vmem:[#allocation7 + $0x18] ss:$12 sps:$4 sm:$0xff]  }
 0x107   :  { %1187 = vmatprep.subr.bf16.mxu1 %v10595_v13  ;;  %v10613_v25 = vld [vmem:[#allocation7 + $0x1b4] ss:$12 sps:$4 sm:$0xff]   ;;  %v10619_v29 = vld [vmem:[#allocation7 + $0x19c] ss:$12 sps:$4 sm:$0xff]   ;;  %v10622_v31 = vld [vmem:[#allocation7 + $0x198] ss:$12 sps:$4 sm:$0xff]  }
 0x108   :  { %v10623_v32 = vld [vmem:[#allocation7 + $0x4] ss:$12 sps:$4 sm:$0xff]   ;;  %v10627_v34 = vld [vmem:[#allocation7] ss:$12 sps:$4 sm:$0xff]   ;;  %v10631_v40 = vld [vmem:[#allocation7 + $0x168] ss:$12 sps:$4 sm:$0xff]  }
 0x109   :  { %995 = vmatpush1.bf16.msra.mxu0 %v10597_v14  ;;  %v10625_v33 = vld [vmem:[#allocation7 + $0x184] ss:$12 sps:$4 sm:$0xff]   ;;  %v10628_v35 = vld [vmem:[#allocation7 + $0x180] ss:$12 sps:$4 sm:$0xff]   ;;  %v360_v46 = vld [vmem:[#allocation2 + $0x58] sm:$0xff]  ;;  %s17506_s29 = sld [smem:[#allocation193_spill]] }
 0x10a   :  { %1188 = vmatpush1.bf16.msra.mxu1 %v10598_v15  ;;  %996 = vmatprep.subr.bf16.mxu0 %v10599_v16  ;;  %v351_v36 = vld [vmem:[#allocation2 + $0x10] sm:$0xff]  ;;  %v354_v37 = vld [vmem:[#allocation2 + $0x28] sm:$0xff]  ;;  %v12179_v49 = vpack.c.bf16 %v360_v46, %v357_v45  ;;  %v10637_v50 = vld [vmem:[#allocation7 + $0x138] ss:$12 sps:$4 sm:$0xff]   ;;  %s17507_s18 = sld [smem:[#allocation189_spill]]  ;;  %vm4440_vm0 = vcmask 130112  }
 0x10b   :  { %1189 = vmatprep.subr.bf16.mxu1 %v10601_v17  ;;  %v10629_v38 = vld [vmem:[#allocation7 + $0x16c] ss:$12 sps:$4 sm:$0xff]   ;;  %v12172_v39 = vpack.c.bf16 %v354_v37, %v351_v36  ;;  %v10632_v41 = vld [vmem:[#allocation7 + $0x154] ss:$12 sps:$4 sm:$0xff]   ;;  %v10634_v43 = vld [vmem:[#allocation7 + $0x150] ss:$12 sps:$4 sm:$0xff]  }
 0x10c   :  { %v350_v42 = vld [vmem:[#allocation2 + $0x8] sm:$0xff]  ;;  %v10638_v51 = vld [vmem:[#allocation7 + $0x124] ss:$12 sps:$4 sm:$0xff]   ;;  %v10644_v58 = vld [vmem:[#allocation7 + $0xf4] ss:$12 sps:$4 sm:$0xff]   ;;  %vm4505_vm1 = vcmask 1041409  }
 0x10d   :  { %997 = vmatpush1.bf16.msra.mxu0 %v10603_v18  ;;  %v12176_v47 = vpack.c.bf16 %v353_v44, %v350_v42  ;;  %v10635_v48 = vld [vmem:[#allocation7 + $0x13c] ss:$12 sps:$4 sm:$0xff]   ;;  %v10640_v52 = vld [vmem:[#allocation7 + $0x120] ss:$12 sps:$4 sm:$0xff]   ;;  %v363_v53 = vld [vmem:[#allocation2 + $0x70] sm:$0xff]  ;;  %vm4507_vm2 = vcmask 1042434  }
 0x10e   :  { %1190 = vmatpush1.bf16.msra.mxu1 %v10604_v19  ;;  %998 = vmatprep.subr.bf16.mxu0 %v10605_v20  ;;  %v366_v54 = vld [vmem:[#allocation2 + $0x88] sm:$0xff]  ;;  %v10646_v59 = vld [vmem:[#allocation7 + $0xf0] ss:$12 sps:$4 sm:$0xff]   ;;  %v369_v60 = vld [vmem:[#allocation2 + $0xa0] sm:$0xff]  ;;  %vm4509_vm3 = vcmask 1043459   ;;  %vm4511_vm4 = vcmask 1044484  }
 0x10f   :  { %1191 = vmatprep.subr.bf16.mxu1 %v10607_v21  ;;  %1022 = vmatprep.mubr.bf16.mxu0 %v12176_v47  ;;  %v10641_v55 = vld [vmem:[#allocation7 + $0x10c] ss:$12 sps:$4 sm:$0xff]   ;;  %v12183_v56 = vpack.c.bf16 %v366_v54, %v363_v53  ;;  %v10643_v57 = vld [vmem:[#allocation7 + $0x108] ss:$12 sps:$4 sm:$0xff]   ;;  %v10650_v1 = vld [vmem:[#allocation7 + $0xc4] ss:$12 sps:$4 sm:$0xff]  }
 0x110   :  { %v372_v61 = vld [vmem:[#allocation2 + $0xb8] sm:$0xff]  ;;  %v10652_v3 = vld [vmem:[#allocation7 + $0xc0] ss:$12 sps:$4 sm:$0xff]   ;;  %v375_v7 = vld [vmem:[#allocation2 + $0xd0] sm:$0xff]  ;;  %vm4513_vm5 = vcmask 1045509   ;;  %vm4515_vm6 = vcmask 1046534  }
 0x111   :  { %999 = vmatpush1.bf16.msra.mxu0 %v10609_v22  ;;  %v10647_v62 = vld [vmem:[#allocation7 + $0xdc] ss:$12 sps:$4 sm:$0xff]   ;;  %v12187_v63 = vpack.c.bf16 %v372_v61, %v369_v60  ;;  %v10649_v0 = vld [vmem:[#allocation7 + $0xd8] ss:$12 sps:$4 sm:$0xff]   ;;  %v359_v13 = vld [vmem:[#allocation2 + $0x50] sm:$0xff]  ;;  %vm4517_vm7 = vcmask 1047559  }
 0x112   :  { %1192 = vmatpush1.bf16.msra.mxu1 %v10610_v23  ;;  %1000 = vmatprep.subr.bf16.mxu0 %v10611_v24  ;;  %v10657_v2 = vld [vmem:[#allocation7 + $0x170] ss:$12 sps:$4 sm:$0xff]   ;;  %v349_v4 = vld [vmem:[#allocation2] sm:$0xff]  ;;  %v378_v8 = vld [vmem:[#allocation2 + $0xe8] sm:$0xff]  ;;  %vm4520_vm8 = vcmask 130048  }
 0x113   :  { %1193 = vmatprep.subr.bf16.mxu1 %v10613_v25  ;;  %v352_v6 = vld [vmem:[#allocation2 + $0x18] sm:$0xff]  ;;  %v12193_v16 = vpack.c.bf16 %v378_v8, %v375_v7  ;;  %v10662_v18 = vld [vmem:[#allocation7 + $0x140] ss:$12 sps:$4 sm:$0xff]   ;;  %v355_v20 = vld [vmem:[#allocation2 + $0x30] sm:$0xff] }
 0x114   :  { %v10653_v9 = vld [vmem:[#allocation7 + $0x230] ss:$12 sps:$4 sm:$0xff]   ;;  %v10660_v12 = vld [vmem:[#allocation7 + $0x158] ss:$12 sps:$4 sm:$0xff]   ;;  %v12191_v15 = vpack.c.bf16 %v352_v6, %v349_v4  ;;  %v10663_v21 = vld [vmem:[#allocation7 + $0x80] ss:$12 sps:$4 sm:$0xff]  }
 0x115   :  { %1001 = vmatpush1.bf16.msra.mxu0 %v10615_v26  ;;  %v356_v10 = vld [vmem:[#allocation2 + $0x38] sm:$0xff]  ;;  %v358_v22 = vld [vmem:[#allocation2 + $0x48] sm:$0xff]  ;;  %v381_v24 = vld [vmem:[#allocation2 + $0x100] sm:$0xff] }
 0x116   :  { %1194 = vmatpush1.bf16.msra.mxu1 %v10616_v27  ;;  %1002 = vmatprep.subr.bf16.mxu0 %v10617_v28  ;;  %v10659_v11 = vld [vmem:[#allocation7 + $0xb0] ss:$12 sps:$4 sm:$0xff]   ;;  %v10661_v14 = vld [vmem:[#allocation7 + $0x98] ss:$12 sps:$4 sm:$0xff]   ;;  %v12195_v17 = vpack.c.bf16 %v359_v13, %v356_v10  ;;  %v10664_v23 = vld [vmem:[#allocation7 + $0x128] ss:$12 sps:$4 sm:$0xff]  }
 0x117   :  { %1195 = vmatprep.subr.bf16.mxu1 %v10619_v29  ;;  %v10654_v19 = vld [vmem:[#allocation7 + $0x218] ss:$12 sps:$4 sm:$0xff]   ;;  %v362_v26 = vld [vmem:[#allocation2 + $0x68] sm:$0xff]  ;;  %v10668_v37 = vld [vmem:[#allocation7 + $0x50] ss:$12 sps:$4 sm:$0xff]  }
 0x118   :  { %v384_v25 = vld [vmem:[#allocation2 + $0x118] sm:$0xff]  ;;  %v365_v27 = vld [vmem:[#allocation2 + $0x80] sm:$0xff]  ;;  %v10665_v29 = vld [vmem:[#allocation7 + $0x68] ss:$12 sps:$4 sm:$0xff]  }
 0x119   :  { %1003 = vmatpush1.bf16.msra.mxu0 %v10621_v30  ;;  %v10655_v28 = vld [vmem:[#allocation7 + $0x200] ss:$12 sps:$4 sm:$0xff]   ;;  %v12201_v30 = vpack.c.bf16 %v358_v22, %v355_v20  ;;  %v10656_v36 = vld [vmem:[#allocation7 + $0x1e8] ss:$12 sps:$4 sm:$0xff]   ;;  %v368_v42 = vld [vmem:[#allocation2 + $0x98] sm:$0xff] }
 0x11a   :  { %1196 = vmatpush1.bf16.msra.mxu1 %v10622_v31  ;;  %1004 = vmatprep.subr.bf16.mxu0 %v10623_v32  ;;  %v12203_v31 = vpack.c.bf16 %v384_v25, %v381_v24  ;;  %v12205_v32 = vpack.c.bf16 %v365_v27, %v362_v26  ;;  %v10658_v44 = vld [vmem:[#allocation7 + $0x1d0] ss:$12 sps:$4 sm:$0xff]   ;;  %v10670_v45 = vld [vmem:[#allocation7 + $0x38] ss:$12 sps:$4 sm:$0xff]   ;;  %v10672_v53 = vld [vmem:[#allocation7 + $0x20] ss:$12 sps:$4 sm:$0xff]  }
 0x11b   :  { %1197 = vmatprep.subr.bf16.mxu1 %v10625_v33  ;;  %v10666_v33 = vld [vmem:[#allocation7 + $0x110] ss:$12 sps:$4 sm:$0xff]   ;;  %v374_v60 = vld [vmem:[#allocation2 + $0xc8] sm:$0xff]  ;;  %v377_v61 = vld [vmem:[#allocation2 + $0xe0] sm:$0xff] }
 0x11c   :  { %v367_v54 = vld [vmem:[#allocation2 + $0x90] sm:$0xff]  ;;  %v373_v4 = vld [vmem:[#allocation2 + $0xc0] sm:$0xff]  ;;  %v376_v6 = vld [vmem:[#allocation2 + $0xd8] sm:$0xff] }
 0x11d   :  { %1005 = vmatpush1.bf16.msra.mxu0 %v10627_v34  ;;  %v361_v34 = vld [vmem:[#allocation2 + $0x60] sm:$0xff]  ;;  %v399_v7 = vld [vmem:[#allocation2 + $0x190] sm:$0xff]  ;;  %v12234_v13 = vpack.c.bf16 %v376_v6, %v373_v4  ;;  %v382_v20 = vld [vmem:[#allocation2 + $0x108] sm:$0xff] }
 0x11e   :  { %1198 = vmatpush1.bf16.msra.mxu1 %v10628_v35  ;;  %1006 = vmatprep.subr.bf16.mxu0 %v10629_v38  ;;  %v364_v35 = vld [vmem:[#allocation2 + $0x78] sm:$0xff]  ;;  %v387_v38 = vld [vmem:[#allocation2 + $0x130] sm:$0xff]  ;;  %v389_v24 = vld [vmem:[#allocation2 + $0x140] sm:$0xff] }
 0x11f   :  { %9982 = vmatprep.subr.bf16.mxu1 %v10657_v2  ;;  %v12211_v46 = vpack.c.bf16 %v364_v35, %v361_v34  ;;  %v10676_v8 = vld [vmem:[#allocation7 + $0x188] ss:$12 sps:$4 sm:$0xff]   ;;  %v12229_v10 = vld [vmem:[#allocation12 + $0xac] ss:$12 sps:$4 sm:$0xff]  }
 0x120   :  { %v408_v22 = vld [vmem:[#allocation2 + $0x1d8] sm:$0xff]  ;;  %v414_v34 = vld [vmem:[#allocation2 + $0x208] sm:$0xff]  ;;  %v403_v6 = vld [vmem:[#allocation2 + $0x1b0] sm:$0xff] }
 0x121   :  { %1216 = vmatmul.mubr.bf16.vlgmr.msra.gmra.mxu1 %v12172_v39  ;;  %1007 = vmatpush2.bf16.msra.mxu0 %v10631_v40  ;;  %v390_v40 = vld [vmem:[#allocation2 + $0x148] sm:$0xff]  ;;  %v392_v35 = vld [vmem:[#allocation2 + $0x158] sm:$0xff] }
 0x122   :  { %1225 = vmatprep.mubr.bf16.mxu1 %v17080_v5  ;;  %1008 = vmatprep.subr.bf16.mxu0 %v10632_v41  ;;  %v10669_v41 = vld [vmem:[#allocation7 + $0xf8] ss:$12 sps:$4 sm:$0xff]  }
 0x123   :  { %9983 = vmatpush3.bf16.msra.mxu1 %v10659_v11  ;;  %v380_v11 = vld [vmem:[#allocation2 + $0xf8] sm:$0xff] }
 0x124   :  { %9984 = vmatprep.subr.bf16.mxu1 %v10660_v12  ;;  %v383_v12 = vld [vmem:[#allocation2 + $0x110] sm:$0xff] }
 0x125   :  { %1009 = vmatpush2.bf16.msra.mxu0 %v10634_v43  ;;  %v371_v43 = vld [vmem:[#allocation2 + $0xb0] sm:$0xff] }
 0x126   :  { %1010 = vmatprep.subr.bf16.mxu0 %v10635_v48  ;;  %v12213_v48 = vpack.c.bf16 %v390_v40, %v387_v38 }
 0x127   :  { %9985 = vmatpush3.bf16.msra.mxu1 %v10661_v14 }
 0x128   :  { %9986 = vmatprep.subr.bf16.mxu1 %v10662_v18  ;;  %v12238_v18 = vpack.c.bf16 %v383_v12, %v380_v11  ;;  %v410_v11 = vld [vmem:[#allocation2 + $0x1e8] sm:$0xff]  ;;  %v413_v12 = vld [vmem:[#allocation2 + $0x200] sm:$0xff] }
 0x129   :  { %1226 = vmatmul.mubr.bf16.gmra.mxu1 %v12179_v49  ;;  %1011 = vmatpush2.bf16.msra.mxu0 %v10637_v50  ;;  %v12215_v50 = vpack.c.bf16 %v371_v43, %v368_v42  ;;  %v394_v42 = vld [vmem:[#allocation2 + $0x168] sm:$0xff]  ;;  %v417_v43 = vld [vmem:[#allocation2 + $0x220] sm:$0xff] }
 0x12a   :  { %1235 = vmatprep.mubr.bf16.mxu1 %v17080_v5  ;;  %1012 = vmatprep.subr.bf16.mxu0 %v10638_v51  ;;  %v10667_v51 = vld [vmem:[#allocation7 + $0x1b8] ss:$12 sps:$4 sm:$0xff]  }
 0x12b   :  { %9987 = vmatpush3.bf16.msra.mxu1 %v10663_v21  ;;  %v405_v21 = vld [vmem:[#allocation2 + $0x1c0] sm:$0xff] }
 0x12c   :  { %9988 = vmatprep.subr.bf16.mxu1 %v10664_v23  ;;  %v386_v23 = vld [vmem:[#allocation2 + $0x128] sm:$0xff]  ;;  %v12247_v26 = vpack.c.bf16 %v408_v22, %v405_v21  ;;  %v12289_v21 = vpack.c.bf16 %v413_v12, %v410_v11  ;;  %v409_v22 = vld [vmem:[#allocation2 + $0x1e0] sm:$0xff]  ;;  %v427_v11 = vld [vmem:[#allocation2 + $0x270] sm:$0xff] }
 0x12d   :  { %1013 = vmatpush2.bf16.msra.mxu0 %v10640_v52  ;;  %v10671_v52 = vld [vmem:[#allocation7 + $0xe0] ss:$12 sps:$4 sm:$0xff]   ;;  %v12249_v27 = vpack.c.bf16 %v389_v24, %v386_v23  ;;  %v412_v23 = vld [vmem:[#allocation2 + $0x1f8] sm:$0xff]  ;;  %v435_v24 = vld [vmem:[#allocation2 + $0x2b0] sm:$0xff] }
 0x12e   :  { %1014 = vmatprep.subr.bf16.mxu0 %v10641_v55  ;;  %v10673_v55 = vld [vmem:[#allocation7 + $0xc8] ss:$12 sps:$4 sm:$0xff]  }
 0x12f   :  { %9989 = vmatpush3.bf16.msra.mxu1 %v10665_v29  ;;  %v388_v29 = vld [vmem:[#allocation2 + $0x138] sm:$0xff]  ;;  %v430_v12 = vld [vmem:[#allocation2 + $0x288] sm:$0xff] }
 0x130   :  { %9990 = vmatprep.subr.bf16.mxu1 %v10666_v33  ;;  %v411_v33 = vld [vmem:[#allocation2 + $0x1f0] sm:$0xff] }
 0x131   :  { %1236 = vmatmul.mubr.bf16.gmra.mxu1 %v12183_v56  ;;  %1015 = vmatpush2.bf16.msra.mxu0 %v10643_v57  ;;  %v370_v57 = vld [vmem:[#allocation2 + $0xa8] sm:$0xff]  ;;  %v12257_v38 = vpack.c.bf16 %v414_v34, %v411_v33  ;;  %v419_v33 = vld [vmem:[#allocation2 + $0x230] sm:$0xff]  ;;  %v12295_v34 = vpack.c.bf16 %v412_v23, %v409_v22  ;;  %v437_v23 = vld [vmem:[#allocation2 + $0x2c0] sm:$0xff] }
 0x132   :  { %1245 = vmatprep.mubr.bf16.mxu1 %v17080_v5  ;;  %1016 = vmatprep.subr.bf16.mxu0 %v10644_v58  ;;  %v393_v58 = vld [vmem:[#allocation2 + $0x160] sm:$0xff]  ;;  %v434_v22 = vld [vmem:[#allocation2 + $0x2a8] sm:$0xff] }
 0x133   :  { %9991 = vmatpush3.bf16.msra.mxu1 %v10668_v37 }
 0x134   :  { %9992 = vmatprep.subr.bf16.mxu1 %v10669_v41  ;;  %v391_v41 = vld [vmem:[#allocation2 + $0x150] sm:$0xff] }
 0x135   :  { %1017 = vmatpush2.bf16.msra.mxu0 %v10646_v59  ;;  %v396_v59 = vld [vmem:[#allocation2 + $0x178] sm:$0xff] }
 0x136   :  { %1018 = vmatprep.subr.bf16.mxu0 %v10647_v62  ;;  %v10674_v62 = vld [vmem:[#allocation7 + $0x8] ss:$12 sps:$4 sm:$0xff]   ;;  %v12223_v2 = vpack.c.bf16 %v396_v59, %v393_v58 }
 0x137   :  { %9993 = vmatpush3.bf16.msra.mxu1 %v10670_v45  ;;  %v398_v45 = vld [vmem:[#allocation2 + $0x188] sm:$0xff]  ;;  %v423_v58 = vld [vmem:[#allocation2 + $0x250] sm:$0xff] }
 0x138   :  { %9994 = vmatprep.subr.bf16.mxu1 %v10671_v52  ;;  %v12265_v52 = vpack.c.bf16 %v394_v42, %v391_v41  ;;  %v426_v59 = vld [vmem:[#allocation2 + $0x268] sm:$0xff]  ;;  %v415_v41 = vld [vmem:[#allocation2 + $0x210] sm:$0xff] }
 0x139   :  { %1246 = vmatmul.mubr.bf16.gmra.mxu1 %v12187_v63  ;;  %1019 = vmatpush2.bf16.msra.mxu0 %v10649_v0  ;;  %v10675_v0 = vld [vmem:[#allocation7 + $0x1a0] ss:$12 sps:$4 sm:$0xff]  }
 0x13a   :  { %1255 = vmatprep.mubr.bf16.mxu1 %v17080_v5  ;;  %1020 = vmatprep.subr.bf16.mxu0 %v10650_v1  ;;  %v12221_v1 = vpack.c.bf16 %v370_v57, %v367_v54  ;;  %v400_v57 = vld [vmem:[#allocation2 + $0x198] sm:$0xff]  ;;  %v418_v42 = vld [vmem:[#allocation2 + $0x228] sm:$0xff] }
 0x13b   :  { %9995 = vmatpush3.bf16.msra.mxu1 %v10672_v53 }
 0x13c   :  { %9996 = vmatprep.subr.bf16.mxu1 %v10673_v55  ;;  %v397_v55 = vld [vmem:[#allocation2 + $0x180] sm:$0xff] }
 0x13d   :  { %1021 = vmatpush2.bf16.msra.mxu0 %v10652_v3  ;;  %v12225_v3 = vpack.c.bf16 %v377_v61, %v374_v60  ;;  %v404_v60 = vld [vmem:[#allocation2 + $0x1b8] sm:$0xff]  ;;  %v407_v61 = vld [vmem:[#allocation2 + $0x1d0] sm:$0xff] }
 0x13e   :  { %10242 = vmatprep.subr.bf16.mxu0 %v10653_v9  ;;  %v12279_v4 = vpack.c.bf16 %v407_v61, %v404_v60  ;;  %v424_v60 = vld [vmem:[#allocation2 + $0x258] sm:$0xff] }
 0x13f   :  { %9997 = vmatpush3.bf16.msra.mxu1 %v10674_v62  ;;  %v12275_v62 = vpack.c.bf16 %v400_v57, %v397_v55  ;;  %v12305_v55 = vpack.c.bf16 %v418_v42, %v415_v41  ;;  %v428_v61 = vld [vmem:[#allocation2 + $0x278] sm:$0xff]  ;;  %v10686_v42 = vld [vmem:[#allocation12 + $0x64] ss:$12 sps:$4 sm:$0xff]  }
 0x140   :  { %1023 = vmatmul.mubr.bf16.vlgmr.msra.gmra.mxu0 %v12191_v15  ;;  %2189 = vmatprep.subr.bf16.mxu1 %v12229_v10  ;;  %v436_v41 = vld [vmem:[#allocation2 + $0x2b8] sm:$0xff] }
 0x141   :  { %1256 = vmatmul.mubr.bf16.gmra.mxu1 %v12193_v16  ;;  %10243 = vmatpush3.bf16.msra.mxu0 %v10653_v9  ;;  %v402_v9 = vld [vmem:[#allocation2 + $0x1a8] sm:$0xff] }
 0x142   :  { %1032 = vmatprep.mubr.bf16.mxu0 %v12195_v17  ;;  %1265 = vmatprep.mubr.bf16.mxu1 %v17080_v5  ;;  %v12236_v14 = vpack.c.bf16 %v402_v9, %v399_v7  ;;  %v406_v7 = vld [vmem:[#allocation2 + $0x1c8] sm:$0xff]  ;;  %v432_v9 = vld [vmem:[#allocation2 + $0x298] sm:$0xff] }
 0x143   :  { %10244 = vmatprep.subr.bf16.mxu0 %v10654_v19 }
 0x145   :  { %10245 = vmatpush3.bf16.msra.mxu0 %v10654_v19  ;;  %v379_v19 = vld [vmem:[#allocation2 + $0xf0] sm:$0xff] }
 0x146   :  { %10246 = vmatprep.subr.bf16.mxu0 %v10655_v28  ;;  %v12245_v25 = vpack.c.bf16 %v382_v20, %v379_v19  ;;  %v12285_v19 = vpack.c.bf16 %v406_v7, %v403_v6  ;;  %v431_v6 = vld [vmem:[#allocation2 + $0x290] sm:$0xff] }
 0x148   :  { %1033 = vmatmul.mubr.bf16.gmra.mxu0 %v12201_v30 }
 0x149   :  { %1266 = vmatmul.mubr.bf16.gmra.mxu1 %v12203_v31  ;;  %1042 = vmatprep.mubr.bf16.mxu0 %v12205_v32 }
 0x14a   :  { %1275 = vmatprep.mubr.bf16.mxu1 %v17080_v5  ;;  %10247 = vmatpush3.bf16.msra.mxu0 %v10655_v28  ;;  %v385_v28 = vld [vmem:[#allocation2 + $0x120] sm:$0xff] }
 0x14b   :  { %10248 = vmatprep.subr.bf16.mxu0 %v10656_v36  ;;  %v12255_v37 = vpack.c.bf16 %v388_v29, %v385_v28  ;;  %v438_v28 = vld [vmem:[#allocation2 + $0x2c8] sm:$0xff]  ;;  %v416_v29 = vld [vmem:[#allocation2 + $0x218] sm:$0xff] }
 0x14e   :  { %10249 = vmatpush3.bf16.msra.mxu0 %v10656_v36  ;;  %v395_v36 = vld [vmem:[#allocation2 + $0x170] sm:$0xff] }
 0x14f   :  { %10250 = vmatprep.subr.bf16.mxu0 %v10658_v44  ;;  %v12259_v40 = vpack.c.bf16 %v395_v36, %v392_v35  ;;  %v12297_v35 = vpack.c.bf16 %v438_v28, %v435_v24  ;;  %v12299_v36 = vpack.c.bf16 %v419_v33, %v416_v29  ;;  %v12323_v24 = vpack.c.bf16 %v430_v12, %v427_v11  ;;  %v10682_v28 = vld [vmem:[#allocation12 + $0x90] ss:$12 sps:$4 sm:$0xff]  }
 0x150   :  { %1043 = vmatmul.mubr.bf16.gmra.mxu0 %v12211_v46  ;;  %v12325_v29 = vpack.c.bf16 %v437_v23, %v434_v22  ;;  %v10683_v33 = vld [vmem:[#allocation12 + $0x7c] ss:$12 sps:$4 sm:$0xff]   ;;  %v10700_v23 = vld [vmem:[#allocation12] ss:$12 sps:$4 sm:$0xff]  }
 0x151   :  { %1276 = vmatmul.mubr.bf16.gmra.mxu1 %v12213_v48  ;;  %1052 = vmatprep.mubr.bf16.mxu0 %v12215_v50  ;;  %v10694_v12 = vld [vmem:[#allocation12 + $0x30] ss:$12 sps:$4 sm:$0xff]  }
 0x152   :  { %1285 = vmatprep.mubr.bf16.mxu1 %v17080_v5  ;;  %10251 = vmatpush3.bf16.msra.mxu0 %v10658_v44  ;;  %v420_v44 = vld [vmem:[#allocation2 + $0x238] sm:$0xff]  ;;  %v10695_v22 = vld [vmem:[#allocation12 + $0x1c] ss:$12 sps:$4 sm:$0xff]  }
 0x153   :  { %10252 = vmatprep.subr.bf16.mxu0 %v10667_v51  ;;  %v12267_v53 = vpack.c.bf16 %v420_v44, %v417_v43  ;;  %v441_v43 = vld [vmem:[#allocation2 + $0x2e0] sm:$0xff]  ;;  %v444_v44 = vld [vmem:[#allocation2 + $0x2f8] sm:$0xff] }
 0x154   :  { %v12307_v57 = vpack.c.bf16 %v444_v44, %v441_v43  ;;  %v440_v43 = vld [vmem:[#allocation2 + $0x2d8] sm:$0xff]  ;;  %v443_v44 = vld [vmem:[#allocation2 + $0x2f0] sm:$0xff] }
 0x156   :  { %10253 = vmatpush3.bf16.msra.mxu0 %v10667_v51  ;;  %v401_v51 = vld [vmem:[#allocation2 + $0x1a0] sm:$0xff] }
 0x157   :  { %10254 = vmatprep.subr.bf16.mxu0 %v10675_v0  ;;  %v12269_v54 = vpack.c.bf16 %v401_v51, %v398_v45  ;;  %v422_v45 = vld [vmem:[#allocation2 + $0x248] sm:$0xff]  ;;  %v425_v51 = vld [vmem:[#allocation2 + $0x260] sm:$0xff] }
 0x158   :  { %1053 = vmatmul.mubr.bf16.gmra.mxu0 %v12221_v1 }
 0x159   :  { %1286 = vmatmul.mubr.bf16.gmra.mxu1 %v12223_v2  ;;  %1062 = vmatprep.mubr.bf16.mxu0 %v12225_v3 }
 0x15a   :  { %1295 = vmatprep.mubr.bf16.mxu1 %v17080_v5  ;;  %10255 = vmatpush3.bf16.msra.mxu0 %v10675_v0  ;;  %v12277_v0 = vpack.c.bf16 %v426_v59, %v423_v58  ;;  %v12309_v58 = vpack.c.bf16 %v425_v51, %v422_v45  ;;  %v421_v59 = vld [vmem:[#allocation2 + $0x240] sm:$0xff] }
 0x15b   :  { %10256 = vmatprep.subr.bf16.mxu0 %v10676_v8  ;;  %v12315_v7 = vpack.c.bf16 %v424_v60, %v421_v59  ;;  %v10688_v51 = vld [vmem:[#allocation12 + $0x60] ss:$12 sps:$4 sm:$0xff]   ;;  %v12333_v59 = vpack.c.bf16 %v443_v44, %v440_v43  ;;  %v12469_v44 = vld [vmem:[#allocation12 + $0x50] ss:$12 sps:$4 sm:$0xff]  }
 0x15c   :  { %v10689_v60 = vld [vmem:[#allocation12 + $0x4c] ss:$12 sps:$4 sm:$0xff]  }
 0x15e   :  { %10257 = vmatpush3.bf16.msra.mxu0 %v10676_v8  ;;  %v429_v8 = vld [vmem:[#allocation2 + $0x280] sm:$0xff] }
 0x15f   :  { %1986 = vmatprep.subr.bf16.mxu0 %v12229_v10  ;;  %v12287_v20 = vpack.c.bf16 %v432_v9, %v429_v8  ;;  %v12317_v8 = vpack.c.bf16 %v431_v6, %v428_v61  ;;  %v10679_v9 = vld [vmem:[#allocation12 + $0xa8] ss:$12 sps:$4 sm:$0xff]  }
 0x160   :  { %1063 = vmatmul.mubr.bf16.gmra.mxu0 %v12234_v13  ;;  %v442_v61 = vld [vmem:[#allocation2 + $0x2e8] sm:$0xff]  ;;  %v10692_v6 = vld [vmem:[#allocation12 + $0x34] ss:$12 sps:$4 sm:$0xff]  }
 0x161   :  { %1296 = vmatmul.mubr.bf16.gmra.mxu1 %v12236_v14  ;;  %1072 = vmatprep.mubr.bf16.mxu0 %v12238_v18 }
 0x162   :  { %1305 = vmatprep.mubr.bf16.mxu1 %v17080_v5 }
 0x168   :  { %1073 = vmatmul.mubr.bf16.gmra.mxu0 %v12245_v25 }
 0x169   :  { %1306 = vmatmul.mubr.bf16.gmra.mxu1 %v12247_v26  ;;  %1082 = vmatprep.mubr.bf16.mxu0 %v12249_v27 }
 0x16a   :  { %1315 = vmatprep.mubr.bf16.mxu1 %v17080_v5 }
 0x170   :  { %1083 = vmatmul.mubr.bf16.gmra.mxu0 %v12255_v37 }
 0x171   :  { %1316 = vmatmul.mubr.bf16.gmra.mxu1 %v12257_v38  ;;  %1092 = vmatprep.mubr.bf16.mxu0 %v12259_v40 }
 0x172   :  { %1325 = vmatprep.mubr.bf16.mxu1 %v17080_v5 }
 0x178   :  { %1093 = vmatmul.mubr.bf16.gmra.mxu0 %v12265_v52 }
 0x179   :  { %1326 = vmatmul.mubr.bf16.gmra.mxu1 %v12267_v53  ;;  %1102 = vmatprep.mubr.bf16.mxu0 %v12269_v54 }
 0x17a   :  { %1335 = vmatprep.mubr.bf16.mxu1 %v17080_v5 }
 0x180   :  { %1103 = vmatmul.mubr.bf16.gmra.mxu0 %v12275_v62 }
 0x181   :  { %1336 = vmatmul.mubr.bf16.gmra.mxu1 %v12277_v0  ;;  %1112 = vmatprep.mubr.bf16.mxu0 %v12279_v4 }
 0x182   :  { %1345 = vmatprep.mubr.bf16.mxu1 %v17080_v5 }
 0x188   :  { %1113 = vmatmul.mubr.bf16.gmra.mxu0 %v12285_v19 }
 0x189   :  { %1346 = vmatmul.mubr.bf16.gmra.mxu1 %v12287_v20  ;;  %1122 = vmatprep.mubr.bf16.mxu0 %v12289_v21 }
 0x18a   :  { %1355 = vmatprep.mubr.bf16.mxu1 %v17080_v5 }
 0x190   :  { %1123 = vmatmul.mubr.bf16.gmra.mxu0 %v12295_v34 }
 0x191   :  { %1356 = vmatmul.mubr.bf16.gmra.mxu1 %v12297_v35  ;;  %1132 = vmatprep.mubr.bf16.mxu0 %v12299_v36 }
 0x192   :  { %1365 = vmatprep.mubr.bf16.mxu1 %v17080_v5 }
 0x198   :  { %1133 = vmatmul.mubr.bf16.gmra.mxu0 %v12305_v55 }
 0x199   :  { %1366 = vmatmul.mubr.bf16.gmra.mxu1 %v12307_v57  ;;  %1142 = vmatprep.mubr.bf16.mxu0 %v12309_v58 }
 0x19a   :  { %1408 = vmatprep.mubr.bf16.mxu1 %v12176_v47  ;;  %v10680_v47 = vld [vmem:[#allocation12 + $0x94] ss:$12 sps:$4 sm:$0xff]  }
 0x1a0   :  { %1143 = vmatmul.mubr.bf16.gmra.mxu0 %v12315_v7 }
 0x1a1   :  { %1409 = vmatmul.mubr.bf16.vlgmr.msra.gmra.mxu1 %v12191_v15  ;;  %1152 = vmatprep.mubr.bf16.mxu0 %v12317_v8  ;;  %v10685_v15 = vld [vmem:[#allocation12 + $0x78] ss:$12 sps:$4 sm:$0xff]  }
 0x1a2   :  { %1416 = vmatprep.mubr.bf16.mxu1 %v12195_v17  ;;  %2190 = vmatpush1.bf16.msra.mxu1 %v10679_v9  ;;  %v433_v17 = vld [vmem:[#allocation2 + $0x2a0] sm:$0xff] }
 0x1a3   :  { %2191 = vmatprep.subr.bf16.mxu1 %v10680_v47  ;;  %v12331_v45 = vpack.c.bf16 %v436_v41, %v433_v17 }
 0x1a6   :  { %2192 = vmatpush1.bf16.msra.mxu1 %v10682_v28 }
 0x1a7   :  { %2193 = vmatprep.subr.bf16.mxu1 %v10683_v33 }
 0x1a8   :  { %1153 = vmatmul.mubr.bf16.gmra.mxu0 %v12323_v24 }
 0x1a9   :  { %1417 = vmatmul.mubr.bf16.gmra.mxu1 %v12201_v30  ;;  %1162 = vmatprep.mubr.bf16.mxu0 %v12325_v29  ;;  %v10691_v30 = vld [vmem:[#allocation12 + $0x48] ss:$12 sps:$4 sm:$0xff]  }
 0x1aa   :  { %1424 = vmatprep.mubr.bf16.mxu1 %v12205_v32  ;;  %2194 = vmatpush1.bf16.msra.mxu1 %v10685_v15  ;;  %v439_v32 = vld [vmem:[#allocation2 + $0x2d0] sm:$0xff] }
 0x1ab   :  { %2195 = vmatprep.subr.bf16.mxu1 %v10686_v42  ;;  %v12339_v11 = vpack.c.bf16 %v442_v61, %v439_v32 }
 0x1ae   :  { %2196 = vmatpush1.bf16.msra.mxu1 %v10688_v51 }
 0x1af   :  { %2197 = vmatprep.subr.bf16.mxu1 %v10689_v60 }
 0x1b0   :  { %1163 = vmatmul.mubr.bf16.gmra.mxu0 %v12331_v45 }
 0x1b1   :  { %1425 = vmatmul.mubr.bf16.gmra.mxu1 %v12211_v46  ;;  %1172 = vmatprep.mubr.bf16.mxu0 %v12333_v59  ;;  %v10697_v46 = vld [vmem:[#allocation12 + $0x18] ss:$12 sps:$4 sm:$0xff]  }
 0x1b2   :  { %1432 = vmatprep.mubr.bf16.mxu1 %v12215_v50  ;;  %2198 = vmatpush1.bf16.msra.mxu1 %v10691_v30  ;;  %v10698_v50 = vld [vmem:[#allocation12 + $0x4] ss:$12 sps:$4 sm:$0xff]  }
 0x1b3   :  { %2199 = vmatprep.subr.bf16.mxu1 %v10692_v6 }
 0x1b6   :  { %2200 = vmatpush1.bf16.msra.mxu1 %v10694_v12 }
 0x1b7   :  { %2201 = vmatprep.subr.bf16.mxu1 %v10695_v22 }
 0x1b8   :  { %1173 = vmatmul.mubr.bf16.gmra.mxu0 %v12339_v11 }
 0x1b9   :  { %1433 = vmatmul.mubr.bf16.gmra.mxu1 %v12221_v1  ;;  %10258 = vmatprep.mubr.bf16.mxu0 %v12172_v39  ;;  %v12362_v39 = vld [vmem:[#allocation12 + $0xb0] ss:$12 sps:$4 sm:$0xff]  }
 0x1ba   :  { %1440 = vmatprep.mubr.bf16.mxu1 %v12225_v3  ;;  %2202 = vmatpush1.bf16.msra.mxu1 %v10697_v46 }
 0x1bb   :  { %2203 = vmatprep.subr.bf16.mxu1 %v10698_v50 }
 0x1be   :  { %2204 = vmatpush1.bf16.msra.mxu1 %v10700_v23 }
 0x1bf   :  { %2392 = vmatprep.subr.bf16.mxu1 %v12229_v10  ;;  %v17079_v10 = vlaneseq }
 0x1c0   :  { %10259 = vmatmul.mubr.bf16.vlgmr.msra.gmra.mxu0 %v12179_v49 }
 0x1c1   :  { %1441 = vmatmul.mubr.bf16.gmra.mxu1 %v12234_v13  ;;  %1987 = vmatpush1.bf16.msra.mxu0 %v10679_v9 }
 0x1c2   :  { %1448 = vmatprep.mubr.bf16.mxu1 %v12238_v18  ;;  %10262 = vmatprep.mubr.bf16.mxu0 %v12183_v56  ;;  %v12394_v18 = vshrl.u32 %v17079_v10, 7 }
 0x1c3   :  { %1988 = vmatprep.subr.bf16.mxu0 %v10680_v47 }
 0x1c4   :  { %17348 = vst [vmem:[#allocation47_spill] sm:$0xff] %v12394_v18 }
 0x1c5   :  { %1989 = vmatpush1.bf16.msra.mxu0 %v10682_v28  ;;  %v12455_v28 = vld [vmem:[#allocation12 + $0x68] ss:$12 sps:$4 sm:$0xff]  }
 0x1c6   :  { %1990 = vmatprep.subr.bf16.mxu0 %v10683_v33 }
 0x1c8   :  { %10263 = vmatmul.mubr.bf16.gmra.mxu0 %v12187_v63 }
 0x1c9   :  { %1449 = vmatmul.mubr.bf16.gmra.mxu1 %v12245_v25  ;;  %10266 = vmatprep.mubr.bf16.mxu0 %v12193_v16 }
 0x1ca   :  { %1456 = vmatprep.mubr.bf16.mxu1 %v12249_v27  ;;  %1991 = vmatpush1.bf16.msra.mxu0 %v10685_v15  ;;  %v12405_v27 = vsub.s32 0, %v12394_v18 }
 0x1cb   :  { %1992 = vmatprep.subr.bf16.mxu0 %v10686_v42 }
 0x1cc   :  { %17349 = vst [vmem:[#allocation48_spill] sm:$0xff] %v12405_v27 }
 0x1ce   :  { %1993 = vmatpush1.bf16.msra.mxu0 %v10688_v51 }
 0x1cf   :  { %1994 = vmatprep.subr.bf16.mxu0 %v10689_v60 }
 0x1d0   :  { %10267 = vmatmul.mubr.bf16.gmra.mxu0 %v12203_v31 }
 0x1d1   :  { %1457 = vmatmul.mubr.bf16.gmra.mxu1 %v12255_v37  ;;  %10270 = vmatprep.mubr.bf16.mxu0 %v12213_v48 }
 0x1d2   :  { %1464 = vmatprep.mubr.bf16.mxu1 %v12259_v40  ;;  %1995 = vmatpush1.bf16.msra.mxu0 %v10691_v30  ;;  %v12412_v40 = vsub.s32 1, %v12394_v18 }
 0x1d3   :  { %1996 = vmatprep.subr.bf16.mxu0 %v10692_v6 }
 0x1d4   :  { %17350 = vst [vmem:[#allocation49_spill] sm:$0xff] %v12412_v40 }
 0x1d6   :  { %1997 = vmatpush1.bf16.msra.mxu0 %v10694_v12  ;;  %v12488_v12 = vld [vmem:[#allocation12 + $0x38] ss:$12 sps:$4 sm:$0xff]  }
 0x1d7   :  { %1998 = vmatprep.subr.bf16.mxu0 %v10695_v22 }
 0x1d8   :  { %10271 = vmatmul.mubr.bf16.gmra.mxu0 %v12223_v2 }
 0x1d9   :  { %1465 = vmatmul.mubr.bf16.gmra.mxu1 %v12265_v52  ;;  %10274 = vmatprep.mubr.bf16.mxu0 %v12236_v14 }
 0x1da   :  { %1472 = vmatprep.mubr.bf16.mxu1 %v12269_v54  ;;  %1999 = vmatpush1.bf16.msra.mxu0 %v10697_v46 }
 0x1db   :  { %2000 = vmatprep.subr.bf16.mxu0 %v10698_v50 }
 0x1de   :  { %2001 = vmatpush1.bf16.msra.mxu0 %v10700_v23 }
 0x1df   :  { %10290 = vmatprep.subr.bf16.mxu0 %v12362_v39 }
 0x1e0   :  { %10275 = vmatmul.mubr.bf16.gmra.mxu0 %v12247_v26 }
 0x1e1   :  { %v1217_v49 = vpop.f32.mrf.mxu1  ;;  %1473 = vmatmul.mubr.bf16.gmra.mxu1 %v12275_v62  ;;  %10278 = vmatprep.mubr.bf16.mxu0 %v12257_v38  ;;  %v12409_v38 = vld [vmem:[#allocation10] sm:$0x7]  ;;  %v12422_v62 = vld [vmem:[#allocation12 + $0x98] ss:$12 sps:$4 sm:$0xff]  }
 0x1e2   :  { %1480 = vmatprep.mubr.bf16.mxu1 %v12279_v4 }
 0x1e3   :  { %v1219_v56 = vpop.f32.mrf.mxu1 }
 0x1e5   :  { %v1221_v63 = vpop.f32.mrf.mxu1 }
 0x1e7   :  { %v12369_v16 = vpop.f32.mrf.mxu1 }
 0x1e8   :  { %10279 = vmatmul.mubr.bf16.gmra.mxu0 %v12267_v53  ;;  %v12418_v53 = vrot.slane %v12409_v38, %v12405_v27 }
 0x1e9   :  { %v12371_v31 = vpop.f32.mrf.mxu1  ;;  %1481 = vmatmul.mubr.bf16.gmra.mxu1 %v12285_v19  ;;  %10282 = vmatprep.mubr.bf16.mxu0 %v12277_v0  ;;  %v12426_v0 = vrot.slane %v12409_v38, %v12412_v40 }
 0x1ea   :  { %1488 = vmatprep.mubr.bf16.mxu1 %v12289_v21 }
 0x1eb   :  { %v12377_v48 = vpop.f32.mrf.mxu1 }
 0x1ed   :  { %v12379_v1 = vpop.f32.mrf.mxu1 }
 0x1ef   :  { %v12381_v2 = vpop.f32.mrf.mxu1 }
 0x1f0   :  { %10283 = vmatmul.mubr.bf16.gmra.mxu0 %v12287_v20 }
 0x1f1   :  { %v12383_v3 = vpop.f32.mrf.mxu1  ;;  %1489 = vmatmul.mubr.bf16.gmra.mxu1 %v12295_v34  ;;  %10286 = vmatprep.mubr.bf16.mxu0 %v12297_v35  ;;  %v12439_v35 = vld [vmem:[#allocation12 + $0x80] ss:$12 sps:$4 sm:$0xff]  }
 0x1f2   :  { %1496 = vmatprep.mubr.bf16.mxu1 %v12299_v36 }
 0x1f3   :  { %v12389_v13 = vpop.f32.mrf.mxu1 }
 0x1f5   :  { %v12391_v14 = vpop.f32.mrf.mxu1 }
 0x1f7   :  { %v12396_v25 = vpop.f32.mrf.mxu1 }
 0x1f8   :  { %10287 = vmatmul.mubr.bf16.gmra.mxu0 %v12307_v57 }
 0x1f9   :  { %v12398_v26 = vpop.f32.mrf.mxu1  ;;  %1497 = vmatmul.mubr.bf16.gmra.mxu1 %v12305_v55  ;;  %2018 = vmatprep.mubr.bf16.mxu0 %v17080_v5 }
 0x1fa   :  { %1504 = vmatprep.mubr.bf16.mxu1 %v12309_v58 }
 0x1fb   :  { %v12407_v37 = vpop.f32.mrf.mxu1 }
 0x1fd   :  { %v12414_v52 = vpop.f32.mrf.mxu1 }
 0x1ff   :  { %v12420_v54 = vpop.f32.mrf.mxu1 }
 0x200   :  { %v1024_v4 = vpop.f32.mrf.mxu0  ;;  %2019 = vmatmul.mubr.bf16.vlgmr.msra.gmra.mxu0 %v17080_v5 }
 0x201   :  { %v12428_v19 = vpop.f32.mrf.mxu1  ;;  %1505 = vmatmul.mubr.bf16.gmra.mxu1 %v12315_v7  ;;  %v1025_v20 = vadd.f32 %v1024_v4, %v12418_v53  ;;  %10291 = vmatpush3.bf16.msra.mxu0 %v12362_v39 }
 0x202   :  { %1512 = vmatprep.mubr.bf16.mxu1 %v12317_v8  ;;  %v1026_v21 = vpop.f32.mrf.mxu0  ;;  %10292 = vmatprep.subr.bf16.mxu0 %v12422_v62 }
 0x203   :  { %v12435_v34 = vpop.f32.mrf.mxu1  ;;  %2028 = vmatprep.mubr.bf16.mxu0 %v17080_v5  ;;  %v12441_v36 = vadd.f32 %v1217_v49, %v1025_v20  ;;  %v1027_v55 = vadd.f32 %v1026_v21, %v12426_v0 }
 0x204   :  { %v1028_v57 = vpop.f32.mrf.mxu0 }
 0x205   :  { %v12444_v58 = vpop.f32.mrf.mxu1  ;;  %v12446_v7 = vadd.f32 %v1219_v56, %v1027_v55  ;;  %v1029_v8 = vadd.f32 %v1028_v57, %v12418_v53  ;;  %10293 = vmatpush3.bf16.msra.mxu0 %v12422_v62 }
 0x206   :  { %v12450_v9 = vpop.f32.mrf.mxu0  ;;  %10294 = vmatprep.subr.bf16.mxu0 %v12439_v35 }
 0x207   :  { %v12452_v47 = vpop.f32.mrf.mxu1  ;;  %v12457_v33 = vadd.f32 %v1221_v63, %v1029_v8  ;;  %v12502_v63 = vld [vmem:[#allocation12 + $0x20] ss:$12 sps:$4 sm:$0xff]  }
 0x208   :  { %17351 = vst [vmem:[#allocation50_spill] sm:$0xff] %v12452_v47  ;;  %v1034_v15 = vpop.f32.mrf.mxu0  ;;  %2029 = vmatmul.mubr.bf16.gmra.mxu0 %v17080_v5 }
 0x209   :  { %v12459_v17 = vpop.f32.mrf.mxu1  ;;  %1513 = vmatmul.mubr.bf16.gmra.mxu1 %v12323_v24  ;;  %v1035_v41 = vadd.f32 %v1034_v15, %v12418_v53  ;;  %10295 = vmatpush3.bf16.msra.mxu0 %v12439_v35 }
 0x20a   :  { %1520 = vmatprep.mubr.bf16.mxu1 %v12325_v29  ;;  %v1036_v42 = vpop.f32.mrf.mxu0  ;;  %10296 = vmatprep.subr.bf16.mxu0 %v12455_v28 }
 0x20b   :  { %v12466_v43 = vpop.f32.mrf.mxu1  ;;  %10306 = vmatprep.mubr.bf16.mxu0 %v17080_v5  ;;  %v12473_v51 = vadd.f32 %v12371_v31, %v1035_v41  ;;  %v1037_v24 = vadd.f32 %v1036_v42, %v12426_v0 }
 0x20c   :  { %v1038_v60 = vpop.f32.mrf.mxu0 }
 0x20d   :  { %v12476_v30 = vpop.f32.mrf.mxu1  ;;  %v12479_v32 = vadd.f32 %v12377_v48, %v1037_v24  ;;  %v1039_v29 = vadd.f32 %v1038_v60, %v12418_v53  ;;  %10297 = vmatpush3.bf16.msra.mxu0 %v12455_v28 }
 0x20e   :  { %v12483_v61 = vpop.f32.mrf.mxu0  ;;  %10298 = vmatprep.subr.bf16.mxu0 %v12469_v44 }
 0x20f   :  { %v12485_v6 = vpop.f32.mrf.mxu1  ;;  %v12491_v22 = vadd.f32 %v12379_v1, %v1039_v29 }
 0x210   :  { %17352 = vst [vmem:[#allocation51_spill] sm:$0xff] %v12485_v6  ;;  %v1044_v46 = vpop.f32.mrf.mxu0 }
 0x211   :  { %v12493_v50 = vpop.f32.mrf.mxu1  ;;  %1521 = vmatmul.mubr.bf16.gmra.mxu1 %v12331_v45  ;;  %v1045_v23 = vadd.f32 %v1044_v46, %v12418_v53  ;;  %10299 = vmatpush3.bf16.msra.mxu0 %v12469_v44 }
 0x212   :  { %1528 = vmatprep.mubr.bf16.mxu1 %v12333_v59  ;;  %v1046_v49 = vpop.f32.mrf.mxu0  ;;  %10300 = vmatprep.subr.bf16.mxu0 %v12488_v12 }
 0x213   :  { %v12499_v56 = vpop.f32.mrf.mxu1  ;;  %v12505_v31 = vadd.f32 %v12383_v3, %v1045_v23  ;;  %v1047_v48 = vadd.f32 %v1046_v49, %v12426_v0  ;;  %v12520_v3 = vld [vmem:[#allocation12 + $0x8] ss:$12 sps:$4 sm:$0xff]  }
 0x214   :  { %v1048_v1 = vpop.f32.mrf.mxu0 }
 0x215   :  { %v12508_v45 = vpop.f32.mrf.mxu1  ;;  %v12511_v4 = vadd.f32 %v12389_v13, %v1047_v48  ;;  %v1049_v59 = vadd.f32 %v1048_v1, %v12418_v53  ;;  %10301 = vmatpush3.bf16.msra.mxu0 %v12488_v12 }
 0x216   :  { %v12515_v20 = vpop.f32.mrf.mxu0  ;;  %10302 = vmatprep.subr.bf16.mxu0 %v12502_v63 }
 0x217   :  { %v12517_v21 = vpop.f32.mrf.mxu1  ;;  %v12523_v55 = vadd.f32 %v12391_v14, %v1049_v59 }
 0x218   :  { %17353 = vst [vmem:[#allocation52_spill] sm:$0xff] %v12517_v21  ;;  %v1054_v57 = vpop.f32.mrf.mxu0 }
 0x219   :  { %v12525_v8 = vpop.f32.mrf.mxu1  ;;  %1529 = vmatmul.mubr.bf16.gmra.mxu1 %v12339_v11  ;;  %v1055_v13 = vadd.f32 %v1054_v57, %v12418_v53  ;;  %10303 = vmatpush3.bf16.msra.mxu0 %v12502_v63 }
 0x21a   :  { %2221 = vmatprep.mubr.bf16.mxu1 %v17080_v5  ;;  %v1056_v15 = vpop.f32.mrf.mxu0  ;;  %10304 = vmatprep.subr.bf16.mxu0 %v12520_v3 }
 0x21b   :  { %v12531_v41 = vpop.f32.mrf.mxu1  ;;  %v12535_v42 = vadd.f32 %v12398_v26, %v1055_v13  ;;  %v1057_v14 = vadd.f32 %v1056_v15, %v12426_v0 }
 0x21c   :  { %v1058_v24 = vpop.f32.mrf.mxu0 }
 0x21d   :  { %v12538_v60 = vpop.f32.mrf.mxu1  ;;  %v12541_v11 = vadd.f32 %v12407_v37, %v1057_v14  ;;  %v1059_v29 = vadd.f32 %v1058_v24, %v12418_v53  ;;  %10305 = vmatpush3.bf16.msra.mxu0 %v12520_v3 }
 0x21e   :  { %v12545_v46 = vpop.f32.mrf.mxu0  ;;  %10310 = vmatprep.subr.bf16.mxu0 %v12362_v39 }
 0x21f   :  { %v12547_v23 = vpop.f32.mrf.mxu1  ;;  %v12551_v26 = vadd.f32 %v12414_v52, %v1059_v29 }
 0x220   :  { %17354 = vst [vmem:[#allocation53_spill] sm:$0xff] %v12547_v23  ;;  %10307 = vmatmul.mubr.bf16.vlgmr.msra.gmra.mxu0 %v17080_v5  ;;  %v1064_v49 = vpop.f32.mrf.mxu0 }
 0x221   :  { %v12554_v48 = vpop.f32.mrf.mxu1  ;;  %v1065_v37 = vadd.f32 %v1064_v49, %v12418_v53  ;;  %10311 = vmatpush3.bf16.msra.mxu0 %v12362_v39 }
 0x222   :  { %v1066_v1 = vpop.f32.mrf.mxu0  ;;  %10312 = vmatprep.subr.bf16.mxu0 %v12422_v62 }
 0x223   :  { %v12558_v59 = vpop.f32.mrf.mxu1  ;;  %v12562_v57 = vadd.f32 %v12428_v19, %v1065_v37  ;;  %v1067_v52 = vadd.f32 %v1066_v1, %v12426_v0 }
 0x224   :  { %v1068_v13 = vpop.f32.mrf.mxu0 }
 0x225   :  { %17355 = vst [vmem:[#allocation54_spill] sm:$0xff] %v12562_v57  ;;  %v12565_v15 = vpop.f32.mrf.mxu1  ;;  %v12568_v14 = vadd.f32 %v12435_v34, %v1067_v52  ;;  %v1069_v24 = vadd.f32 %v1068_v13, %v12418_v53  ;;  %10313 = vmatpush3.bf16.msra.mxu0 %v12422_v62 }
 0x226   :  { %v12572_v29 = vpop.f32.mrf.mxu0  ;;  %10314 = vmatprep.subr.bf16.mxu0 %v12439_v35 }
 0x227   :  { %17356 = vst [vmem:[#allocation55_spill] sm:$0xff] %v12568_v14  ;;  %17357 = vst [vmem:[#allocation56_spill] sm:$0xff] %v12572_v29  ;;  %v12574_v49 = vpop.f32.mrf.mxu1  ;;  %v12578_v19 = vadd.f32 %v12444_v58, %v1069_v24 }
 0x228   :  { %17358 = vst [vmem:[#allocation57_spill] sm:$0xff] %v12574_v49  ;;  %v1074_v37 = vpop.f32.mrf.mxu0 }
 0x229   :  { %17359 = vst [vmem:[#allocation58_spill] sm:$0xff] %v12578_v19  ;;  %v12580_v1 = vpop.f32.mrf.mxu1  ;;  %v1075_v10 = vadd.f32 %v1074_v37, %v12418_v53  ;;  %10315 = vmatpush3.bf16.msra.mxu0 %v12439_v35 }
 0x22a   :  { %v1076_v34 = vpop.f32.mrf.mxu0  ;;  %10316 = vmatprep.subr.bf16.mxu0 %v12455_v28 }
 0x22b   :  { %v12584_v52 = vpop.f32.mrf.mxu1  ;;  %v12588_v62 = vadd.f32 %v12459_v17, %v1075_v10  ;;  %v1077_v13 = vadd.f32 %v1076_v34, %v12426_v0 }
 0x22c   :  { %v1078_v5 = vpop.f32.mrf.mxu0 }
 0x22d   :  { %17360 = vst [vmem:[#allocation59_spill] sm:$0xff] %v12588_v62  ;;  %v12591_v58 = vpop.f32.mrf.mxu1  ;;  %v12594_v24 = vadd.f32 %v12466_v43, %v1077_v13  ;;  %v1079_v37 = vadd.f32 %v1078_v5, %v12418_v53  ;;  %10317 = vmatpush3.bf16.msra.mxu0 %v12455_v28 }
 0x22e   :  { %v12598_v35 = vpop.f32.mrf.mxu0  ;;  %10318 = vmatprep.subr.bf16.mxu0 %v12469_v44 }
 0x22f   :  { %17361 = vst [vmem:[#allocation60_spill] sm:$0xff] %v12594_v24  ;;  %17362 = vst [vmem:[#allocation61_spill] sm:$0xff] %v12598_v35  ;;  %v12600_v49 = vpop.f32.mrf.mxu1  ;;  %v12604_v10 = vadd.f32 %v12476_v30, %v1079_v37 }
 0x230   :  { %17363 = vst [vmem:[#allocation62_spill] sm:$0xff] %v12600_v49  ;;  %v1084_v17 = vpop.f32.mrf.mxu0 }
 0x231   :  { %17364 = vst [vmem:[#allocation63_spill] sm:$0xff] %v12604_v10  ;;  %v12606_v34 = vpop.f32.mrf.mxu1  ;;  %v1085_v23 = vadd.f32 %v1084_v17, %v12418_v53  ;;  %10319 = vmatpush3.bf16.msra.mxu0 %v12469_v44 }
 0x232   :  { %v1086_v43 = vpop.f32.mrf.mxu0  ;;  %10320 = vmatprep.subr.bf16.mxu0 %v12488_v12 }
 0x233   :  { %v12610_v5 = vpop.f32.mrf.mxu1  ;;  %v12614_v28 = vadd.f32 %v12493_v50, %v1085_v23  ;;  %v1087_v13 = vadd.f32 %v1086_v43, %v12426_v0 }
 0x234   :  { %v1088_v49 = vpop.f32.mrf.mxu0 }
 0x235   :  { %17365 = vst [vmem:[#allocation64_spill] sm:$0xff] %v12614_v28  ;;  %v12617_v30 = vpop.f32.mrf.mxu1  ;;  %v12620_v37 = vadd.f32 %v12499_v56, %v1087_v13  ;;  %v1089_v17 = vadd.f32 %v1088_v49, %v12418_v53  ;;  %10321 = vmatpush3.bf16.msra.mxu0 %v12488_v12 }
 0x236   :  { %v12624_v44 = vpop.f32.mrf.mxu0  ;;  %10322 = vmatprep.subr.bf16.mxu0 %v12502_v63 }
 0x237   :  { %17366 = vst [vmem:[#allocation65_spill] sm:$0xff] %v12620_v37  ;;  %17367 = vst [vmem:[#allocation66_spill] sm:$0xff] %v12624_v44  ;;  %v12626_v21 = vpop.f32.mrf.mxu1  ;;  %v12630_v50 = vadd.f32 %v12508_v45, %v1089_v17 }
 0x238   :  { %17368 = vst [vmem:[#allocation67_spill] sm:$0xff] %v12626_v21  ;;  %v1094_v23 = vpop.f32.mrf.mxu0 }
 0x239   :  { %17369 = vst [vmem:[#allocation68_spill] sm:$0xff] %v12630_v50  ;;  %v12632_v43 = vpop.f32.mrf.mxu1  ;;  %v1095_v28 = vadd.f32 %v1094_v23, %v12418_v53  ;;  %10323 = vmatpush3.bf16.msra.mxu0 %v12502_v63 }
 0x23a   :  { %v1096_v56 = vpop.f32.mrf.mxu0  ;;  %10324 = vmatprep.subr.bf16.mxu0 %v12520_v3 }
 0x23b   :  { %v12636_v49 = vpop.f32.mrf.mxu1  ;;  %v12640_v12 = vadd.f32 %v12525_v8, %v1095_v28  ;;  %v1097_v13 = vadd.f32 %v1096_v56, %v12426_v0 }
 0x23c   :  { %v1098_v21 = vpop.f32.mrf.mxu0 }
 0x23d   :  { %17370 = vst [vmem:[#allocation69_spill] sm:$0xff] %v12640_v12  ;;  %v12643_v45 = vpop.f32.mrf.mxu1  ;;  %v12646_v17 = vadd.f32 %v12531_v41, %v1097_v13  ;;  %v1099_v23 = vadd.f32 %v1098_v21, %v12418_v53  ;;  %10325 = vmatpush3.bf16.msra.mxu0 %v12520_v3 }
 0x23e   :  { %v12650_v63 = vpop.f32.mrf.mxu0  ;;  %10330 = vmatprep.subr.bf16.mxu0 %v12362_v39 }
 0x23f   :  { %17371 = vst [vmem:[#allocation70_spill] sm:$0xff] %v12646_v17  ;;  %17372 = vst [vmem:[#allocation71_spill] sm:$0xff] %v12650_v63  ;;  %v12652_v37 = vpop.f32.mrf.mxu1  ;;  %v12656_v8 = vadd.f32 %v12538_v60, %v1099_v23 }
 0x240   :  { %17373 = vst [vmem:[#allocation72_spill] sm:$0xff] %v12652_v37  ;;  %v1104_v28 = vpop.f32.mrf.mxu0 }
 0x241   :  { %17374 = vst [vmem:[#allocation73_spill] sm:$0xff] %v12656_v8  ;;  %v1337_v56 = vpop.f32.mrf.mxu1  ;;  %v1105_v12 = vadd.f32 %v1104_v28, %v12418_v53 }
 0x242   :  { %v1106_v50 = vpop.f32.mrf.mxu0 }
 0x243   :  { %v1339_v41 = vpop.f32.mrf.mxu1  ;;  %v12660_v13 = vadd.f32 %v12554_v48, %v1105_v12  ;;  %v1107_v21 = vadd.f32 %v1106_v50, %v12426_v0 }
 0x244   :  { %v1108_v3 = vpop.f32.mrf.mxu0 }
 0x245   :  { %17375 = vst [vmem:[#allocation74_spill] sm:$0xff] %v12660_v13  ;;  %v1341_v17 = vpop.f32.mrf.mxu1  ;;  %v12664_v37 = vadd.f32 %v12558_v59, %v1107_v21  ;;  %v1109_v39 = vadd.f32 %v1108_v3, %v12418_v53 }
 0x246   :  { %v12667_v60 = vpop.f32.mrf.mxu0 }
 0x247   :  { %17376 = vst [vmem:[#allocation75_spill] sm:$0xff] %v12664_v37  ;;  %17377 = vst [vmem:[#allocation76_spill] sm:$0xff] %v12667_v60  ;;  %v12669_v23 = vpop.f32.mrf.mxu1  ;;  %v12672_v28 = vadd.f32 %v12565_v15, %v1109_v39 }
 0x248   :  { %17378 = vst [vmem:[#allocation77_spill] sm:$0xff] %v12669_v23  ;;  %v1114_v8 = vpop.f32.mrf.mxu0 }
 0x249   :  { %17379 = vst [vmem:[#allocation78_spill] sm:$0xff] %v12672_v28  ;;  %v1347_v63 = vpop.f32.mrf.mxu1  ;;  %v1115_v48 = vadd.f32 %v1114_v8, %v12418_v53 }
 0x24a   :  { %v1116_v12 = vpop.f32.mrf.mxu0 }
 0x24b   :  { %v1349_v50 = vpop.f32.mrf.mxu1  ;;  %v12676_v13 = vadd.f32 %v12580_v1, %v1115_v48  ;;  %v1117_v59 = vadd.f32 %v1116_v12, %v12426_v0 }
 0x24c   :  { %v1118_v21 = vpop.f32.mrf.mxu0 }
 0x24d   :  { %17380 = vst [vmem:[#allocation79_spill] sm:$0xff] %v12676_v13  ;;  %v1351_v3 = vpop.f32.mrf.mxu1  ;;  %v12680_v37 = vadd.f32 %v12584_v52, %v1117_v59  ;;  %v1119_v23 = vadd.f32 %v1118_v21, %v12418_v53 }
 0x24e   :  { %v12683_v15 = vpop.f32.mrf.mxu0 }
 0x24f   :  { %17381 = vst [vmem:[#allocation80_spill] sm:$0xff] %v12680_v37  ;;  %17382 = vst [vmem:[#allocation81_spill] sm:$0xff] %v12683_v15  ;;  %v12685_v39 = vpop.f32.mrf.mxu1  ;;  %v12688_v8 = vadd.f32 %v12591_v58, %v1119_v23 }
 0x250   :  { %17383 = vst [vmem:[#allocation82_spill] sm:$0xff] %v12685_v39  ;;  %v1124_v28 = vpop.f32.mrf.mxu0 }
 0x251   :  { %17384 = vst [vmem:[#allocation83_spill] sm:$0xff] %v12688_v8  ;;  %v1357_v60 = vpop.f32.mrf.mxu1  ;;  %v1125_v1 = vadd.f32 %v1124_v28, %v12418_v53 }
 0x252   :  { %v1126_v48 = vpop.f32.mrf.mxu0 }
 0x253   :  { %v1359_v12 = vpop.f32.mrf.mxu1  ;;  %v12692_v13 = vadd.f32 %v12606_v34, %v1125_v1  ;;  %v1127_v52 = vadd.f32 %v1126_v48, %v12426_v0 }
 0x254   :  { %v1128_v59 = vpop.f32.mrf.mxu0 }
 0x255   :  { %17385 = vst [vmem:[#allocation84_spill] sm:$0xff] %v12692_v13  ;;  %v1361_v21 = vpop.f32.mrf.mxu1  ;;  %v12696_v37 = vadd.f32 %v12610_v5, %v1127_v52  ;;  %v1129_v39 = vadd.f32 %v1128_v59, %v12418_v53 }
 0x256   :  { %v12699_v58 = vpop.f32.mrf.mxu0 }
 0x257   :  { %17386 = vst [vmem:[#allocation85_spill] sm:$0xff] %v12696_v37  ;;  %17387 = vst [vmem:[#allocation86_spill] sm:$0xff] %v12699_v58  ;;  %v12701_v23 = vpop.f32.mrf.mxu1  ;;  %v12704_v28 = vadd.f32 %v12617_v30, %v1129_v39 }
 0x258   :  { %17388 = vst [vmem:[#allocation87_spill] sm:$0xff] %v12701_v23  ;;  %v1134_v8 = vpop.f32.mrf.mxu0 }
 0x259   :  { %17389 = vst [vmem:[#allocation88_spill] sm:$0xff] %v12704_v28  ;;  %v1367_v15 = vpop.f32.mrf.mxu1  ;;  %v1135_v34 = vadd.f32 %v1134_v8, %v12418_v53 }
 0x25a   :  { %v1136_v1 = vpop.f32.mrf.mxu0 }
 0x25b   :  { %v12707_v48 = vpop.f32.mrf.mxu1  ;;  %v12710_v13 = vadd.f32 %v12632_v43, %v1135_v34  ;;  %v1137_v5 = vadd.f32 %v1136_v1, %v12426_v0 }
 0x25c   :  { %17390 = vst [vmem:[#allocation89_spill] sm:$0xff] %v12707_v48  ;;  %v1138_v52 = vpop.f32.mrf.mxu0 }
 0x25d   :  { %17391 = vst [vmem:[#allocation90_spill] sm:$0xff] %v12710_v13  ;;  %v1371_v59 = vpop.f32.mrf.mxu1  ;;  %v12714_v37 = vadd.f32 %v12636_v49, %v1137_v5  ;;  %v1139_v30 = vadd.f32 %v1138_v52, %v12418_v53 }
 0x25e   :  { %v12717_v39 = vpop.f32.mrf.mxu0 }
 0x25f   :  { %17392 = vst [vmem:[#allocation91_spill] sm:$0xff] %v12714_v37  ;;  %17393 = vst [vmem:[#allocation92_spill] sm:$0xff] %v12717_v39  ;;  %v12719_v23 = vpop.f32.mrf.mxu1  ;;  %v12722_v8 = vadd.f32 %v12643_v45, %v1139_v30 }
 0x260   :  { %17394 = vst [vmem:[#allocation93_spill] sm:$0xff] %v12719_v23  ;;  %v1144_v48 = vpop.f32.mrf.mxu0 }
 0x261   :  { %17395 = vst [vmem:[#allocation94_spill] sm:$0xff] %v12722_v8  ;;  %v12724_v28 = vpop.f32.mrf.mxu1  ;;  %v1145_v43 = vadd.f32 %v1144_v48, %v12418_v53 }
 0x262   :  { %v1146_v34 = vpop.f32.mrf.mxu0 }
 0x263   :  { %v12727_v1 = vpop.f32.mrf.mxu1  ;;  %v12729_v13 = vadd.f32 %v1337_v56, %v1145_v43  ;;  %v1147_v49 = vadd.f32 %v1146_v34, %v12426_v0 }
 0x264   :  { %v1148_v5 = vpop.f32.mrf.mxu0 }
 0x265   :  { %17396 = vst [vmem:[#allocation95_spill] sm:$0xff] %v12729_v13  ;;  %v12732_v52 = vpop.f32.mrf.mxu1  ;;  %v12734_v37 = vadd.f32 %v1339_v41, %v1147_v49  ;;  %v1149_v45 = vadd.f32 %v1148_v5, %v12418_v53 }
 0x266   :  { %v12737_v30 = vpop.f32.mrf.mxu0 }
 0x267   :  { %17397 = vst [vmem:[#allocation96_spill] sm:$0xff] %v12734_v37  ;;  %17398 = vst [vmem:[#allocation97_spill] sm:$0xff] %v12737_v30  ;;  %v12739_v23 = vpop.f32.mrf.mxu1  ;;  %v12741_v8 = vadd.f32 %v1341_v17, %v1149_v45 }
 0x268   :  { %v1154_v48 = vpop.f32.mrf.mxu0 }
 0x269   :  { %17399 = vst [vmem:[#allocation98_spill] sm:$0xff] %v12741_v8  ;;  %v12743_v39 = vpop.f32.mrf.mxu1  ;;  %v1155_v56 = vadd.f32 %v1154_v48, %v12418_v53 }
 0x26a   :  { %v1156_v43 = vpop.f32.mrf.mxu0 }
 0x26b   :  { %v12746_v34 = vpop.f32.mrf.mxu1  ;;  %v12748_v13 = vadd.f32 %v1347_v63, %v1155_v56  ;;  %v1157_v41 = vadd.f32 %v1156_v43, %v12426_v0 }
 0x26c   :  { %v1158_v49 = vpop.f32.mrf.mxu0 }
 0x26d   :  { %17400 = vst [vmem:[#allocation99_spill] sm:$0xff] %v12748_v13  ;;  %v12751_v5 = vpop.f32.mrf.mxu1  ;;  %v12753_v37 = vadd.f32 %v1349_v50, %v1157_v41  ;;  %v1159_v17 = vadd.f32 %v1158_v49, %v12418_v53 }
 0x26e   :  { %v12756_v45 = vpop.f32.mrf.mxu0 }
 0x26f   :  { %17401 = vst [vmem:[#allocation100_spill] sm:$0xff] %v12753_v37  ;;  %17402 = vst [vmem:[#allocation101_spill] sm:$0xff] %v12756_v45  ;;  %v12758_v8 = vpop.f32.mrf.mxu1  ;;  %v12760_v30 = vadd.f32 %v1351_v3, %v1159_v17 }
 0x270   :  { %v1164_v48 = vpop.f32.mrf.mxu0 }
 0x271   :  { %17403 = vst [vmem:[#allocation102_spill] sm:$0xff] %v12760_v30  ;;  %v10010_v58 = vpop.f32.mrf.mxu1  ;;  %v1165_v63 = vadd.f32 %v1164_v48, %v12418_v53 }
 0x272   :  { %v1166_v56 = vpop.f32.mrf.mxu0 }
 0x273   :  { %v10011_v13 = vpop.f32.mrf.mxu1  ;;  %v12763_v43 = vadd.f32 %v1357_v60, %v1165_v63  ;;  %v1167_v44 = vadd.f32 %v1166_v56, %v12426_v0 }
 0x274   :  { %v10012_v50 = vadd.f32 %v10011_v13, %v10010_v58  ;;  %v1168_v41 = vpop.f32.mrf.mxu0 }
 0x275   :  { %17404 = vst [vmem:[#allocation103_spill] sm:$0xff] %v12763_v43  ;;  %v10013_v37 = vpop.f32.mrf.mxu1  ;;  %v12766_v49 = vadd.f32 %v1359_v12, %v1167_v44  ;;  %v1169_v45 = vadd.f32 %v1168_v41, %v12418_v53 }
 0x276   :  { %v12769_v6 = vpop.f32.mrf.mxu0 }
 0x277   :  { %17405 = vst [vmem:[#allocation104_spill] sm:$0xff] %v12766_v49  ;;  %17406 = vst [vmem:[#allocation105_spill] sm:$0xff] %v12769_v6  ;;  %v10014_v3 = vpop.f32.mrf.mxu1  ;;  %v12771_v17 = vadd.f32 %v1361_v21, %v1169_v45  ;;  %v12784_v21 = vsub.s32 2, %v12394_v18 }
 0x278   :  { %v1174_v30 = vpop.f32.mrf.mxu0  ;;  %v10015_v18 = vadd.f32 %v10014_v3, %v10013_v37 }
 0x279   :  { %17407 = vst [vmem:[#allocation106_spill] sm:$0xff] %v12771_v17  ;;  %v10016_v48 = vpop.f32.mrf.mxu1  ;;  %v1175_v24 = vadd.f32 %v1174_v30, %v12418_v53  ;;  %17412 = vst [vmem:[#allocation111_spill] sm:$0xff] %v12784_v21 }
 0x27a   :  { %v12774_v60 = vpop.f32.mrf.mxu0 }
 0x27b   :  { %17408 = vst [vmem:[#allocation107_spill] sm:$0xff] %v12774_v60  ;;  %v10017_v63 = vpop.f32.mrf.mxu1  ;;  %v12776_v56 = vadd.f32 %v1367_v15, %v1175_v24  ;;  %v12792_v24 = vrot.slane %v12409_v38, %v12784_v21 }
 0x27c   :  { %v10018_v13 = vadd.f32 %v10017_v63, %v10016_v48  ;;  %v1178_v58 = vpop.f32.mrf.mxu0 }
 0x27d   :  { %17409 = vst [vmem:[#allocation108_spill] sm:$0xff] %v12776_v56  ;;  %v10019_v44 = vpop.f32.mrf.mxu1  ;;  %v1179_v12 = vadd.f32 %v1178_v58, %v12418_v53 }
 0x27e   :  { %v12779_v41 = vpop.f32.mrf.mxu0 }
 0x27f   :  { %17410 = vst [vmem:[#allocation109_spill] sm:$0xff] %v12779_v41  ;;  %v10020_v49 = vpop.f32.mrf.mxu1  ;;  %v12781_v6 = vadd.f32 %v1371_v59, %v1179_v12  ;;  %v1435_v59 = vadd.f32 %v10018_v13, %v12792_v24 }
 0x280   :  { %v12786_v30 = vpop.f32.mrf.mxu0  ;;  %v10021_v63 = vadd.f32 %v10020_v49, %v10019_v44  ;;  %v1430_v49 = vadd.f32 %v10015_v18, %v12792_v24 }
 0x281   :  { %17411 = vst [vmem:[#allocation110_spill] sm:$0xff] %v12781_v6  ;;  %v10022_v45 = vpop.f32.mrf.mxu1  ;;  %v1427_v6 = vadd.f32 %v10012_v50, %v12792_v24 }
 0x282   :  { %v12788_v17 = vpop.f32.mrf.mxu0  ;;  %v1438_v38 = vadd.f32 %v10021_v63, %v12792_v24 }
 0x283   :  { %v10023_v60 = vpop.f32.mrf.mxu1 }
 0x284   :  { %v10024_v15 = vadd.f32 %v10023_v60, %v10022_v45  ;;  %v12794_v48 = vpop.f32.mrf.mxu0 }
 0x285   :  { %v10025_v53 = vpop.f32.mrf.mxu1 }
 0x286   :  { %v12797_v12 = vpop.f32.mrf.mxu0  ;;  %v1443_v63 = vadd.f32 %v10024_v15, %v12792_v24 }
 0x287   :  { %v10026_v58 = vpop.f32.mrf.mxu1 }
 0x288   :  { %v10264_v56 = vpop.f32.mrf.mxu0  ;;  %v10027_v47 = vadd.f32 %v10026_v58, %v10025_v53 }
 0x289   :  { %v10028_v41 = vpop.f32.mrf.mxu1  ;;  %v12800_v43 = vadd.f32 %v10264_v56, %v1435_v59 }
 0x28a   :  { %v1587_v60 = vpop.f32.mrf.mxu0 }
 0x28b   :  { %17413 = vst [vmem:[#allocation112_spill] sm:$0xff] %v12800_v43  ;;  %v10029_v10 = vpop.f32.mrf.mxu1  ;;  %v12803_v35 = vadd.f32 %v1587_v60, %v1427_v6 }
 0x28c   :  { %v10030_v45 = vadd.f32 %v10029_v10, %v10028_v41  ;;  %v10265_v44 = vpop.f32.mrf.mxu0 }
 0x28d   :  { %17414 = vst [vmem:[#allocation113_spill] sm:$0xff] %v12803_v35  ;;  %v10031_v13 = vpop.f32.mrf.mxu1  ;;  %v12806_v62 = vadd.f32 %v10265_v44, %v1438_v38 }
 0x28e   :  { %v1451_v37 = vadd.f32 %v10030_v45, %v12792_v24  ;;  %v1590_v3 = vpop.f32.mrf.mxu0  ;;  %v1446_v45 = vadd.f32 %v10027_v47, %v12792_v24 }
 0x28f   :  { %17415 = vst [vmem:[#allocation114_spill] sm:$0xff] %v12806_v62  ;;  %v10032_v50 = vpop.f32.mrf.mxu1  ;;  %v12809_v59 = vadd.f32 %v1590_v3, %v1430_v49 }
 0x290   :  { %v10033_v56 = vadd.f32 %v10032_v50, %v10031_v13  ;;  %v10268_v10 = vpop.f32.mrf.mxu0 }
 0x291   :  { %17416 = vst [vmem:[#allocation115_spill] sm:$0xff] %v12809_v59  ;;  %v10034_v14 = vpop.f32.mrf.mxu1  ;;  %v12812_v6 = vadd.f32 %v10268_v10, %v1451_v37 }
 0x292   :  { %v1454_v18 = vadd.f32 %v10033_v56, %v12792_v24  ;;  %v1603_v60 = vpop.f32.mrf.mxu0 }
 0x293   :  { %17417 = vst [vmem:[#allocation116_spill] sm:$0xff] %v12812_v6  ;;  %v10035_v41 = vpop.f32.mrf.mxu1  ;;  %v12815_v44 = vadd.f32 %v1603_v60, %v1443_v63 }
 0x294   :  { %v10036_v38 = vadd.f32 %v10035_v41, %v10034_v14  ;;  %v10269_v53 = vpop.f32.mrf.mxu0 }
 0x295   :  { %17418 = vst [vmem:[#allocation117_spill] sm:$0xff] %v12815_v44  ;;  %v10037_v19 = vpop.f32.mrf.mxu1  ;;  %v12818_v58 = vadd.f32 %v10269_v53, %v1454_v18 }
 0x296   :  { %v1606_v13 = vpop.f32.mrf.mxu0  ;;  %v1459_v37 = vadd.f32 %v10036_v38, %v12792_v24 }
 0x297   :  { %17419 = vst [vmem:[#allocation118_spill] sm:$0xff] %v12818_v58  ;;  %v10038_v49 = vpop.f32.mrf.mxu1  ;;  %v12820_v50 = vadd.f32 %v1606_v13, %v1446_v45 }
 0x298   :  { %v10039_v15 = vadd.f32 %v10038_v49, %v10037_v19  ;;  %v10272_v56 = vpop.f32.mrf.mxu0 }
 0x299   :  { %17420 = vst [vmem:[#allocation119_spill] sm:$0xff] %v12820_v50  ;;  %v10040_v3 = vpop.f32.mrf.mxu1 }
 0x29a   :  { %v1619_v6 = vpop.f32.mrf.mxu0  ;;  %v1462_v47 = vadd.f32 %v10039_v15, %v12792_v24 }
 0x29b   :  { %v10041_v10 = vpop.f32.mrf.mxu1  ;;  %v12823_v63 = vadd.f32 %v1619_v6, %v1459_v37 }
 0x29c   :  { %v10042_v14 = vadd.f32 %v10041_v10, %v10040_v3  ;;  %v10273_v60 = vpop.f32.mrf.mxu0 }
 0x29d   :  { %17421 = vst [vmem:[#allocation120_spill] sm:$0xff] %v12823_v63  ;;  %v10043_v41 = vpop.f32.mrf.mxu1 }
 0x29e   :  { %v1467_v18 = vadd.f32 %v10042_v14, %v12792_v24  ;;  %v1622_v58 = vpop.f32.mrf.mxu0 }
 0x29f   :  { %v10044_v53 = vpop.f32.mrf.mxu1  ;;  %v12829_v49 = vadd.f32 %v1622_v58, %v1462_v47 }
 0x2a0   :  { %v12827_v19 = vadd.f32 %v10272_v56, %v1467_v18  ;;  %v10045_v45 = vadd.f32 %v10044_v53, %v10043_v41  ;;  %v10276_v13 = vpop.f32.mrf.mxu0 }
 0x2a1   :  { %17423 = vst [vmem:[#allocation122_spill] sm:$0xff] %v12829_v49  ;;  %v10046_v38 = vpop.f32.mrf.mxu1 }
 0x2a2   :  { %17422 = vst [vmem:[#allocation121_spill] sm:$0xff] %v12827_v19  ;;  %v1470_v50 = vadd.f32 %v10045_v45, %v12792_v24  ;;  %v1635_v6 = vpop.f32.mrf.mxu0 }
 0x2a3   :  { %v10047_v3 = vpop.f32.mrf.mxu1 }
 0x2a4   :  { %v12832_v37 = vadd.f32 %v10273_v60, %v1470_v50  ;;  %v10048_v15 = vadd.f32 %v10047_v3, %v10046_v38  ;;  %v10277_v63 = vpop.f32.mrf.mxu0 }
 0x2a5   :  { %v10049_v10 = vpop.f32.mrf.mxu1 }
 0x2a6   :  { %17424 = vst [vmem:[#allocation123_spill] sm:$0xff] %v12832_v37  ;;  %v1475_v14 = vadd.f32 %v10048_v15, %v12792_v24  ;;  %v1638_v29 = vpop.f32.mrf.mxu0 }
 0x2a7   :  { %v10050_v44 = vpop.f32.mrf.mxu1 }
 0x2a8   :  { %v12835_v56 = vadd.f32 %v1635_v6, %v1475_v14  ;;  %v10051_v41 = vadd.f32 %v10050_v44, %v10049_v10  ;;  %v10280_v47 = vpop.f32.mrf.mxu0 }
 0x2a9   :  { %v10052_v58 = vpop.f32.mrf.mxu1 }
 0x2aa   :  { %17425 = vst [vmem:[#allocation124_spill] sm:$0xff] %v12835_v56  ;;  %v1478_v18 = vadd.f32 %v10051_v41, %v12792_v24  ;;  %v1651_v45 = vpop.f32.mrf.mxu0 }
 0x2ab   :  { %v10053_v53 = vpop.f32.mrf.mxu1 }
 0x2ac   :  { %v12838_v19 = vadd.f32 %v1638_v29, %v1478_v18  ;;  %v10054_v50 = vadd.f32 %v10053_v53, %v10052_v58  ;;  %v10281_v38 = vpop.f32.mrf.mxu0 }
 0x2ad   :  { %v10055_v60 = vpop.f32.mrf.mxu1 }
 0x2ae   :  { %17426 = vst [vmem:[#allocation125_spill] sm:$0xff] %v12838_v19  ;;  %v1483_v3 = vadd.f32 %v10054_v50, %v12792_v24  ;;  %v1654_v15 = vpop.f32.mrf.mxu0 }
 0x2af   :  { %v10056_v37 = vpop.f32.mrf.mxu1 }
 0x2b0   :  { %v12841_v49 = vadd.f32 %v10276_v13, %v1483_v3  ;;  %v10057_v6 = vadd.f32 %v10056_v37, %v10055_v60  ;;  %v12843_v44 = vpop.f32.mrf.mxu0 }
 0x2b1   :  { %v10058_v14 = vpop.f32.mrf.mxu1 }
 0x2b2   :  { %17427 = vst [vmem:[#allocation126_spill] sm:$0xff] %v12841_v49  ;;  %v1486_v10 = vadd.f32 %v10057_v6, %v12792_v24  ;;  %v1667_v56 = vpop.f32.mrf.mxu0 }
 0x2b3   :  { %v10059_v41 = vpop.f32.mrf.mxu1 }
 0x2b4   :  { %v12846_v57 = vadd.f32 %v10277_v63, %v1486_v10  ;;  %v10060_v29 = vadd.f32 %v10059_v41, %v10058_v14  ;;  %v12848_v18 = vpop.f32.mrf.mxu0  ;;  %v12858_v63 = vld [vmem:[#allocation13] sm:$0x7] }
 0x2b5   :  { %v10061_v58 = vpop.f32.mrf.mxu1 }
 0x2b6   :  { %17428 = vst [vmem:[#allocation127_spill] sm:$0xff] %v12846_v57  ;;  %v1491_v53 = vadd.f32 %v10060_v29, %v12792_v24  ;;  %v1670_v19 = vpop.f32.mrf.mxu0 }
 0x2b7   :  { %v10062_v50 = vpop.f32.mrf.mxu1 }
 0x2b8   :  { %v12851_v13 = vadd.f32 %v1651_v45, %v1491_v53  ;;  %v10063_v37 = vadd.f32 %v10062_v50, %v10061_v58  ;;  %v12853_v3 = vpop.f32.mrf.mxu0  ;;  %v12867_v58 = vrot.slane %v12858_v63, %v12405_v27 }
 0x2b9   :  { %v10064_v60 = vpop.f32.mrf.mxu1 }
 0x2ba   :  { %17429 = vst [vmem:[#allocation128_spill] sm:$0xff] %v12851_v13  ;;  %v1494_v6 = vadd.f32 %v10063_v37, %v12792_v24  ;;  %v12856_v62 = vpop.f32.mrf.mxu0 }
 0x2bb   :  { %v10065_v49 = vpop.f32.mrf.mxu1 }
 0x2bc   :  { %v12860_v14 = vadd.f32 %v1654_v15, %v1494_v6  ;;  %v10066_v10 = vadd.f32 %v10065_v49, %v10064_v60  ;;  %v12862_v29 = vpop.f32.mrf.mxu0  ;;  %v12877_v60 = vrot.slane %v12858_v63, %v12412_v40  ;;  %v1031_v40 = vadd.f32 %v12450_v9, %v12426_v0 }
 0x2bd   :  { %v10067_v41 = vpop.f32.mrf.mxu1 }
 0x2be   :  { %17430 = vst [vmem:[#allocation129_spill] sm:$0xff] %v12860_v14  ;;  %v1499_v45 = vadd.f32 %v10066_v10, %v12792_v24  ;;  %v12869_v50 = vpop.f32.mrf.mxu0 }
 0x2bf   :  { %v10068_v53 = vpop.f32.mrf.mxu1 }
 0x2c0   :  { %v12871_v37 = vadd.f32 %v10280_v47, %v1499_v45  ;;  %v10069_v13 = vadd.f32 %v10068_v53, %v10067_v41  ;;  %v2020_v43 = vpop.f32.mrf.mxu0 }
 0x2c1   :  { %v10070_v57 = vpop.f32.mrf.mxu1  ;;  %v2021_v49 = vadd.f32 %v2020_v43, %v12867_v58 }
 0x2c2   :  { %17431 = vst [vmem:[#allocation130_spill] sm:$0xff] %v12871_v37  ;;  %v1502_v15 = vadd.f32 %v10069_v13, %v12792_v24  ;;  %v2022_v10 = vpop.f32.mrf.mxu0 }
 0x2c3   :  { %v10071_v6 = vpop.f32.mrf.mxu1  ;;  %v2088_v14 = vadd.f32 %v2021_v49, %v12441_v36  ;;  %v2023_v13 = vadd.f32 %v2022_v10, %v12877_v60 }
 0x2c4   :  { %v12879_v27 = vadd.f32 %v10281_v38, %v1502_v15  ;;  %v10072_v59 = vadd.f32 %v10071_v6, %v10070_v57  ;;  %v2024_v45 = vpop.f32.mrf.mxu0 }
 0x2c5   :  { %v10073_v47 = vpop.f32.mrf.mxu1  ;;  %v9849_v41 = vmul.f32 -1.442695, %v2088_v14  ;;  %v2025_v43 = vadd.f32 %v2024_v45, %v12867_v58  ;;  %v1224_v45 = vadd.f32 %v12369_v16, %v1031_v40  ;;  %v1041_v40 = vadd.f32 %v12483_v61, %v12426_v0 }
 0x2c6   :  { %17432 = vst [vmem:[#allocation131_spill] sm:$0xff] %v12879_v27  ;;  %v1507_v53 = vadd.f32 %v10072_v59, %v12792_v24  ;;  %v2026_v35 = vpop.f32.mrf.mxu0  ;;  %v2116_v59 = vadd.f32 %v2023_v13, %v12446_v7 }
 0x2c7   :  { %v10074_v37 = vpop.f32.mrf.mxu1  ;;  %10789 = vpow2.f32 %v9849_v41  ;;  %v2089_v36 = vadd.f32 %v2025_v43, %v12457_v33  ;;  %v2027_v15 = vadd.f32 %v2026_v35, %v12877_v60 }
 0x2c8   :  { %v12887_v38 = vadd.f32 %v1667_v56, %v1507_v53  ;;  %v10075_v57 = vadd.f32 %v10074_v37, %v10073_v47  ;;  %v2030_v49 = vpop.f32.mrf.mxu0  ;;  %v9853_v13 = vmul.f32 -1.442695, %v2116_v59 }
 0x2c9   :  { %v10076_v14 = vpop.f32.mrf.mxu1  ;;  %v9850_v6 = vmul.f32 -1.442695, %v2089_v36  ;;  %v2031_v10 = vadd.f32 %v2030_v49, %v12867_v58  ;;  %v2117_v35 = vadd.f32 %v2027_v15, %v1224_v45  ;;  %v1234_v45 = vadd.f32 %v12381_v2, %v1041_v40 }
 0x2ca   :  { %v1510_v9 = vadd.f32 %v10075_v57, %v12792_v24  ;;  %v2032_v41 = vpop.f32.mrf.mxu0 }
 0x2cb   :  { %v10077_v27 = vpop.f32.mrf.mxu1  ;;  %10791 = vpow2.f32 %v9850_v6  ;;  %v2090_v56 = vadd.f32 %v2031_v10, %v12473_v51  ;;  %v2033_v47 = vadd.f32 %v2032_v41, %v12877_v60 }
 0x2cc   :  { %v10078_v33 = vadd.f32 %v10077_v27, %v10076_v14  ;;  %v12896_v37 = vadd.f32 %v1670_v19, %v1510_v9  ;;  %v2034_v7 = vpop.f32.mrf.mxu0  ;;  %v9854_v19 = vmul.f32 -1.442695, %v2117_v35 }
 0x2cd   :  { %v10079_v53 = vpop.f32.mrf.mxu1  ;;  %v9851_v43 = vmul.f32 -1.442695, %v2090_v56  ;;  %v2035_v16 = vadd.f32 %v2034_v7, %v12867_v58  ;;  %v2118_v15 = vadd.f32 %v2033_v47, %v12479_v32 }
 0x2ce   :  { %v1515_v36 = vadd.f32 %v10078_v33, %v12792_v24  ;;  %v2036_v49 = vpop.f32.mrf.mxu0 }
 0x2cf   :  { %v10080_v57 = vpop.f32.mrf.mxu1  ;;  %10793 = vpow2.f32 %v9851_v43  ;;  %v2091_v51 = vadd.f32 %v2035_v16, %v12491_v22  ;;  %v2037_v59 = vadd.f32 %v2036_v49, %v12877_v60  ;;  %v9855_v56 = vmul.f32 -1.442695, %v2118_v15 }
 0x2d0   :  { %v12904_v27 = vadd.f32 %v12843_v44, %v1515_v36  ;;  %v10081_v14 = vadd.f32 %v10080_v57, %v10079_v53  ;;  %10795 = vpow2.f32 %v9853_v13 }
 0x2d1   :  { %v10082_v6 = vpop.f32.mrf.mxu1  ;;  %v9852_v10 = vmul.f32 -1.442695, %v2091_v51  ;;  %v2119_v32 = vadd.f32 %v2037_v59, %v1234_v45 }
 0x2d2   :  { %v1518_v61 = vadd.f32 %v10081_v14, %v12792_v24 }
 0x2d3   :  { %v10083_v9 = vpop.f32.mrf.mxu1  ;;  %10797 = vpow2.f32 %v9852_v10  ;;  %v9856_v43 = vmul.f32 -1.442695, %v2119_v32 }
 0x2d4   :  { %v10084_v41 = vadd.f32 %v10083_v9, %v10082_v6  ;;  %v10790_v44 = vpop.eup %10789  ;;  %10799 = vpow2.f32 %v9854_v19  ;;  %v12912_v22 = vadd.f32 %v12848_v18, %v1518_v61  ;;  %v10000_v19 = vadd.f32 %v12727_v1, %v12724_v28 }
 0x2d5   :  { %v10085_v33 = vpop.f32.mrf.mxu1  ;;  %v2104_v35 = vadd.f32 1.0, %v10790_v44 }
 0x2d6   :  { %v1523_v47 = vadd.f32 %v10084_v41, %v12792_v24  ;;  %v1411_v9 = vadd.f32 %v10000_v19, %v12792_v24  ;;  %v10003_v41 = vadd.f32 %v12739_v23, %v12732_v52 }
 0x2d7   :  { %v10086_v53 = vpop.f32.mrf.mxu1  ;;  %10801 = vrcp.f32 %v2104_v35 }
 0x2d8   :  { %v12916_v2 = vadd.f32 %v12856_v62, %v1523_v47  ;;  %v10087_v7 = vadd.f32 %v10086_v53, %v10085_v33  ;;  %v10792_v13 = vpop.eup %10791  ;;  %10803 = vpow2.f32 %v9855_v56  ;;  %v10006_v47 = vadd.f32 %v12746_v34, %v12743_v39 }
 0x2d9   :  { %v10088_v36 = vpop.f32.mrf.mxu1  ;;  %v2105_v16 = vadd.f32 1.0, %v10792_v13  ;;  %v1572_v23 = vadd.f32 %v12788_v17, %v1411_v9  ;;  %v1414_v52 = vadd.f32 %v10003_v41, %v12792_v24  ;;  %v10009_v39 = vadd.f32 %v12758_v8, %v12751_v5 }
 0x2da   :  { %v1526_v40 = vadd.f32 %v10087_v7, %v12792_v24 }
 0x2db   :  { %v10089_v18 = vpop.f32.mrf.mxu1  ;;  %10805 = vrcp.f32 %v2105_v16  ;;  %v1575_v34 = vadd.f32 %v12797_v12, %v1414_v52 }
 0x2dc   :  { %v12920_v57 = vadd.f32 %v12869_v50, %v1526_v40  ;;  %v10090_v49 = vadd.f32 %v10089_v18, %v10088_v36  ;;  %v10794_v51 = vpop.eup %10793  ;;  %10807 = vpow2.f32 %v9856_v43  ;;  %v12930_v50 = vrot.slane %v12858_v63, %v12784_v21 }
 0x2dd   :  { %v10091_v62 = vpop.f32.mrf.mxu1  ;;  %v2106_v15 = vadd.f32 1.0, %v10794_v51  ;;  %v10796_v59 = vpop.eup %10795  ;;  %v1419_v18 = vadd.f32 %v10006_v47, %v12792_v24 }
 0x2de   :  { %v1531_v14 = vadd.f32 %v10090_v49, %v12792_v24  ;;  %v2132_v44 = vadd.f32 1.0, %v10796_v59 }
 0x2df   :  { %v10092_v6 = vpop.f32.mrf.mxu1  ;;  %10809 = vrcp.f32 %v2106_v15  ;;  %v1580_v59 = vadd.f32 %v12786_v30, %v1419_v18  ;;  %v17435_v18 = vmov 0  }
 0x2e0   :  { %v12926_v10 = vadd.f32 %v12853_v3, %v1531_v14  ;;  %v10093_v45 = vadd.f32 %v10092_v6, %v10091_v62  ;;  %v10798_v61 = vpop.eup %10797  ;;  %v10308_v28 = vpop.f32.mrf.mxu0  ;;  %v1422_v6 = vadd.f32 %v10009_v39, %v12792_v24 }
 0x2e1   :  { %v10800_v1 = vpop.eup %10799  ;;  %v2107_v56 = vadd.f32 1.0, %v10798_v61  ;;  %v2082_v19 = vadd.f32 %v10308_v28, %v12930_v50 }
 0x2e2   :  { %17433 = vst [vmem:[#allocation132_spill] sm:$0xff] %v12926_v10  ;;  %v1534_v32 = vadd.f32 %v10093_v45, %v12792_v24  ;;  %v2073_v33 = vpop.f32.mrf.mxu0  ;;  %v2133_v53 = vadd.f32 1.0, %v10800_v1  ;;  %v1583_v5 = vadd.f32 %v12794_v48, %v1422_v6  ;;  %v12985_v6 = vld [vmem:[#allocation12 + $0x64] ss:$12 sps:$4 sm:$0xff]  }
 0x2e3   :  { %10811 = vrcp.f32 %v2107_v56  ;;  %v2074_v63 = vadd.f32 %v2073_v33, %v12930_v50 }
 0x2e4   :  { %v12937_v3 = vadd.f32 %v12862_v29, %v1534_v32  ;;  %v10802_v35 = vpop.eup %10801  ;;  %v10309_v7 = vpop.f32.mrf.mxu0  ;;  %10813 = vrcp.f32 %v2132_v44 }
 0x2e5   :  { %v10804_v13 = vpop.eup %10803  ;;  %v2144_v43 = vmul.f32 %v10802_v35, %v2074_v63  ;;  %10815 = vrcp.f32 %v2133_v53  ;;  %v2085_v9 = vadd.f32 %v10309_v7, %v12930_v50 }
 0x2e6   :  { %17434 = vst [vmem:[#allocation133_spill] sm:$0xff] %v12937_v3  ;;  %v2076_v36 = vpop.f32.mrf.mxu0  ;;  %v2134_v49 = vadd.f32 1.0, %v10804_v13 }
 0x2e7   :  { %v2148_v16 = vadd.f32 %v2144_v43, %v1572_v23  ;;  %v2077_v29 = vadd.f32 %v2076_v36, %v12930_v50 }
 0x2e8   :  { %v10806_v40 = vpop.eup %10805 }
 0x2e9   :  { %v10808_v51 = vpop.eup %10807  ;;  %10817 = vtanh.f32 %v2148_v16  ;;  %v2145_v17 = vmul.f32 %v10806_v40, %v2077_v29 }
 0x2ea   :  { %10819 = vrcp.f32 %v2134_v49  ;;  %v2135_v14 = vadd.f32 1.0, %v10808_v51  ;;  %v12963_v49 = vld [vmem:[#allocation12 + $0xa8] ss:$12 sps:$4 sm:$0xff]  }
 0x2eb   :  { %v2149_v62 = vadd.f32 %v2145_v17, %v1575_v34  ;;  %v12966_v34 = vld [vmem:[#allocation12 + $0x94] ss:$12 sps:$4 sm:$0xff]  }
 0x2ec   :  { %v10810_v15 = vpop.eup %10809 }
 0x2ed   :  { %v2146_v45 = vmul.f32 %v10810_v15, %v2082_v19  ;;  %10821 = vtanh.f32 %v2149_v62  ;;  %v12971_v19 = vld [vmem:[#allocation12 + $0x90] ss:$12 sps:$4 sm:$0xff]  }
 0x2ee   :  { %10823 = vrcp.f32 %v2135_v14  ;;  %v12976_v15 = vld [vmem:[#allocation12 + $0x7c] ss:$12 sps:$4 sm:$0xff]   ;;  %v12979_v14 = vld [vmem:[#allocation12 + $0x78] ss:$12 sps:$4 sm:$0xff]  }
 0x2ef   :  { %v2150_v61 = vadd.f32 %v2146_v45, %v1580_v59  ;;  %v12982_v59 = vld [vmem:[#allocation12 + $0xb0] ss:$12 sps:$4 sm:$0xff]   ;;  %v12988_v45 = vld [vmem:[#allocation12 + $0x98] ss:$12 sps:$4 sm:$0xff]  }
 0x2f0   :  { %v10812_v8 = vpop.eup %10811 }
 0x2f1   :  { %10825 = vtanh.f32 %v2150_v61  ;;  %v2147_v12 = vmul.f32 %v10812_v8, %v2085_v9  ;;  %v10814_v28 = vpop.eup %10813  ;;  %v12992_v61 = vld [vmem:[#allocation12 + $0x60] ss:$12 sps:$4 sm:$0xff]  }
 0x2f2   :  { %v10816_v41 = vpop.eup %10815  ;;  %v2156_v44 = vsub.f32 1.0, %v10814_v28  ;;  %v2164_v32 = vmul.f32 0.0, %v10814_v28  ;;  %v12996_v9 = vld [vmem:[#allocation12 + $0x4c] ss:$12 sps:$4 sm:$0xff]   ;;  %v13009_v28 = vld [vmem:[#allocation12 + $0x68] ss:$12 sps:$4 sm:$0xff]  }
 0x2f3   :  { %v2151_v1 = vadd.f32 %v2147_v12, %v1583_v5  ;;  %v2157_v33 = vsub.f32 1.0, %v10816_v41  ;;  %v2165_v53 = vmul.f32 0.0, %v10816_v41  ;;  %v12999_v8 = vld [vmem:[#allocation12 + $0x80] ss:$12 sps:$4 sm:$0xff]   ;;  %v13002_v5 = vld [vmem:[#allocation12 + $0x48] ss:$12 sps:$4 sm:$0xff]  }
 0x2f4   :  { %v13006_v12 = vld [vmem:[#allocation12 + $0x34] ss:$12 sps:$4 sm:$0xff]   ;;  %v13016_v41 = vld [vmem:[#allocation12 + $0x1c] ss:$12 sps:$4 sm:$0xff]  }
 0x2f5   :  { %10827 = vtanh.f32 %v2151_v1  ;;  %v13012_v1 = vld [vmem:[#allocation12 + $0x30] ss:$12 sps:$4 sm:$0xff]  }
 0x2f6   :  { %v10818_v56 = vpop.eup %10817 }
 0x2f7   :  { %v2160_v30 = vmul.f32 %v10818_v56, %v2156_v44  ;;  %v10820_v24 = vpop.eup %10819  ;;  %v13019_v44 = vld [vmem:[#allocation12 + $0x50] ss:$12 sps:$4 sm:$0xff]   ;;  %v13022_v56 = vld [vmem:[#allocation12 + $0x18] ss:$12 sps:$4 sm:$0xff]  }
 0x2f8   :  { %v2158_v48 = vsub.f32 1.0, %v10820_v24  ;;  %v2166_v36 = vmul.f32 0.0, %v10820_v24  ;;  %v13032_v24 = vld [vmem:[#allocation12] ss:$12 sps:$4 sm:$0xff]  }
 0x2f9   :  { %v12954_v63 = vadd.f32 %v2164_v32, %v2160_v30  ;;  %v13026_v30 = vld [vmem:[#allocation12 + $0x4] ss:$12 sps:$4 sm:$0xff]  }
 0x2fa   :  { %v10822_v35 = vpop.eup %10821  ;;  %v13029_v32 = vld [vmem:[#allocation12 + $0x38] ss:$12 sps:$4 sm:$0xff]  }
 0x2fb   :  { %v2161_v47 = vmul.f32 %v10822_v35, %v2157_v33  ;;  %v10824_v7 = vpop.eup %10823  ;;  %v13036_v33 = vld [vmem:[#allocation12 + $0x20] ss:$12 sps:$4 sm:$0xff]  }
 0x2fc   :  { %v2159_v16 = vsub.f32 1.0, %v10824_v7  ;;  %v2167_v39 = vmul.f32 0.0, %v10824_v7  ;;  %v13039_v35 = vld [vmem:[#allocation12 + $0xac] ss:$12 sps:$4 sm:$0xff]  }
 0x2fd   :  { %v12956_v13 = vadd.f32 %v2165_v53, %v2161_v47  ;;  %v13043_v47 = vld [vmem:[#allocation12 + $0x8] ss:$12 sps:$4 sm:$0xff]  }
 0x2fe   :  { %v10826_v23 = vpop.eup %10825 }
 0x2ff   :  { %v2187_v52 = vpack.c.bf16 %v12956_v13, %v12954_v63  ;;  %v2162_v43 = vmul.f32 %v10826_v23, %v2158_v48 }
 0x301   :  { %2222 = vmatmul.mubr.bf16.vlgmr.msra.gmra.mxu1 %v2187_v52  ;;  %10326 = vmatprep.mubr.bf16.mxu0 %v2187_v52  ;;  %v12960_v29 = vadd.f32 %v2166_v36, %v2162_v43 }
 0x302   :  { %v10828_v40 = vpop.eup %10827  ;;  %2231 = vmatprep.mubr.bf16.mxu1 %v17435_v18  ;;  %2393 = vmatpush1.bf16.msra.mxu1 %v12963_v49 }
 0x303   :  { %v2163_v51 = vmul.f32 %v10828_v40, %v2159_v16  ;;  %2394 = vmatprep.subr.bf16.mxu1 %v12966_v34  ;;  %v1051_v40 = vadd.f32 %v12515_v20, %v12426_v0 }
 0x305   :  { %v12969_v17 = vadd.f32 %v2167_v39, %v2163_v51 }
 0x306   :  { %2395 = vmatpush1.bf16.msra.mxu1 %v12971_v19 }
 0x307   :  { %v2188_v62 = vpack.c.bf16 %v12969_v17, %v12960_v29  ;;  %2396 = vmatprep.subr.bf16.mxu1 %v12976_v15 }
 0x309   :  { %2232 = vmatmul.mubr.bf16.gmra.mxu1 %v2188_v62  ;;  %10327 = vmatmul.mubr.bf16.vlgmr.msra.gmra.mxu0 %v2188_v62 }
 0x30a   :  { %2397 = vmatpush1.bf16.msra.mxu1 %v12979_v14  ;;  %10331 = vmatpush3.bf16.msra.mxu0 %v12982_v59 }
 0x30b   :  { %2398 = vmatprep.subr.bf16.mxu1 %v12985_v6  ;;  %10332 = vmatprep.subr.bf16.mxu0 %v12988_v45 }
 0x30c   :  { %2424 = vmatprep.mubr.bf16.mxu1 %v17435_v18 }
 0x30e   :  { %2399 = vmatpush1.bf16.msra.mxu1 %v12992_v61  ;;  %10333 = vmatpush3.bf16.msra.mxu0 %v12988_v45 }
 0x30f   :  { %2400 = vmatprep.subr.bf16.mxu1 %v12996_v9  ;;  %10334 = vmatprep.subr.bf16.mxu0 %v12999_v8 }
 0x312   :  { %2401 = vmatpush1.bf16.msra.mxu1 %v13002_v5  ;;  %10335 = vmatpush3.bf16.msra.mxu0 %v12999_v8 }
 0x313   :  { %2402 = vmatprep.subr.bf16.mxu1 %v13006_v12  ;;  %10336 = vmatprep.subr.bf16.mxu0 %v13009_v28 }
 0x316   :  { %2403 = vmatpush1.bf16.msra.mxu1 %v13012_v1  ;;  %10337 = vmatpush3.bf16.msra.mxu0 %v13009_v28 }
 0x317   :  { %2404 = vmatprep.subr.bf16.mxu1 %v13016_v41  ;;  %10338 = vmatprep.subr.bf16.mxu0 %v13019_v44 }
 0x31a   :  { %2405 = vmatpush1.bf16.msra.mxu1 %v13022_v56  ;;  %10339 = vmatpush3.bf16.msra.mxu0 %v13019_v44 }
 0x31b   :  { %2406 = vmatprep.subr.bf16.mxu1 %v13026_v30  ;;  %10340 = vmatprep.subr.bf16.mxu0 %v13029_v32 }
 0x31e   :  { %2407 = vmatpush1.bf16.msra.mxu1 %v13032_v24  ;;  %10341 = vmatpush3.bf16.msra.mxu0 %v13029_v32 }
 0x31f   :  { %10342 = vmatprep.subr.bf16.mxu0 %v13036_v33  ;;  %2595 = vmatprep.subr.bf16.mxu1 %v13039_v35 }
 0x322   :  { %10343 = vmatpush3.bf16.msra.mxu0 %v13036_v33 }
 0x323   :  { %10344 = vmatprep.subr.bf16.mxu0 %v13043_v47 }
 0x326   :  { %10345 = vmatpush3.bf16.msra.mxu0 %v13043_v47 }
 0x327   :  { %10350 = vmatprep.subr.bf16.mxu0 %v12982_v59 }
 0x3c1   :  { %v2223_v53 = vpop.f32.mrf.mxu1 }
 0x3c2   :  { %v2224_v7 = vadd.f32 %v2223_v53, %v12867_v58 }
 0x3c3   :  { %v2225_v48 = vpop.f32.mrf.mxu1 }
 0x3c4   :  { %v2291_v23 = vadd.f32 %v2224_v7, %v12505_v31  ;;  %v2226_v36 = vadd.f32 %v2225_v48, %v12877_v60  ;;  %v1244_v7 = vadd.f32 %v12396_v25, %v1051_v40 }
 0x3c5   :  { %v2227_v52 = vpop.f32.mrf.mxu1 }
 0x3c6   :  { %v9857_v43 = vmul.f32 -1.442695, %v2291_v23  ;;  %v2228_v16 = vadd.f32 %v2227_v52, %v12867_v58  ;;  %v2319_v53 = vadd.f32 %v2226_v36, %v12511_v4  ;;  %v1061_v4 = vadd.f32 %v12545_v46, %v12426_v0 }
 0x3c7   :  { %v2229_v51 = vpop.f32.mrf.mxu1 }
 0x3c8   :  { %10829 = vpow2.f32 %v9857_v43  ;;  %v2292_v39 = vadd.f32 %v2228_v16, %v12523_v55  ;;  %v2230_v62 = vadd.f32 %v2229_v51, %v12877_v60  ;;  %v9861_v10 = vmul.f32 -1.442695, %v2319_v53 }
 0x3c9   :  { %v2233_v21 = vpop.f32.mrf.mxu1  ;;  %v1254_v51 = vadd.f32 %v12420_v54, %v1061_v4 }
 0x3ca   :  { %v9858_v3 = vmul.f32 -1.442695, %v2292_v39  ;;  %v2234_v31 = vadd.f32 %v2233_v21, %v12867_v58  ;;  %v2320_v52 = vadd.f32 %v2230_v62, %v1244_v7  ;;  %v10328_v7 = vpop.f32.mrf.mxu0 }
 0x3cb   :  { %v2235_v48 = vpop.f32.mrf.mxu1 }
 0x3cc   :  { %10831 = vpow2.f32 %v9858_v3  ;;  %v2293_v23 = vadd.f32 %v2234_v31, %v12535_v42  ;;  %v2236_v20 = vadd.f32 %v2235_v48, %v12877_v60  ;;  %v9862_v25 = vmul.f32 -1.442695, %v2320_v52 }
 0x3cd   :  { %v2237_v43 = vpop.f32.mrf.mxu1 }
 0x3ce   :  { %v9859_v55 = vmul.f32 -1.442695, %v2293_v23  ;;  %v2238_v16 = vadd.f32 %v2237_v43, %v12867_v58  ;;  %v2321_v3 = vadd.f32 %v2236_v20, %v12541_v11  ;;  %v2276_v23 = vpop.f32.mrf.mxu0 }
 0x3cf   :  { %v2239_v36 = vpop.f32.mrf.mxu1  ;;  %v2277_v4 = vadd.f32 %v2276_v23, %v12930_v50 }
 0x3d0   :  { %10833 = vpow2.f32 %v9859_v55  ;;  %v2294_v21 = vadd.f32 %v2238_v16, %v12551_v26  ;;  %v2240_v42 = vadd.f32 %v2239_v36, %v12877_v60  ;;  %v9863_v62 = vmul.f32 -1.442695, %v2321_v3  ;;  %v10329_v20 = vpop.f32.mrf.mxu0 }
 0x3d1   :  { %10835 = vpow2.f32 %v9861_v10 }
 0x3d2   :  { %v9860_v40 = vmul.f32 -1.442695, %v2294_v21  ;;  %v2322_v53 = vadd.f32 %v2240_v42, %v1254_v51 }
 0x3d4   :  { %10837 = vpow2.f32 %v9860_v40  ;;  %v9864_v26 = vmul.f32 -1.442695, %v2322_v53  ;;  %v17436_v40 = vld [vmem:[#allocation113_spill] sm:$0xff] }
 0x3d5   :  { %v10830_v39 = vpop.eup %10829  ;;  %10839 = vpow2.f32 %v9862_v25  ;;  %v2279_v25 = vpop.f32.mrf.mxu0 }
 0x3d6   :  { %v2307_v31 = vadd.f32 1.0, %v10830_v39  ;;  %v2280_v39 = vadd.f32 %v2279_v25, %v12930_v50 }
 0x3d8   :  { %10841 = vrcp.f32 %v2307_v31 }
 0x3d9   :  { %v10832_v46 = vpop.eup %10831  ;;  %10843 = vpow2.f32 %v9863_v62 }
 0x3da   :  { %v2308_v48 = vadd.f32 1.0, %v10832_v46 }
 0x3dc   :  { %10845 = vrcp.f32 %v2308_v48  ;;  %v17437_v48 = vld [vmem:[#allocation115_spill] sm:$0xff] }
 0x3dd   :  { %v10834_v11 = vpop.eup %10833  ;;  %10847 = vpow2.f32 %v9864_v26  ;;  %v2285_v26 = vadd.f32 %v10328_v7, %v12930_v50 }
 0x3de   :  { %v2309_v10 = vadd.f32 1.0, %v10834_v11  ;;  %v10836_v52 = vpop.eup %10835 }
 0x3df   :  { %v2335_v55 = vadd.f32 1.0, %v10836_v52 }
 0x3e0   :  { %10849 = vrcp.f32 %v2309_v10 }
 0x3e1   :  { %v10838_v54 = vpop.eup %10837 }
 0x3e2   :  { %v10840_v43 = vpop.eup %10839  ;;  %v2310_v16 = vadd.f32 1.0, %v10838_v54  ;;  %v17438_v54 = vld [vmem:[#allocation112_spill] sm:$0xff] }
 0x3e3   :  { %v2336_v21 = vadd.f32 1.0, %v10840_v43 }
 0x3e4   :  { %10851 = vrcp.f32 %v2310_v16 }
 0x3e5   :  { %v10842_v36 = vpop.eup %10841  ;;  %10853 = vrcp.f32 %v2335_v55  ;;  %v2288_v55 = vadd.f32 %v10329_v20, %v12930_v50 }
 0x3e6   :  { %v10844_v3 = vpop.eup %10843  ;;  %v2347_v42 = vmul.f32 %v10842_v36, %v2277_v4  ;;  %10855 = vrcp.f32 %v2336_v21  ;;  %v17439_v21 = vld [vmem:[#allocation114_spill] sm:$0xff] }
 0x3e7   :  { %v2337_v53 = vadd.f32 1.0, %v10844_v3 }
 0x3e8   :  { %v2351_v51 = vadd.f32 %v2347_v42, %v17436_v40 }
 0x3e9   :  { %v10846_v62 = vpop.eup %10845 }
 0x3ea   :  { %v10848_v31 = vpop.eup %10847  ;;  %10857 = vtanh.f32 %v2351_v51  ;;  %v2348_v46 = vmul.f32 %v10846_v62, %v2280_v39 }
 0x3eb   :  { %10859 = vrcp.f32 %v2337_v53  ;;  %v2338_v10 = vadd.f32 1.0, %v10848_v31 }
 0x3ec   :  { %v2352_v11 = vadd.f32 %v2348_v46, %v17437_v48 }
 0x3ed   :  { %v10850_v23 = vpop.eup %10849 }
 0x3ee   :  { %v2349_v52 = vmul.f32 %v10850_v23, %v2285_v26  ;;  %10861 = vtanh.f32 %v2352_v11 }
 0x3ef   :  { %10863 = vrcp.f32 %v2338_v10 }
 0x3f0   :  { %v2353_v43 = vadd.f32 %v2349_v52, %v17438_v54 }
 0x3f1   :  { %v10852_v16 = vpop.eup %10851 }
 0x3f2   :  { %10865 = vtanh.f32 %v2353_v43  ;;  %v2350_v4 = vmul.f32 %v10852_v16, %v2288_v55  ;;  %v10854_v36 = vpop.eup %10853 }
 0x3f3   :  { %v10856_v3 = vpop.eup %10855  ;;  %v2359_v7 = vsub.f32 1.0, %v10854_v36  ;;  %v2367_v51 = vmul.f32 %v10854_v36, %v12954_v63 }
 0x3f4   :  { %v2354_v25 = vadd.f32 %v2350_v4, %v17439_v21  ;;  %v2360_v62 = vsub.f32 1.0, %v10856_v3  ;;  %v2368_v46 = vmul.f32 %v10856_v3, %v12956_v13 }
 0x3f6   :  { %10867 = vtanh.f32 %v2354_v25  ;;  %v17440_v25 = vld [vmem:[#allocation54_spill] sm:$0xff] }
 0x3f7   :  { %v10858_v42 = vpop.eup %10857 }
 0x3f8   :  { %v2363_v40 = vmul.f32 %v10858_v42, %v2359_v7  ;;  %v10860_v39 = vpop.eup %10859 }
 0x3f9   :  { %v2361_v11 = vsub.f32 1.0, %v10860_v39  ;;  %v2369_v54 = vmul.f32 %v10860_v39, %v12960_v29  ;;  %v17441_v39 = vld [vmem:[#allocation56_spill] sm:$0xff] }
 0x3fa   :  { %v13077_v53 = vadd.f32 %v2367_v51, %v2363_v40 }
 0x3fb   :  { %v10862_v31 = vpop.eup %10861 }
 0x3fc   :  { %v2364_v20 = vmul.f32 %v10862_v31, %v2360_v62  ;;  %v10864_v26 = vpop.eup %10863  ;;  %v1071_v62 = vadd.f32 %v17441_v39, %v12426_v0  ;;  %v17447_v39 = vld [vmem:[#allocation63_spill] sm:$0xff] }
 0x3fd   :  { %v2362_v63 = vsub.f32 1.0, %v10864_v26  ;;  %v2370_v16 = vmul.f32 %v10864_v26, %v12969_v17 }
 0x3fe   :  { %v13080_v48 = vadd.f32 %v2368_v46, %v2364_v20  ;;  %v17442_v20 = vld [vmem:[#allocation58_spill] sm:$0xff] }
 0x3ff   :  { %v10866_v23 = vpop.eup %10865 }
 0x400   :  { %v2390_v10 = vpack.c.bf16 %v13080_v48, %v13077_v53  ;;  %v2365_v52 = vmul.f32 %v10866_v23, %v2361_v11  ;;  %v17443_v23 = vld [vmem:[#allocation55_spill] sm:$0xff] }
 0x402   :  { %2425 = vmatmul.mubr.bf16.vlgmr.msra.gmra.mxu1 %v2390_v10  ;;  %10346 = vmatprep.mubr.bf16.mxu0 %v2390_v10  ;;  %v13085_v43 = vadd.f32 %v2369_v54, %v2365_v52 }
 0x403   :  { %v10868_v55 = vpop.eup %10867  ;;  %2434 = vmatprep.mubr.bf16.mxu1 %v17435_v18  ;;  %2596 = vmatpush1.bf16.msra.mxu1 %v12963_v49 }
 0x404   :  { %v2366_v13 = vmul.f32 %v10868_v55, %v2362_v63  ;;  %2597 = vmatprep.subr.bf16.mxu1 %v12966_v34  ;;  %v17444_v63 = vld [vmem:[#allocation50_spill] sm:$0xff] }
 0x405   :  { %v1264_v55 = vadd.f32 %v17444_v63, %v1071_v62 }
 0x406   :  { %v13091_v4 = vadd.f32 %v2370_v16, %v2366_v13  ;;  %v17445_v16 = vld [vmem:[#allocation59_spill] sm:$0xff] }
 0x407   :  { %2598 = vmatpush1.bf16.msra.mxu1 %v12971_v19 }
 0x408   :  { %v2391_v29 = vpack.c.bf16 %v13091_v4, %v13085_v43  ;;  %2599 = vmatprep.subr.bf16.mxu1 %v12976_v15 }
 0x40a   :  { %2435 = vmatmul.mubr.bf16.gmra.mxu1 %v2391_v29  ;;  %10347 = vmatmul.mubr.bf16.vlgmr.msra.gmra.mxu0 %v2391_v29 }
 0x40b   :  { %2600 = vmatpush1.bf16.msra.mxu1 %v12979_v14  ;;  %10351 = vmatpush3.bf16.msra.mxu0 %v12982_v59 }
 0x40c   :  { %2601 = vmatprep.subr.bf16.mxu1 %v12985_v6  ;;  %10352 = vmatprep.subr.bf16.mxu0 %v12988_v45 }
 0x40d   :  { %2627 = vmatprep.mubr.bf16.mxu1 %v17435_v18 }
 0x40f   :  { %2602 = vmatpush1.bf16.msra.mxu1 %v12992_v61  ;;  %10353 = vmatpush3.bf16.msra.mxu0 %v12988_v45 }
 0x410   :  { %2603 = vmatprep.subr.bf16.mxu1 %v12996_v9  ;;  %10354 = vmatprep.subr.bf16.mxu0 %v12999_v8 }
 0x413   :  { %2604 = vmatpush1.bf16.msra.mxu1 %v13002_v5  ;;  %10355 = vmatpush3.bf16.msra.mxu0 %v12999_v8 }
 0x414   :  { %2605 = vmatprep.subr.bf16.mxu1 %v13006_v12  ;;  %10356 = vmatprep.subr.bf16.mxu0 %v13009_v28 }
 0x417   :  { %2606 = vmatpush1.bf16.msra.mxu1 %v13012_v1  ;;  %10357 = vmatpush3.bf16.msra.mxu0 %v13009_v28 }
 0x418   :  { %2607 = vmatprep.subr.bf16.mxu1 %v13016_v41  ;;  %10358 = vmatprep.subr.bf16.mxu0 %v13019_v44 }
 0x41b   :  { %2608 = vmatpush1.bf16.msra.mxu1 %v13022_v56  ;;  %10359 = vmatpush3.bf16.msra.mxu0 %v13019_v44 }
 0x41c   :  { %2609 = vmatprep.subr.bf16.mxu1 %v13026_v30  ;;  %10360 = vmatprep.subr.bf16.mxu0 %v13029_v32 }
 0x41f   :  { %2610 = vmatpush1.bf16.msra.mxu1 %v13032_v24  ;;  %10361 = vmatpush3.bf16.msra.mxu0 %v13029_v32 }
 0x420   :  { %10362 = vmatprep.subr.bf16.mxu0 %v13036_v33  ;;  %2798 = vmatprep.subr.bf16.mxu1 %v13039_v35 }
 0x423   :  { %10363 = vmatpush3.bf16.msra.mxu0 %v13036_v33 }
 0x424   :  { %10364 = vmatprep.subr.bf16.mxu0 %v13043_v47 }
 0x427   :  { %10365 = vmatpush3.bf16.msra.mxu0 %v13043_v47 }
 0x428   :  { %10370 = vmatprep.subr.bf16.mxu0 %v12982_v59 }
 0x4c2   :  { %v2426_v17 = vpop.f32.mrf.mxu1 }
 0x4c3   :  { %v2427_v36 = vadd.f32 %v2426_v17, %v12867_v58 }
 0x4c4   :  { %v2428_v21 = vpop.f32.mrf.mxu1 }
 0x4c5   :  { %v2494_v3 = vadd.f32 %v2427_v36, %v17440_v25  ;;  %v2429_v40 = vadd.f32 %v2428_v21, %v12877_v60 }
 0x4c6   :  { %v2430_v7 = vpop.f32.mrf.mxu1 }
 0x4c7   :  { %v9865_v42 = vmul.f32 -1.442695, %v2494_v3  ;;  %v2431_v51 = vadd.f32 %v2430_v7, %v12867_v58  ;;  %v2522_v10 = vadd.f32 %v2429_v40, %v17443_v23  ;;  %v17449_v23 = vld [vmem:[#allocation51_spill] sm:$0xff] }
 0x4c8   :  { %v2432_v31 = vpop.f32.mrf.mxu1 }
 0x4c9   :  { %10869 = vpow2.f32 %v9865_v42  ;;  %v2495_v46 = vadd.f32 %v2431_v51, %v17442_v20  ;;  %v2433_v26 = vadd.f32 %v2432_v31, %v12877_v60  ;;  %v9869_v25 = vmul.f32 -1.442695, %v2522_v10  ;;  %v17446_v42 = vld [vmem:[#allocation61_spill] sm:$0xff]  ;;  %v17448_v20 = vld [vmem:[#allocation60_spill] sm:$0xff] }
 0x4ca   :  { %v2436_v11 = vpop.f32.mrf.mxu1  ;;  %v1081_v40 = vadd.f32 %v17446_v42, %v12426_v0 }
 0x4cb   :  { %v9866_v52 = vmul.f32 -1.442695, %v2495_v46  ;;  %v2437_v54 = vadd.f32 %v2436_v11, %v12867_v58  ;;  %v2523_v17 = vadd.f32 %v2433_v26, %v1264_v55 }
 0x4cc   :  { %v2438_v13 = vpop.f32.mrf.mxu1 }
 0x4cd   :  { %10871 = vpow2.f32 %v9866_v52  ;;  %v2496_v29 = vadd.f32 %v2437_v54, %v17445_v16  ;;  %v2439_v36 = vadd.f32 %v2438_v13, %v12877_v60  ;;  %v9870_v62 = vmul.f32 -1.442695, %v2523_v17  ;;  %v10348_v16 = vpop.f32.mrf.mxu0 }
 0x4ce   :  { %v2440_v21 = vpop.f32.mrf.mxu1  ;;  %v1274_v52 = vadd.f32 %v17449_v23, %v1081_v40  ;;  %v17450_v23 = vld [vmem:[#allocation117_spill] sm:$0xff] }
 0x4cf   :  { %v9867_v3 = vmul.f32 -1.442695, %v2496_v29  ;;  %v2441_v7 = vadd.f32 %v2440_v21, %v12867_v58  ;;  %v2524_v46 = vadd.f32 %v2439_v36, %v17448_v20  ;;  %v2479_v21 = vpop.f32.mrf.mxu0 }
 0x4d0   :  { %v2442_v51 = vpop.f32.mrf.mxu1 }
 0x4d1   :  { %10873 = vpow2.f32 %v9867_v3  ;;  %v2497_v31 = vadd.f32 %v2441_v7, %v17447_v39  ;;  %v2443_v11 = vadd.f32 %v2442_v51, %v12877_v60  ;;  %v9871_v54 = vmul.f32 -1.442695, %v2524_v46  ;;  %v10349_v42 = vpop.f32.mrf.mxu0 }
 0x4d2   :  { %10875 = vpow2.f32 %v9869_v25 }
 0x4d3   :  { %v9868_v26 = vmul.f32 -1.442695, %v2497_v31  ;;  %v2525_v63 = vadd.f32 %v2443_v11, %v1274_v52  ;;  %v2480_v31 = vadd.f32 %v2479_v21, %v12930_v50  ;;  %v2482_v46 = vpop.f32.mrf.mxu0 }
 0x4d5   :  { %10877 = vpow2.f32 %v9868_v26  ;;  %v9872_v29 = vmul.f32 -1.442695, %v2525_v63 }
 0x4d6   :  { %v10870_v10 = vpop.eup %10869  ;;  %10879 = vpow2.f32 %v9870_v62 }
 0x4d7   :  { %v2510_v55 = vadd.f32 1.0, %v10870_v10  ;;  %v2483_v10 = vadd.f32 %v2482_v46, %v12930_v50 }
 0x4d9   :  { %10881 = vrcp.f32 %v2510_v55 }
 0x4da   :  { %v10872_v13 = vpop.eup %10871  ;;  %10883 = vpow2.f32 %v9871_v54 }
 0x4db   :  { %v2511_v17 = vadd.f32 1.0, %v10872_v13 }
 0x4dd   :  { %10885 = vrcp.f32 %v2511_v17  ;;  %v17451_v17 = vld [vmem:[#allocation119_spill] sm:$0xff] }
 0x4de   :  { %v10874_v36 = vpop.eup %10873  ;;  %10887 = vpow2.f32 %v9872_v29  ;;  %v2488_v29 = vadd.f32 %v10348_v16, %v12930_v50 }
 0x4df   :  { %v2512_v25 = vadd.f32 1.0, %v10874_v36  ;;  %v10876_v3 = vpop.eup %10875 }
 0x4e0   :  { %v2538_v51 = vadd.f32 1.0, %v10876_v3 }
 0x4e1   :  { %10889 = vrcp.f32 %v2512_v25 }
 0x4e2   :  { %v10878_v7 = vpop.eup %10877 }
 0x4e3   :  { %v10880_v40 = vpop.eup %10879  ;;  %v2513_v39 = vadd.f32 1.0, %v10878_v7  ;;  %v17452_v7 = vld [vmem:[#allocation116_spill] sm:$0xff] }
 0x4e4   :  { %v2539_v20 = vadd.f32 1.0, %v10880_v40 }
 0x4e5   :  { %10891 = vrcp.f32 %v2513_v39 }
 0x4e6   :  { %v10882_v62 = vpop.eup %10881  ;;  %10893 = vrcp.f32 %v2538_v51  ;;  %v2491_v51 = vadd.f32 %v10349_v42, %v12930_v50 }
 0x4e7   :  { %v10884_v11 = vpop.eup %10883  ;;  %v2550_v26 = vmul.f32 %v10882_v62, %v2480_v31  ;;  %10895 = vrcp.f32 %v2539_v20  ;;  %v17453_v20 = vld [vmem:[#allocation118_spill] sm:$0xff] }
 0x4e8   :  { %v2540_v63 = vadd.f32 1.0, %v10884_v11 }
 0x4e9   :  { %v2554_v52 = vadd.f32 %v2550_v26, %v17450_v23 }
 0x4ea   :  { %v10886_v54 = vpop.eup %10885 }
 0x4eb   :  { %v10888_v55 = vpop.eup %10887  ;;  %10897 = vtanh.f32 %v2554_v52  ;;  %v2551_v13 = vmul.f32 %v10886_v54, %v2483_v10 }
 0x4ec   :  { %10899 = vrcp.f32 %v2540_v63  ;;  %v2541_v25 = vadd.f32 1.0, %v10888_v55 }
 0x4ed   :  { %v2555_v36 = vadd.f32 %v2551_v13, %v17451_v17 }
 0x4ee   :  { %v10890_v21 = vpop.eup %10889 }
 0x4ef   :  { %v2552_v3 = vmul.f32 %v10890_v21, %v2488_v29  ;;  %10901 = vtanh.f32 %v2555_v36 }
 0x4f0   :  { %10903 = vrcp.f32 %v2541_v25 }
 0x4f1   :  { %v2556_v40 = vadd.f32 %v2552_v3, %v17452_v7 }
 0x4f2   :  { %v10892_v39 = vpop.eup %10891 }
 0x4f3   :  { %10905 = vtanh.f32 %v2556_v40  ;;  %v2553_v31 = vmul.f32 %v10892_v39, %v2491_v51  ;;  %v10894_v62 = vpop.eup %10893 }
 0x4f4   :  { %v10896_v11 = vpop.eup %10895  ;;  %v2562_v16 = vsub.f32 1.0, %v10894_v62  ;;  %v2570_v52 = vmul.f32 %v10894_v62, %v13077_v53 }
 0x4f5   :  { %v2557_v46 = vadd.f32 %v2553_v31, %v17453_v20  ;;  %v2563_v54 = vsub.f32 1.0, %v10896_v11  ;;  %v2571_v13 = vmul.f32 %v10896_v11, %v13080_v48 }
 0x4f7   :  { %10907 = vtanh.f32 %v2557_v46  ;;  %v17454_v46 = vld [vmem:[#allocation64_spill] sm:$0xff] }
 0x4f8   :  { %v10898_v26 = vpop.eup %10897 }
 0x4f9   :  { %v2566_v23 = vmul.f32 %v10898_v26, %v2562_v16  ;;  %v10900_v10 = vpop.eup %10899 }
 0x4fa   :  { %v2564_v36 = vsub.f32 1.0, %v10900_v10  ;;  %v2572_v7 = vmul.f32 %v10900_v10, %v13085_v43  ;;  %v17455_v10 = vld [vmem:[#allocation66_spill] sm:$0xff] }
 0x4fb   :  { %v13155_v63 = vadd.f32 %v2570_v52, %v2566_v23 }
 0x4fc   :  { %v10902_v55 = vpop.eup %10901 }
 0x4fd   :  { %v2567_v42 = vmul.f32 %v10902_v55, %v2563_v54  ;;  %v10904_v29 = vpop.eup %10903  ;;  %v1091_v54 = vadd.f32 %v17455_v10, %v12426_v0  ;;  %v17461_v10 = vld [vmem:[#allocation73_spill] sm:$0xff] }
 0x4fe   :  { %v2565_v53 = vsub.f32 1.0, %v10904_v29  ;;  %v2573_v39 = vmul.f32 %v10904_v29, %v13091_v4 }
 0x4ff   :  { %v13158_v17 = vadd.f32 %v2571_v13, %v2567_v42  ;;  %v17456_v42 = vld [vmem:[#allocation68_spill] sm:$0xff] }
 0x500   :  { %v10906_v21 = vpop.eup %10905 }
 0x501   :  { %v2593_v25 = vpack.c.bf16 %v13158_v17, %v13155_v63  ;;  %v2568_v3 = vmul.f32 %v10906_v21, %v2564_v36  ;;  %v17457_v21 = vld [vmem:[#allocation65_spill] sm:$0xff] }
 0x503   :  { %2628 = vmatmul.mubr.bf16.vlgmr.msra.gmra.mxu1 %v2593_v25  ;;  %10366 = vmatprep.mubr.bf16.mxu0 %v2593_v25  ;;  %v13163_v40 = vadd.f32 %v2572_v7, %v2568_v3 }
 0x504   :  { %v10908_v51 = vpop.eup %10907  ;;  %2637 = vmatprep.mubr.bf16.mxu1 %v17435_v18  ;;  %2799 = vmatpush1.bf16.msra.mxu1 %v12963_v49 }
 0x505   :  { %v2569_v48 = vmul.f32 %v10908_v51, %v2565_v53  ;;  %2800 = vmatprep.subr.bf16.mxu1 %v12966_v34  ;;  %v17458_v53 = vld [vmem:[#allocation52_spill] sm:$0xff] }
 0x506   :  { %v1284_v51 = vadd.f32 %v17458_v53, %v1091_v54 }
 0x507   :  { %v13169_v31 = vadd.f32 %v2573_v39, %v2569_v48  ;;  %v17459_v39 = vld [vmem:[#allocation69_spill] sm:$0xff] }
 0x508   :  { %2801 = vmatpush1.bf16.msra.mxu1 %v12971_v19 }
 0x509   :  { %v2594_v43 = vpack.c.bf16 %v13169_v31, %v13163_v40  ;;  %2802 = vmatprep.subr.bf16.mxu1 %v12976_v15 }
 0x50b   :  { %2638 = vmatmul.mubr.bf16.gmra.mxu1 %v2594_v43  ;;  %10367 = vmatmul.mubr.bf16.vlgmr.msra.gmra.mxu0 %v2594_v43 }
 0x50c   :  { %2803 = vmatpush1.bf16.msra.mxu1 %v12979_v14  ;;  %10371 = vmatpush3.bf16.msra.mxu0 %v12982_v59 }
 0x50d   :  { %2804 = vmatprep.subr.bf16.mxu1 %v12985_v6  ;;  %10372 = vmatprep.subr.bf16.mxu0 %v12988_v45 }
 0x50e   :  { %2830 = vmatprep.mubr.bf16.mxu1 %v17435_v18 }
 0x510   :  { %2805 = vmatpush1.bf16.msra.mxu1 %v12992_v61  ;;  %10373 = vmatpush3.bf16.msra.mxu0 %v12988_v45 }
 0x511   :  { %2806 = vmatprep.subr.bf16.mxu1 %v12996_v9  ;;  %10374 = vmatprep.subr.bf16.mxu0 %v12999_v8 }
 0x514   :  { %2807 = vmatpush1.bf16.msra.mxu1 %v13002_v5  ;;  %10375 = vmatpush3.bf16.msra.mxu0 %v12999_v8 }
 0x515   :  { %2808 = vmatprep.subr.bf16.mxu1 %v13006_v12  ;;  %10376 = vmatprep.subr.bf16.mxu0 %v13009_v28 }
 0x518   :  { %2809 = vmatpush1.bf16.msra.mxu1 %v13012_v1  ;;  %10377 = vmatpush3.bf16.msra.mxu0 %v13009_v28 }
 0x519   :  { %2810 = vmatprep.subr.bf16.mxu1 %v13016_v41  ;;  %10378 = vmatprep.subr.bf16.mxu0 %v13019_v44 }
 0x51c   :  { %2811 = vmatpush1.bf16.msra.mxu1 %v13022_v56  ;;  %10379 = vmatpush3.bf16.msra.mxu0 %v13019_v44 }
 0x51d   :  { %2812 = vmatprep.subr.bf16.mxu1 %v13026_v30  ;;  %10380 = vmatprep.subr.bf16.mxu0 %v13029_v32 }
 0x520   :  { %2813 = vmatpush1.bf16.msra.mxu1 %v13032_v24  ;;  %10381 = vmatpush3.bf16.msra.mxu0 %v13029_v32 }
 0x521   :  { %10382 = vmatprep.subr.bf16.mxu0 %v13036_v33  ;;  %3001 = vmatprep.subr.bf16.mxu1 %v13039_v35 }
 0x524   :  { %10383 = vmatpush3.bf16.msra.mxu0 %v13036_v33 }
 0x525   :  { %10384 = vmatprep.subr.bf16.mxu0 %v13043_v47 }
 0x528   :  { %10385 = vmatpush3.bf16.msra.mxu0 %v13043_v47 }
 0x529   :  { %10390 = vmatprep.subr.bf16.mxu0 %v12982_v59 }
 0x5c3   :  { %v2629_v4 = vpop.f32.mrf.mxu1 }
 0x5c4   :  { %v2630_v62 = vadd.f32 %v2629_v4, %v12867_v58 }
 0x5c5   :  { %v2631_v20 = vpop.f32.mrf.mxu1 }
 0x5c6   :  { %v2697_v11 = vadd.f32 %v2630_v62, %v17454_v46  ;;  %v2632_v23 = vadd.f32 %v2631_v20, %v12877_v60 }
 0x5c7   :  { %v2633_v16 = vpop.f32.mrf.mxu1 }
 0x5c8   :  { %v9873_v26 = vmul.f32 -1.442695, %v2697_v11  ;;  %v2634_v52 = vadd.f32 %v2633_v16, %v12867_v58  ;;  %v2725_v25 = vadd.f32 %v2632_v23, %v17457_v21  ;;  %v17463_v21 = vld [vmem:[#allocation53_spill] sm:$0xff] }
 0x5c9   :  { %v2635_v55 = vpop.f32.mrf.mxu1 }
 0x5ca   :  { %10909 = vpow2.f32 %v9873_v26  ;;  %v2698_v13 = vadd.f32 %v2634_v52, %v17456_v42  ;;  %v2636_v29 = vadd.f32 %v2635_v55, %v12877_v60  ;;  %v9877_v46 = vmul.f32 -1.442695, %v2725_v25  ;;  %v17460_v26 = vld [vmem:[#allocation71_spill] sm:$0xff]  ;;  %v17462_v42 = vld [vmem:[#allocation70_spill] sm:$0xff] }
 0x5cb   :  { %v2639_v36 = vpop.f32.mrf.mxu1  ;;  %v1101_v23 = vadd.f32 %v17460_v26, %v12426_v0 }
 0x5cc   :  { %v9874_v3 = vmul.f32 -1.442695, %v2698_v13  ;;  %v2640_v7 = vadd.f32 %v2639_v36, %v12867_v58  ;;  %v2726_v4 = vadd.f32 %v2636_v29, %v1284_v51 }
 0x5cd   :  { %v2641_v48 = vpop.f32.mrf.mxu1 }
 0x5ce   :  { %10911 = vpow2.f32 %v9874_v3  ;;  %v2699_v43 = vadd.f32 %v2640_v7, %v17459_v39  ;;  %v2642_v62 = vadd.f32 %v2641_v48, %v12877_v60  ;;  %v9878_v54 = vmul.f32 -1.442695, %v2726_v4  ;;  %v10368_v39 = vpop.f32.mrf.mxu0 }
 0x5cf   :  { %v2643_v20 = vpop.f32.mrf.mxu1  ;;  %v1294_v3 = vadd.f32 %v17463_v21, %v1101_v23  ;;  %v17464_v21 = vld [vmem:[#allocation120_spill] sm:$0xff] }
 0x5d0   :  { %v9875_v11 = vmul.f32 -1.442695, %v2699_v43  ;;  %v2644_v16 = vadd.f32 %v2643_v20, %v12867_v58  ;;  %v2727_v13 = vadd.f32 %v2642_v62, %v17462_v42  ;;  %v2682_v20 = vpop.f32.mrf.mxu0 }
 0x5d1   :  { %v2645_v52 = vpop.f32.mrf.mxu1 }
 0x5d2   :  { %10913 = vpow2.f32 %v9875_v11  ;;  %v2700_v55 = vadd.f32 %v2644_v16, %v17461_v10  ;;  %v2646_v36 = vadd.f32 %v2645_v52, %v12877_v60  ;;  %v9879_v7 = vmul.f32 -1.442695, %v2727_v13  ;;  %v10369_v26 = vpop.f32.mrf.mxu0 }
 0x5d3   :  { %10915 = vpow2.f32 %v9877_v46 }
 0x5d4   :  { %v9876_v29 = vmul.f32 -1.442695, %v2700_v55  ;;  %v2728_v53 = vadd.f32 %v2646_v36, %v1294_v3  ;;  %v2683_v55 = vadd.f32 %v2682_v20, %v12930_v50  ;;  %v2685_v13 = vpop.f32.mrf.mxu0 }
 0x5d6   :  { %10917 = vpow2.f32 %v9876_v29  ;;  %v9880_v43 = vmul.f32 -1.442695, %v2728_v53 }
 0x5d7   :  { %v10910_v25 = vpop.eup %10909  ;;  %10919 = vpow2.f32 %v9878_v54 }
 0x5d8   :  { %v2713_v51 = vadd.f32 1.0, %v10910_v25  ;;  %v2686_v25 = vadd.f32 %v2685_v13, %v12930_v50 }
 0x5da   :  { %10921 = vrcp.f32 %v2713_v51 }
 0x5db   :  { %v10912_v48 = vpop.eup %10911  ;;  %10923 = vpow2.f32 %v9879_v7 }
 0x5dc   :  { %v2714_v4 = vadd.f32 1.0, %v10912_v48 }
 0x5de   :  { %10925 = vrcp.f32 %v2714_v4  ;;  %v17465_v4 = vld [vmem:[#allocation122_spill] sm:$0xff] }
 0x5df   :  { %v10914_v62 = vpop.eup %10913  ;;  %10927 = vpow2.f32 %v9880_v43  ;;  %v2691_v43 = vadd.f32 %v10368_v39, %v12930_v50 }
 0x5e0   :  { %v2715_v46 = vadd.f32 1.0, %v10914_v62  ;;  %v10916_v11 = vpop.eup %10915 }
 0x5e1   :  { %v2741_v52 = vadd.f32 1.0, %v10916_v11 }
 0x5e2   :  { %10929 = vrcp.f32 %v2715_v46 }
 0x5e3   :  { %v10918_v16 = vpop.eup %10917 }
 0x5e4   :  { %v10920_v23 = vpop.eup %10919  ;;  %v2716_v10 = vadd.f32 1.0, %v10918_v16  ;;  %v17466_v16 = vld [vmem:[#allocation121_spill] sm:$0xff] }
 0x5e5   :  { %v2742_v42 = vadd.f32 1.0, %v10920_v23 }
 0x5e6   :  { %10931 = vrcp.f32 %v2716_v10 }
 0x5e7   :  { %v10922_v54 = vpop.eup %10921  ;;  %10933 = vrcp.f32 %v2741_v52  ;;  %v2694_v52 = vadd.f32 %v10369_v26, %v12930_v50 }
 0x5e8   :  { %v10924_v36 = vpop.eup %10923  ;;  %v2753_v29 = vmul.f32 %v10922_v54, %v2683_v55  ;;  %10935 = vrcp.f32 %v2742_v42  ;;  %v17467_v42 = vld [vmem:[#allocation123_spill] sm:$0xff] }
 0x5e9   :  { %v2743_v53 = vadd.f32 1.0, %v10924_v36 }
 0x5ea   :  { %v2757_v3 = vadd.f32 %v2753_v29, %v17464_v21 }
 0x5eb   :  { %v10926_v7 = vpop.eup %10925 }
 0x5ec   :  { %v10928_v51 = vpop.eup %10927  ;;  %10937 = vtanh.f32 %v2757_v3  ;;  %v2754_v48 = vmul.f32 %v10926_v7, %v2686_v25 }
 0x5ed   :  { %10939 = vrcp.f32 %v2743_v53  ;;  %v2744_v46 = vadd.f32 1.0, %v10928_v51 }
 0x5ee   :  { %v2758_v62 = vadd.f32 %v2754_v48, %v17465_v4 }
 0x5ef   :  { %v10930_v20 = vpop.eup %10929 }
 0x5f0   :  { %v2755_v11 = vmul.f32 %v10930_v20, %v2691_v43  ;;  %10941 = vtanh.f32 %v2758_v62 }
 0x5f1   :  { %10943 = vrcp.f32 %v2744_v46 }
 0x5f2   :  { %v2759_v23 = vadd.f32 %v2755_v11, %v17466_v16 }
 0x5f3   :  { %v10932_v10 = vpop.eup %10931 }
 0x5f4   :  { %10945 = vtanh.f32 %v2759_v23  ;;  %v2756_v55 = vmul.f32 %v10932_v10, %v2694_v52  ;;  %v10934_v54 = vpop.eup %10933 }
 0x5f5   :  { %v10936_v36 = vpop.eup %10935  ;;  %v2765_v39 = vsub.f32 1.0, %v10934_v54  ;;  %v2773_v3 = vmul.f32 %v10934_v54, %v13155_v63 }
 0x5f6   :  { %v2760_v13 = vadd.f32 %v2756_v55, %v17467_v42  ;;  %v2766_v7 = vsub.f32 1.0, %v10936_v36  ;;  %v2774_v48 = vmul.f32 %v10936_v36, %v13158_v17 }
 0x5f8   :  { %10947 = vtanh.f32 %v2760_v13 }
 0x5f9   :  { %v10938_v29 = vpop.eup %10937 }
 0x5fa   :  { %v2769_v21 = vmul.f32 %v10938_v29, %v2765_v39  ;;  %v10940_v25 = vpop.eup %10939 }
 0x5fb   :  { %v2767_v62 = vsub.f32 1.0, %v10940_v25  ;;  %v2775_v16 = vmul.f32 %v10940_v25, %v13163_v40 }
 0x5fc   :  { %v13233_v53 = vadd.f32 %v2773_v3, %v2769_v21  ;;  %v17474_v21 = vld [vmem:[#allocation81_spill] sm:$0xff] }
 0x5fd   :  { %v10942_v51 = vpop.eup %10941  ;;  %v1121_v3 = vadd.f32 %v17474_v21, %v12426_v0 }
 0x5fe   :  { %v2770_v26 = vmul.f32 %v10942_v51, %v2766_v7  ;;  %v10944_v43 = vpop.eup %10943  ;;  %v17475_v7 = vld [vmem:[#allocation83_spill] sm:$0xff] }
 0x5ff   :  { %v2768_v63 = vsub.f32 1.0, %v10944_v43  ;;  %v2776_v10 = vmul.f32 %v10944_v43, %v13169_v31 }
 0x600   :  { %v13236_v4 = vadd.f32 %v2774_v48, %v2770_v26  ;;  %v17476_v48 = vld [vmem:[#allocation80_spill] sm:$0xff] }
 0x601   :  { %v10946_v20 = vpop.eup %10945 }
 0x602   :  { %v2796_v46 = vpack.c.bf16 %v13236_v4, %v13233_v53  ;;  %v2771_v11 = vmul.f32 %v10946_v20, %v2767_v62 }
 0x604   :  { %2831 = vmatmul.mubr.bf16.vlgmr.msra.gmra.mxu1 %v2796_v46  ;;  %10386 = vmatprep.mubr.bf16.mxu0 %v2796_v46  ;;  %v13241_v23 = vadd.f32 %v2775_v16, %v2771_v11  ;;  %v17477_v46 = vld [vmem:[#allocation62_spill] sm:$0xff] }
 0x605   :  { %v10948_v52 = vpop.eup %10947  ;;  %2840 = vmatprep.mubr.bf16.mxu1 %v17435_v18  ;;  %3002 = vmatpush1.bf16.msra.mxu1 %v12963_v49  ;;  %v1314_v11 = vadd.f32 %v17477_v46, %v1121_v3 }
 0x606   :  { %v2772_v17 = vmul.f32 %v10948_v52, %v2768_v63  ;;  %3003 = vmatprep.subr.bf16.mxu1 %v12966_v34 }
 0x608   :  { %v13247_v55 = vadd.f32 %v2776_v10, %v2772_v17 }
 0x609   :  { %3004 = vmatpush1.bf16.msra.mxu1 %v12971_v19 }
 0x60a   :  { %v2797_v40 = vpack.c.bf16 %v13247_v55, %v13241_v23  ;;  %3005 = vmatprep.subr.bf16.mxu1 %v12976_v15  ;;  %v17468_v15 = vld [vmem:[#allocation74_spill] sm:$0xff] }
 0x60c   :  { %2841 = vmatmul.mubr.bf16.gmra.mxu1 %v2797_v40  ;;  %10387 = vmatmul.mubr.bf16.vlgmr.msra.gmra.mxu0 %v2797_v40 }
 0x60d   :  { %3006 = vmatpush1.bf16.msra.mxu1 %v12979_v14  ;;  %10391 = vmatpush3.bf16.msra.mxu0 %v12982_v59 }
 0x60e   :  { %3007 = vmatprep.subr.bf16.mxu1 %v12985_v6  ;;  %10392 = vmatprep.subr.bf16.mxu0 %v12988_v45 }
 0x60f   :  { %3033 = vmatprep.mubr.bf16.mxu1 %v17435_v18 }
 0x611   :  { %3008 = vmatpush1.bf16.msra.mxu1 %v12992_v61  ;;  %10393 = vmatpush3.bf16.msra.mxu0 %v12988_v45 }
 0x612   :  { %3009 = vmatprep.subr.bf16.mxu1 %v12996_v9  ;;  %10394 = vmatprep.subr.bf16.mxu0 %v12999_v8 }
 0x615   :  { %3010 = vmatpush1.bf16.msra.mxu1 %v13002_v5  ;;  %10395 = vmatpush3.bf16.msra.mxu0 %v12999_v8  ;;  %v17469_v8 = vld [vmem:[#allocation76_spill] sm:$0xff] }
 0x616   :  { %3011 = vmatprep.subr.bf16.mxu1 %v13006_v12  ;;  %10396 = vmatprep.subr.bf16.mxu0 %v13009_v28  ;;  %v1111_v5 = vadd.f32 %v17469_v8, %v12426_v0 }
 0x619   :  { %3012 = vmatpush1.bf16.msra.mxu1 %v13012_v1  ;;  %10397 = vmatpush3.bf16.msra.mxu0 %v13009_v28  ;;  %v17470_v28 = vld [vmem:[#allocation78_spill] sm:$0xff] }
 0x61a   :  { %3013 = vmatprep.subr.bf16.mxu1 %v13016_v41  ;;  %10398 = vmatprep.subr.bf16.mxu0 %v13019_v44 }
 0x61d   :  { %3014 = vmatpush1.bf16.msra.mxu1 %v13022_v56  ;;  %10399 = vmatpush3.bf16.msra.mxu0 %v13019_v44  ;;  %v17471_v44 = vld [vmem:[#allocation75_spill] sm:$0xff] }
 0x61e   :  { %3015 = vmatprep.subr.bf16.mxu1 %v13026_v30  ;;  %10400 = vmatprep.subr.bf16.mxu0 %v13029_v32 }
 0x621   :  { %3016 = vmatpush1.bf16.msra.mxu1 %v13032_v24  ;;  %10401 = vmatpush3.bf16.msra.mxu0 %v13029_v32  ;;  %v17472_v24 = vld [vmem:[#allocation57_spill] sm:$0xff] }
 0x622   :  { %10402 = vmatprep.subr.bf16.mxu0 %v13036_v33  ;;  %3204 = vmatprep.subr.bf16.mxu1 %v13039_v35 }
 0x625   :  { %10403 = vmatpush3.bf16.msra.mxu0 %v13036_v33  ;;  %v1304_v33 = vadd.f32 %v17472_v24, %v1111_v5 }
 0x626   :  { %10404 = vmatprep.subr.bf16.mxu0 %v13043_v47 }
 0x629   :  { %10405 = vmatpush3.bf16.msra.mxu0 %v13043_v47  ;;  %v17473_v47 = vld [vmem:[#allocation79_spill] sm:$0xff] }
 0x62a   :  { %10410 = vmatprep.subr.bf16.mxu0 %v12982_v59 }
 0x6c4   :  { %v2832_v49 = vpop.f32.mrf.mxu1 }
 0x6c5   :  { %v2833_v34 = vadd.f32 %v2832_v49, %v12867_v58 }
 0x6c6   :  { %v2834_v19 = vpop.f32.mrf.mxu1 }
 0x6c7   :  { %v2900_v14 = vadd.f32 %v2833_v34, %v17468_v15  ;;  %v2835_v61 = vadd.f32 %v2834_v19, %v12877_v60 }
 0x6c8   :  { %v2836_v6 = vpop.f32.mrf.mxu1 }
 0x6c9   :  { %v9881_v45 = vmul.f32 -1.442695, %v2900_v14  ;;  %v2837_v9 = vadd.f32 %v2836_v6, %v12867_v58  ;;  %v2928_v56 = vadd.f32 %v2835_v61, %v17471_v44 }
 0x6ca   :  { %v2838_v12 = vpop.f32.mrf.mxu1 }
 0x6cb   :  { %10949 = vpow2.f32 %v9881_v45  ;;  %v2901_v1 = vadd.f32 %v2837_v9, %v17470_v28  ;;  %v2839_v59 = vadd.f32 %v2838_v12, %v12877_v60  ;;  %v9885_v36 = vmul.f32 -1.442695, %v2928_v56  ;;  %v17478_v56 = vld [vmem:[#allocation124_spill] sm:$0xff] }
 0x6cc   :  { %v2842_v41 = vpop.f32.mrf.mxu1  ;;  %v10388_v40 = vpop.f32.mrf.mxu0 }
 0x6cd   :  { %v9882_v30 = vmul.f32 -1.442695, %v2901_v1  ;;  %v2843_v32 = vadd.f32 %v2842_v41, %v12867_v58  ;;  %v2929_v54 = vadd.f32 %v2839_v59, %v1304_v33 }
 0x6ce   :  { %v2844_v35 = vpop.f32.mrf.mxu1  ;;  %v2885_v15 = vpop.f32.mrf.mxu0 }
 0x6cf   :  { %10951 = vpow2.f32 %v9882_v30  ;;  %v2902_v31 = vadd.f32 %v2843_v32, %v17473_v47  ;;  %v2845_v42 = vadd.f32 %v2844_v35, %v12877_v60  ;;  %v9886_v26 = vmul.f32 -1.442695, %v2929_v54  ;;  %v17479_v54 = vld [vmem:[#allocation125_spill] sm:$0xff] }
 0x6d0   :  { %v2846_v13 = vpop.f32.mrf.mxu1  ;;  %v10389_v61 = vpop.f32.mrf.mxu0  ;;  %v2886_v12 = vadd.f32 %v2885_v15, %v12930_v50 }
 0x6d1   :  { %v9883_v39 = vmul.f32 -1.442695, %v2902_v31  ;;  %v2847_v29 = vadd.f32 %v2846_v13, %v12867_v58  ;;  %v2930_v43 = vadd.f32 %v2845_v42, %v17476_v48  ;;  %v2894_v31 = vadd.f32 %v10388_v40, %v12930_v50 }
 0x6d2   :  { %v2848_v25 = vpop.f32.mrf.mxu1  ;;  %v2888_v59 = vpop.f32.mrf.mxu0  ;;  %v2897_v3 = vadd.f32 %v10389_v61, %v12930_v50 }
 0x6d3   :  { %10953 = vpow2.f32 %v9883_v39  ;;  %v2903_v51 = vadd.f32 %v2847_v29, %v17475_v7  ;;  %v2849_v62 = vadd.f32 %v2848_v25, %v12877_v60  ;;  %v9887_v63 = vmul.f32 -1.442695, %v2930_v43  ;;  %v17480_v29 = vld [vmem:[#allocation126_spill] sm:$0xff] }
 0x6d4   :  { %10955 = vpow2.f32 %v9885_v36  ;;  %v2889_v32 = vadd.f32 %v2888_v59, %v12930_v50  ;;  %v13336_v59 = vld [vmem:[#allocation12 + $0x7c] ss:$12 sps:$4 sm:$0xff]  }
 0x6d5   :  { %v9884_v20 = vmul.f32 -1.442695, %v2903_v51  ;;  %v2931_v52 = vadd.f32 %v2849_v62, %v1314_v11 }
 0x6d7   :  { %10957 = vpow2.f32 %v9884_v20  ;;  %v9888_v49 = vmul.f32 -1.442695, %v2931_v52 }
 0x6d8   :  { %v10950_v16 = vpop.eup %10949  ;;  %10959 = vpow2.f32 %v9886_v26  ;;  %v17481_v26 = vld [vmem:[#allocation127_spill] sm:$0xff] }
 0x6d9   :  { %v2916_v17 = vadd.f32 1.0, %v10950_v16 }
 0x6db   :  { %10961 = vrcp.f32 %v2916_v17 }
 0x6dc   :  { %v10952_v10 = vpop.eup %10951  ;;  %10963 = vpow2.f32 %v9887_v63 }
 0x6dd   :  { %v2917_v34 = vadd.f32 1.0, %v10952_v10 }
 0x6df   :  { %10965 = vrcp.f32 %v2917_v34 }
 0x6e0   :  { %v10954_v19 = vpop.eup %10953  ;;  %10967 = vpow2.f32 %v9888_v49 }
 0x6e1   :  { %v2918_v14 = vadd.f32 1.0, %v10954_v19  ;;  %v10956_v6 = vpop.eup %10955 }
 0x6e2   :  { %v2944_v8 = vadd.f32 1.0, %v10956_v6 }
 0x6e3   :  { %10969 = vrcp.f32 %v2918_v14 }
 0x6e4   :  { %v10958_v45 = vpop.eup %10957 }
 0x6e5   :  { %v10960_v9 = vpop.eup %10959  ;;  %v2919_v5 = vadd.f32 1.0, %v10958_v45 }
 0x6e6   :  { %v2945_v1 = vadd.f32 1.0, %v10960_v9 }
 0x6e7   :  { %10971 = vrcp.f32 %v2919_v5 }
 0x6e8   :  { %v10962_v28 = vpop.eup %10961  ;;  %10973 = vrcp.f32 %v2944_v8 }
 0x6e9   :  { %v10964_v41 = vpop.eup %10963  ;;  %v2956_v44 = vmul.f32 %v10962_v28, %v2886_v12  ;;  %10975 = vrcp.f32 %v2945_v1  ;;  %v13326_v12 = vld [vmem:[#allocation12 + $0x94] ss:$12 sps:$4 sm:$0xff]   ;;  %v13331_v28 = vld [vmem:[#allocation12 + $0x90] ss:$12 sps:$4 sm:$0xff]  }
 0x6ea   :  { %v2946_v33 = vadd.f32 1.0, %v10964_v41  ;;  %v13342_v41 = vld [vmem:[#allocation12 + $0xb0] ss:$12 sps:$4 sm:$0xff]  }
 0x6eb   :  { %v2960_v30 = vadd.f32 %v2956_v44, %v17478_v56  ;;  %v13345_v44 = vld [vmem:[#allocation12 + $0x64] ss:$12 sps:$4 sm:$0xff]  }
 0x6ec   :  { %v10966_v24 = vpop.eup %10965  ;;  %v13348_v56 = vld [vmem:[#allocation12 + $0x98] ss:$12 sps:$4 sm:$0xff]  }
 0x6ed   :  { %v10968_v35 = vpop.eup %10967  ;;  %10977 = vtanh.f32 %v2960_v30  ;;  %v2957_v47 = vmul.f32 %v10966_v24, %v2889_v32  ;;  %v13352_v30 = vld [vmem:[#allocation12 + $0x60] ss:$12 sps:$4 sm:$0xff]  }
 0x6ee   :  { %10979 = vrcp.f32 %v2946_v33  ;;  %v2947_v36 = vadd.f32 1.0, %v10968_v35  ;;  %v13356_v32 = vld [vmem:[#allocation12 + $0x4c] ss:$12 sps:$4 sm:$0xff]   ;;  %v13362_v33 = vld [vmem:[#allocation12 + $0x48] ss:$12 sps:$4 sm:$0xff]  }
 0x6ef   :  { %v2961_v42 = vadd.f32 %v2957_v47, %v17479_v54  ;;  %v13359_v24 = vld [vmem:[#allocation12 + $0x80] ss:$12 sps:$4 sm:$0xff]   ;;  %v13369_v47 = vld [vmem:[#allocation12 + $0x68] ss:$12 sps:$4 sm:$0xff]  }
 0x6f0   :  { %v10970_v13 = vpop.eup %10969  ;;  %v13366_v35 = vld [vmem:[#allocation12 + $0x34] ss:$12 sps:$4 sm:$0xff]   ;;  %v13376_v54 = vld [vmem:[#allocation12 + $0x1c] ss:$12 sps:$4 sm:$0xff]  }
 0x6f1   :  { %v2958_v39 = vmul.f32 %v10970_v13, %v2894_v31  ;;  %10981 = vtanh.f32 %v2961_v42  ;;  %v13372_v31 = vld [vmem:[#allocation12 + $0x30] ss:$12 sps:$4 sm:$0xff]   ;;  %v13382_v13 = vld [vmem:[#allocation12 + $0x18] ss:$12 sps:$4 sm:$0xff]  }
 0x6f2   :  { %10983 = vrcp.f32 %v2947_v36  ;;  %v13379_v42 = vld [vmem:[#allocation12 + $0x50] ss:$12 sps:$4 sm:$0xff]  }
 0x6f3   :  { %v2962_v21 = vadd.f32 %v2958_v39, %v17480_v29  ;;  %v13386_v36 = vld [vmem:[#allocation12 + $0x4] ss:$12 sps:$4 sm:$0xff]   ;;  %v13392_v29 = vld [vmem:[#allocation12] ss:$12 sps:$4 sm:$0xff]  }
 0x6f4   :  { %v10972_v25 = vpop.eup %10971  ;;  %v13389_v39 = vld [vmem:[#allocation12 + $0x38] ss:$12 sps:$4 sm:$0xff]  }
 0x6f5   :  { %10985 = vtanh.f32 %v2962_v21  ;;  %v2959_v7 = vmul.f32 %v10972_v25, %v2897_v3  ;;  %v10974_v51 = vpop.eup %10973  ;;  %v13396_v21 = vld [vmem:[#allocation12 + $0x20] ss:$12 sps:$4 sm:$0xff]   ;;  %v13400_v25 = vld [vmem:[#allocation12 + $0x8] ss:$12 sps:$4 sm:$0xff]  }
 0x6f6   :  { %v10976_v43 = vpop.eup %10975  ;;  %v2968_v62 = vsub.f32 1.0, %v10974_v51  ;;  %v2976_v11 = vmul.f32 %v10974_v51, %v13233_v53  ;;  %v11569_v3 = vld [vmem:[#allocation12 + $0xac] ss:$12 sps:$4 sm:$0xff]  }
 0x6f7   :  { %v2963_v48 = vadd.f32 %v2959_v7, %v17481_v26  ;;  %v2969_v63 = vsub.f32 1.0, %v10976_v43  ;;  %v2977_v40 = vmul.f32 %v10976_v43, %v13236_v4  ;;  %v13322_v4 = vld [vmem:[#allocation12 + $0xa8] ss:$12 sps:$4 sm:$0xff]  }
 0x6f9   :  { %10987 = vtanh.f32 %v2963_v48  ;;  %v17482_v48 = vld [vmem:[#allocation84_spill] sm:$0xff] }
 0x6fa   :  { %v10978_v20 = vpop.eup %10977 }
 0x6fb   :  { %v2972_v46 = vmul.f32 %v10978_v20, %v2968_v62  ;;  %v10980_v16 = vpop.eup %10979 }
 0x6fc   :  { %v2970_v19 = vsub.f32 1.0, %v10980_v16  ;;  %v2978_v45 = vmul.f32 %v10980_v16, %v13241_v23  ;;  %v17483_v16 = vld [vmem:[#allocation86_spill] sm:$0xff] }
 0x6fd   :  { %v13311_v52 = vadd.f32 %v2976_v11, %v2972_v46 }
 0x6fe   :  { %v10982_v17 = vpop.eup %10981 }
 0x6ff   :  { %v2973_v10 = vmul.f32 %v10982_v17, %v2969_v63  ;;  %v10984_v49 = vpop.eup %10983  ;;  %v1131_v63 = vadd.f32 %v17483_v16, %v12426_v0 }
 0x700   :  { %v2971_v53 = vsub.f32 1.0, %v10984_v49  ;;  %v2979_v5 = vmul.f32 %v10984_v49, %v13247_v55  ;;  %v13339_v55 = vld [vmem:[#allocation12 + $0x78] ss:$12 sps:$4 sm:$0xff]  }
 0x701   :  { %v13314_v34 = vadd.f32 %v2977_v40, %v2973_v10  ;;  %v17484_v10 = vld [vmem:[#allocation88_spill] sm:$0xff] }
 0x702   :  { %v10986_v15 = vpop.eup %10985 }
 0x703   :  { %v2999_v14 = vpack.c.bf16 %v13314_v34, %v13311_v52  ;;  %v2974_v6 = vmul.f32 %v10986_v15, %v2970_v19  ;;  %v17485_v15 = vld [vmem:[#allocation85_spill] sm:$0xff] }
 0x705   :  { %3034 = vmatmul.mubr.bf16.vlgmr.msra.gmra.mxu1 %v2999_v14  ;;  %10406 = vmatprep.mubr.bf16.mxu0 %v2999_v14  ;;  %v13319_v61 = vadd.f32 %v2978_v45, %v2974_v6 }
 0x706   :  { %v10988_v9 = vpop.eup %10987  ;;  %3043 = vmatprep.mubr.bf16.mxu1 %v17435_v18  ;;  %3205 = vmatpush1.bf16.msra.mxu1 %v13322_v4 }
 0x707   :  { %v2975_v8 = vmul.f32 %v10988_v9, %v2971_v53  ;;  %3206 = vmatprep.subr.bf16.mxu1 %v13326_v12  ;;  %v17486_v53 = vld [vmem:[#allocation67_spill] sm:$0xff] }
 0x708   :  { %v1324_v9 = vadd.f32 %v17486_v53, %v1131_v63 }
 0x709   :  { %v13329_v23 = vadd.f32 %v2979_v5, %v2975_v8  ;;  %v17487_v5 = vld [vmem:[#allocation90_spill] sm:$0xff] }
 0x70a   :  { %3207 = vmatpush1.bf16.msra.mxu1 %v13331_v28 }
 0x70b   :  { %v3000_v1 = vpack.c.bf16 %v13329_v23, %v13319_v61  ;;  %3208 = vmatprep.subr.bf16.mxu1 %v13336_v59 }
 0x70d   :  { %3044 = vmatmul.mubr.bf16.gmra.mxu1 %v3000_v1  ;;  %10407 = vmatmul.mubr.bf16.vlgmr.msra.gmra.mxu0 %v3000_v1 }
 0x70e   :  { %3209 = vmatpush1.bf16.msra.mxu1 %v13339_v55  ;;  %10411 = vmatpush3.bf16.msra.mxu0 %v13342_v41 }
 0x70f   :  { %3210 = vmatprep.subr.bf16.mxu1 %v13345_v44  ;;  %10412 = vmatprep.subr.bf16.mxu0 %v13348_v56 }
 0x710   :  { %3236 = vmatprep.mubr.bf16.mxu1 %v17435_v18 }
 0x712   :  { %3211 = vmatpush1.bf16.msra.mxu1 %v13352_v30  ;;  %10413 = vmatpush3.bf16.msra.mxu0 %v13348_v56 }
 0x713   :  { %3212 = vmatprep.subr.bf16.mxu1 %v13356_v32  ;;  %10414 = vmatprep.subr.bf16.mxu0 %v13359_v24 }
 0x716   :  { %3213 = vmatpush1.bf16.msra.mxu1 %v13362_v33  ;;  %10415 = vmatpush3.bf16.msra.mxu0 %v13359_v24 }
 0x717   :  { %3214 = vmatprep.subr.bf16.mxu1 %v13366_v35  ;;  %10416 = vmatprep.subr.bf16.mxu0 %v13369_v47 }
 0x71a   :  { %3215 = vmatpush1.bf16.msra.mxu1 %v13372_v31  ;;  %10417 = vmatpush3.bf16.msra.mxu0 %v13369_v47 }
 0x71b   :  { %3216 = vmatprep.subr.bf16.mxu1 %v13376_v54  ;;  %10418 = vmatprep.subr.bf16.mxu0 %v13379_v42 }
 0x71e   :  { %3217 = vmatpush1.bf16.msra.mxu1 %v13382_v13  ;;  %10419 = vmatpush3.bf16.msra.mxu0 %v13379_v42 }
 0x71f   :  { %3218 = vmatprep.subr.bf16.mxu1 %v13386_v36  ;;  %10420 = vmatprep.subr.bf16.mxu0 %v13389_v39 }
 0x722   :  { %3219 = vmatpush1.bf16.msra.mxu1 %v13392_v29  ;;  %10421 = vmatpush3.bf16.msra.mxu0 %v13389_v39 }
 0x723   :  { %10422 = vmatprep.subr.bf16.mxu0 %v13396_v21  ;;  %3407 = vmatprep.subr.bf16.mxu1 %v11569_v3 }
 0x726   :  { %10423 = vmatpush3.bf16.msra.mxu0 %v13396_v21 }
 0x727   :  { %10424 = vmatprep.subr.bf16.mxu0 %v13400_v25 }
 0x72a   :  { %10425 = vmatpush3.bf16.msra.mxu0 %v13400_v25 }
 0x72b   :  { %10430 = vmatprep.subr.bf16.mxu0 %v13342_v41 }
 0x7c5   :  { %v3035_v7 = vpop.f32.mrf.mxu1 }
 0x7c6   :  { %v3036_v51 = vadd.f32 %v3035_v7, %v12867_v58 }
 0x7c7   :  { %v3037_v26 = vpop.f32.mrf.mxu1 }
 0x7c8   :  { %v3103_v43 = vadd.f32 %v3036_v51, %v17482_v48  ;;  %v3038_v46 = vadd.f32 %v3037_v26, %v12877_v60 }
 0x7c9   :  { %v3039_v62 = vpop.f32.mrf.mxu1 }
 0x7ca   :  { %v9889_v20 = vmul.f32 -1.442695, %v3103_v43  ;;  %v3040_v11 = vadd.f32 %v3039_v62, %v12867_v58  ;;  %v3131_v14 = vadd.f32 %v3038_v46, %v17485_v15  ;;  %v17488_v62 = vld [vmem:[#allocation92_spill] sm:$0xff] }
 0x7cb   :  { %v3041_v17 = vpop.f32.mrf.mxu1 }
 0x7cc   :  { %10989 = vpow2.f32 %v9889_v20  ;;  %v3104_v40 = vadd.f32 %v3040_v11, %v17484_v10  ;;  %v3042_v49 = vadd.f32 %v3041_v17, %v12877_v60  ;;  %v9893_v26 = vmul.f32 -1.442695, %v3131_v14  ;;  %v17489_v11 = vld [vmem:[#allocation94_spill] sm:$0xff]  ;;  %v17490_v17 = vld [vmem:[#allocation91_spill] sm:$0xff] }
 0x7cd   :  { %v3045_v19 = vpop.f32.mrf.mxu1  ;;  %v1141_v20 = vadd.f32 %v17488_v62, %v12426_v0 }
 0x7ce   :  { %v9890_v6 = vmul.f32 -1.442695, %v3104_v40  ;;  %v3046_v45 = vadd.f32 %v3045_v19, %v12867_v58  ;;  %v3132_v3 = vadd.f32 %v3042_v49, %v1324_v9  ;;  %v17491_v19 = vld [vmem:[#allocation72_spill] sm:$0xff] }
 0x7cf   :  { %v3047_v8 = vpop.f32.mrf.mxu1  ;;  %v1334_v15 = vadd.f32 %v17491_v19, %v1141_v20 }
 0x7d0   :  { %10991 = vpow2.f32 %v9890_v6  ;;  %v3105_v1 = vadd.f32 %v3046_v45, %v17487_v5  ;;  %v3048_v7 = vadd.f32 %v3047_v8, %v12877_v60  ;;  %v9894_v63 = vmul.f32 -1.442695, %v3132_v3  ;;  %v10408_v8 = vpop.f32.mrf.mxu0 }
 0x7d1   :  { %v3049_v51 = vpop.f32.mrf.mxu1 }
 0x7d2   :  { %v9891_v48 = vmul.f32 -1.442695, %v3105_v1  ;;  %v3050_v43 = vadd.f32 %v3049_v51, %v12867_v58  ;;  %v3133_v10 = vadd.f32 %v3048_v7, %v17490_v17  ;;  %v3088_v7 = vpop.f32.mrf.mxu0 }
 0x7d3   :  { %v3051_v46 = vpop.f32.mrf.mxu1 }
 0x7d4   :  { %10993 = vpow2.f32 %v9891_v48  ;;  %v3106_v16 = vadd.f32 %v3050_v43, %v17489_v11  ;;  %v3052_v40 = vadd.f32 %v3051_v46, %v12877_v60  ;;  %v9895_v6 = vmul.f32 -1.442695, %v3133_v10  ;;  %v10409_v43 = vpop.f32.mrf.mxu0 }
 0x7d5   :  { %10995 = vpow2.f32 %v9893_v26  ;;  %v3089_v11 = vadd.f32 %v3088_v7, %v12930_v50 }
 0x7d6   :  { %v9892_v49 = vmul.f32 -1.442695, %v3106_v16  ;;  %v3134_v45 = vadd.f32 %v3052_v40, %v1334_v15  ;;  %v3091_v17 = vpop.f32.mrf.mxu0 }
 0x7d7   :  { %v3092_v15 = vadd.f32 %v3091_v17, %v12930_v50 }
 0x7d8   :  { %10997 = vpow2.f32 %v9892_v49  ;;  %v9896_v5 = vmul.f32 -1.442695, %v3134_v45  ;;  %v17492_v49 = vld [vmem:[#allocation128_spill] sm:$0xff] }
 0x7d9   :  { %v10990_v14 = vpop.eup %10989  ;;  %10999 = vpow2.f32 %v9894_v63 }
 0x7da   :  { %v3119_v53 = vadd.f32 1.0, %v10990_v14 }
 0x7dc   :  { %11001 = vrcp.f32 %v3119_v53 }
 0x7dd   :  { %v10992_v9 = vpop.eup %10991  ;;  %11003 = vpow2.f32 %v9895_v6 }
 0x7de   :  { %v3120_v1 = vadd.f32 1.0, %v10992_v9  ;;  %v3097_v9 = vadd.f32 %v10408_v8, %v12930_v50 }
 0x7e0   :  { %11005 = vrcp.f32 %v3120_v1 }
 0x7e1   :  { %v10994_v3 = vpop.eup %10993  ;;  %11007 = vpow2.f32 %v9896_v5  ;;  %v17493_v5 = vld [vmem:[#allocation129_spill] sm:$0xff] }
 0x7e2   :  { %v3121_v51 = vadd.f32 1.0, %v10994_v3  ;;  %v10996_v26 = vpop.eup %10995 }
 0x7e3   :  { %v3147_v20 = vadd.f32 1.0, %v10996_v26  ;;  %v17494_v26 = vld [vmem:[#allocation130_spill] sm:$0xff] }
 0x7e4   :  { %11009 = vrcp.f32 %v3121_v51 }
 0x7e5   :  { %v10998_v48 = vpop.eup %10997 }
 0x7e6   :  { %v11000_v62 = vpop.eup %10999  ;;  %v3122_v46 = vadd.f32 1.0, %v10998_v48 }
 0x7e7   :  { %v3148_v63 = vadd.f32 1.0, %v11000_v62  ;;  %v3100_v62 = vadd.f32 %v10409_v43, %v12930_v50 }
 0x7e8   :  { %11011 = vrcp.f32 %v3122_v46 }
 0x7e9   :  { %v11002_v16 = vpop.eup %11001  ;;  %11013 = vrcp.f32 %v3147_v20 }
 0x7ea   :  { %v11004_v10 = vpop.eup %11003  ;;  %v3159_v40 = vmul.f32 %v11002_v16, %v3089_v11  ;;  %11015 = vrcp.f32 %v3148_v63  ;;  %v17495_v16 = vld [vmem:[#allocation131_spill] sm:$0xff] }
 0x7eb   :  { %v3149_v6 = vadd.f32 1.0, %v11004_v10 }
 0x7ec   :  { %v3163_v19 = vadd.f32 %v3159_v40, %v17492_v49 }
 0x7ed   :  { %v11006_v14 = vpop.eup %11005 }
 0x7ee   :  { %v11008_v45 = vpop.eup %11007  ;;  %11017 = vtanh.f32 %v3163_v19  ;;  %v3160_v53 = vmul.f32 %v11006_v14, %v3092_v15 }
 0x7ef   :  { %11019 = vrcp.f32 %v3149_v6  ;;  %v3150_v7 = vadd.f32 1.0, %v11008_v45 }
 0x7f0   :  { %v3164_v1 = vadd.f32 %v3160_v53, %v17493_v5 }
 0x7f1   :  { %v11010_v3 = vpop.eup %11009 }
 0x7f2   :  { %v3161_v51 = vmul.f32 %v11010_v3, %v3097_v9  ;;  %11021 = vtanh.f32 %v3164_v1 }
 0x7f3   :  { %11023 = vrcp.f32 %v3150_v7 }
 0x7f4   :  { %v3165_v48 = vadd.f32 %v3161_v51, %v17494_v26 }
 0x7f5   :  { %v11012_v20 = vpop.eup %11011 }
 0x7f6   :  { %11025 = vtanh.f32 %v3165_v48  ;;  %v3162_v46 = vmul.f32 %v11012_v20, %v3100_v62  ;;  %v11014_v11 = vpop.eup %11013 }
 0x7f7   :  { %v11016_v17 = vpop.eup %11015  ;;  %v3171_v8 = vsub.f32 1.0, %v11014_v11  ;;  %v3179_v49 = vmul.f32 %v11014_v11, %v13311_v52 }
 0x7f8   :  { %v3166_v63 = vadd.f32 %v3162_v46, %v17495_v16  ;;  %v3172_v15 = vsub.f32 1.0, %v11016_v17  ;;  %v3180_v45 = vmul.f32 %v11016_v17, %v13314_v34 }
 0x7fa   :  { %11027 = vtanh.f32 %v3166_v63 }
 0x7fb   :  { %v11018_v10 = vpop.eup %11017 }
 0x7fc   :  { %v3175_v40 = vmul.f32 %v11018_v10, %v3171_v8  ;;  %v11020_v19 = vpop.eup %11019 }
 0x7fd   :  { %v3173_v5 = vsub.f32 1.0, %v11020_v19  ;;  %v3181_v51 = vmul.f32 %v11020_v19, %v13319_v61 }
 0x7fe   :  { %v13434_v14 = vadd.f32 %v3179_v49, %v3175_v40  ;;  %v17502_v40 = vld [vmem:[#allocation101_spill] sm:$0xff] }
 0x7ff   :  { %v11022_v6 = vpop.eup %11021  ;;  %v1161_v49 = vadd.f32 %v17502_v40, %v12426_v0 }
 0x800   :  { %v3176_v43 = vmul.f32 %v11022_v6, %v3172_v15  ;;  %v11024_v53 = vpop.eup %11023  ;;  %v17503_v15 = vld [vmem:[#allocation102_spill] sm:$0xff] }
 0x801   :  { %v3174_v52 = vsub.f32 1.0, %v11024_v53  ;;  %v3182_v62 = vmul.f32 %v11024_v53, %v13329_v23 }
 0x802   :  { %v13437_v9 = vadd.f32 %v3180_v45, %v3176_v43  ;;  %v17504_v45 = vld [vmem:[#allocation100_spill] sm:$0xff] }
 0x803   :  { %v11026_v1 = vpop.eup %11025 }
 0x804   :  { %v3202_v3 = vpack.c.bf16 %v13437_v9, %v13434_v14  ;;  %v3177_v7 = vmul.f32 %v11026_v1, %v3173_v5 }
 0x806   :  { %3237 = vmatmul.mubr.bf16.vlgmr.msra.gmra.mxu1 %v3202_v3  ;;  %10426 = vmatprep.mubr.bf16.mxu0 %v3202_v3  ;;  %v13442_v26 = vadd.f32 %v3181_v51, %v3177_v7  ;;  %v17505_v3 = vld [vmem:[#allocation82_spill] sm:$0xff] }
 0x807   :  { %v11028_v48 = vpop.eup %11027  ;;  %3246 = vmatprep.mubr.bf16.mxu1 %v17435_v18  ;;  %3408 = vmatpush1.bf16.msra.mxu1 %v13322_v4  ;;  %v1354_v7 = vadd.f32 %v17505_v3, %v1161_v49 }
 0x808   :  { %v3178_v34 = vmul.f32 %v11028_v48, %v3174_v52  ;;  %3409 = vmatprep.subr.bf16.mxu1 %v13326_v12 }
 0x80a   :  { %v13448_v20 = vadd.f32 %v3182_v62, %v3178_v34 }
 0x80b   :  { %3410 = vmatpush1.bf16.msra.mxu1 %v13331_v28  ;;  %v17496_v28 = vld [vmem:[#allocation95_spill] sm:$0xff] }
 0x80c   :  { %v3203_v61 = vpack.c.bf16 %v13448_v20, %v13442_v26  ;;  %3411 = vmatprep.subr.bf16.mxu1 %v13336_v59 }
 0x80e   :  { %3247 = vmatmul.mubr.bf16.gmra.mxu1 %v3203_v61  ;;  %10427 = vmatmul.mubr.bf16.vlgmr.msra.gmra.mxu0 %v3203_v61 }
 0x80f   :  { %3412 = vmatpush1.bf16.msra.mxu1 %v13339_v55  ;;  %10431 = vmatpush3.bf16.msra.mxu0 %v13342_v41 }
 0x810   :  { %3413 = vmatprep.subr.bf16.mxu1 %v13345_v44  ;;  %10432 = vmatprep.subr.bf16.mxu0 %v13348_v56 }
 0x811   :  { %3439 = vmatprep.mubr.bf16.mxu1 %v17435_v18 }
 0x813   :  { %3414 = vmatpush1.bf16.msra.mxu1 %v13352_v30  ;;  %10433 = vmatpush3.bf16.msra.mxu0 %v13348_v56  ;;  %v17497_v30 = vld [vmem:[#allocation97_spill] sm:$0xff] }
 0x814   :  { %3415 = vmatprep.subr.bf16.mxu1 %v13356_v32  ;;  %10434 = vmatprep.subr.bf16.mxu0 %v13359_v24  ;;  %v1151_v32 = vadd.f32 %v17497_v30, %v12426_v0 }
 0x817   :  { %3416 = vmatpush1.bf16.msra.mxu1 %v13362_v33  ;;  %10435 = vmatpush3.bf16.msra.mxu0 %v13359_v24  ;;  %v17498_v33 = vld [vmem:[#allocation98_spill] sm:$0xff] }
 0x818   :  { %3417 = vmatprep.subr.bf16.mxu1 %v13366_v35  ;;  %10436 = vmatprep.subr.bf16.mxu0 %v13369_v47 }
 0x81b   :  { %3418 = vmatpush1.bf16.msra.mxu1 %v13372_v31  ;;  %10437 = vmatpush3.bf16.msra.mxu0 %v13369_v47 }
 0x81c   :  { %3419 = vmatprep.subr.bf16.mxu1 %v13376_v54  ;;  %10438 = vmatprep.subr.bf16.mxu0 %v13379_v42  ;;  %v17499_v54 = vld [vmem:[#allocation96_spill] sm:$0xff] }
 0x81f   :  { %3420 = vmatpush1.bf16.msra.mxu1 %v13382_v13  ;;  %10439 = vmatpush3.bf16.msra.mxu0 %v13379_v42 }
 0x820   :  { %3421 = vmatprep.subr.bf16.mxu1 %v13386_v36  ;;  %10440 = vmatprep.subr.bf16.mxu0 %v13389_v39 }
 0x823   :  { %3422 = vmatpush1.bf16.msra.mxu1 %v13392_v29  ;;  %10441 = vmatpush3.bf16.msra.mxu0 %v13389_v39  ;;  %v17500_v39 = vld [vmem:[#allocation77_spill] sm:$0xff] }
 0x824   :  { %10442 = vmatprep.subr.bf16.mxu0 %v13396_v21  ;;  %v1344_v29 = vadd.f32 %v17500_v39, %v1151_v32 }
 0x827   :  { %10443 = vmatpush3.bf16.msra.mxu0 %v13396_v21 }
 0x828   :  { %10444 = vmatprep.subr.bf16.mxu0 %v13400_v25 }
 0x82b   :  { %10445 = vmatpush3.bf16.msra.mxu0 %v13400_v25  ;;  %v17501_v25 = vld [vmem:[#allocation99_spill] sm:$0xff] }
 0x8c6   :  { %v3238_v4 = vpop.f32.mrf.mxu1 }
 0x8c7   :  { %v3239_v12 = vadd.f32 %v3238_v4, %v12867_v58 }
 0x8c8   :  { %v3240_v23 = vpop.f32.mrf.mxu1 }
 0x8c9   :  { %v3306_v59 = vadd.f32 %v3239_v12, %v17496_v28  ;;  %v3241_v44 = vadd.f32 %v3240_v23, %v12877_v60 }
 0x8ca   :  { %v3242_v55 = vpop.f32.mrf.mxu1 }
 0x8cb   :  { %v9897_v41 = vmul.f32 -1.442695, %v3306_v59  ;;  %v3243_v56 = vadd.f32 %v3242_v55, %v12867_v58  ;;  %v3334_v42 = vadd.f32 %v3241_v44, %v17499_v54 }
 0x8cc   :  { %v3244_v24 = vpop.f32.mrf.mxu1 }
 0x8cd   :  { %11029 = vpow2.f32 %v9897_v41  ;;  %v3307_v35 = vadd.f32 %v3243_v56, %v17498_v33  ;;  %v3245_v47 = vadd.f32 %v3244_v24, %v12877_v60  ;;  %v9901_v17 = vmul.f32 -1.442695, %v3334_v42 }
 0x8ce   :  { %v3248_v31 = vpop.f32.mrf.mxu1  ;;  %v10428_v61 = vpop.f32.mrf.mxu0 }
 0x8cf   :  { %v9898_v13 = vmul.f32 -1.442695, %v3307_v35  ;;  %v3249_v36 = vadd.f32 %v3248_v31, %v12867_v58  ;;  %v3335_v11 = vadd.f32 %v3245_v47, %v1344_v29 }
 0x8d0   :  { %v3250_v21 = vpop.f32.mrf.mxu1  ;;  %v3291_v28 = vpop.f32.mrf.mxu0 }
 0x8d1   :  { %11031 = vpow2.f32 %v9898_v13  ;;  %v3308_v46 = vadd.f32 %v3249_v36, %v17501_v25  ;;  %v3251_v16 = vadd.f32 %v3250_v21, %v12877_v60  ;;  %v9902_v43 = vmul.f32 -1.442695, %v3335_v11 }
 0x8d2   :  { %v3252_v63 = vpop.f32.mrf.mxu1  ;;  %v10429_v44 = vpop.f32.mrf.mxu0  ;;  %v3292_v24 = vadd.f32 %v3291_v28, %v12930_v50  ;;  %v3300_v25 = vadd.f32 %v10428_v61, %v12930_v50 }
 0x8d3   :  { %v9899_v8 = vmul.f32 -1.442695, %v3308_v46  ;;  %v3253_v10 = vadd.f32 %v3252_v63, %v12867_v58  ;;  %v3336_v53 = vadd.f32 %v3251_v16, %v17504_v45 }
 0x8d4   :  { %v3254_v19 = vpop.f32.mrf.mxu1  ;;  %v3294_v47 = vpop.f32.mrf.mxu0 }
 0x8d5   :  { %11033 = vpow2.f32 %v9899_v8  ;;  %v3309_v6 = vadd.f32 %v3253_v10, %v17503_v15  ;;  %v3255_v5 = vadd.f32 %v3254_v19, %v12877_v60  ;;  %v9903_v52 = vmul.f32 -1.442695, %v3336_v53 }
 0x8d6   :  { %11035 = vpow2.f32 %v9901_v17  ;;  %v3295_v13 = vadd.f32 %v3294_v47, %v12930_v50  ;;  %v10728_v47 = vld [vmem:[#allocation16 + $0x24] ss:$8 sps:$4 sm:$0xff]  }
 0x8d7   :  { %v9900_v1 = vmul.f32 -1.442695, %v3309_v6  ;;  %v3337_v48 = vadd.f32 %v3255_v5, %v1354_v7 }
 0x8d9   :  { %11037 = vpow2.f32 %v9900_v1  ;;  %v9904_v4 = vmul.f32 -1.442695, %v3337_v48 }
 0x8da   :  { %v11030_v51 = vpop.eup %11029  ;;  %11039 = vpow2.f32 %v9902_v43 }
 0x8db   :  { %v3322_v34 = vadd.f32 1.0, %v11030_v51 }
 0x8dd   :  { %11041 = vrcp.f32 %v3322_v34 }
 0x8de   :  { %v11032_v62 = vpop.eup %11031  ;;  %11043 = vpow2.f32 %v9903_v52 }
 0x8df   :  { %v3323_v12 = vadd.f32 1.0, %v11032_v62 }
 0x8e1   :  { %11045 = vrcp.f32 %v3323_v12 }
 0x8e2   :  { %v11034_v23 = vpop.eup %11033  ;;  %11047 = vpow2.f32 %v9904_v4 }
 0x8e3   :  { %v3324_v59 = vadd.f32 1.0, %v11034_v23  ;;  %v11036_v55 = vpop.eup %11035 }
 0x8e4   :  { %v3350_v30 = vadd.f32 1.0, %v11036_v55  ;;  %v10714_v55 = vld [vmem:[#allocation16 + $0x64] ss:$8 sps:$4 sm:$0xff]  }
 0x8e5   :  { %11049 = vrcp.f32 %v3324_v59  ;;  %v10709_v59 = vld [vmem:[#allocation16 + $0x70] ss:$8 sps:$4 sm:$0xff]  }
 0x8e6   :  { %v11038_v41 = vpop.eup %11037 }
 0x8e7   :  { %v11040_v56 = vpop.eup %11039  ;;  %v3325_v32 = vadd.f32 1.0, %v11038_v41  ;;  %v10712_v41 = vld [vmem:[#allocation16 + $0x60] ss:$8 sps:$4 sm:$0xff]  }
 0x8e8   :  { %v3351_v35 = vadd.f32 1.0, %v11040_v56  ;;  %v10715_v56 = vld [vmem:[#allocation16 + $0x50] ss:$8 sps:$4 sm:$0xff]  }
 0x8e9   :  { %11051 = vrcp.f32 %v3325_v32  ;;  %v10721_v32 = vld [vmem:[%s17506_s29 + $0x38] sm:$0xff]  }
 0x8ea   :  { %v11042_v33 = vpop.eup %11041  ;;  %11053 = vrcp.f32 %v3350_v30  ;;  %v10718_v30 = vld [vmem:[#allocation16 + $0x40] ss:$8 sps:$4 sm:$0xff]   ;;  %10450 = vmatprep.subr.bf16.mxu1 %v10721_v32 }
 0x8eb   :  { %v11044_v31 = vpop.eup %11043  ;;  %v3362_v54 = vmul.f32 %v11042_v33, %v3292_v24  ;;  %11055 = vrcp.f32 %v3351_v35  ;;  %v10724_v24 = vld [vmem:[#allocation16 + $0x34] ss:$8 sps:$4 sm:$0xff]   ;;  %v10722_v33 = vld [vmem:[#allocation16 + $0x30] ss:$8 sps:$4 sm:$0xff]   ;;  %v10725_v35 = vld [vmem:[%s17506_s29 + $0x30] sm:$0xff]  }
 0x8ec   :  { %v3352_v39 = vadd.f32 1.0, %v11044_v31  ;;  %v10726_v31 = vld [vmem:[#allocation16 + $0x20] ss:$8 sps:$4 sm:$0xff]  }
 0x8ed   :  { %v3366_v42 = vadd.f32 %v3362_v54, %v12887_v38  ;;  %v3303_v38 = vadd.f32 %v10429_v44, %v12930_v50  ;;  %v10717_v44 = vld [vmem:[#allocation16 + $0x54] ss:$8 sps:$4 sm:$0xff]  }
 0x8ee   :  { %v11046_v36 = vpop.eup %11045  ;;  %v10729_v54 = vld [vmem:[%s17506_s29 + $0x28] sm:$0xff]  }
 0x8ef   :  { %v11048_v29 = vpop.eup %11047  ;;  %11057 = vtanh.f32 %v3366_v42  ;;  %v3363_v21 = vmul.f32 %v11046_v36, %v3295_v13  ;;  %v10732_v42 = vld [vmem:[#allocation16 + $0x14] ss:$8 sps:$4 sm:$0xff]   ;;  %v10730_v13 = vld [vmem:[#allocation16 + $0x10] ss:$8 sps:$4 sm:$0xff]  }
 0x8f0   :  { %11059 = vrcp.f32 %v3352_v39  ;;  %v3353_v16 = vadd.f32 1.0, %v11048_v29  ;;  %v10733_v36 = vld [vmem:[%s17506_s29 + $0x20] sm:$0xff]   ;;  %v10734_v39 = vld [vmem:[#allocation16] ss:$8 sps:$4 sm:$0xff]   ;;  %v10736_v29 = vld [vmem:[#allocation16 + $0x4] ss:$8 sps:$4 sm:$0xff]  }
 0x8f1   :  { %v3367_v46 = vadd.f32 %v3363_v21, %v12896_v37  ;;  %v10737_v21 = vld [vmem:[%s17506_s29 + $0x18] sm:$0xff]  }
 0x8f2   :  { %v11050_v11 = vpop.eup %11049 }
 0x8f3   :  { %v3364_v63 = vmul.f32 %v11050_v11, %v3300_v25  ;;  %11061 = vtanh.f32 %v3367_v46  ;;  %v3719_v25 = vld [vmem:[%s17507_s18] sm:$0xff]  ;;  %v3720_v46 = vld [vmem:[%s17507_s18 + $0x8] sm:$0xff] }
 0x8f4   :  { %11063 = vrcp.f32 %v3353_v16  ;;  %v3735_v11 = vpack.c.bf16 %v3720_v46, %v3719_v25  ;;  %v10738_v16 = vld [vmem:[%s17506_s29 + $0x10] sm:$0xff]   ;;  %v17514_v25 = vld [vmem:[#allocation108_spill] sm:$0xff] }
 0x8f5   :  { %v3368_v17 = vadd.f32 %v3364_v63, %v12904_v27  ;;  %v10739_v63 = vld [vmem:[%s17506_s29 + $0x8] sm:$0xff]  }
 0x8f6   :  { %v11052_v8 = vpop.eup %11051 }
 0x8f7   :  { %11065 = vtanh.f32 %v3368_v17  ;;  %v3365_v10 = vmul.f32 %v11052_v8, %v3303_v38  ;;  %v11054_v40 = vpop.eup %11053  ;;  %v3721_v17 = vld [vmem:[%s17507_s18 + $0x10] sm:$0xff]  ;;  %v3722_v38 = vld [vmem:[%s17507_s18 + $0x18] sm:$0xff] }
 0x8f8   :  { %v11056_v19 = vpop.eup %11055  ;;  %v3374_v15 = vsub.f32 1.0, %v11054_v40  ;;  %v3382_v43 = vmul.f32 %v11054_v40, %v13434_v14  ;;  %v3736_v8 = vpack.c.bf16 %v3722_v38, %v3721_v17  ;;  %v10743_v40 = vld [vmem:[#allocation19 + $0x74] ss:$8 sps:$4 sm:$0xff]  }
 0x8f9   :  { %v3369_v49 = vadd.f32 %v3365_v10, %v12912_v22  ;;  %v3375_v53 = vsub.f32 1.0, %v11056_v19  ;;  %v3383_v3 = vmul.f32 %v11056_v19, %v13437_v9  ;;  %v10740_v10 = vld [vmem:[%s17506_s29] sm:$0xff]   ;;  %v3724_v19 = vld [vmem:[%s17507_s18 + $0x28] sm:$0xff] }
 0x8fb   :  { %11067 = vtanh.f32 %v3369_v49  ;;  %v3723_v49 = vld [vmem:[%s17507_s18 + $0x20] sm:$0xff] }
 0x8fc   :  { %v11058_v37 = vpop.eup %11057 }
 0x8fd   :  { %v3378_v6 = vmul.f32 %v11058_v37, %v3374_v15  ;;  %v11060_v45 = vpop.eup %11059  ;;  %v3737_v15 = vpack.c.bf16 %v3724_v19, %v3723_v49  ;;  %v3725_v37 = vld [vmem:[%s17507_s18 + $0x30] sm:$0xff]  ;;  %v17516_v49 = vld [vmem:[#allocation109_spill] sm:$0xff] }
 0x8fe   :  { %v3376_v52 = vsub.f32 1.0, %v11060_v45  ;;  %v3384_v62 = vmul.f32 %v11060_v45, %v13442_v26  ;;  %v10711_v26 = vld [vmem:[#allocation16 + $0x74] ss:$8 sps:$4 sm:$0xff]   ;;  %v1181_v19 = vadd.f32 %v17516_v49, %v12426_v0 }
 0x8ff   :  { %v13510_v5 = vadd.f32 %v3382_v43, %v3378_v6  ;;  %3851 = vmatprep.subr.bf16.mxu0 %v10711_v26  ;;  %v3726_v6 = vld [vmem:[%s17507_s18 + $0x38] sm:$0xff]  ;;  %v3727_v45 = vld [vmem:[%s17507_s18 + $0x40] sm:$0xff] }
 0x900   :  { %v11062_v27 = vpop.eup %11061  ;;  %v3738_v43 = vpack.c.bf16 %v3726_v6, %v3725_v37  ;;  %v17517_v37 = vld [vmem:[#allocation110_spill] sm:$0xff] }
 0x901   :  { %v3379_v1 = vmul.f32 %v11062_v27, %v3375_v53  ;;  %v11064_v7 = vpop.eup %11063  ;;  %v3728_v53 = vld [vmem:[%s17507_s18 + $0x48] sm:$0xff] }
 0x902   :  { %v3377_v14 = vsub.f32 1.0, %v11064_v7  ;;  %v3385_v12 = vmul.f32 %v11064_v7, %v13448_v20  ;;  %v10720_v20 = vld [vmem:[#allocation16 + $0x44] ss:$8 sps:$4 sm:$0xff]   ;;  %v3739_v27 = vpack.c.bf16 %v3728_v53, %v3727_v45 }
 0x903   :  { %v13513_v51 = vadd.f32 %v3383_v3, %v3379_v1  ;;  %v3729_v1 = vld [vmem:[%s17507_s18 + $0x50] sm:$0xff]  ;;  %v3730_v3 = vld [vmem:[%s17507_s18 + $0x58] sm:$0xff] }
 0x904   :  { %v11066_v22 = vpop.eup %11065  ;;  %v3740_v7 = vpack.c.bf16 %v3730_v3, %v3729_v1  ;;  %v17518_v1 = vld [vmem:[#allocation93_spill] sm:$0xff] }
 0x905   :  { %v3405_v48 = vpack.c.bf16 %v13513_v51, %v13510_v5  ;;  %v3380_v34 = vmul.f32 %v11066_v22, %v3376_v52  ;;  %v3731_v52 = vld [vmem:[%s17507_s18 + $0x60] sm:$0xff]  ;;  %v3732_v22 = vld [vmem:[%s17507_s18 + $0x68] sm:$0xff]  ;;  %v1374_v3 = vadd.f32 %v17518_v1, %v1181_v19 }
 0x907   :  { %3440 = vmatmul.mubr.bf16.vlgmr.msra.gmra.mxu1 %v3405_v48  ;;  %10446 = vmatprep.mubr.bf16.mxu0 %v3405_v48  ;;  %v13518_v61 = vadd.f32 %v3384_v62, %v3380_v34  ;;  %v3741_v48 = vpack.c.bf16 %v3732_v22, %v3731_v52  ;;  %v3733_v34 = vld [vmem:[%s17507_s18 + $0x70] sm:$0xff]  ;;  %v3734_v62 = vld [vmem:[%s17507_s18 + $0x78] sm:$0xff] }
 0x908   :  { %v11068_v4 = vpop.eup %11067  ;;  %3449 = vmatprep.mubr.bf16.mxu1 %v17435_v18  ;;  %10451 = vmatpush3.bf16.msra.mxu1 %v10721_v32  ;;  %v17510_v32 = vld [vmem:[#allocation106_spill] sm:$0xff] }
 0x909   :  { %v3381_v9 = vmul.f32 %v11068_v4, %v3377_v14  ;;  %10452 = vmatprep.subr.bf16.mxu1 %v10725_v35  ;;  %v3742_v14 = vpack.c.bf16 %v3734_v62, %v3733_v34 }
 0x90b   :  { %v13522_v23 = vadd.f32 %v3385_v12, %v3381_v9 }
 0x90c   :  { %10453 = vmatpush3.bf16.msra.mxu1 %v10725_v35 }
 0x90d   :  { %v3406_v28 = vpack.c.bf16 %v13522_v23, %v13518_v61  ;;  %10454 = vmatprep.subr.bf16.mxu1 %v10729_v54 }
 0x90f   :  { %3450 = vmatmul.mubr.bf16.gmra.mxu1 %v3406_v28  ;;  %10447 = vmatmul.mubr.bf16.vlgmr.msra.gmra.mxu0 %v3406_v28  ;;  %v17508_v28 = vld [vmem:[#allocation103_spill] sm:$0xff] }
 0x910   :  { %3883 = vmatprep.mubr.bf16.mxu0 %v17435_v18  ;;  %3852 = vmatpush1.bf16.msra.mxu0 %v10709_v59 }
 0x911   :  { %3853 = vmatprep.subr.bf16.mxu0 %v10714_v55  ;;  %10455 = vmatpush3.bf16.msra.mxu1 %v10729_v54 }
 0x912   :  { %10456 = vmatprep.subr.bf16.mxu1 %v10733_v36 }
 0x914   :  { %3854 = vmatpush1.bf16.msra.mxu0 %v10712_v41 }
 0x915   :  { %3855 = vmatprep.subr.bf16.mxu0 %v10717_v44  ;;  %10457 = vmatpush3.bf16.msra.mxu1 %v10733_v36 }
 0x916   :  { %10458 = vmatprep.subr.bf16.mxu1 %v10737_v21 }
 0x918   :  { %3856 = vmatpush1.bf16.msra.mxu0 %v10715_v56  ;;  %v17509_v56 = vld [vmem:[#allocation105_spill] sm:$0xff] }
 0x919   :  { %3857 = vmatprep.subr.bf16.mxu0 %v10720_v20  ;;  %10459 = vmatpush3.bf16.msra.mxu1 %v10737_v21  ;;  %v1171_v20 = vadd.f32 %v17509_v56, %v12426_v0 }
 0x91a   :  { %10460 = vmatprep.subr.bf16.mxu1 %v10738_v16 }
 0x91c   :  { %3858 = vmatpush1.bf16.msra.mxu0 %v10718_v30 }
 0x91d   :  { %3859 = vmatprep.subr.bf16.mxu0 %v10724_v24  ;;  %10461 = vmatpush3.bf16.msra.mxu1 %v10738_v16 }
 0x91e   :  { %10462 = vmatprep.subr.bf16.mxu1 %v10739_v63 }
 0x920   :  { %3860 = vmatpush1.bf16.msra.mxu0 %v10722_v33 }
 0x921   :  { %3861 = vmatprep.subr.bf16.mxu0 %v10728_v47  ;;  %10463 = vmatpush3.bf16.msra.mxu1 %v10739_v63  ;;  %v17511_v47 = vld [vmem:[#allocation104_spill] sm:$0xff] }
 0x922   :  { %10464 = vmatprep.subr.bf16.mxu1 %v10740_v10 }
 0x924   :  { %3862 = vmatpush1.bf16.msra.mxu0 %v10726_v31 }
 0x925   :  { %3863 = vmatprep.subr.bf16.mxu0 %v10732_v42  ;;  %10465 = vmatpush3.bf16.msra.mxu1 %v10740_v10  ;;  %v17515_v10 = vld [vmem:[#allocation89_spill] sm:$0xff] }
 0x926   :  { %4104 = vmatprep.subr.bf16.mxu1 %v10743_v40 }
 0x928   :  { %3864 = vmatpush1.bf16.msra.mxu0 %v10730_v13  ;;  %v17512_v13 = vld [vmem:[#allocation87_spill] sm:$0xff] }
 0x929   :  { %3865 = vmatprep.subr.bf16.mxu0 %v10736_v29  ;;  %v1364_v36 = vadd.f32 %v17512_v13, %v1171_v20 }
 0x92c   :  { %3866 = vmatpush1.bf16.msra.mxu0 %v10734_v39  ;;  %v17513_v39 = vld [vmem:[#allocation107_spill] sm:$0xff] }
 0x92d   :  { %v1177_v29 = vadd.f32 %v17513_v39, %v12426_v0 }
 0x92f   :  { %3884 = vmatmul.mubr.bf16.vlgmr.msra.gmra.mxu0 %v3735_v11  ;;  %v1370_v40 = vadd.f32 %v17515_v10, %v1177_v29 }
 0x930   :  { %3893 = vmatprep.mubr.bf16.mxu0 %v17435_v18 }
 0x937   :  { %3894 = vmatmul.mubr.bf16.gmra.mxu0 %v3736_v8 }
 0x938   :  { %3903 = vmatprep.mubr.bf16.mxu0 %v17435_v18 }
 0x93f   :  { %3904 = vmatmul.mubr.bf16.gmra.mxu0 %v3737_v15 }
 0x940   :  { %3913 = vmatprep.mubr.bf16.mxu0 %v17435_v18 }
 0x947   :  { %3914 = vmatmul.mubr.bf16.gmra.mxu0 %v3738_v43 }
 0x948   :  { %3923 = vmatprep.mubr.bf16.mxu0 %v17435_v18 }
 0x94f   :  { %3924 = vmatmul.mubr.bf16.gmra.mxu0 %v3739_v27 }
 0x950   :  { %3933 = vmatprep.mubr.bf16.mxu0 %v17435_v18 }
 0x957   :  { %3934 = vmatmul.mubr.bf16.gmra.mxu0 %v3740_v7 }
 0x958   :  { %3943 = vmatprep.mubr.bf16.mxu0 %v17435_v18 }
 0x95f   :  { %3944 = vmatmul.mubr.bf16.gmra.mxu0 %v3741_v48 }
 0x960   :  { %3953 = vmatprep.mubr.bf16.mxu0 %v17435_v18 }
 0x967   :  { %3954 = vmatmul.mubr.bf16.gmra.mxu0 %v3742_v14 }
 0x9c7   :  { %v3441_v4 = vpop.f32.mrf.mxu1 }
 0x9c8   :  { %v3442_v9 = vadd.f32 %v3441_v4, %v12867_v58 }
 0x9c9   :  { %v3443_v12 = vpop.f32.mrf.mxu1 }
 0x9ca   :  { %v3509_v26 = vadd.f32 %v3442_v9, %v17508_v28  ;;  %v3444_v41 = vadd.f32 %v3443_v12, %v12877_v60 }
 0x9cb   :  { %v3445_v59 = vpop.f32.mrf.mxu1 }
 0x9cc   :  { %v9905_v55 = vmul.f32 -1.442695, %v3509_v26  ;;  %v3446_v44 = vadd.f32 %v3445_v59, %v12867_v58  ;;  %v3537_v31 = vadd.f32 %v3444_v41, %v17511_v47 }
 0x9cd   :  { %v3447_v30 = vpop.f32.mrf.mxu1 }
 0x9ce   :  { %11069 = vpow2.f32 %v9905_v55  ;;  %v3510_v24 = vadd.f32 %v3446_v44, %v17510_v32  ;;  %v3448_v33 = vadd.f32 %v3447_v30, %v12877_v60  ;;  %v9909_v17 = vmul.f32 -1.442695, %v3537_v31 }
 0x9cf   :  { %v3451_v35 = vpop.f32.mrf.mxu1  ;;  %v10448_v48 = vpop.f32.mrf.mxu0 }
 0x9d0   :  { %v9906_v54 = vmul.f32 -1.442695, %v3510_v24  ;;  %v3452_v42 = vadd.f32 %v3451_v35, %v12867_v58  ;;  %v3538_v11 = vadd.f32 %v3448_v33, %v1364_v36 }
 0x9d1   :  { %v3453_v21 = vpop.f32.mrf.mxu1  ;;  %v3494_v4 = vpop.f32.mrf.mxu0 }
 0x9d2   :  { %11071 = vpow2.f32 %v9906_v54  ;;  %v3511_v46 = vadd.f32 %v3452_v42, %v17514_v25  ;;  %v3454_v16 = vadd.f32 %v3453_v21, %v12877_v60  ;;  %v9910_v43 = vmul.f32 -1.442695, %v3538_v11  ;;  %v17519_v21 = vld [vmem:[#allocation132_spill] sm:$0xff] }
 0x9d3   :  { %v3455_v63 = vpop.f32.mrf.mxu1  ;;  %v10449_v28 = vpop.f32.mrf.mxu0  ;;  %v3495_v41 = vadd.f32 %v3494_v4, %v12930_v50  ;;  %v3503_v42 = vadd.f32 %v10448_v48, %v12930_v50  ;;  %v10749_v4 = vld [vmem:[#allocation19 + $0x54] ss:$8 sps:$4 sm:$0xff]  }
 0x9d4   :  { %v9907_v38 = vmul.f32 -1.442695, %v3511_v46  ;;  %v3456_v8 = vadd.f32 %v3455_v63, %v12867_v58  ;;  %v3539_v45 = vadd.f32 %v3454_v16, %v1370_v40  ;;  %v17520_v63 = vld [vmem:[#allocation133_spill] sm:$0xff] }
 0x9d5   :  { %v3457_v15 = vpop.f32.mrf.mxu1  ;;  %v3497_v20 = vpop.f32.mrf.mxu0 }
 0x9d6   :  { %11073 = vpow2.f32 %v9907_v38  ;;  %v3512_v6 = vadd.f32 %v3456_v8, %v17517_v37  ;;  %v3458_v53 = vadd.f32 %v3457_v15, %v12877_v60  ;;  %v9911_v58 = vmul.f32 -1.442695, %v3539_v45 }
 0x9d7   :  { %11075 = vpow2.f32 %v9909_v17  ;;  %v3498_v33 = vadd.f32 %v3497_v20, %v12930_v50 }
 0x9d8   :  { %v9908_v27 = vmul.f32 -1.442695, %v3512_v6  ;;  %v3540_v52 = vadd.f32 %v3458_v53, %v1374_v3 }
 0x9da   :  { %11077 = vpow2.f32 %v9908_v27  ;;  %v9912_v34 = vmul.f32 -1.442695, %v3540_v52 }
 0x9db   :  { %v11070_v7 = vpop.eup %11069  ;;  %11079 = vpow2.f32 %v9910_v43 }
 0x9dc   :  { %v3525_v22 = vadd.f32 1.0, %v11070_v7 }
 0x9de   :  { %11081 = vrcp.f32 %v3525_v22 }
 0x9df   :  { %v11072_v0 = vpop.eup %11071  ;;  %11083 = vpow2.f32 %v9911_v58 }
 0x9e0   :  { %v3526_v62 = vadd.f32 1.0, %v11072_v0 }
 0x9e2   :  { %11085 = vrcp.f32 %v3526_v62 }
 0x9e3   :  { %v11074_v14 = vpop.eup %11073  ;;  %11087 = vpow2.f32 %v9912_v34  ;;  %v10741_v34 = vld [vmem:[#allocation19 + $0x70] ss:$8 sps:$4 sm:$0xff]  }
 0x9e4   :  { %v3527_v60 = vadd.f32 1.0, %v11074_v14  ;;  %v11076_v9 = vpop.eup %11075  ;;  %v10746_v14 = vld [vmem:[#allocation19 + $0x64] ss:$8 sps:$4 sm:$0xff]  }
 0x9e5   :  { %v3553_v59 = vadd.f32 1.0, %v11076_v9  ;;  %v10750_v9 = vld [vmem:[#allocation19 + $0x40] ss:$8 sps:$4 sm:$0xff]  }
 0x9e6   :  { %11089 = vrcp.f32 %v3527_v60  ;;  %v10752_v60 = vld [vmem:[#allocation19 + $0x44] ss:$8 sps:$4 sm:$0xff]  }
 0x9e7   :  { %v11078_v12 = vpop.eup %11077 }
 0x9e8   :  { %v11080_v26 = vpop.eup %11079  ;;  %v3528_v55 = vadd.f32 1.0, %v11078_v12  ;;  %v10755_v12 = vld [vmem:[#allocation19 + $0x34] ss:$8 sps:$4 sm:$0xff]  }
 0x9e9   :  { %v3554_v56 = vadd.f32 1.0, %v11080_v26  ;;  %v10756_v26 = vld [vmem:[#allocation19 + $0x20] ss:$8 sps:$4 sm:$0xff]  }
 0x9ea   :  { %11091 = vrcp.f32 %v3528_v55  ;;  %v10759_v55 = vld [vmem:[#allocation19 + $0x10] ss:$8 sps:$4 sm:$0xff]  }
 0x9eb   :  { %v11082_v44 = vpop.eup %11081  ;;  %11093 = vrcp.f32 %v3553_v59  ;;  %v10761_v59 = vld [vmem:[#allocation19 + $0x14] ss:$8 sps:$4 sm:$0xff]  }
 0x9ec   :  { %v11084_v30 = vpop.eup %11083  ;;  %v3565_v32 = vmul.f32 %v11082_v44, %v3495_v41  ;;  %11095 = vrcp.f32 %v3554_v56  ;;  %v10764_v41 = vld [vmem:[#allocation19 + $0x4] ss:$8 sps:$4 sm:$0xff]   ;;  %v10762_v44 = vld [vmem:[#allocation19] ss:$8 sps:$4 sm:$0xff]  }
 0x9ed   :  { %v3555_v47 = vadd.f32 1.0, %v11084_v30 }
 0x9ee   :  { %v3569_v24 = vadd.f32 %v3565_v32, %v12916_v2  ;;  %v3506_v2 = vadd.f32 %v10449_v28, %v12930_v50  ;;  %v10758_v28 = vld [vmem:[#allocation19 + $0x24] ss:$8 sps:$4 sm:$0xff]  }
 0x9ef   :  { %v11086_v35 = vpop.eup %11085  ;;  %v3885_v56 = vpop.f32.mrf.mxu0 }
 0x9f0   :  { %v11088_v31 = vpop.eup %11087  ;;  %11097 = vtanh.f32 %v3569_v24  ;;  %v3566_v54 = vmul.f32 %v11086_v35, %v3498_v33 }
 0x9f1   :  { %11099 = vrcp.f32 %v3555_v47  ;;  %v3556_v39 = vadd.f32 1.0, %v11088_v31  ;;  %v3887_v20 = vpop.f32.mrf.mxu0 }
 0x9f2   :  { %v3570_v13 = vadd.f32 %v3566_v54, %v12920_v57 }
 0x9f3   :  { %v11090_v36 = vpop.eup %11089  ;;  %v3889_v30 = vpop.f32.mrf.mxu0 }
 0x9f4   :  { %v3567_v29 = vmul.f32 %v11090_v36, %v3503_v42  ;;  %11101 = vtanh.f32 %v3570_v13 }
 0x9f5   :  { %11103 = vrcp.f32 %v3556_v39  ;;  %v3891_v32 = vpop.f32.mrf.mxu0 }
 0x9f6   :  { %v3571_v25 = vadd.f32 %v3567_v29, %v17519_v21 }
 0x9f7   :  { %v11092_v46 = vpop.eup %11091  ;;  %v3895_v24 = vpop.f32.mrf.mxu0 }
 0x9f8   :  { %11105 = vtanh.f32 %v3571_v25  ;;  %v3568_v11 = vmul.f32 %v11092_v46, %v3506_v2  ;;  %v11094_v16 = vpop.eup %11093 }
 0x9f9   :  { %v11096_v38 = vpop.eup %11095  ;;  %v3577_v8 = vsub.f32 1.0, %v11094_v16  ;;  %v3585_v40 = vmul.f32 %v11094_v16, %v13510_v5  ;;  %v3897_v33 = vpop.f32.mrf.mxu0 }
 0x9fa   :  { %v3572_v17 = vadd.f32 %v3568_v11, %v17520_v63  ;;  %v3578_v19 = vsub.f32 1.0, %v11096_v38  ;;  %v3586_v50 = vmul.f32 %v11096_v38, %v13513_v51  ;;  %v10744_v51 = vld [vmem:[#allocation19 + $0x60] ss:$8 sps:$4 sm:$0xff]  }
 0x9fb   :  { %v3899_v35 = vpop.f32.mrf.mxu0 }
 0x9fc   :  { %11107 = vtanh.f32 %v3572_v17  ;;  %v3759_v17 = vld [vmem:[#allocation18] sm:$0x3] }
 0x9fd   :  { %v11098_v57 = vpop.eup %11097  ;;  %v3901_v47 = vpop.f32.mrf.mxu0 }
 0x9fe   :  { %v3581_v10 = vmul.f32 %v11098_v57, %v3577_v8  ;;  %v11100_v49 = vpop.eup %11099  ;;  %v17522_v57 = vld [vmem:[#allocation48_spill] sm:$0xff] }
 0x9ff   :  { %v3579_v45 = vsub.f32 1.0, %v11100_v49  ;;  %v3587_v7 = vmul.f32 %v11100_v49, %v13518_v61  ;;  %v10747_v61 = vld [vmem:[#allocation19 + $0x50] ss:$8 sps:$4 sm:$0xff]   ;;  %v3905_v31 = vpop.f32.mrf.mxu0 }
 0xa00   :  { %v3589_v15 = vadd.f32 %v3585_v40, %v3581_v10  ;;  %v13659_v10 = vrot.slane %v3759_v17, %v17522_v57  ;;  %v17523_v40 = vld [vmem:[#allocation49_spill] sm:$0xff] }
 0xa01   :  { %v11102_v37 = vpop.eup %11101  ;;  %v3907_v54 = vpop.f32.mrf.mxu0  ;;  %v13662_v49 = vrot.slane %v3759_v17, %v17523_v40 }
 0xa02   :  { %v3582_v6 = vmul.f32 %v11102_v37, %v3578_v19  ;;  %v11104_v43 = vpop.eup %11103  ;;  %v3886_v37 = vadd.f32 %v3885_v56, %v13659_v10 }
 0xa03   :  { %v3580_v58 = vsub.f32 1.0, %v11104_v43  ;;  %v3588_v0 = vmul.f32 %v11104_v43, %v13522_v23  ;;  %v10753_v23 = vld [vmem:[#allocation19 + $0x30] ss:$8 sps:$4 sm:$0xff]   ;;  %v3909_v42 = vpop.f32.mrf.mxu0  ;;  %v3892_v43 = vadd.f32 %v3891_v32, %v13662_v49 }
 0xa04   :  { %v3590_v53 = vadd.f32 %v3586_v50, %v3582_v6  ;;  %v3888_v6 = vadd.f32 %v3887_v20, %v13662_v49  ;;  %v3890_v50 = vadd.f32 %v3889_v30, %v13659_v10  ;;  %v4165_v20 = vld [vmem:[#allocation22] sm:$0x3] }
 0xa05   :  { %v11106_v27 = vpop.eup %11105  ;;  %v3911_v13 = vpop.f32.mrf.mxu0 }
 0xa06   :  { %v3593_v1 = vpack.c.bf16 %v3590_v53, %v3589_v15  ;;  %v3583_v3 = vmul.f32 %v11106_v27, %v3579_v45  ;;  %v4012_v53 = vld [vmem:[#allocation21] sm:$0x3]  ;;  %v3896_v27 = vadd.f32 %v3895_v24, %v13659_v10 }
 0xa07   :  { %v3915_v36 = vpop.f32.mrf.mxu0 }
 0xa08   :  { %10466 = vmatprep.mubr.bf16.mxu1 %v3593_v1  ;;  %v3591_v52 = vadd.f32 %v3587_v7, %v3583_v3  ;;  %v3900_v3 = vadd.f32 %v3899_v35, %v13659_v10 }
 0xa09   :  { %v11108_v22 = vpop.eup %11107  ;;  %v3917_v39 = vpop.f32.mrf.mxu0 }
 0xa0a   :  { %v3584_v5 = vmul.f32 %v11108_v22, %v3580_v58  ;;  %v13679_v58 = vmax.f32 %v3886_v37, 0.0  ;;  %v13683_v22 = vmax.f32 %v3890_v50, 0.0 }
 0xa0b   :  { %v3919_v29 = vpop.f32.mrf.mxu0 }
 0xa0c   :  { %v3592_v48 = vadd.f32 %v3588_v0, %v3584_v5  ;;  %v13685_v5 = vmax.f32 %v3892_v43, 0.0  ;;  %v3902_v0 = vadd.f32 %v3901_v47, %v13662_v49 }
 0xa0d   :  { %v3921_v21 = vpop.f32.mrf.mxu0 }
 0xa0e   :  { %v3594_v62 = vpack.c.bf16 %v3592_v48, %v3591_v52  ;;  %v13681_v52 = vmax.f32 %v3888_v6, 0.0  ;;  %v3906_v48 = vadd.f32 %v3905_v31, %v13659_v10  ;;  %v13712_v30 = vmax.f32 %v3902_v0, 0.0 }
 0xa0f   :  { %v3925_v25 = vpop.f32.mrf.mxu0 }
 0xa10   :  { %10467 = vmatmul.mubr.bf16.vlgmr.msra.gmra.mxu1 %v3594_v62  ;;  %17527 = vst [vmem:[#allocation54_spill] sm:$0xff] %v13712_v30  ;;  %v13714_v32 = vmax.f32 %v3906_v48, 0.0  ;;  %v3926_v24 = vadd.f32 %v3925_v25, %v13659_v10 }
 0xa11   :  { %4105 = vmatpush1.bf16.msra.mxu1 %v10741_v34  ;;  %4136 = vmatprep.mubr.bf16.mxu1 %v17435_v18  ;;  %v13642_v2 = vpop.f32.mrf.mxu0  ;;  %v13690_v34 = vrot.slane %v4012_v53, %v17522_v57 }
 0xa12   :  { %4106 = vmatprep.subr.bf16.mxu1 %v10746_v14  ;;  %v3910_v14 = vadd.f32 %v3909_v42, %v13659_v10  ;;  %17528 = vst [vmem:[#allocation56_spill] sm:$0xff] %v13714_v32  ;;  %v13741_v43 = vmax.f32 %v3926_v24, 0.0 }
 0xa14   :  { %v13720_v47 = vmax.f32 %v3910_v14, 0.0 }
 0xa15   :  { %4107 = vmatpush1.bf16.msra.mxu1 %v10744_v51 }
 0xa16   :  { %4108 = vmatprep.subr.bf16.mxu1 %v10749_v4  ;;  %v3912_v4 = vadd.f32 %v3911_v13, %v13662_v49 }
 0xa18   :  { %v13722_v31 = vmax.f32 %v3912_v4, 0.0 }
 0xa19   :  { %4109 = vmatpush1.bf16.msra.mxu1 %v10747_v61  ;;  %v12003_v61 = vmov 1966171168  }
 0xa1a   :  { %4110 = vmatprep.subr.bf16.mxu1 %v10752_v60  ;;  %v4190_v60 = vunpack.c.l.s4 %v12003_v61 }
 0xa1c   :  { %v4191_v42 = vunpack.c.0.s8 %v4190_v60 }
 0xa1d   :  { %4111 = vmatpush1.bf16.msra.mxu1 %v10750_v9  ;;  %v13697_v9 = vmax.f32 %v3896_v27, 0.0 }
 0xa1e   :  { %4112 = vmatprep.subr.bf16.mxu1 %v10755_v12 }
 0xa21   :  { %4113 = vmatpush1.bf16.msra.mxu1 %v10753_v23  ;;  %v13701_v23 = vmax.f32 %v3900_v3, 0.0 }
 0xa22   :  { %4114 = vmatprep.subr.bf16.mxu1 %v10758_v28  ;;  %v13704_v28 = vrot.slane %v4012_v53, %v17523_v40  ;;  %v3928_v53 = vadd.f32 %v13642_v2, %v13662_v49 }
 0xa25   :  { %4115 = vmatpush1.bf16.msra.mxu1 %v10756_v26 }
 0xa26   :  { %4116 = vmatprep.subr.bf16.mxu1 %v10761_v59  ;;  %v3916_v59 = vadd.f32 %v3915_v36, %v13659_v10  ;;  %v13725_v36 = vrot.slane %v4165_v20, %v17522_v57 }
 0xa28   :  { %v13733_v25 = vmax.f32 %v3916_v59, 0.0 }
 0xa29   :  { %4117 = vmatpush1.bf16.msra.mxu1 %v10759_v55  ;;  %v3918_v55 = vadd.f32 %v3917_v39, %v13662_v49 }
 0xa2a   :  { %4118 = vmatprep.subr.bf16.mxu1 %v10764_v41  ;;  %v3920_v41 = vadd.f32 %v3919_v29, %v13659_v10  ;;  %v13729_v29 = vrot.slane %v4165_v20, %v17523_v40 }
 0xa2b   :  { %v13735_v17 = vmax.f32 %v3918_v55, 0.0 }
 0xa2c   :  { %v13737_v37 = vmax.f32 %v3920_v41, 0.0 }
 0xa2d   :  { %4119 = vmatpush1.bf16.msra.mxu1 %v10762_v44  ;;  %v3922_v44 = vadd.f32 %v3921_v21, %v13662_v49 }
 0xa2f   :  { %v13739_v6 = vmax.f32 %v3922_v44, 0.0 }
 0xa30   :  { %4137 = vmatmul.mubr.bf16.vlgmr.msra.gmra.mxu1 %v3593_v1  ;;  %v3898_v1 = vadd.f32 %v3897_v33, %v13662_v49 }
 0xa31   :  { %4146 = vmatprep.mubr.bf16.mxu1 %v17435_v18  ;;  %v13644_v18 = vpop.f32.mrf.mxu0 }
 0xa32   :  { %v13699_v12 = vmax.f32 %v3898_v1, 0.0  ;;  %v3930_v3 = vadd.f32 %v13644_v18, %v13659_v10 }
 0xa33   :  { %v13646_v46 = vpop.f32.mrf.mxu0 }
 0xa34   :  { %v3932_v0 = vadd.f32 %v13646_v46, %v13662_v49 }
 0xa35   :  { %v13648_v11 = vpop.f32.mrf.mxu0 }
 0xa36   :  { %v3936_v48 = vadd.f32 %v13648_v11, %v13659_v10 }
 0xa37   :  { %v13650_v16 = vpop.f32.mrf.mxu0 }
 0xa38   :  { %4147 = vmatmul.mubr.bf16.gmra.mxu1 %v3594_v62  ;;  %v3908_v62 = vadd.f32 %v3907_v54, %v13662_v49  ;;  %v3938_v18 = vadd.f32 %v13650_v16, %v13662_v49  ;;  %v13771_v16 = vmax.f32 %v3932_v0, 0.0 }
 0xa39   :  { %v13652_v63 = vpop.f32.mrf.mxu0 }
 0xa3a   :  { %v13718_v35 = vmax.f32 %v3908_v62, 0.0  ;;  %v17529_v62 = vld [vmem:[#allocation47_spill] sm:$0xff]  ;;  %v3940_v46 = vadd.f32 %v13652_v63, %v13659_v10 }
 0xa3b   :  { %v13656_v8 = vpop.f32.mrf.mxu0  ;;  %v13753_v14 = vsub.s32 %v4191_v42, %v17529_v62  ;;  %v13769_v42 = vmax.f32 %v3930_v3, 0.0 }
 0xa3c   :  { %v3942_v11 = vadd.f32 %v13656_v8, %v13662_v49  ;;  %v13782_v3 = vmax.f32 %v3940_v46, 0.0 }
 0xa3d   :  { %v13666_v15 = vpop.f32.mrf.mxu0 }
 0xa3e   :  { %v3946_v41 = vadd.f32 %v13666_v15, %v13659_v10 }
 0xa3f   :  { %v13677_v7 = vpop.f32.mrf.mxu0 }
 0xa41   :  { %v13706_v26 = vpop.f32.mrf.mxu0 }
 0xa43   :  { %v13731_v21 = vpop.f32.mrf.mxu0 }
 0xa45   :  { %v3955_v55 = vpop.f32.mrf.mxu0 }
 0xad0   :  { %v13654_v38 = vpop.f32.mrf.mxu1 }
 0xad1   :  { %17521 = vst [vmem:[#allocation113_spill] sm:$0xff] %v13654_v38 }
 0xad2   :  { %v13664_v19 = vpop.f32.mrf.mxu1 }
 0xad3   :  { %17524 = vst [vmem:[#allocation115_spill] sm:$0xff] %v13664_v19 }
 0xad4   :  { %v13672_v45 = vpop.f32.mrf.mxu1 }
 0xad5   :  { %17525 = vst [vmem:[#allocation112_spill] sm:$0xff] %v13672_v45 }
 0xad6   :  { %v13694_v51 = vpop.f32.mrf.mxu1 }
 0xad7   :  { %17526 = vst [vmem:[#allocation114_spill] sm:$0xff] %v13694_v51 }
 0xaf0   :  { %v4138_v56 = vpop.f32.mrf.mxu1 }
 0xaf1   :  { %v4139_v33 = vadd.f32 %v4138_v56, %v13690_v34 }
 0xaf2   :  { %v4140_v54 = vpop.f32.mrf.mxu1 }
 0xaf3   :  { %v4157_v13 = vmax.f32 %v4139_v33, 0.0  ;;  %v4141_v39 = vadd.f32 %v4140_v54, %v13704_v28  ;;  %v13767_v54 = vmax.f32 %v3928_v53, 0.0  ;;  %v13780_v53 = vmax.f32 %v3938_v18, 0.0 }
 0xaf4   :  { %v4142_v50 = vpop.f32.mrf.mxu1 }
 0xaf5   :  { %v4158_v27 = vmax.f32 %v4141_v39, 0.0  ;;  %v4143_v1 = vadd.f32 %v4142_v50, %v13690_v34  ;;  %v4177_v61 = vmul.f32 %v13725_v36, %v4157_v13 }
 0xaf6   :  { %v4144_v4 = vpop.f32.mrf.mxu1 }
 0xaf7   :  { %v4178_v2 = vmul.f32 %v13729_v29, %v4158_v27  ;;  %v4159_v60 = vmax.f32 %v4143_v1, 0.0  ;;  %v4145_v59 = vadd.f32 %v4144_v4, %v13704_v28  ;;  %v3957_v27 = vpop.f32.mrf.mxu0  ;;  %v13778_v1 = vmax.f32 %v3936_v48, 0.0 }
 0xaf8   :  { %v4148_v44 = vpop.f32.mrf.mxu1 }
 0xaf9   :  { %v4187_v56 = vcombine.low %v4177_v61, %v4178_v2  ;;  %v4188_v20 = vcombine.high %v4177_v61, %v4178_v2  ;;  %v4179_v24 = vmul.f32 %v13725_v36, %v4159_v60  ;;  %v4160_v33 = vmax.f32 %v4145_v59, 0.0 }
 0xafa   :  { %v4149_v63 = vadd.f32 %v4148_v44, %v13690_v34  ;;  %v4150_v13 = vpop.f32.mrf.mxu1  ;;  %v13784_v61 = vmax.f32 %v3942_v11, 0.0  ;;  %v13786_v2 = vmax.f32 %v3946_v41, 0.0  ;;  %v3959_v11 = vpop.f32.mrf.mxu0 }
 0xafb   :  { %v4195_v8 = vrot.slane %v4187_v56, %v13753_v14  ;;  %v4202_v39 = vrot.slane %v4188_v20, %v13753_v14  ;;  %v4180_v15 = vmul.f32 %v13729_v29, %v4160_v33  ;;  %v4151_v50 = vadd.f32 %v4150_v13, %v13704_v28 }
 0xafc   :  { %v4161_v0 = vmax.f32 %v4149_v63, 0.0  ;;  %v4152_v4 = vpop.f32.mrf.mxu1 }
 0xafd   :  { %v5395_v60 = vcombine.low %v4179_v24, %v4180_v15  ;;  %v5396_v59 = vcombine.high %v4179_v24, %v4180_v15  ;;  %v4162_v56 = vmax.f32 %v4151_v50, 0.0  ;;  %v4153_v20 = vadd.f32 %v4152_v4, %v13690_v34 }
 0xafe   :  { %v4181_v44 = vmul.f32 %v13725_v36, %v4161_v0  ;;  %v4154_v33 = vpop.f32.mrf.mxu1  ;;  %v4218_v48 = vrot.slane %v4202_v39, %v13753_v14  ;;  %v4211_v63 = vrot.slane %v4195_v8, %v13753_v14  ;;  %v3948_v24 = vadd.f32 %v13677_v7, %v13662_v49 }
 0xaff   :  { %v13792_v18 = vrot.slane %v5395_v60, %v13753_v14  ;;  %v13795_v46 = vrot.slane %v5396_v59, %v13753_v14  ;;  %v4155_v41 = vadd.f32 %v4154_v33, %v13704_v28  ;;  %v4182_v13 = vmul.f32 %v13729_v29, %v4162_v56 }
 0xb00   :  { %v4163_v34 = vmax.f32 %v4153_v20, 0.0  ;;  %v4272_v15 = vrot.slane %v4218_v48, %v17522_v57  ;;  %v4203_v50 = vcombine.high %v4195_v8, %v4195_v8  ;;  %v3950_v0 = vadd.f32 %v13706_v26, %v13659_v10  ;;  %v3961_v20 = vpop.f32.mrf.mxu0 }
 0xb01   :  { %v4164_v4 = vmax.f32 %v4155_v41, 0.0  ;;  %v4240_v60 = vrot.slane %v4211_v63, %v17522_v57  ;;  %v6591_v59 = vcombine.low %v4181_v44, %v4182_v13  ;;  %v6592_v51 = vcombine.high %v4181_v44, %v4182_v13 }
 0xb02   :  { %v4183_v28 = vmul.f32 %v13725_v36, %v4163_v34  ;;  %v4335_v33 = vmul.f32 %v4272_v15, %v13769_v42  ;;  %v3952_v7 = vadd.f32 %v13731_v21, %v13662_v49  ;;  %v4244_v45 = vrot.slane %v4211_v63, %v17523_v40 }
 0xb03   :  { %v4184_v56 = vmul.f32 %v13729_v29, %v4164_v4  ;;  %v4317_v8 = vmul.f32 %v4240_v60, %v13679_v58  ;;  %v4204_v26 = vcombine.high %v4202_v39, %v4202_v39  ;;  %v3956_v41 = vadd.f32 %v3955_v55, %v13659_v10 }
 0xb04   :  { %v13815_v19 = vrot.slane %v6591_v59, %v13753_v14  ;;  %v13818_v36 = vrot.slane %v6592_v51, %v13753_v14  ;;  %4367 = vadd.xlane.f32.xlu1 %v4335_v33  ;;  %v3958_v44 = vadd.f32 %v3957_v27, %v13662_v49  ;;  %v3960_v21 = vadd.f32 %v3959_v11, %v13659_v10 }
 0xb05   :  { %v7787_v29 = vcombine.low %v4183_v28, %v4184_v56  ;;  %v7788_v13 = vcombine.high %v4183_v28, %v4184_v56  ;;  %4349 = vadd.xlane.f32.xlu0 %v4317_v8  ;;  %v3962_v34 = vadd.f32 %v3961_v20, %v13662_v49  ;;  %v4320_v39 = vmul.f32 %v4244_v45, %v13685_v5 }
 0xb06   :  { %v4276_v55 = vrot.slane %v4218_v48, %v17523_v40  ;;  %v4225_v4 = vrot.slane %v4203_v50, %v13753_v14  ;;  %v4319_v27 = vmul.f32 %v4240_v60, %v13683_v22  ;;  %v4233_v10 = vcombine.high %v4211_v63, %v4211_v63 }
 0xb07   :  { %v13827_v59 = vrot.slane %v7787_v29, %v13753_v14  ;;  %v13830_v51 = vrot.slane %v7788_v13, %v13753_v14  ;;  %v13833_v11 = vmax.f32 %v3948_v24, 0.0  ;;  %v13835_v28 = vmax.f32 %v3950_v0, 0.0 }
 0xb08   :  { %4383 = vadd.xlane.f32.xlu1 %v4320_v39  ;;  %v4232_v49 = vrot.slane %v4204_v26, %v13753_v14  ;;  %v4234_v33 = vcombine.high %v4218_v48, %v4218_v48  ;;  %v13838_v56 = vmax.f32 %v3952_v7, 0.0  ;;  %v13840_v50 = vmax.f32 %v3956_v41, 0.0 }
 0xb09   :  { %17530 = vst [vmem:[#allocation58_spill] sm:$0xff] %v13827_v59  ;;  %17531 = vst [vmem:[#allocation55_spill] sm:$0xff] %v13830_v51  ;;  %v13842_v20 = vmax.f32 %v3958_v44, 0.0  ;;  %v13844_v8 = vmax.f32 %v3960_v21, 0.0  ;;  %4351 = vadd.xlane.f32.xlu0 %v4319_v27  ;;  %v5411_v63 = vcombine.high %v13792_v18, %v13792_v18  ;;  %v13848_v24 = vmax.f32 %v3962_v34, 0.0 }
 0xb0a   :  { %v4336_v0 = vmul.f32 %v4276_v55, %v13771_v16  ;;  %v4248_v60 = vrot.slane %v4225_v4, %v17522_v57  ;;  %v5412_v48 = vcombine.high %v13795_v46, %v13795_v46  ;;  %v4333_v7 = vmul.f32 %v4272_v15, %v13741_v43 }
 0xb0b   :  { %v4256_v26 = vrot.slane %v4233_v10, %v17522_v57  ;;  %v4252_v41 = vrot.slane %v4225_v4, %v17523_v40  ;;  %v4318_v21 = vmul.f32 %v4244_v45, %v13681_v52  ;;  %v4280_v29 = vrot.slane %v4232_v49, %v17522_v57 }
 0xb0c   :  { %4399 = vadd.xlane.f32.xlu1 %v4336_v0  ;;  %v4288_v13 = vrot.slane %v4234_v33, %v17522_v57  ;;  %v4334_v39 = vmul.f32 %v4276_v55, %v13767_v54  ;;  %v4235_v27 = vcombine.high %v4225_v4, %v4225_v4  ;;  %v4321_v0 = vmul.f32 %v4248_v60, %v13697_v9 }
 0xb0d   :  { %4365 = vadd.xlane.f32.xlu0 %v4333_v7  ;;  %v4323_v45 = vmul.f32 %v4248_v60, %v13701_v23  ;;  %v5419_v38 = vrot.slane %v13792_v18, %v13753_v14  ;;  %v4325_v62 = vmul.f32 %v4256_v26, %v13714_v32  ;;  %v4327_v34 = vmul.f32 %v4256_v26, %v13720_v47 }
 0xb0e   :  { %v13876_v15 = vmul.f32 %v4252_v41, %v13699_v12  ;;  %v4260_v55 = vrot.slane %v4233_v10, %v17523_v40  ;;  %v4337_v4 = vmul.f32 %v4280_v29, %v13778_v1  ;;  %v4339_v7 = vmul.f32 %v4280_v29, %v13782_v3 }
 0xb0f   :  { %v13882_v44 = vmul.f32 %v4288_v13, %v13786_v2  ;;  %v13885_v60 = vmul.f32 %v4288_v13, %v13835_v28  ;;  %v13888_v18 = vmul.f32 %v4252_v41, %v13712_v30  ;;  %v4284_v26 = vrot.slane %v4232_v49, %v17523_v40 }
 0xb10   :  { %4353 = vadd.xlane.f32.xlu1 %v4321_v0  ;;  %v13892_v51 = vrot.slane %v5419_v38, %v17522_v57  ;;  %v13895_v10 = vrot.slane %v5419_v38, %v17523_v40  ;;  %v4292_v29 = vrot.slane %v4234_v33, %v17523_v40  ;;  %v4264_v0 = vrot.slane %v4235_v27, %v17522_v57 }
 0xb11   :  { %4381 = vadd.xlane.f32.xlu0 %v4318_v21  ;;  %v5426_v13 = vrot.slane %v13795_v46, %v13753_v14  ;;  %v13902_v21 = vrot.slane %v5411_v63, %v13753_v14  ;;  %v13905_v41 = vmul.f32 %v4260_v55, %v13718_v35  ;;  %v13908_v59 = vmul.f32 %v4260_v55, %v13722_v31 }
 0xb12   :  { %17532 = vst [vmem:[#allocation50_spill] sm:$0xff] %v13892_v51  ;;  %17533 = vst [vmem:[#allocation59_spill] sm:$0xff] %v13895_v10  ;;  %v13910_v32 = vcombine.high %v4232_v49, %v4232_v49  ;;  %v13914_v30 = vmul.f32 %v13892_v51, %v13679_v58  ;;  %v4268_v33 = vrot.slane %v4235_v27, %v17523_v40 }
 0xb13   :  { %17534 = vst [vmem:[#allocation61_spill] sm:$0xff] %v13902_v21  ;;  %17535 = vst [vmem:[#allocation63_spill] sm:$0xff] %v13905_v41  ;;  %v13918_v46 = vrot.slane %v5426_v13, %v17522_v57  ;;  %v13922_v63 = vmul.f32 %v13895_v10, %v13685_v5  ;;  %v13925_v41 = vrot.slane %v5426_v13, %v17523_v40 }
 0xb14   :  { %17536 = vst [vmem:[#allocation60_spill] sm:$0xff] %v13914_v30  ;;  %4355 = vadd.xlane.f32.xlu1 %v4323_v45  ;;  %v13928_v49 = vmul.f32 %v4284_v26, %v13780_v53  ;;  %v5441_v55 = vcombine.high %v5419_v38, %v5419_v38  ;;  %v5456_v45 = vrot.slane %v13902_v21, %v17522_v57 }
 0xb15   :  { %17537 = vst [vmem:[#allocation51_spill] sm:$0xff] %v13918_v46  ;;  %17538 = vst [vmem:[#allocation117_spill] sm:$0xff] %v13922_v63  ;;  %4397 = vadd.xlane.f32.xlu0 %v4334_v39  ;;  %v5440_v27 = vrot.slane %v5412_v48, %v13753_v14  ;;  %v13934_v30 = vmul.f32 %v4284_v26, %v13784_v61  ;;  %v13937_v51 = vmul.f32 %v4292_v29, %v13833_v11 }
 0xb16   :  { %17539 = vst [vmem:[#allocation119_spill] sm:$0xff] %v13925_v41  ;;  %v13941_v63 = vmul.f32 %v13918_v46, %v13769_v42  ;;  %v13945_v39 = vmul.f32 %v13925_v41, %v13771_v16  ;;  %v13948_v38 = vmul.f32 %v4292_v29, %v13838_v56  ;;  %v13951_v10 = vrot.slane %v5441_v55, %v17522_v57 }
 0xb17   :  { %v13954_v48 = vmul.f32 %v5456_v45, %v13697_v9  ;;  %v13957_v26 = vrot.slane %v5441_v55, %v17523_v40  ;;  %v13960_v46 = vmul.f32 %v4264_v0, %v13737_v37  ;;  %v13967_v29 = vrot.slane %v5440_v27, %v17523_v40 }
 0xb18   :  { %17540 = vst [vmem:[#allocation116_spill] sm:$0xff] %v13941_v63  ;;  %17541 = vst [vmem:[#allocation118_spill] sm:$0xff] %v13945_v39  ;;  %4359 = vadd.xlane.f32.xlu1 %v4327_v34  ;;  %v13963_v63 = vmul.f32 %v5456_v45, %v13701_v23  ;;  %v5488_v39 = vrot.slane %v5440_v27, %v17522_v57  ;;  %v13970_v41 = vmul.f32 %v4264_v0, %v13733_v25 }
 0xb19   :  { %17542 = vst [vmem:[#allocation64_spill] sm:$0xff] %v13951_v10  ;;  %17543 = vst [vmem:[#allocation66_spill] sm:$0xff] %v13954_v48  ;;  %4357 = vadd.xlane.f32.xlu0 %v4325_v62  ;;  %v4296_v55 = vrot.slane %v13910_v32, %v17522_v57  ;;  %v13976_v34 = vmul.f32 %v13951_v10, %v13720_v47  ;;  %v5442_v48 = vcombine.high %v5426_v13, %v5426_v13 }
 0xb1a   :  { %17544 = vst [vmem:[#allocation68_spill] sm:$0xff] %v13957_v26  ;;  %17545 = vst [vmem:[#allocation65_spill] sm:$0xff] %v13960_v46  ;;  %v13979_v45 = vmul.f32 %v4268_v33, %v13739_v6  ;;  %v13986_v62 = vmul.f32 %v13957_v26, %v13722_v31  ;;  %v13989_v0 = vmul.f32 %v5488_v39, %v13782_v3 }
 0xb1b   :  { %17546 = vst [vmem:[#allocation52_spill] sm:$0xff] %v13963_v63  ;;  %17547 = vst [vmem:[#allocation69_spill] sm:$0xff] %v13967_v29  ;;  %v13982_v63 = vmul.f32 %v5488_v39, %v13778_v1  ;;  %v13993_v46 = vrot.slane %v5442_v48, %v17523_v40  ;;  %v6615_v13 = vrot.slane %v13815_v19, %v13753_v14 }
 0xb1c   :  { %17548 = vst [vmem:[#allocation71_spill] sm:$0xff] %v13970_v41  ;;  %17549 = vst [vmem:[#allocation73_spill] sm:$0xff] %v13976_v34  ;;  %v5496_v41 = vrot.slane %v5442_v48, %v17522_v57  ;;  %v13999_v34 = vmul.f32 %v13967_v29, %v13784_v61  ;;  %4371 = vadd.xlane.f32.xlu1 %v4339_v7  ;;  %v5443_v39 = vcombine.high %v13902_v21, %v13902_v21 }
 0xb1d   :  { %17550 = vst [vmem:[#allocation70_spill] sm:$0xff] %v13982_v63  ;;  %17551 = vst [vmem:[#allocation53_spill] sm:$0xff] %v13986_v62  ;;  %v14002_v63 = vmul.f32 %v4268_v33, %v13735_v17  ;;  %v17554_v48 = vcombine.high %v13815_v19, %v13815_v19  ;;  %4369 = vadd.xlane.f32.xlu0 %v4337_v4  ;;  %v6644_v7 = vrot.slane %v6615_v13, %v17522_v57 }
 0xb1e   :  { %17552 = vst [vmem:[#allocation120_spill] sm:$0xff] %v13989_v0  ;;  %17553 = vst [vmem:[#allocation122_spill] sm:$0xff] %v13999_v34  ;;  %v6622_v0 = vrot.slane %v13818_v36, %v13753_v14  ;;  %v14015_v29 = vmul.f32 %v5496_v41, %v13786_v2  ;;  %v6648_v33 = vrot.slane %v6615_v13, %v17523_v40 }
 0xb1f   :  { %v14012_v62 = vrot.slane %v17554_v48, %v13753_v14  ;;  %v5444_v34 = vcombine.high %v5440_v27, %v5440_v27  ;;  %v14020_v26 = vmul.f32 %v5496_v41, %v13835_v28  ;;  %v5472_v10 = vrot.slane %v5443_v39, %v17522_v57 }
 0xb20   :  { %17555 = vst [vmem:[#allocation121_spill] sm:$0xff] %v14015_v29  ;;  %v14025_v21 = vmul.f32 %v13993_v46, %v13838_v56  ;;  %v5476_v19 = vrot.slane %v5443_v39, %v17523_v40  ;;  %v14029_v4 = vmul.f32 %v6644_v7, %v13679_v58  ;;  %v14032_v48 = vmul.f32 %v6648_v33, %v13681_v52 }
 0xb21   :  { %17556 = vst [vmem:[#allocation123_spill] sm:$0xff] %v14020_v26  ;;  %v14035_v29 = vmul.f32 %v6644_v7, %v13683_v22  ;;  %v6676_v41 = vrot.slane %v6622_v0, %v17522_v57  ;;  %4375 = vadd.xlane.f32.xlu1 %v13885_v60  ;;  %v14040_v27 = vmul.f32 %v5472_v10, %v13733_v25 }
 0xb22   :  { %17557 = vst [vmem:[#allocation74_spill] sm:$0xff] %v14025_v21  ;;  %v14043_v21 = vmul.f32 %v5476_v19, %v13735_v17  ;;  %v14046_v39 = vmul.f32 %v6648_v33, %v13685_v5  ;;  %v6680_v26 = vrot.slane %v6622_v0, %v17523_v40  ;;  %4373 = vadd.xlane.f32.xlu0 %v13882_v44 }
 0xb23   :  { %17558 = vst [vmem:[#allocation76_spill] sm:$0xff] %v14035_v29  ;;  %17559 = vst [vmem:[#allocation78_spill] sm:$0xff] %v14040_v27  ;;  %v14051_v7 = vmul.f32 %v6676_v41, %v13741_v43  ;;  %v14054_v29 = vmul.f32 %v5472_v10, %v13737_v37  ;;  %v5504_v60 = vrot.slane %v5444_v34, %v17522_v57 }
 0xb24   :  { %17560 = vst [vmem:[#allocation75_spill] sm:$0xff] %v14043_v21  ;;  %17561 = vst [vmem:[#allocation57_spill] sm:$0xff] %v14046_v39  ;;  %v14058_v27 = vmul.f32 %v5476_v19, %v13739_v6  ;;  %v14061_v21 = vmul.f32 %v6680_v26, %v13767_v54  ;;  %v5508_v33 = vrot.slane %v5444_v34, %v17523_v40 }
 0xb25   :  { %17562 = vst [vmem:[#allocation79_spill] sm:$0xff] %v14054_v29  ;;  %v14065_v39 = vmul.f32 %v6676_v41, %v13769_v42  ;;  %v6652_v44 = vrot.slane %v14012_v62, %v17522_v57  ;;  %v14071_v10 = vrot.slane %v13910_v32, %v17523_v40  ;;  %v14074_v29 = vmul.f32 %v5504_v60, %v13840_v50 }
 0xb26   :  { %17563 = vst [vmem:[#allocation81_spill] sm:$0xff] %v14058_v27  ;;  %17564 = vst [vmem:[#allocation83_spill] sm:$0xff] %v14061_v21  ;;  %v14077_v19 = vmul.f32 %v6680_v26, %v13771_v16  ;;  %v6656_v27 = vrot.slane %v14012_v62, %v17523_v40  ;;  %4387 = vadd.xlane.f32.xlu1 %v13888_v18  ;;  %v14083_v34 = vmul.f32 %v5508_v33, %v13842_v20 }
 0xb27   :  { %17565 = vst [vmem:[#allocation80_spill] sm:$0xff] %v14065_v39  ;;  %17566 = vst [vmem:[#allocation62_spill] sm:$0xff] %v14074_v29  ;;  %v14086_v41 = vmul.f32 %v6652_v44, %v13697_v9  ;;  %v14089_v32 = vmul.f32 %v5504_v60, %v13844_v8  ;;  %v6637_v39 = vcombine.high %v6615_v13, %v6615_v13  ;;  %4385 = vadd.xlane.f32.xlu0 %v13876_v15 }
 0xb28   :  { %17567 = vst [vmem:[#allocation124_spill] sm:$0xff] %v14077_v19  ;;  %17568 = vst [vmem:[#allocation125_spill] sm:$0xff] %v14083_v34  ;;  %v14093_v26 = vmul.f32 %v6656_v27, %v13699_v12  ;;  %v14096_v19 = vmul.f32 %v5508_v33, %v13848_v24  ;;  %v14099_v18 = vmul.f32 %v6652_v44, %v13701_v23 }
 0xb29   :  { %17569 = vst [vmem:[#allocation126_spill] sm:$0xff] %v14086_v41  ;;  %17570 = vst [vmem:[#allocation127_spill] sm:$0xff] %v14089_v32  ;;  %v17574_v34 = vcombine.high %v13818_v36, %v13818_v36  ;;  %v14106_v60 = vmul.f32 %v4296_v55, %v13844_v8  ;;  %v6660_v13 = vrot.slane %v6637_v39, %v17522_v57  ;;  %v17575_v32 = vld [vmem:[#allocation54_spill] sm:$0xff]  ;;  %v17577_v36 = vld [vmem:[#allocation56_spill] sm:$0xff] }
 0xb2a   :  { %17571 = vst [vmem:[#allocation84_spill] sm:$0xff] %v14093_v26  ;;  %17572 = vst [vmem:[#allocation86_spill] sm:$0xff] %v14096_v19  ;;  %v6664_v15 = vrot.slane %v6637_v39, %v17523_v40  ;;  %v14111_v26 = vmul.f32 %v6656_v27, %v17575_v32  ;;  %v14114_v33 = vmul.f32 %v4296_v55, %v13840_v50  ;;  %4391 = vadd.xlane.f32.xlu1 %v13908_v59  ;;  %v17582_v55 = vld [vmem:[#allocation63_spill] sm:$0xff] }
 0xb2b   :  { %17573 = vst [vmem:[#allocation88_spill] sm:$0xff] %v14099_v18  ;;  %v6636_v41 = vrot.slane %v17574_v34, %v13753_v14  ;;  %v6638_v19 = vcombine.high %v6622_v0, %v6622_v0  ;;  %v14120_v34 = vmul.f32 %v6660_v13, %v17577_v36  ;;  %v14126_v39 = vmul.f32 %v6660_v13, %v13720_v47  ;;  %v17586_v13 = vld [vmem:[#allocation58_spill] sm:$0xff] }
 0xb2c   :  { %17576 = vst [vmem:[#allocation85_spill] sm:$0xff] %v14111_v26  ;;  %v14123_v29 = vmul.f32 %v6664_v15, %v13718_v35  ;;  %v14129_v27 = vmul.f32 %v6664_v15, %v13722_v31  ;;  %4389 = vadd.xlane.f32.xlu0 %v17582_v55  ;;  %v6639_v55 = vcombine.high %v14012_v62, %v14012_v62 }
 0xb2d   :  { %v6684_v44 = vrot.slane %v6636_v41, %v17522_v57  ;;  %v6688_v18 = vrot.slane %v6636_v41, %v17523_v40  ;;  %17578 = vst [vmem:[#allocation67_spill] sm:$0xff] %v14120_v34  ;;  %17580 = vst [vmem:[#allocation92_spill] sm:$0xff] %v14126_v39  ;;  %v6692_v59 = vrot.slane %v6638_v19, %v17522_v57 }
 0xb2e   :  { %17579 = vst [vmem:[#allocation90_spill] sm:$0xff] %v14123_v29  ;;  %17581 = vst [vmem:[#allocation94_spill] sm:$0xff] %v14129_v27  ;;  %v6696_v34 = vrot.slane %v6638_v19, %v17523_v40  ;;  %v7811_v39 = vrot.slane %v17586_v13, %v13753_v14  ;;  %4403 = vadd.xlane.f32.xlu1 %v13934_v30  ;;  %v6668_v62 = vrot.slane %v6639_v55, %v17522_v57 }
 0xb2f   :  { %v14133_v26 = vmul.f32 %v6684_v44, %v13778_v1  ;;  %v14136_v0 = vmul.f32 %v6688_v18, %v13780_v53  ;;  %v14141_v29 = vmul.f32 %v6684_v44, %v13782_v3  ;;  %v14146_v15 = vmul.f32 %v6688_v18, %v13784_v61 }
 0xb30   :  { %v14151_v27 = vmul.f32 %v6692_v59, %v13786_v2  ;;  %v14157_v19 = vmul.f32 %v6692_v59, %v13835_v28  ;;  %v14160_v44 = vmul.f32 %v6696_v34, %v13838_v56  ;;  %v7840_v18 = vrot.slane %v7811_v39, %v17522_v57  ;;  %4401 = vadd.xlane.f32.xlu0 %v13928_v49 }
 0xb31   :  { %17583 = vst [vmem:[#allocation91_spill] sm:$0xff] %v14133_v26  ;;  %17584 = vst [vmem:[#allocation72_spill] sm:$0xff] %v14136_v0  ;;  %v14154_v0 = vmul.f32 %v6696_v34, %v13833_v11  ;;  %v6640_v59 = vcombine.high %v6636_v41, %v6636_v41  ;;  %v17593_v34 = vcombine.high %v17586_v13, %v17586_v13 }
 0xb32   :  { %17585 = vst [vmem:[#allocation128_spill] sm:$0xff] %v14141_v29  ;;  %17587 = vst [vmem:[#allocation129_spill] sm:$0xff] %v14146_v15  ;;  %v7844_v15 = vrot.slane %v7811_v39, %v17523_v40  ;;  %v6672_v29 = vrot.slane %v6639_v55, %v17523_v40  ;;  %v7833_v30 = vcombine.high %v7811_v39, %v7811_v39  ;;  %4407 = vadd.xlane.f32.xlu1 %v13948_v38 }
 0xb33   :  { %17588 = vst [vmem:[#allocation130_spill] sm:$0xff] %v14151_v27  ;;  %17589 = vst [vmem:[#allocation131_spill] sm:$0xff] %v14154_v0  ;;  %v17592_v0 = vld [vmem:[#allocation55_spill] sm:$0xff]  ;;  %v14181_v55 = vmul.f32 %v6668_v62, %v13733_v25  ;;  %v14187_v41 = vmul.f32 %v7840_v18, %v13683_v22  ;;  %v14196_v39 = vmul.f32 %v6668_v62, %v13737_v37 }
 0xb34   :  { %17590 = vst [vmem:[#allocation95_spill] sm:$0xff] %v14157_v19  ;;  %17591 = vst [vmem:[#allocation97_spill] sm:$0xff] %v14160_v44  ;;  %v7818_v27 = vrot.slane %v17592_v0, %v13753_v14  ;;  %v7825_v44 = vrot.slane %v17593_v34, %v13753_v14  ;;  %v14175_v19 = vmul.f32 %v7840_v18, %v13679_v58  ;;  %4405 = vadd.xlane.f32.xlu0 %v13937_v51 }
 0xb35   :  { %v14178_v26 = vmul.f32 %v7844_v15, %v13681_v52  ;;  %17594 = vst [vmem:[#allocation98_spill] sm:$0xff] %v14181_v55  ;;  %v14184_v49 = vmul.f32 %v6672_v29, %v13735_v17  ;;  %17595 = vst [vmem:[#allocation96_spill] sm:$0xff] %v14187_v41  ;;  %v14191_v13 = vmul.f32 %v7844_v15, %v13685_v5 }
 0xb36   :  { %v7872_v21 = vrot.slane %v7818_v27, %v17522_v57  ;;  %v7876_v58 = vrot.slane %v7818_v27, %v17523_v40  ;;  %17596 = vst [vmem:[#allocation77_spill] sm:$0xff] %v14196_v39  ;;  %v6700_v34 = vrot.slane %v6640_v59, %v17522_v57  ;;  %v14200_v55 = vmul.f32 %v6672_v29, %v13739_v6 }
 0xb37   :  { %v6704_v18 = vrot.slane %v6640_v59, %v17523_v40  ;;  %v7848_v15 = vrot.slane %v7825_v44, %v17522_v57  ;;  %v7852_v51 = vrot.slane %v7825_v44, %v17523_v40 }
 0xb38   :  { %17597 = vst [vmem:[#allocation99_spill] sm:$0xff] %v14200_v55  ;;  %v14205_v41 = vmul.f32 %v7872_v21, %v13741_v43  ;;  %v14208_v5 = vmul.f32 %v7876_v58, %v13767_v54  ;;  %v14211_v38 = vmul.f32 %v7872_v21, %v13769_v42  ;;  %v14215_v62 = vmul.f32 %v6700_v34, %v13840_v50 }
 0xb39   :  { %v14218_v29 = vmul.f32 %v6704_v18, %v13842_v20  ;;  %v14221_v59 = vmul.f32 %v7876_v58, %v13771_v16  ;;  %v14225_v55 = vmul.f32 %v7848_v15, %v13697_v9  ;;  %v14228_v39 = vmul.f32 %v6700_v34, %v13844_v8 }
 0xb3a   :  { %17598 = vst [vmem:[#allocation101_spill] sm:$0xff] %v14211_v38  ;;  %v7856_v42 = vrot.slane %v7833_v30, %v17522_v57  ;;  %v14232_v21 = vmul.f32 %v6704_v18, %v13848_v24  ;;  %v17602_v38 = vld [vmem:[#allocation65_spill] sm:$0xff]  ;;  %v7860_v16 = vrot.slane %v7833_v30, %v17523_v40  ;;  %v14240_v58 = vmul.f32 %v7848_v15, %v13701_v23 }
 0xb3b   :  { %17599 = vst [vmem:[#allocation102_spill] sm:$0xff] %v14218_v29  ;;  %17600 = vst [vmem:[#allocation100_spill] sm:$0xff] %v14228_v39  ;;  %4363 = vadd.xlane.f32.xlu1 %v17602_v38  ;;  %v14236_v29 = vmul.f32 %v7852_v51, %v13699_v12  ;;  %v17603_v9 = vcombine.high %v17592_v0, %v17592_v0  ;;  %v17604_v39 = vld [vmem:[#allocation71_spill] sm:$0xff]  ;;  %v14251_v38 = vmul.f32 %v7852_v51, %v17575_v32 }
 0xb3c   :  { %17601 = vst [vmem:[#allocation82_spill] sm:$0xff] %v14232_v21  ;;  %4361 = vadd.xlane.f32.xlu0 %v17604_v39  ;;  %v14248_v18 = vmul.f32 %v7856_v42, %v17577_v36  ;;  %v14254_v21 = vmul.f32 %v7856_v42, %v13720_v47  ;;  %v7834_v30 = vcombine.high %v7818_v27, %v7818_v27 }
 0xb3d   :  { %v7832_v34 = vrot.slane %v17603_v9, %v13753_v14  ;;  %17605 = vst [vmem:[#allocation103_spill] sm:$0xff] %v14251_v38  ;;  %v14257_v23 = vmul.f32 %v7860_v16, %v13718_v35  ;;  %v14262_v14 = vmul.f32 %v7860_v16, %v13722_v31  ;;  %v7835_v51 = vcombine.high %v7825_v44, %v7825_v44 }
 0xb3e   :  { %v7888_v39 = vrot.slane %v7834_v30, %v17522_v57  ;;  %v7892_v9 = vrot.slane %v7834_v30, %v17523_v40 }
 0xb3f   :  { %v7880_v15 = vrot.slane %v7832_v34, %v17522_v57  ;;  %v7884_v0 = vrot.slane %v7832_v34, %v17523_v40  ;;  %v7836_v38 = vcombine.high %v7832_v34, %v7832_v34  ;;  %4379 = vadd.xlane.f32.xlu1 %v14106_v60  ;;  %v7868_v60 = vrot.slane %v7835_v51, %v17523_v40 }
 0xb40   :  { %4377 = vadd.xlane.f32.xlu0 %v14114_v33  ;;  %v14281_v16 = vmul.f32 %v7888_v39, %v13786_v2  ;;  %v14284_v44 = vmul.f32 %v7892_v9, %v13833_v11  ;;  %v14289_v34 = vmul.f32 %v7888_v39, %v13835_v28 }
 0xb41   :  { %v14268_v47 = vmul.f32 %v7880_v15, %v13778_v1  ;;  %v14271_v27 = vmul.f32 %v7884_v0, %v13780_v53  ;;  %v14274_v42 = vmul.f32 %v7880_v15, %v13782_v3  ;;  %v14277_v31 = vmul.f32 %v7884_v0, %v13784_v61 }
 0xb42   :  { %v7864_v1 = vrot.slane %v7835_v51, %v17522_v57  ;;  %v7896_v3 = vrot.slane %v7836_v38, %v17522_v57  ;;  %v14293_v61 = vmul.f32 %v7892_v9, %v13838_v56  ;;  %v7900_v33 = vrot.slane %v7836_v38, %v17523_v40  ;;  %v17607_v38 = vld [vmem:[#allocation60_spill] sm:$0xff]  ;;  %v17609_v9 = vld [vmem:[#allocation51_spill] sm:$0xff] }
 0xb43   :  { %v14300_v30 = vmul.f32 %v7868_v60, %v13735_v17  ;;  %v14306_v0 = vmul.f32 %v7868_v60, %v13739_v6  ;;  %4395 = vadd.xlane.f32.xlu1 %v13979_v45  ;;  %v4346_v6 = vmul.f32 %v14071_v10, %v13842_v20  ;;  %v17613_v60 = vld [vmem:[#allocation116_spill] sm:$0xff] }
 0xb44   :  { %v14297_v2 = vmul.f32 %v7864_v1, %v13733_v25  ;;  %v14303_v15 = vmul.f32 %v7864_v1, %v13737_v37  ;;  %v14310_v28 = vmul.f32 %v7896_v3, %v13840_v50  ;;  %v14313_v56 = vmul.f32 %v7900_v33, %v13842_v20  ;;  %4393 = vadd.xlane.f32.xlu0 %v14002_v63  ;;  %v17606_v50 = vld [vmem:[#allocation50_spill] sm:$0xff]  ;;  %v17611_v20 = vld [vmem:[#allocation61_spill] sm:$0xff] }
 0xb45   :  { %v14316_v25 = vmul.f32 %v7896_v3, %v13844_v8  ;;  %v14319_v17 = vmul.f32 %v7900_v33, %v13848_v24  ;;  %v4348_v37 = vmul.f32 %v14071_v10, %v13848_v24  ;;  %v5527_v45 = vmul.f32 %v17606_v50, %v13683_v22  ;;  %v17608_v8 = vld [vmem:[#allocation59_spill] sm:$0xff]  ;;  %v17612_v1 = vld [vmem:[#allocation117_spill] sm:$0xff]  ;;  %v17616_v33 = vld [vmem:[#allocation68_spill] sm:$0xff] }
 0xb46   :  { %v5526_v39 = vmul.f32 %v17608_v8, %v13681_v52  ;;  %v5541_v63 = vmul.f32 %v17609_v9, %v13741_v43  ;;  %v17610_v24 = vld [vmem:[#allocation119_spill] sm:$0xff]  ;;  %v5460_v10 = vrot.slane %v17611_v20, %v17523_v40  ;;  %v17614_v52 = vld [vmem:[#allocation64_spill] sm:$0xff]  ;;  %v17615_v43 = vld [vmem:[#allocation118_spill] sm:$0xff] }
 0xb47   :  { %4411 = vadd.xlane.f32.xlu1 %v4348_v37  ;;  %v5542_v51 = vmul.f32 %v17610_v24, %v13767_v54  ;;  %v5533_v3 = vmul.f32 %v17614_v52, %v17577_v36  ;;  %v5534_v54 = vmul.f32 %v17616_v33, %v13718_v35  ;;  %v17617_v37 = vld [vmem:[#allocation66_spill] sm:$0xff]  ;;  %v17621_v36 = vld [vmem:[#allocation73_spill] sm:$0xff]  ;;  %v5550_v35 = vmul.f32 %v13993_v46, %v13833_v11  ;;  %v17624_v9 = vld [vmem:[#allocation120_spill] sm:$0xff] }
 0xb48   :  { %4409 = vadd.xlane.f32.xlu0 %v4346_v6  ;;  %v5530_v22 = vmul.f32 %v5460_v10, %v13699_v12  ;;  %v17618_v6 = vld [vmem:[#allocation52_spill] sm:$0xff]  ;;  %v17619_v50 = vld [vmem:[#allocation70_spill] sm:$0xff]  ;;  %v5532_v12 = vmul.f32 %v5460_v10, %v17575_v32  ;;  %v17622_v8 = vld [vmem:[#allocation121_spill] sm:$0xff] }
 0xb49   :  { %v17625_v32 = vld [vmem:[#allocation122_spill] sm:$0xff]  ;;  %v17630_v11 = vld [vmem:[#allocation76_spill] sm:$0xff]  ;;  %v17631_v46 = vld [vmem:[#allocation57_spill] sm:$0xff] }
 0xb4a   :  { %v17628_v24 = vld [vmem:[#allocation74_spill] sm:$0xff]  ;;  %v17632_v20 = vld [vmem:[#allocation83_spill] sm:$0xff] }
 0xb4b   :  { %5557 = vadd.xlane.f32.xlu1 %v17607_v38  ;;  %v17634_v10 = vld [vmem:[#allocation62_spill] sm:$0xff] }
 0xb4c   :  { %5559 = vadd.xlane.f32.xlu0 %v5527_v45  ;;  %v17620_v45 = vld [vmem:[#allocation69_spill] sm:$0xff] }
 0xb4d   :  { %v5546_v38 = vmul.f32 %v17620_v45, %v13780_v53  ;;  %v17626_v53 = vld [vmem:[#allocation123_spill] sm:$0xff]  ;;  %v17646_v45 = vld [vmem:[#allocation86_spill] sm:$0xff] }
 0xb4f   :  { %5589 = vadd.xlane.f32.xlu1 %v5526_v39  ;;  %v17623_v39 = vld [vmem:[#allocation53_spill] sm:$0xff] }
 0xb50   :  { %5573 = vadd.xlane.f32.xlu0 %v5541_v63  ;;  %v17627_v63 = vld [vmem:[#allocation78_spill] sm:$0xff] }
 0xb53   :  { %5591 = vadd.xlane.f32.xlu1 %v17612_v1  ;;  %v17636_v1 = vld [vmem:[#allocation125_spill] sm:$0xff] }
 0xb54   :  { %5605 = vadd.xlane.f32.xlu0 %v5542_v51  ;;  %v17629_v51 = vld [vmem:[#allocation75_spill] sm:$0xff] }
 0xb57   :  { %5575 = vadd.xlane.f32.xlu1 %v17613_v60  ;;  %v17638_v60 = vld [vmem:[#allocation126_spill] sm:$0xff] }
 0xb58   :  { %5593 = vadd.xlane.f32.xlu0 %v5530_v22  ;;  %v17637_v22 = vld [vmem:[#allocation80_spill] sm:$0xff] }
 0xb5b   :  { %5607 = vadd.xlane.f32.xlu1 %v17615_v43  ;;  %v17641_v43 = vld [vmem:[#allocation84_spill] sm:$0xff] }
 0xb5c   :  { %5565 = vadd.xlane.f32.xlu0 %v5533_v3 }
 0xb5f   :  { %5561 = vadd.xlane.f32.xlu1 %v17617_v37  ;;  %v17643_v37 = vld [vmem:[#allocation127_spill] sm:$0xff] }
 0xb60   :  { %5597 = vadd.xlane.f32.xlu0 %v5534_v54 }
 0xb63   :  { %5563 = vadd.xlane.f32.xlu1 %v17618_v6  ;;  %v17644_v6 = vld [vmem:[#allocation67_spill] sm:$0xff] }
 0xb64   :  { %5577 = vadd.xlane.f32.xlu0 %v17619_v50 }
 0xb67   :  { %5595 = vadd.xlane.f32.xlu1 %v5532_v12 }
 0xb68   :  { %5609 = vadd.xlane.f32.xlu0 %v5546_v38  ;;  %v17647_v38 = vld [vmem:[#allocation90_spill] sm:$0xff] }
 0xb6b   :  { %5567 = vadd.xlane.f32.xlu1 %v17621_v36 }
 0xb6c   :  { %5581 = vadd.xlane.f32.xlu0 %v17622_v8 }
 0xb6f   :  { %5599 = vadd.xlane.f32.xlu1 %v17623_v39  ;;  %v17650_v39 = vld [vmem:[#allocation91_spill] sm:$0xff] }
 0xb70   :  { %5613 = vadd.xlane.f32.xlu0 %v5550_v35  ;;  %v17649_v35 = vld [vmem:[#allocation88_spill] sm:$0xff] }
 0xb73   :  { %5579 = vadd.xlane.f32.xlu1 %v17624_v9 }
 0xb74   :  { %6753 = vadd.xlane.f32.xlu0 %v14029_v4  ;;  %v17633_v4 = vld [vmem:[#allocation79_spill] sm:$0xff] }
 0xb77   :  { %5611 = vadd.xlane.f32.xlu1 %v17625_v32 }
 0xb78   :  { %6785 = vadd.xlane.f32.xlu0 %v14032_v48  ;;  %v17635_v48 = vld [vmem:[#allocation81_spill] sm:$0xff] }
 0xb7b   :  { %5583 = vadd.xlane.f32.xlu1 %v17626_v53  ;;  %v17652_v53 = vld [vmem:[#allocation85_spill] sm:$0xff] }
 0xb7c   :  { %5569 = vadd.xlane.f32.xlu0 %v17627_v63  ;;  %v17653_v63 = vld [vmem:[#allocation72_spill] sm:$0xff] }
 0xb7f   :  { %5615 = vadd.xlane.f32.xlu1 %v17628_v24 }
 0xb80   :  { %5601 = vadd.xlane.f32.xlu0 %v17629_v51 }
 0xb83   :  { %6755 = vadd.xlane.f32.xlu1 %v17630_v11  ;;  %v17656_v11 = vld [vmem:[#allocation92_spill] sm:$0xff] }
 0xb84   :  { %6769 = vadd.xlane.f32.xlu0 %v14051_v7  ;;  %v17640_v7 = vld [vmem:[#allocation124_spill] sm:$0xff] }
 0xb87   :  { %6787 = vadd.xlane.f32.xlu1 %v17631_v46  ;;  %v17657_v46 = vld [vmem:[#allocation130_spill] sm:$0xff] }
 0xb88   :  { %6801 = vadd.xlane.f32.xlu0 %v17632_v20 }
 0xb8b   :  { %5571 = vadd.xlane.f32.xlu1 %v17633_v4 }
 0xb8c   :  { %5585 = vadd.xlane.f32.xlu0 %v17634_v10  ;;  %v17658_v10 = vld [vmem:[#allocation94_spill] sm:$0xff] }
 0xb8d   :  { %v14374_v52 = vpop.xlane.xlu1 %4367 }
 0xb8e   :  { %v14376_v3 = vpop.xlane.xlu0 %4349 }
 0xb8f   :  { %5603 = vadd.xlane.f32.xlu1 %v17635_v48  ;;  %17639 = vst [vmem:[#allocation105_spill] sm:$0xff] %v14376_v3  ;;  %v17659_v48 = vld [vmem:[#allocation131_spill] sm:$0xff] }
 0xb90   :  { %5617 = vadd.xlane.f32.xlu0 %v17636_v1 }
 0xb91   :  { %v14380_v33 = vpop.xlane.xlu1 %4383 }
 0xb92   :  { %v14382_v54 = vpop.xlane.xlu0 %4351 }
 0xb93   :  { %6771 = vadd.xlane.f32.xlu1 %v17637_v22  ;;  %17642 = vst [vmem:[#allocation106_spill] sm:$0xff] %v14382_v54 }
 0xb94   :  { %6757 = vadd.xlane.f32.xlu0 %v17638_v60  ;;  %v17660_v60 = vld [vmem:[#allocation128_spill] sm:$0xff] }
 0xb95   :  { %v14386_v50 = vpop.xlane.xlu1 %4399 }
 0xb96   :  { %17645 = vst [vmem:[#allocation104_spill] sm:$0xff] %v14386_v50  ;;  %v14388_v12 = vpop.xlane.xlu0 %4365 }
 0xb97   :  { %6803 = vadd.xlane.f32.xlu1 %v17640_v7 }
 0xb98   :  { %6789 = vadd.xlane.f32.xlu0 %v17641_v43 }
 0xb99   :  { %v14392_v36 = vpop.xlane.xlu1 %4353 }
 0xb9a   :  { %17648 = vst [vmem:[#allocation87_spill] sm:$0xff] %v14392_v36  ;;  %v14394_v8 = vpop.xlane.xlu0 %4381 }
 0xb9b   :  { %5587 = vadd.xlane.f32.xlu1 %v17643_v37  ;;  %v17662_v37 = vld [vmem:[#allocation129_spill] sm:$0xff] }
 0xb9c   :  { %6761 = vadd.xlane.f32.xlu0 %v17644_v6 }
 0xb9d   :  { %v14398_v9 = vpop.xlane.xlu1 %4355 }
 0xb9e   :  { %17651 = vst [vmem:[#allocation107_spill] sm:$0xff] %v14398_v9  ;;  %v14400_v32 = vpop.xlane.xlu0 %4397 }
 0xb9f   :  { %5619 = vadd.xlane.f32.xlu1 %v17646_v45 }
 0xba0   :  { %6793 = vadd.xlane.f32.xlu0 %v17647_v38  ;;  %v17664_v38 = vld [vmem:[#allocation95_spill] sm:$0xff] }
 0xba1   :  { %v14404_v24 = vpop.xlane.xlu1 %4359 }
 0xba2   :  { %17654 = vst [vmem:[#allocation108_spill] sm:$0xff] %v14404_v24  ;;  %v14406_v51 = vpop.xlane.xlu0 %4357 }
 0xba3   :  { %6759 = vadd.xlane.f32.xlu1 %v17649_v35  ;;  %17655 = vst [vmem:[#allocation89_spill] sm:$0xff] %v14406_v51  ;;  %v17665_v35 = vld [vmem:[#allocation98_spill] sm:$0xff] }
 0xba4   :  { %6773 = vadd.xlane.f32.xlu0 %v17650_v39 }
 0xba5   :  { %v14410_v20 = vpop.xlane.xlu1 %4371 }
 0xba6   :  { %v14412_v4 = vpop.xlane.xlu0 %4369 }
 0xba7   :  { %6791 = vadd.xlane.f32.xlu1 %v17652_v53 }
 0xba8   :  { %6805 = vadd.xlane.f32.xlu0 %v17653_v63 }
 0xbaa   :  { %v14416_v1 = vpop.xlane.xlu1 %4375 }
 0xbab   :  { %6763 = vadd.xlane.f32.xlu1 %v17656_v11  ;;  %v14418_v22 = vpop.xlane.xlu0 %4373 }
 0xbac   :  { %6777 = vadd.xlane.f32.xlu0 %v17657_v46 }
 0xbaf   :  { %6795 = vadd.xlane.f32.xlu1 %v17658_v10  ;;  %v14422_v7 = vpop.xlane.xlu1 %4387 }
 0xbb0   :  { %6809 = vadd.xlane.f32.xlu0 %v17659_v48  ;;  %17661 = vst [vmem:[#allocation109_spill] sm:$0xff] %v14422_v7  ;;  %v14424_v43 = vpop.xlane.xlu0 %4385 }
 0xbb3   :  { %6775 = vadd.xlane.f32.xlu1 %v17660_v60  ;;  %v14428_v6 = vpop.xlane.xlu1 %4391 }
 0xbb4   :  { %7949 = vadd.xlane.f32.xlu0 %v14175_v19  ;;  %17663 = vst [vmem:[#allocation110_spill] sm:$0xff] %v14428_v6  ;;  %v17667_v19 = vld [vmem:[#allocation97_spill] sm:$0xff] }
 0xbb5   :  { %v14430_v45 = vpop.xlane.xlu0 %4389 }
 0xbb7   :  { %6807 = vadd.xlane.f32.xlu1 %v17662_v37  ;;  %v14434_v39 = vpop.xlane.xlu1 %4403 }
 0xbb8   :  { %7981 = vadd.xlane.f32.xlu0 %v14178_v26  ;;  %17666 = vst [vmem:[#allocation93_spill] sm:$0xff] %v14434_v39  ;;  %v17669_v26 = vld [vmem:[#allocation96_spill] sm:$0xff] }
 0xbb9   :  { %v14436_v53 = vpop.xlane.xlu0 %4401 }
 0xbbb   :  { %6779 = vadd.xlane.f32.xlu1 %v17664_v38  ;;  %v14440_v63 = vpop.xlane.xlu1 %4407 }
 0xbbc   :  { %6765 = vadd.xlane.f32.xlu0 %v17665_v35  ;;  %17668 = vst [vmem:[#allocation132_spill] sm:$0xff] %v14440_v63  ;;  %v17676_v35 = vld [vmem:[#allocation102_spill] sm:$0xff] }
 0xbbd   :  { %v14442_v11 = vpop.xlane.xlu0 %4405 }
 0xbbf   :  { %6811 = vadd.xlane.f32.xlu1 %v17667_v19 }
 0xbc0   :  { %6797 = vadd.xlane.f32.xlu0 %v14184_v49  ;;  %v17673_v49 = vld [vmem:[#allocation77_spill] sm:$0xff] }
 0xbc3   :  { %7951 = vadd.xlane.f32.xlu1 %v17669_v26 }
 0xbc4   :  { %7965 = vadd.xlane.f32.xlu0 %v14205_v41  ;;  %v14446_v46 = vpop.xlane.xlu1 %4363  ;;  %v17675_v41 = vld [vmem:[#allocation99_spill] sm:$0xff] }
 0xbc5   :  { %17670 = vst [vmem:[#allocation133_spill] sm:$0xff] %v14446_v46  ;;  %v14448_v10 = vpop.xlane.xlu0 %4361 }
 0xbc6   :  { %17671 = vst [vmem:[#allocation54_spill] sm:$0xff] %v14448_v10 }
 0xbc7   :  { %7983 = vadd.xlane.f32.xlu1 %v14191_v13 }
 0xbc8   :  { %7997 = vadd.xlane.f32.xlu0 %v14208_v5  ;;  %v14452_v48 = vpop.xlane.xlu1 %4379  ;;  %v17678_v5 = vld [vmem:[#allocation101_spill] sm:$0xff] }
 0xbc9   :  { %17672 = vst [vmem:[#allocation56_spill] sm:$0xff] %v14452_v48  ;;  %v14454_v60 = vpop.xlane.xlu0 %4377 }
 0xbcb   :  { %6767 = vadd.xlane.f32.xlu1 %v17673_v49 }
 0xbcc   :  { %6781 = vadd.xlane.f32.xlu0 %v14215_v62  ;;  %v14458_v37 = vpop.xlane.xlu1 %4395 }
 0xbcd   :  { %17674 = vst [vmem:[#allocation63_spill] sm:$0xff] %v14458_v37  ;;  %v14460_v38 = vpop.xlane.xlu0 %4393 }
 0xbcf   :  { %6799 = vadd.xlane.f32.xlu1 %v17675_v41 }
 0xbd0   :  { %6813 = vadd.xlane.f32.xlu0 %v17676_v35  ;;  %v14464_v19 = vpop.xlane.xlu1 %4411  ;;  %v17682_v35 = vld [vmem:[#allocation100_spill] sm:$0xff] }
 0xbd1   :  { %17677 = vst [vmem:[#allocation58_spill] sm:$0xff] %v14464_v19  ;;  %v14466_v13 = vpop.xlane.xlu0 %4409 }
 0xbd3   :  { %7967 = vadd.xlane.f32.xlu1 %v17678_v5 }
 0xbd4   :  { %7953 = vadd.xlane.f32.xlu0 %v14225_v55  ;;  %v14470_v26 = vpop.xlane.xlu1 %5557  ;;  %v17684_v55 = vld [vmem:[#allocation82_spill] sm:$0xff] }
 0xbd5   :  { %v14472_v49 = vpop.xlane.xlu0 %5559 }
 0xbd6   :  { %17679 = vst [vmem:[#allocation55_spill] sm:$0xff] %v14472_v49 }
 0xbd7   :  { %7999 = vadd.xlane.f32.xlu1 %v14221_v59  ;;  %v17686_v59 = vlaneseq }
 0xbd8   :  { %7985 = vadd.xlane.f32.xlu0 %v14236_v29  ;;  %v14476_v62 = vpop.xlane.xlu1 %5589 }
 0xbd9   :  { %17680 = vst [vmem:[#allocation65_spill] sm:$0xff] %v14476_v62  ;;  %v14478_v41 = vpop.xlane.xlu0 %5573  ;;  %v14491_v29 = vand.u32 127, %v17686_v59  ;;  %v17693_v59 = vld [vmem:[#allocation47_spill] sm:$0xff] }
 0xbda   :  { %17681 = vst [vmem:[#allocation71_spill] sm:$0xff] %v14478_v41 }
 0xbdb   :  { %6783 = vadd.xlane.f32.xlu1 %v17682_v35  ;;  %17687 = vst [vmem:[#allocation59_spill] sm:$0xff] %v14491_v29  ;;  %v4435_v35 = vadd.s32 4294967288, %v14491_v29 }
 0xbdc   :  { %7957 = vadd.xlane.f32.xlu0 %v14248_v18  ;;  %v14482_v40 = vpop.xlane.xlu1 %5591 }
 0xbdd   :  { %v14484_v5 = vpop.xlane.xlu0 %5605  ;;  %v14507_v41 = vsub.s32 %v4435_v35, %v17693_v59 }
 0xbde   :  { %17683 = vst [vmem:[#allocation50_spill] sm:$0xff] %v14484_v5 }
 0xbdf   :  { %6815 = vadd.xlane.f32.xlu1 %v17684_v55  ;;  %v17691_v55 = vld [vmem:[#allocation103_spill] sm:$0xff] }
 0xbe0   :  { %7989 = vadd.xlane.f32.xlu0 %v14257_v23  ;;  %v14488_v57 = vpop.xlane.xlu1 %5575 }
 0xbe1   :  { %17685 = vst [vmem:[#allocation60_spill] sm:$0xff] %v14488_v57  ;;  %v14493_v62 = vpop.xlane.xlu0 %5593 }
 0xbe2   :  { %17688 = vst [vmem:[#allocation51_spill] sm:$0xff] %v14493_v62 }
 0xbe3   :  { %7955 = vadd.xlane.f32.xlu1 %v14240_v58  ;;  %v14513_v58 = vsub.s32 %v14491_v29, %v17693_v59 }
 0xbe4   :  { %7969 = vadd.xlane.f32.xlu0 %v14268_v47  ;;  %v14497_v18 = vpop.xlane.xlu1 %5607  ;;  %v4449_v47 = vrot.slane %v14398_v9, %v14507_v41  ;;  %v4467_v9 = vrot.slane %v14446_v46, %v14507_v41 }
 0xbe5   :  { %17689 = vst [vmem:[#allocation119_spill] sm:$0xff] %v14497_v18  ;;  %v14500_v5 = vpop.xlane.xlu0 %5565  ;;  %v4439_v18 = vrot.slane %v14382_v54, %v14507_v41  ;;  %v4445_v29 = vrot.slane %v14392_v36, %v14513_v58 }
 0xbe6   :  { %17690 = vst [vmem:[#allocation61_spill] sm:$0xff] %v14500_v5 }
 0xbe7   :  { %7987 = vadd.xlane.f32.xlu1 %v17691_v55  ;;  %v4454_v55 = vrot.slane %v14406_v51, %v14513_v58 }
 0xbe8   :  { %8001 = vadd.xlane.f32.xlu0 %v14271_v27  ;;  %v14504_v23 = vpop.xlane.xlu1 %5561  ;;  %v4458_v27 = vrot.slane %v14404_v24, %v14507_v41  ;;  %v4450_v24 = vsel %vm4440_vm0, %v4449_v47, %v4445_v29 }
 0xbe9   :  { %17692 = vst [vmem:[#allocation117_spill] sm:$0xff] %v14504_v23  ;;  %v14509_v57 = vpop.xlane.xlu0 %5597 }
 0xbea   :  { %17694 = vst [vmem:[#allocation116_spill] sm:$0xff] %v14509_v57  ;;  %v4459_v36 = vsel %vm4440_vm0, %v4458_v27, %v4454_v55 }
 0xbeb   :  { %7959 = vadd.xlane.f32.xlu1 %v14254_v21  ;;  %v4463_v21 = vrot.slane %v14448_v10, %v14513_v58 }
 0xbec   :  { %7973 = vadd.xlane.f32.xlu0 %v14281_v16  ;;  %v14523_v35 = vpop.xlane.xlu1 %5563  ;;  %v4434_v16 = vrot.slane %v14376_v3, %v14513_v58  ;;  %v4472_v3 = vrot.slane %v14388_v12, %v14513_v58 }
 0xbed   :  { %v14533_v51 = vpop.xlane.xlu0 %5577  ;;  %v4468_v54 = vsel %vm4440_vm0, %v4467_v9, %v4463_v21  ;;  %v4481_v9 = vrot.slane %v14412_v4, %v14513_v58 }
 0xbee   :  { %17695 = vst [vmem:[#allocation64_spill] sm:$0xff] %v14533_v51  ;;  %v4441_v10 = vsel %vm4440_vm0, %v4439_v18, %v4434_v16  ;;  %v4853_v16 = vrot.slane %v14424_v43, %v14513_v58 }
 0xbef   :  { %7991 = vadd.xlane.f32.xlu1 %v14262_v14  ;;  %v4506_v29 = vsel %vm4505_vm1, %v4450_v24, %v4441_v10  ;;  %v4485_v24 = vrot.slane %v14410_v20, %v14507_v41 }
 0xbf0   :  { %8005 = vadd.xlane.f32.xlu0 %v14284_v44  ;;  %v14541_v46 = vpop.xlane.xlu1 %5595  ;;  %v4508_v14 = vsel %vm4507_vm2, %v4459_v36, %v4506_v29  ;;  %v4476_v44 = vrot.slane %v14374_v52, %v14507_v41  ;;  %v4857_v29 = vrot.slane %v14422_v7, %v14507_v41  ;;  %v4848_v7 = vrot.slane %v14380_v33, %v14507_v41 }
 0xbf1   :  { %17696 = vst [vmem:[#allocation118_spill] sm:$0xff] %v14541_v46  ;;  %v14545_v59 = vpop.xlane.xlu0 %5609  ;;  %v4510_v47 = vsel %vm4509_vm3, %v4468_v54, %v4508_v14  ;;  %v4494_v54 = vrot.slane %v14416_v1, %v14507_v41  ;;  %v4486_v27 = vsel %vm4440_vm0, %v4485_v24, %v4481_v9  ;;  %v4862_v14 = vrot.slane %v14430_v45, %v14513_v58 }
 0xbf2   :  { %17697 = vst [vmem:[#allocation68_spill] sm:$0xff] %v14545_v59  ;;  %v4875_v9 = vrot.slane %v14458_v37, %v14507_v41  ;;  %v4871_v24 = vrot.slane %v14460_v38, %v14513_v58  ;;  %v4858_v37 = vsel %vm4440_vm0, %v4857_v29, %v4853_v16 }
 0xbf3   :  { %7971 = vadd.xlane.f32.xlu1 %v14274_v42  ;;  %v4477_v42 = vsel %vm4440_vm0, %v4476_v44, %v4472_v3  ;;  %v4503_v3 = vrot.slane %v14452_v48, %v14507_v41  ;;  %v4866_v44 = vrot.slane %v14428_v6, %v14507_v41 }
 0xbf4   :  { %7961 = vadd.xlane.f32.xlu0 %v14297_v2  ;;  %v14556_v18 = vpop.xlane.xlu1 %5567  ;;  %v4512_v36 = vsel %vm4511_vm4, %v4477_v42, %v4510_v47  ;;  %v4490_v2 = vrot.slane %v14418_v22, %v14513_v58  ;;  %v4844_v47 = vrot.slane %v14394_v8, %v14513_v58 }
 0xbf5   :  { %17698 = vst [vmem:[#allocation66_spill] sm:$0xff] %v14556_v18  ;;  %v14562_v10 = vpop.xlane.xlu0 %5581  ;;  %v4867_v48 = vsel %vm4440_vm0, %v4866_v44, %v4862_v14  ;;  %v4893_v14 = vrot.slane %v14434_v39, %v14507_v41 }
 0xbf6   :  { %17699 = vst [vmem:[#allocation52_spill] sm:$0xff] %v14562_v10 }
 0xbf7   :  { %8003 = vadd.xlane.f32.xlu1 %v14277_v31  ;;  %v4499_v31 = vrot.slane %v14454_v60, %v14513_v58 }
 0xbf8   :  { %7993 = vadd.xlane.f32.xlu0 %v14300_v30  ;;  %v14572_v55 = vpop.xlane.xlu1 %5599  ;;  %v4514_v30 = vsel %vm4513_vm5, %v4486_v27, %v4512_v36  ;;  %v4495_v36 = vsel %vm4440_vm0, %v4494_v54, %v4490_v2  ;;  %v4876_v2 = vsel %vm4440_vm0, %v4875_v9, %v4871_v24  ;;  %v4902_v9 = vrot.slane %v14440_v63, %v14507_v41 }
 0xbf9   :  { %17700 = vst [vmem:[#allocation70_spill] sm:$0xff] %v14572_v55  ;;  %v14579_v21 = vpop.xlane.xlu0 %5613  ;;  %v4504_v6 = vsel %vm4440_vm0, %v4503_v3, %v4499_v31  ;;  %v4880_v31 = vrot.slane %v14400_v32, %v14513_v58 }
 0xbfa   :  { %17701 = vst [vmem:[#allocation69_spill] sm:$0xff] %v14579_v21 }
 0xbfb   :  { %7975 = vadd.xlane.f32.xlu1 %v14289_v34  ;;  %v4516_v34 = vsel %vm4515_vm6, %v4495_v36, %v4514_v30  ;;  %v4911_v36 = vrot.slane %v14464_v19, %v14507_v41  ;;  %v17717_v19 = vld [vmem:[#allocation60_spill] sm:$0xff] }
 0xbfc   :  { %7977 = vadd.xlane.f32.xlu0 %v14310_v28  ;;  %v14598_v42 = vpop.xlane.xlu1 %5579  ;;  %v4849_v28 = vsel %vm4440_vm0, %v4848_v7, %v4844_v47  ;;  %v4518_v3 = vsel %vm4517_vm7, %v4504_v6, %v4516_v34  ;;  %v4884_v7 = vrot.slane %v14386_v50, %v14507_v41  ;;  %v4889_v6 = vrot.slane %v14436_v53, %v14513_v58 }
 0xbfd   :  { %17702 = vst [vmem:[#allocation73_spill] sm:$0xff] %v14598_v42  ;;  %v14601_v27 = vpop.xlane.xlu0 %6753  ;;  %v4913_v16 = vsel %vm4505_vm1, %v4858_v37, %v4849_v28  ;;  %v4907_v34 = vrot.slane %v14466_v13, %v14513_v58  ;;  %v5680_v63 = vrot.slane %v17717_v19, %v14507_v41  ;;  %v17721_v19 = vld [vmem:[#allocation71_spill] sm:$0xff] }
 0xbfe   :  { %17703 = vst [vmem:[#allocation121_spill] sm:$0xff] %v14601_v27  ;;  %v4894_v24 = vsel %vm4440_vm0, %v4893_v14, %v4889_v6 }
 0xbff   :  { %8007 = vadd.xlane.f32.xlu1 %v14293_v61  ;;  %v4914_v61 = vsel %vm4507_vm2, %v4867_v48, %v4913_v16  ;;  %v4885_v48 = vsel %vm4440_vm0, %v4884_v7, %v4880_v31 }
 0xc00   :  { %8009 = vadd.xlane.f32.xlu0 %v14313_v56  ;;  %v14613_v54 = vpop.xlane.xlu1 %5611  ;;  %v4915_v30 = vsel %vm4509_vm3, %v4876_v2, %v4914_v61  ;;  %v4521_v56 = vsel %vm4520_vm8, %v4518_v3, -inf }
 0xc01   :  { %17704 = vst [vmem:[#allocation53_spill] sm:$0xff] %v14613_v54  ;;  %v14619_v29 = vpop.xlane.xlu0 %6785  ;;  %v4916_v47 = vsel %vm4511_vm4, %v4885_v48, %v4915_v30  ;;  %v5653_v48 = vrot.slane %v14523_v35, %v14507_v41 }
 0xc02   :  { %17705 = vst [vmem:[#allocation120_spill] sm:$0xff] %v14619_v29  ;;  %v4917_v3 = vsel %vm4513_vm5, %v4894_v24, %v4916_v47  ;;  %v5649_v24 = vrot.slane %v14504_v23, %v14513_v58 }
 0xc03   :  { %7963 = vadd.xlane.f32.xlu1 %v14303_v15  ;;  %v4898_v15 = vrot.slane %v14442_v11, %v14513_v58 }
 0xc04   :  { %4522 = vmax.xlane.f32.xlu0 %v4521_v56  ;;  %v14631_v37 = vpop.xlane.xlu1 %5583 }
 0xc05   :  { %17706 = vst [vmem:[#allocation122_spill] sm:$0xff] %v14631_v37  ;;  %v14634_v44 = vpop.xlane.xlu0 %5569  ;;  %v4903_v31 = vsel %vm4440_vm0, %v4902_v9, %v4898_v15  ;;  %v5640_v15 = vrot.slane %v14470_v26, %v14513_v58  ;;  %v5662_v9 = vrot.slane %v14556_v18, %v14507_v41 }
 0xc06   :  { %17707 = vst [vmem:[#allocation123_spill] sm:$0xff] %v14634_v44  ;;  %v4918_v61 = vsel %vm4515_vm6, %v4903_v31, %v4917_v3  ;;  %v5654_v31 = vsel %vm4440_vm0, %v5653_v48, %v5649_v24  ;;  %v6049_v48 = vrot.slane %v14493_v62, %v14513_v58 }
 0xc07   :  { %7995 = vadd.xlane.f32.xlu1 %v14306_v0  ;;  %v4912_v0 = vsel %vm4440_vm0, %v4911_v36, %v4907_v34  ;;  %v5658_v34 = vrot.slane %v14500_v5, %v14513_v58  ;;  %v6044_v5 = vrot.slane %v14482_v40, %v14507_v41 }
 0xc08   :  { %v14647_v28 = vpop.xlane.xlu1 %5615  ;;  %v4919_v30 = vsel %vm4517_vm7, %v4912_v0, %v4918_v61  ;;  %v6053_v0 = vrot.slane %v14541_v46, %v14507_v41  ;;  %v5667_v61 = vrot.slane %v14634_v44, %v14513_v58 }
 0xc09   :  { %17708 = vst [vmem:[#allocation78_spill] sm:$0xff] %v14647_v28  ;;  %v14649_v2 = vpop.xlane.xlu0 %5601  ;;  %v5663_v23 = vsel %vm4440_vm0, %v5662_v9, %v5658_v34  ;;  %v17719_v34 = vld [vmem:[#allocation65_spill] sm:$0xff] }
 0xc0a   :  { %17709 = vst [vmem:[#allocation74_spill] sm:$0xff] %v14649_v2  ;;  %v6040_v39 = vrot.slane %v17719_v34, %v14513_v58  ;;  %v6054_v62 = vsel %vm4440_vm0, %v6053_v0, %v6049_v48  ;;  %v5689_v34 = vrot.slane %v14598_v42, %v14507_v41  ;;  %v17722_v48 = vld [vmem:[#allocation119_spill] sm:$0xff] }
 0xc0b   :  { %7979 = vadd.xlane.f32.xlu1 %v14316_v25  ;;  %v4921_v25 = vsel %vm4520_vm8, %v4919_v30, -inf }
 0xc0c   :  { %v14654_v16 = vpop.xlane.xlu1 %6755 }
 0xc0d   :  { %17710 = vst [vmem:[#allocation75_spill] sm:$0xff] %v14654_v16  ;;  %v14658_v7 = vpop.xlane.xlu0 %6769 }
 0xc0e   :  { %17711 = vst [vmem:[#allocation76_spill] sm:$0xff] %v14658_v7 }
 0xc0f   :  { %8011 = vadd.xlane.f32.xlu1 %v14319_v17  ;;  %v5644_v17 = vrot.slane %v14472_v49, %v14507_v41  ;;  %v6062_v49 = vrot.slane %v14572_v55, %v14507_v41 }
 0xc10   :  { %v14662_v56 = vpop.xlane.xlu1 %6787 }
 0xc11   :  { %v14664_v6 = vpop.xlane.xlu0 %6801 }
 0xc12   :  { %17712 = vst [vmem:[#allocation57_spill] sm:$0xff] %v14664_v6 }
 0xc13   :  { %4922 = vmax.xlane.f32.xlu1 %v4921_v25  ;;  %v5645_v25 = vsel %vm4440_vm0, %v5644_v17, %v5640_v15  ;;  %v6058_v15 = vrot.slane %v14509_v57, %v14513_v58 }
 0xc14   :  { %v14667_v14 = vpop.xlane.xlu1 %5571  ;;  %v5709_v17 = vsel %vm4505_vm1, %v5654_v31, %v5645_v25  ;;  %v6045_v25 = vsel %vm4440_vm0, %v6044_v5, %v6040_v39 }
 0xc15   :  { %17713 = vst [vmem:[#allocation83_spill] sm:$0xff] %v14667_v14  ;;  %v14671_v47 = vpop.xlane.xlu0 %5585  ;;  %v5671_v36 = vrot.slane %v14667_v14, %v14507_v41  ;;  %v5676_v14 = vrot.slane %v17721_v19, %v14513_v58  ;;  %v6063_v57 = vsel %vm4440_vm0, %v6062_v49, %v6058_v15  ;;  %v5685_v49 = vrot.slane %v14533_v51, %v14513_v58 }
 0xc16   :  { %17714 = vst [vmem:[#allocation79_spill] sm:$0xff] %v14671_v47 }
 0xc17   :  { %v5672_v24 = vsel %vm4440_vm0, %v5671_v36, %v5667_v61  ;;  %v5710_v36 = vsel %vm4507_vm2, %v5663_v23, %v5709_v17  ;;  %v6067_v61 = vrot.slane %v14649_v2, %v14513_v58  ;;  %v5681_v23 = vsel %vm4440_vm0, %v5680_v63, %v5676_v14 }
 0xc18   :  { %v14685_v3 = vpop.xlane.xlu1 %5603  ;;  %v5711_v31 = vsel %vm4509_vm3, %v5672_v24, %v5710_v36  ;;  %v6080_v17 = vrot.slane %v17722_v48, %v14507_v41  ;;  %v6109_v2 = vsel %vm4505_vm1, %v6054_v62, %v6045_v25  ;;  %v5698_v63 = vrot.slane %v14631_v37, %v14507_v41 }
 0xc19   :  { %17715 = vst [vmem:[#allocation62_spill] sm:$0xff] %v14685_v3  ;;  %v14692_v30 = vpop.xlane.xlu0 %5617  ;;  %v6071_v44 = vrot.slane %v14685_v3, %v14507_v41  ;;  %v6110_v24 = vsel %vm4507_vm2, %v6063_v57, %v6109_v2  ;;  %v5712_v5 = vsel %vm4511_vm4, %v5681_v23, %v5711_v31  ;;  %v5690_v62 = vsel %vm4440_vm0, %v5689_v34, %v5685_v49 }
 0xc1a   :  { %17716 = vst [vmem:[#allocation81_spill] sm:$0xff] %v14692_v30  ;;  %v6089_v36 = vrot.slane %v14613_v54, %v14507_v41  ;;  %v5694_v57 = vrot.slane %v14562_v10, %v14513_v58  ;;  %v5713_v31 = vsel %vm4513_vm5, %v5690_v62, %v5712_v5  ;;  %v6085_v25 = vrot.slane %v14545_v59, %v14513_v58 }
 0xc1b   :  { %v6072_v0 = vsel %vm4440_vm0, %v6071_v44, %v6067_v61  ;;  %v17724_v44 = vld [vmem:[#allocation50_spill] sm:$0xff]  ;;  %v6098_v49 = vrot.slane %v14647_v28, %v14507_v41  ;;  %v6840_v28 = vrot.slane %v14654_v16, %v14507_v41  ;;  %v6836_v48 = vrot.slane %v14601_v27, %v14513_v58 }
 0xc1c   :  { %v14710_v9 = vpop.xlane.xlu1 %6771  ;;  %v6076_v15 = vrot.slane %v17724_v44, %v14513_v58  ;;  %v6111_v14 = vsel %vm4509_vm3, %v6072_v0, %v6110_v24  ;;  %v5703_v0 = vrot.slane %v14671_v47, %v14513_v58  ;;  %v5699_v24 = vsel %vm4440_vm0, %v5698_v63, %v5694_v57 }
 0xc1d   :  { %17718 = vst [vmem:[#allocation125_spill] sm:$0xff] %v14710_v9  ;;  %v14718_v3 = vpop.xlane.xlu0 %6757  ;;  %v6090_v5 = vsel %vm4440_vm0, %v6089_v36, %v6085_v25  ;;  %v5714_v62 = vsel %vm4515_vm6, %v5699_v24, %v5713_v31  ;;  %v6094_v47 = vrot.slane %v14579_v21, %v14513_v58 }
 0xc1e   :  { %17720 = vst [vmem:[#allocation80_spill] sm:$0xff] %v14718_v3  ;;  %v6081_v61 = vsel %vm4440_vm0, %v6080_v17, %v6076_v15  ;;  %v6845_v54 = vrot.slane %v14718_v3, %v14513_v58 }
 0xc1f   :  { %v6112_v17 = vsel %vm4511_vm4, %v6081_v61, %v6111_v14  ;;  %v6103_v61 = vrot.slane %v14692_v30, %v14513_v58  ;;  %v6099_v31 = vsel %vm4440_vm0, %v6098_v49, %v6094_v47 }
 0xc20   :  { %v14732_v50 = vpop.xlane.xlu1 %6803  ;;  %v6113_v14 = vsel %vm4513_vm5, %v6090_v5, %v6112_v17 }
 0xc21   :  { %v14737_v39 = vpop.xlane.xlu0 %6789 }
 0xc22   :  { %17723 = vst [vmem:[#allocation126_spill] sm:$0xff] %v14737_v39 }
 0xc24   :  { %v14751_v2 = vpop.xlane.xlu1 %5587 }
 0xc25   :  { %17725 = vst [vmem:[#allocation124_spill] sm:$0xff] %v14751_v2  ;;  %v5707_v34 = vrot.slane %v14751_v2, %v14507_v41  ;;  %v14760_v23 = vpop.xlane.xlu0 %6761 }
 0xc26   :  { %17726 = vst [vmem:[#allocation84_spill] sm:$0xff] %v14760_v23 }
 0xc27   :  { %v5708_v15 = vsel %vm4440_vm0, %v5707_v34, %v5703_v0  ;;  %v6114_v0 = vsel %vm4515_vm6, %v6099_v31, %v6113_v14 }
 0xc28   :  { %v14771_v10 = vpop.xlane.xlu1 %5619  ;;  %v5715_v59 = vsel %vm4517_vm7, %v5708_v15, %v5714_v62 }
 0xc29   :  { %17727 = vst [vmem:[#allocation127_spill] sm:$0xff] %v14771_v10  ;;  %v6107_v63 = vrot.slane %v14771_v10, %v14507_v41  ;;  %v14779_v36 = vpop.xlane.xlu0 %6793  ;;  %v5717_v57 = vsel %vm4520_vm8, %v5715_v59, -inf }
 0xc2a   :  { %17728 = vst [vmem:[#allocation67_spill] sm:$0xff] %v14779_v36  ;;  %5718 = vmax.xlane.f32.xlu0 %v5717_v57 }
 0xc2b   :  { %v6108_v25 = vsel %vm4440_vm0, %v6107_v63, %v6103_v61 }
 0xc2c   :  { %v14785_v34 = vpop.xlane.xlu1 %6759  ;;  %v6115_v17 = vsel %vm4517_vm7, %v6108_v25, %v6114_v0 }
 0xc2d   :  { %17729 = vst [vmem:[#allocation86_spill] sm:$0xff] %v14785_v34  ;;  %v14788_v24 = vpop.xlane.xlu0 %6773  ;;  %v6117_v5 = vsel %vm4520_vm8, %v6115_v17, -inf  ;;  %v6849_v10 = vrot.slane %v14785_v34, %v14507_v41  ;;  %v6854_v34 = vrot.slane %v14760_v23, %v14513_v58  ;;  %v7240_v23 = vrot.slane %v14662_v56, %v14507_v41 }
 0xc2e   :  { %17730 = vst [vmem:[#allocation90_spill] sm:$0xff] %v14788_v24  ;;  %6118 = vmax.xlane.f32.xlu1 %v6117_v5 }
 0xc2f   :  { %v6850_v18 = vsel %vm4440_vm0, %v6849_v10, %v6845_v54  ;;  %v7245_v10 = vrot.slane %v14737_v39, %v14513_v58 }
 0xc30   :  { %v14791_v15 = vpop.xlane.xlu1 %6791 }
 0xc31   :  { %17731 = vst [vmem:[#allocation88_spill] sm:$0xff] %v14791_v15  ;;  %v14793_v62 = vpop.xlane.xlu0 %6805  ;;  %v7249_v16 = vrot.slane %v14791_v15, %v14507_v41  ;;  %v6876_v15 = vrot.slane %v14710_v9, %v14507_v41  ;;  %v6872_v9 = vrot.slane %v14658_v7, %v14513_v58 }
 0xc32   :  { %17732 = vst [vmem:[#allocation91_spill] sm:$0xff] %v14793_v62 }
 0xc33   :  { %v7250_v39 = vsel %vm4440_vm0, %v7249_v16, %v7245_v10  ;;  %v7276_v10 = vrot.slane %v14732_v50, %v14507_v41 }
 0xc34   :  { %v14795_v59 = vpop.xlane.xlu1 %6763 }
 0xc35   :  { %17733 = vst [vmem:[#allocation85_spill] sm:$0xff] %v14795_v59  ;;  %v14797_v47 = vpop.xlane.xlu0 %6777  ;;  %v6858_v37 = vrot.slane %v14795_v59, %v14507_v41 }
 0xc36   :  { %17734 = vst [vmem:[#allocation72_spill] sm:$0xff] %v14797_v47 }
 0xc37   :  { %v6859_v46 = vsel %vm4440_vm0, %v6858_v37, %v6854_v34  ;;  %v7254_v37 = vrot.slane %v14779_v36, %v14513_v58  ;;  %v7236_v34 = vrot.slane %v14619_v29, %v14513_v58 }
 0xc38   :  { %v14799_v49 = vpop.xlane.xlu1 %6795 }
 0xc39   :  { %v14801_v14 = vpop.xlane.xlu0 %6809  ;;  %v7258_v27 = vrot.slane %v14799_v49, %v14507_v41 }
 0xc3a   :  { %17735 = vst [vmem:[#allocation92_spill] sm:$0xff] %v14801_v14 }
 0xc3b   :  { %v7259_v36 = vsel %vm4440_vm0, %v7258_v27, %v7254_v37  ;;  %v6881_v27 = vrot.slane %v14788_v24, %v14513_v58 }
 0xc3c   :  { %v14803_v61 = vpop.xlane.xlu1 %6775 }
 0xc3d   :  { %v14805_v63 = vpop.xlane.xlu0 %7949  ;;  %v6885_v29 = vrot.slane %v14803_v61, %v14507_v41 }
 0xc3e   :  { %17736 = vst [vmem:[#allocation130_spill] sm:$0xff] %v14805_v63 }
 0xc40   :  { %v14807_v57 = vpop.xlane.xlu1 %6807 }
 0xc41   :  { %v14809_v31 = vpop.xlane.xlu0 %7981 }
 0xc42   :  { %17737 = vst [vmem:[#allocation94_spill] sm:$0xff] %v14809_v31 }
 0xc44   :  { %v14811_v25 = vpop.xlane.xlu1 %6779 }
 0xc45   :  { %17738 = vst [vmem:[#allocation131_spill] sm:$0xff] %v14811_v25  ;;  %v14813_v0 = vpop.xlane.xlu0 %6765 }
 0xc46   :  { %17739 = vst [vmem:[#allocation128_spill] sm:$0xff] %v14813_v0  ;;  %v6863_v59 = vrot.slane %v14813_v0, %v14513_v58 }
 0xc48   :  { %v14815_v17 = vpop.xlane.xlu1 %6811 }
 0xc49   :  { %17740 = vst [vmem:[#allocation129_spill] sm:$0xff] %v14815_v17  ;;  %v14817_v5 = vpop.xlane.xlu0 %6797 }
 0xc4a   :  { %17741 = vst [vmem:[#allocation95_spill] sm:$0xff] %v14817_v5 }
 0xc4c   :  { %v14819_v30 = vpop.xlane.xlu1 %7951 }
 0xc4d   :  { %17742 = vst [vmem:[#allocation98_spill] sm:$0xff] %v14819_v30  ;;  %v14821_v21 = vpop.xlane.xlu0 %7965 }
 0xc4e   :  { %17743 = vst [vmem:[#allocation97_spill] sm:$0xff] %v14821_v21 }
 0xc50   :  { %v14823_v51 = vpop.xlane.xlu1 %7983 }
 0xc51   :  { %v14825_v44 = vpop.xlane.xlu0 %7997 }
 0xc54   :  { %v14827_v19 = vpop.xlane.xlu1 %6767 }
 0xc55   :  { %17744 = vst [vmem:[#allocation96_spill] sm:$0xff] %v14827_v19  ;;  %v14831_v2 = vpop.xlane.xlu0 %6781  ;;  %v6867_v42 = vrot.slane %v14827_v19, %v14507_v41  ;;  %v6841_v19 = vsel %vm4440_vm0, %v6840_v28, %v6836_v48 }
 0xc56   :  { %17745 = vst [vmem:[#allocation77_spill] sm:$0xff] %v14831_v2  ;;  %v6905_v28 = vsel %vm4505_vm1, %v6850_v18, %v6841_v19  ;;  %v7241_v18 = vsel %vm4440_vm0, %v7240_v23, %v7236_v34  ;;  %v7285_v34 = vrot.slane %v14807_v57, %v14507_v41 }
 0xc57   :  { %v6868_v54 = vsel %vm4440_vm0, %v6867_v42, %v6863_v59  ;;  %v6906_v42 = vsel %vm4507_vm2, %v6859_v46, %v6905_v28  ;;  %v7263_v59 = vrot.slane %v14817_v5, %v14513_v58  ;;  %v6877_v46 = vsel %vm4440_vm0, %v6876_v15, %v6872_v9 }
 0xc58   :  { %v14845_v55 = vpop.xlane.xlu1 %6799  ;;  %v6907_v19 = vsel %vm4509_vm3, %v6868_v54, %v6906_v42  ;;  %v7305_v28 = vsel %vm4505_vm1, %v7250_v39, %v7241_v18  ;;  %v6894_v9 = vrot.slane %v14811_v25, %v14507_v41  ;;  %v6886_v39 = vsel %vm4440_vm0, %v6885_v29, %v6881_v27 }
 0xc59   :  { %17746 = vst [vmem:[#allocation99_spill] sm:$0xff] %v14845_v55  ;;  %v14852_v3 = vpop.xlane.xlu0 %6813  ;;  %v7267_v0 = vrot.slane %v14845_v55, %v14507_v41  ;;  %v7306_v54 = vsel %vm4507_vm2, %v7259_v36, %v7305_v28  ;;  %v6908_v37 = vsel %vm4511_vm4, %v6877_v46, %v6907_v19  ;;  %v6890_v36 = vrot.slane %v14797_v47, %v14513_v58 }
 0xc5a   :  { %17747 = vst [vmem:[#allocation102_spill] sm:$0xff] %v14852_v3  ;;  %v6909_v19 = vsel %vm4513_vm5, %v6886_v39, %v6908_v37  ;;  %v7281_v18 = vrot.slane %v14793_v62, %v14513_v58  ;;  %v7294_v28 = vrot.slane %v14815_v17, %v14507_v41  ;;  %v7290_v39 = vrot.slane %v14801_v14, %v14513_v58 }
 0xc5b   :  { %v7268_v16 = vsel %vm4440_vm0, %v7267_v0, %v7263_v59  ;;  %v7272_v0 = vrot.slane %v14664_v6, %v14513_v58  ;;  %v6895_v27 = vsel %vm4440_vm0, %v6894_v9, %v6890_v36  ;;  %v8036_v62 = vrot.slane %v14819_v30, %v14507_v41 }
 0xc5c   :  { %v14870_v48 = vpop.xlane.xlu1 %7967  ;;  %v7307_v15 = vsel %vm4509_vm3, %v7268_v16, %v7306_v54  ;;  %v6899_v16 = vrot.slane %v14831_v2, %v14513_v58  ;;  %v7286_v54 = vsel %vm4440_vm0, %v7285_v34, %v7281_v18 }
 0xc5d   :  { %17748 = vst [vmem:[#allocation101_spill] sm:$0xff] %v14870_v48  ;;  %v14878_v55 = vpop.xlane.xlu0 %7953  ;;  %v7277_v42 = vsel %vm4440_vm0, %v7276_v10, %v7272_v0  ;;  %v6910_v0 = vsel %vm4515_vm6, %v6895_v27, %v6909_v19  ;;  %v7295_v19 = vsel %vm4440_vm0, %v7294_v28, %v7290_v39 }
 0xc5e   :  { %17749 = vst [vmem:[#allocation100_spill] sm:$0xff] %v14878_v55  ;;  %v7308_v10 = vsel %vm4511_vm4, %v7277_v42, %v7307_v15  ;;  %v7299_v42 = vrot.slane %v14852_v3, %v14513_v58  ;;  %v8041_v24 = vrot.slane %v14878_v55, %v14513_v58  ;;  %v8072_v55 = vrot.slane %v14870_v48, %v14507_v41 }
 0xc5f   :  { %v7309_v15 = vsel %vm4513_vm5, %v7286_v54, %v7308_v10 }
 0xc60   :  { %v14892_v5 = vpop.xlane.xlu1 %7999 }
 0xc61   :  { %v14897_v23 = vpop.xlane.xlu0 %7985 }
 0xc62   :  { %17750 = vst [vmem:[#allocation82_spill] sm:$0xff] %v14897_v23 }
 0xc64   :  { %v14911_v59 = vpop.xlane.xlu1 %6783 }
 0xc65   :  { %17751 = vst [vmem:[#allocation103_spill] sm:$0xff] %v14911_v59  ;;  %v6903_v29 = vrot.slane %v14911_v59, %v14507_v41  ;;  %v14920_v46 = vpop.xlane.xlu0 %7957 }
 0xc66   :  { %17752 = vst [vmem:[#allocation134_spill] sm:$0xff] %v14920_v46 }
 0xc67   :  { %v6904_v37 = vsel %vm4440_vm0, %v6903_v29, %v6899_v16  ;;  %v7310_v16 = vsel %vm4515_vm6, %v7295_v19, %v7309_v15 }
 0xc68   :  { %v14931_v2 = vpop.xlane.xlu1 %6815  ;;  %v6911_v47 = vsel %vm4517_vm7, %v6904_v37, %v6910_v0 }
 0xc69   :  { %17753 = vst [vmem:[#allocation135_spill] sm:$0xff] %v14931_v2  ;;  %v7303_v9 = vrot.slane %v14931_v2, %v14507_v41  ;;  %v14939_v34 = vpop.xlane.xlu0 %7989  ;;  %v6913_v36 = vsel %vm4520_vm8, %v6911_v47, -inf  ;;  %v8050_v2 = vrot.slane %v14920_v46, %v14513_v58  ;;  %v8068_v46 = vrot.slane %v14821_v21, %v14513_v58 }
 0xc6a   :  { %17754 = vst [vmem:[#allocation136_spill] sm:$0xff] %v14939_v34  ;;  %6914 = vmax.xlane.f32.xlu0 %v6913_v36 }
 0xc6b   :  { %v7304_v18 = vsel %vm4440_vm0, %v7303_v9, %v7299_v42 }
 0xc6c   :  { %v14945_v29 = vpop.xlane.xlu1 %7955  ;;  %v7311_v10 = vsel %vm4517_vm7, %v7304_v18, %v7310_v16 }
 0xc6d   :  { %17755 = vst [vmem:[#allocation137_spill] sm:$0xff] %v14945_v29  ;;  %v14948_v27 = vpop.xlane.xlu0 %7969  ;;  %v7313_v54 = vsel %vm4520_vm8, %v7311_v10, -inf  ;;  %v8045_v3 = vrot.slane %v14945_v29, %v14507_v41  ;;  %v8032_v29 = vrot.slane %v14805_v63, %v14513_v58 }
 0xc6e   :  { %17756 = vst [vmem:[#allocation138_spill] sm:$0xff] %v14948_v27  ;;  %7314 = vmax.xlane.f32.xlu1 %v7313_v54 }
 0xc6f   :  { %v8046_v59 = vsel %vm4440_vm0, %v8045_v3, %v8041_v24  ;;  %v8037_v17 = vsel %vm4440_vm0, %v8036_v62, %v8032_v29  ;;  %v17769_v3 = vld [vmem:[#allocation47_spill] sm:$0xff] }
 0xc70   :  { %v14951_v37 = vpop.xlane.xlu1 %7987  ;;  %v8101_v63 = vsel %vm4505_vm1, %v8046_v59, %v8037_v17  ;;  %v15009_v24 = vsub.s32 5, %v17769_v3  ;;  %v8073_v17 = vsel %vm4440_vm0, %v8072_v55, %v8068_v46 }
 0xc71   :  { %v14953_v0 = vpop.xlane.xlu0 %8001  ;;  %v8445_v48 = vrot.slane %v14951_v37, %v14507_v41 }
 0xc72   :  { %17757 = vst [vmem:[#allocation139_spill] sm:$0xff] %v14953_v0  ;;  %17770 = vst [vmem:[#allocation151_spill] sm:$0xff] %v15009_v24 }
 0xc74   :  { %v14955_v47 = vpop.xlane.xlu1 %7959 }
 0xc75   :  { %17758 = vst [vmem:[#allocation140_spill] sm:$0xff] %v14955_v47  ;;  %v14957_v28 = vpop.xlane.xlu0 %7973  ;;  %v8054_v14 = vrot.slane %v14955_v47, %v14507_v41 }
 0xc76   :  { %17759 = vst [vmem:[#allocation141_spill] sm:$0xff] %v14957_v28  ;;  %v8086_v55 = vrot.slane %v14957_v28, %v14513_v58 }
 0xc78   :  { %v14959_v39 = vpop.xlane.xlu1 %7991 }
 0xc79   :  { %17760 = vst [vmem:[#allocation142_spill] sm:$0xff] %v14959_v39  ;;  %v14961_v15 = vpop.xlane.xlu0 %8005  ;;  %v8454_v21 = vrot.slane %v14959_v39, %v14507_v41 }
 0xc7a   :  { %17761 = vst [vmem:[#allocation143_spill] sm:$0xff] %v14961_v15 }
 0xc7c   :  { %v14963_v42 = vpop.xlane.xlu1 %7971 }
 0xc7d   :  { %17762 = vst [vmem:[#allocation144_spill] sm:$0xff] %v14963_v42  ;;  %v14967_v36 = vpop.xlane.xlu0 %7961  ;;  %v8081_v62 = vrot.slane %v14963_v42, %v14507_v41  ;;  %v17772_v42 = vld [vmem:[#allocation48_spill] sm:$0xff] }
 0xc7e   :  { %17763 = vst [vmem:[#allocation145_spill] sm:$0xff] %v14967_v36  ;;  %v8059_v47 = vrot.slane %v14967_v36, %v14513_v58  ;;  %v8432_v36 = vrot.slane %v14809_v31, %v14513_v58 }
 0xc80   :  { %v14965_v9 = vpop.xlane.xlu1 %8003 }
 0xc81   :  { %v14971_v18 = vpop.xlane.xlu0 %7993 }
 0xc84   :  { %v14969_v19 = vpop.xlane.xlu1 %7975 }
 0xc85   :  { %17764 = vst [vmem:[#allocation146_spill] sm:$0xff] %v14969_v19  ;;  %v14977_v54 = vpop.xlane.xlu0 %7977  ;;  %v8090_v59 = vrot.slane %v14969_v19, %v14507_v41 }
 0xc86   :  { %17766 = vst [vmem:[#allocation148_spill] sm:$0xff] %v14977_v54 }
 0xc88   :  { %v14973_v16 = vpop.xlane.xlu1 %8007 }
 0xc89   :  { %v14998_v30 = vpop.xlane.xlu0 %8009 }
 0xc8a   :  { %17768 = vst [vmem:[#allocation150_spill] sm:$0xff] %v14998_v30 }
 0xc8c   :  { %v14975_v10 = vpop.xlane.xlu1 %7963 }
 0xc8d   :  { %17765 = vst [vmem:[#allocation147_spill] sm:$0xff] %v14975_v10  ;;  %v8063_v6 = vrot.slane %v14975_v10, %v14507_v41  ;;  %v8055_v10 = vsel %vm4440_vm0, %v8054_v14, %v8050_v2  ;;  %v8436_v14 = vrot.slane %v14823_v51, %v14507_v41  ;;  %v15034_v31 = vpop.xlane.xlu0 %4522 }
 0xc8e   :  { %v8102_v2 = vsel %vm4507_vm2, %v8055_v10, %v8101_v63  ;;  %v8450_v63 = vrot.slane %v14939_v34, %v14513_v58  ;;  %v8077_v10 = vrot.slane %v14948_v27, %v14513_v58  ;;  %v4528_v28 = vrot.slane %v15034_v31, %v17772_v42 }
 0xc8f   :  { %v8064_v25 = vsel %vm4440_vm0, %v8063_v6, %v8059_v47  ;;  %v8441_v47 = vrot.slane %v14897_v23, %v14513_v58  ;;  %v8459_v23 = vrot.slane %v14971_v18, %v14513_v58 }
 0xc90   :  { %v14989_v7 = vpop.xlane.xlu1 %7995  ;;  %v8103_v29 = vsel %vm4509_vm3, %v8064_v25, %v8102_v2  ;;  %v8095_v25 = vrot.slane %v14977_v54, %v14513_v58  ;;  %v8082_v27 = vsel %vm4440_vm0, %v8081_v62, %v8077_v10  ;;  %v8091_v54 = vsel %vm4440_vm0, %v8090_v59, %v8086_v55 }
 0xc91   :  { %17767 = vst [vmem:[#allocation149_spill] sm:$0xff] %v14989_v7  ;;  %v8463_v46 = vrot.slane %v14989_v7, %v14507_v41  ;;  %v8446_v34 = vsel %vm4440_vm0, %v8445_v48, %v8441_v47  ;;  %v8104_v19 = vsel %vm4511_vm4, %v8073_v17, %v8103_v29  ;;  %v8437_v62 = vsel %vm4440_vm0, %v8436_v14, %v8432_v36  ;;  %v17773_v36 = vld [vmem:[#allocation106_spill] sm:$0xff] }
 0xc92   :  { %v8105_v7 = vsel %vm4513_vm5, %v8082_v27, %v8104_v19  ;;  %v8472_v17 = vrot.slane %v14892_v5, %v14507_v41  ;;  %v8501_v29 = vsel %vm4505_vm1, %v8446_v34, %v8437_v62  ;;  %v15063_v59 = vsub.s32 6, %v17769_v3 }
 0xc93   :  { %v8106_v48 = vsel %vm4515_vm6, %v8091_v54, %v8105_v7  ;;  %v8464_v47 = vsel %vm4440_vm0, %v8463_v46, %v8459_v23  ;;  %v15069_v7 = vrot.slane %v15034_v31, %v15009_v24  ;;  %v4566_v23 = vsub.f32 %v17773_v36, %v4528_v28 }
 0xc94   :  { %v15018_v6 = vpop.xlane.xlu1 %7979  ;;  %v8481_v54 = vrot.slane %v14965_v9, %v14507_v41  ;;  %v15087_v55 = vrot.slane %v15034_v31, %v15063_v59  ;;  %v8490_v62 = vrot.slane %v14973_v16, %v14507_v41 }
 0xc95   :  { %17771 = vst [vmem:[#allocation152_spill] sm:$0xff] %v15018_v6  ;;  %v8099_v2 = vrot.slane %v15018_v6, %v14507_v41  ;;  %v8455_v6 = vsel %vm4440_vm0, %v8454_v21, %v8450_v63  ;;  %v15083_v63 = vsub.s32 7, %v17769_v3  ;;  %v4583_v46 = vmul.f32 1.442695, %v4566_v23 }
 0xc96   :  { %v8502_v21 = vsel %vm4507_vm2, %v8455_v6, %v8501_v29  ;;  %v8477_v6 = vrot.slane %v14953_v0, %v14513_v58  ;;  %v17774_v29 = vld [vmem:[#allocation49_spill] sm:$0xff] }
 0xc97   :  { %v8100_v39 = vsel %vm4440_vm0, %v8099_v2, %v8095_v25  ;;  %v8503_v19 = vsel %vm4509_vm3, %v8464_v47, %v8502_v21  ;;  %v4575_v25 = vsub.f32 %v14412_v4, %v15069_v7  ;;  %v8486_v47 = vrot.slane %v14961_v15, %v14513_v58  ;;  %v17775_v21 = vld [vmem:[#allocation105_spill] sm:$0xff]  ;;  %v17776_v15 = vld [vmem:[#allocation87_spill] sm:$0xff] }
 0xc98   :  { %v8107_v10 = vsel %vm4517_vm7, %v8100_v39, %v8106_v48  ;;  %v8468_v39 = vrot.slane %v14825_v44, %v14513_v58  ;;  %v15075_v34 = vpop.xlane.xlu1 %8011  ;;  %v4532_v4 = vrot.slane %v15034_v31, %v17774_v29  ;;  %v4565_v36 = vsub.f32 %v17775_v21, %v4528_v28 }
 0xc99   :  { %v8109_v27 = vsel %vm4520_vm8, %v8107_v10, -inf  ;;  %v8499_v2 = vrot.slane %v15075_v34, %v14507_v41  ;;  %v8482_v10 = vsel %vm4440_vm0, %v8481_v54, %v8477_v6  ;;  %11109 = vpow2.f32 %v4583_v46 }
 0xc9a   :  { %8110 = vmax.xlane.f32.xlu0 %v8109_v27  ;;  %v8473_v14 = vsel %vm4440_vm0, %v8472_v17, %v8468_v39  ;;  %v8495_v17 = vrot.slane %v14998_v30, %v14513_v58  ;;  %v15105_v27 = vrot.slane %v15034_v31, %v15083_v63  ;;  %v4577_v39 = vsub.f32 %v14418_v22, %v15087_v55 }
 0xc9b   :  { %v8504_v48 = vsel %vm4511_vm4, %v8473_v14, %v8503_v19  ;;  %v4601_v19 = vmul.f32 1.442695, %v4575_v25  ;;  %v8491_v6 = vsel %vm4440_vm0, %v8490_v62, %v8486_v47  ;;  %v4567_v0 = vsub.f32 %v17776_v15, %v4532_v4  ;;  %v17778_v47 = vld [vmem:[#allocation107_spill] sm:$0xff] }
 0xc9c   :  { %v8505_v23 = vsel %vm4513_vm5, %v8482_v10, %v8504_v48  ;;  %v8500_v54 = vsel %vm4440_vm0, %v8499_v2, %v8495_v17  ;;  %v15112_v14 = vpop.xlane.xlu1 %4922  ;;  %v4579_v28 = vsub.f32 %v14454_v60, %v15105_v27  ;;  %v4581_v21 = vmul.f32 1.442695, %v4565_v36  ;;  %v17777_v2 = vld [vmem:[#allocation111_spill] sm:$0xff] }
 0xc9d   :  { %v8506_v30 = vsel %vm4515_vm6, %v8491_v6, %v8505_v23  ;;  %11111 = vpow2.f32 %v4601_v19  ;;  %v4605_v22 = vmul.f32 1.442695, %v4577_v39  ;;  %v15122_v25 = vrot.slane %v15112_v14, %v17772_v42  ;;  %v17780_v23 = vld [vmem:[#allocation89_spill] sm:$0xff] }
 0xc9e   :  { %v8507_v48 = vsel %vm4517_vm7, %v8500_v54, %v8506_v30  ;;  %v4536_v62 = vrot.slane %v15034_v31, %v17777_v2  ;;  %v4568_v15 = vsub.f32 %v17778_v47, %v4532_v4  ;;  %11113 = vpow2.f32 %v4581_v21 }
 0xc9f   :  { %v8509_v46 = vsel %vm4520_vm8, %v8507_v48, -inf  ;;  %v4585_v10 = vmul.f32 1.442695, %v4567_v0  ;;  %11115 = vpow2.f32 %v4605_v22  ;;  %v4609_v60 = vmul.f32 1.442695, %v4579_v28  ;;  %v17782_v28 = vld [vmem:[#allocation108_spill] sm:$0xff] }
 0xca0   :  { %8510 = vmax.xlane.f32.xlu1 %v8509_v46  ;;  %v15130_v30 = vrot.slane %v15112_v14, %v17774_v29  ;;  %v4965_v17 = vsub.f32 %v14394_v8, %v15122_v25  ;;  %v15135_v36 = vsub.s32 3, %v17769_v3  ;;  %v4569_v39 = vsub.f32 %v17780_v23, %v4536_v62 }
 0xca1   :  { %11117 = vpow2.f32 %v4585_v10  ;;  %v4587_v19 = vmul.f32 1.442695, %v4568_v15  ;;  %v15140_v0 = vrot.slane %v15112_v14, %v17777_v2  ;;  %v4570_v21 = vsub.f32 %v17782_v28, %v4536_v62  ;;  %v17785_v10 = vld [vmem:[#allocation54_spill] sm:$0xff] }
 0xca2   :  { %17779 = vst [vmem:[#allocation106_spill] sm:$0xff] %v15135_v36  ;;  %11119 = vpow2.f32 %v4609_v60  ;;  %v4967_v4 = vsub.f32 %v14424_v43, %v15130_v30  ;;  %v4981_v54 = vmul.f32 1.442695, %v4965_v17  ;;  %v4540_v8 = vrot.slane %v15034_v31, %v15135_v36 }
 0xca3   :  { %11121 = vpow2.f32 %v4587_v19  ;;  %v4589_v48 = vmul.f32 1.442695, %v4569_v39  ;;  %v15152_v22 = vrot.slane %v15112_v14, %v15135_v36  ;;  %v4969_v46 = vsub.f32 %v14430_v45, %v15140_v0 }
 0xca4   :  { %11123 = vpow2.f32 %v4981_v54  ;;  %v4985_v43 = vmul.f32 1.442695, %v4967_v4  ;;  %v15159_v15 = vsub.s32 4, %v17769_v3  ;;  %v4571_v62 = vsub.f32 %v17785_v10, %v4540_v8  ;;  %v17788_v54 = vld [vmem:[#allocation133_spill] sm:$0xff] }
 0xca5   :  { %11125 = vpow2.f32 %v4589_v48  ;;  %v4591_v60 = vmul.f32 1.442695, %v4570_v21  ;;  %v4971_v45 = vsub.f32 %v14460_v38, %v15152_v22  ;;  %v4989_v39 = vmul.f32 1.442695, %v4969_v46 }
 0xca6   :  { %v15144_v6 = vpop.eup %11109  ;;  %17784 = vst [vmem:[#allocation107_spill] sm:$0xff] %v15159_v15  ;;  %v15167_v23 = vrot.slane %v15112_v14, %v15159_v15  ;;  %11127 = vpow2.f32 %v4985_v43  ;;  %v4544_v4 = vrot.slane %v15034_v31, %v15159_v15  ;;  %v4572_v28 = vsub.f32 %v17788_v54, %v4540_v8 }
 0xca7   :  { %17781 = vst [vmem:[#allocation105_spill] sm:$0xff] %v15144_v6  ;;  %11129 = vpow2.f32 %v4591_v60  ;;  %v4593_v21 = vmul.f32 1.442695, %v4571_v62  ;;  %v15182_v38 = vrot.slane %v15112_v14, %v15009_v24  ;;  %v4993_v43 = vmul.f32 1.442695, %v4971_v45 }
 0xca8   :  { %v4973_v46 = vsub.f32 %v14400_v32, %v15167_v23  ;;  %11131 = vpow2.f32 %v4989_v39  ;;  %v4573_v31 = vsub.f32 %v14388_v12, %v4544_v4  ;;  %v4595_v8 = vmul.f32 1.442695, %v4572_v28 }
 0xca9   :  { %11133 = vpow2.f32 %v4593_v21  ;;  %v15195_v60 = vrot.slane %v15112_v14, %v15063_v59  ;;  %v4975_v32 = vsub.f32 %v14436_v53, %v15182_v38  ;;  %v4574_v12 = vsub.f32 %v14374_v52, %v4544_v4 }
 0xcaa   :  { %v15156_v47 = vpop.eup %11111  ;;  %11135 = vpow2.f32 %v4993_v43  ;;  %v4997_v45 = vmul.f32 1.442695, %v4973_v46  ;;  %v4597_v54 = vmul.f32 1.442695, %v4573_v31  ;;  %v15208_v21 = vrot.slane %v15112_v14, %v15083_v63 }
 0xcab   :  { %17783 = vst [vmem:[#allocation87_spill] sm:$0xff] %v15156_v47  ;;  %v15163_v17 = vpop.eup %11113  ;;  %11137 = vpow2.f32 %v4595_v8  ;;  %v4977_v53 = vsub.f32 %v14442_v11, %v15195_v60  ;;  %v5001_v46 = vmul.f32 1.442695, %v4975_v32  ;;  %v4576_v52 = vsub.f32 %v14410_v20, %v15069_v7 }
 0xcac   :  { %17786 = vst [vmem:[#allocation89_spill] sm:$0xff] %v15163_v17  ;;  %v15171_v19 = vpop.eup %11115  ;;  %11139 = vpow2.f32 %v4997_v45  ;;  %v4599_v4 = vmul.f32 1.442695, %v4574_v12  ;;  %v4979_v11 = vsub.f32 %v14466_v13, %v15208_v21  ;;  %v4578_v20 = vsub.f32 %v14416_v1, %v15087_v55  ;;  %v17799_v1 = vld [vmem:[#allocation56_spill] sm:$0xff] }
 0xcad   :  { %17787 = vst [vmem:[#allocation108_spill] sm:$0xff] %v15171_v19  ;;  %11141 = vpow2.f32 %v4597_v54  ;;  %v5005_v31 = vmul.f32 1.442695, %v4977_v53  ;;  %v4603_v7 = vmul.f32 1.442695, %v4576_v52  ;;  %v4580_v55 = vsub.f32 %v17799_v1, %v15105_v27 }
 0xcae   :  { %v15178_v48 = vpop.eup %11117  ;;  %11143 = vpow2.f32 %v5001_v46  ;;  %v5009_v13 = vmul.f32 1.442695, %v4979_v11  ;;  %v4607_v52 = vmul.f32 1.442695, %v4578_v20  ;;  %v4966_v20 = vsub.f32 %v14380_v33, %v15122_v25  ;;  %v17804_v33 = vld [vmem:[#allocation109_spill] sm:$0xff] }
 0xcaf   :  { %17789 = vst [vmem:[#allocation54_spill] sm:$0xff] %v15178_v48  ;;  %v15186_v10 = vpop.eup %11119  ;;  %11145 = vpow2.f32 %v4599_v4  ;;  %v4611_v27 = vmul.f32 1.442695, %v4580_v55  ;;  %v4968_v25 = vsub.f32 %v17804_v33, %v15130_v30  ;;  %v17808_v30 = vld [vmem:[#allocation110_spill] sm:$0xff] }
 0xcb0   :  { %4633 = vperm.xlu0 %10580, %v15144_v6   ;;  %17790 = vst [vmem:[#allocation133_spill] sm:$0xff] %v15186_v10  ;;  %v15191_v62 = vpop.eup %11121  ;;  %11147 = vpow2.f32 %v5005_v31  ;;  %v4983_v55 = vmul.f32 1.442695, %v4966_v20 }
 0xcb1   :  { %4630 = vperm.xlu1 %10579, %v15163_v17   ;;  %17791 = vst [vmem:[#allocation153_spill] sm:$0xff] %v15191_v62  ;;  %v15199_v39 = vpop.eup %11123  ;;  %11149 = vpow2.f32 %v4603_v7  ;;  %v4987_v20 = vmul.f32 1.442695, %v4968_v25 }
 0xcb2   :  { %17792 = vst [vmem:[#allocation154_spill] sm:$0xff] %v15199_v39  ;;  %v15204_v28 = vpop.eup %11125  ;;  %11151 = vpow2.f32 %v5009_v13 }
 0xcb3   :  { %17793 = vst [vmem:[#allocation155_spill] sm:$0xff] %v15204_v28  ;;  %v15212_v43 = vpop.eup %11127  ;;  %v15214_v3 = vpop.xlane.xlu0 %5718  ;;  %11153 = vpow2.f32 %v4607_v52 }
 0xcb4   :  { %4660 = vperm.xlu0 %10580, %v15156_v47   ;;  %17794 = vst [vmem:[#allocation156_spill] sm:$0xff] %v15212_v43  ;;  %v15220_v14 = vpop.eup %11129  ;;  %v15226_v8 = vrot.slane %v15214_v3, %v17772_v42  ;;  %v15238_v12 = vrot.slane %v15214_v3, %v17774_v29 }
 0xcb5   :  { %4636 = vperm.xlu1 %10579, %v15178_v48   ;;  %17795 = vst [vmem:[#allocation157_spill] sm:$0xff] %v15220_v14  ;;  %v15228_v32 = vpop.eup %11131 }
 0xcb6   :  { %17796 = vst [vmem:[#allocation158_spill] sm:$0xff] %v15228_v32  ;;  %v15234_v45 = vpop.eup %11133  ;;  %v5761_v54 = vsub.f32 %v14470_v26, %v15226_v8  ;;  %v5764_v11 = vsub.f32 %v14523_v35, %v15238_v12 }
 0xcb7   :  { %17797 = vst [vmem:[#allocation159_spill] sm:$0xff] %v15234_v45  ;;  %v15242_v53 = vpop.eup %11135  ;;  %v15244_v46 = vpop.xlane.xlu1 %6118 }
 0xcb8   :  { %4666 = vperm.xlu0 %10580, %v15171_v19   ;;  %17798 = vst [vmem:[#allocation160_spill] sm:$0xff] %v15242_v53  ;;  %v15250_v4 = vpop.eup %11137  ;;  %v5777_v26 = vmul.f32 1.442695, %v5761_v54  ;;  %v15256_v31 = vrot.slane %v15244_v46, %v17772_v42  ;;  %v5783_v35 = vmul.f32 1.442695, %v5764_v11  ;;  %v15268_v13 = vrot.slane %v15244_v46, %v17774_v29 }
 0xcb9   :  { %4639 = vperm.xlu1 %10579, %v15191_v62   ;;  %17800 = vst [vmem:[#allocation56_spill] sm:$0xff] %v15250_v4  ;;  %v15282_v11 = vrot.slane %v15214_v3, %v17777_v2 }
 0xcba   :  { %11155 = vpow2.f32 %v5777_v26  ;;  %v6162_v54 = vsub.f32 %v14482_v40, %v15256_v31  ;;  %v17806_v40 = vld [vmem:[#allocation118_spill] sm:$0xff] }
 0xcbb   :  { %11157 = vpow2.f32 %v4611_v27  ;;  %v6164_v26 = vsub.f32 %v17806_v40, %v15268_v13  ;;  %v4970_v27 = vsub.f32 %v17808_v30, %v15140_v0  ;;  %v15298_v40 = vrot.slane %v15244_v46, %v17777_v2  ;;  %v17812_v0 = vld [vmem:[#allocation63_spill] sm:$0xff] }
 0xcbc   :  { %4672 = vperm.xlu0 %10580, %v15186_v10   ;;  %11159 = vpow2.f32 %v5783_v35  ;;  %v4972_v25 = vsub.f32 %v17812_v0, %v15152_v22  ;;  %v17816_v22 = vld [vmem:[#allocation104_spill] sm:$0xff] }
 0xcbd   :  { %4642 = vperm.xlu1 %10579, %v15204_v28   ;;  %11161 = vpow2.f32 %v4983_v55  ;;  %v4991_v55 = vmul.f32 1.442695, %v4970_v27  ;;  %v4974_v27 = vsub.f32 %v17816_v22, %v15167_v23  ;;  %v17820_v23 = vld [vmem:[#allocation93_spill] sm:$0xff] }
 0xcc0   :  { %5030 = vperm.xlu0 %10580, %v15199_v39  }
 0xcc1   :  { %4645 = vperm.xlu1 %10579, %v15220_v14   ;;  %v15258_v14 = vpop.eup %11139 }
 0xcc2   :  { %17801 = vst [vmem:[#allocation161_spill] sm:$0xff] %v15258_v14  ;;  %v15264_v7 = vpop.eup %11141 }
 0xcc3   :  { %17802 = vst [vmem:[#allocation162_spill] sm:$0xff] %v15264_v7  ;;  %v15272_v1 = vpop.eup %11143 }
 0xcc4   :  { %5036 = vperm.xlu0 %10580, %v15212_v43   ;;  %17803 = vst [vmem:[#allocation163_spill] sm:$0xff] %v15272_v1  ;;  %v15278_v52 = vpop.eup %11145 }
 0xcc5   :  { %4648 = vperm.xlu1 %10579, %v15234_v45   ;;  %17805 = vst [vmem:[#allocation109_spill] sm:$0xff] %v15278_v52  ;;  %v15286_v45 = vpop.eup %11147 }
 0xcc6   :  { %17807 = vst [vmem:[#allocation118_spill] sm:$0xff] %v15286_v45  ;;  %v15292_v33 = vpop.eup %11149 }
 0xcc7   :  { %17809 = vst [vmem:[#allocation110_spill] sm:$0xff] %v15292_v33  ;;  %v15300_v28 = vpop.eup %11151 }
 0xcc8   :  { %5042 = vperm.xlu0 %10580, %v15228_v32   ;;  %v15306_v30 = vpop.eup %11153 }
 0xcc9   :  { %4651 = vperm.xlu1 %10579, %v15250_v4   ;;  %v6179_v4 = vmul.f32 1.442695, %v6162_v54  ;;  %v6183_v54 = vmul.f32 1.442695, %v6164_v26  ;;  %17813 = vst [vmem:[#allocation63_spill] sm:$0xff] %v15306_v30  ;;  %v15314_v10 = vpop.eup %11155 }
 0xcca   :  { %v15320_v0 = vpop.eup %11157 }
 0xccb   :  { %11163 = vpow2.f32 %v6179_v4  ;;  %v17814_v4 = vld [vmem:[#allocation70_spill] sm:$0xff]  ;;  %17817 = vst [vmem:[#allocation104_spill] sm:$0xff] %v15320_v0  ;;  %v15328_v32 = vpop.eup %11159 }
 0xccc   :  { %5048 = vperm.xlu0 %10580, %v15242_v53   ;;  %v17810_v53 = vld [vmem:[#allocation66_spill] sm:$0xff]  ;;  %11165 = vpow2.f32 %v4987_v20  ;;  %v6166_v26 = vsub.f32 %v17814_v4, %v15298_v40  ;;  %17815 = vst [vmem:[#allocation70_spill] sm:$0xff] %v15314_v10  ;;  %v4995_v20 = vmul.f32 1.442695, %v4972_v25  ;;  %v4976_v25 = vsub.f32 %v17820_v23, %v15182_v38  ;;  %v15334_v22 = vpop.eup %11161  ;;  %v17824_v38 = vld [vmem:[#allocation132_spill] sm:$0xff] }
 0xccd   :  { %4654 = vperm.xlu1 %10579, %v15264_v7   ;;  %v5766_v35 = vsub.f32 %v17810_v53, %v15282_v11  ;;  %17811 = vst [vmem:[#allocation66_spill] sm:$0xff] %v15300_v28  ;;  %v15310_v53 = vrot.slane %v15214_v3, %v15135_v36  ;;  %11167 = vpow2.f32 %v6183_v54  ;;  %v15326_v54 = vrot.slane %v15244_v46, %v15135_v36 }
 0xcce   :  { %11169 = vpow2.f32 %v4991_v55  ;;  %v6187_v4 = vmul.f32 1.442695, %v6166_v26  ;;  %v4999_v55 = vmul.f32 1.442695, %v4974_v27  ;;  %17821 = vst [vmem:[#allocation93_spill] sm:$0xff] %v15334_v22  ;;  %v17822_v26 = vld [vmem:[#allocation62_spill] sm:$0xff]  ;;  %v4978_v27 = vsub.f32 %v17824_v38, %v15195_v60 }
 0xccf   :  { %v17828_v60 = vld [vmem:[#allocation58_spill] sm:$0xff] }
 0xcd0   :  { %5054 = vperm.xlu0 %10580, %v15258_v14  }
 0xcd1   :  { %4657 = vperm.xlu1 %10579, %v15278_v52   ;;  %v5787_v52 = vmul.f32 1.442695, %v5766_v35 }
 0xcd3   :  { %11171 = vpow2.f32 %v5787_v52  ;;  %v15338_v52 = vrot.slane %v15214_v3, %v15159_v15 }
 0xcd4   :  { %5060 = vperm.xlu0 %10580, %v15272_v1   ;;  %11173 = vpow2.f32 %v4995_v20  ;;  %v5003_v20 = vmul.f32 1.442695, %v4976_v25  ;;  %v4980_v25 = vsub.f32 %v17828_v60, %v15208_v21 }
 0xcd5   :  { %4663 = vperm.xlu1 %10579, %v15292_v33   ;;  %v17818_v33 = vld [vmem:[#allocation83_spill] sm:$0xff]  ;;  %11175 = vpow2.f32 %v6187_v4  ;;  %v15354_v4 = vrot.slane %v15244_v46, %v15159_v15 }
 0xcd6   :  { %v5768_v35 = vsub.f32 %v17818_v33, %v15310_v53  ;;  %17819 = vst [vmem:[#allocation83_spill] sm:$0xff] %v15328_v32  ;;  %11177 = vpow2.f32 %v4999_v55  ;;  %v5007_v55 = vmul.f32 1.442695, %v4978_v27  ;;  %v5011_v21 = vmul.f32 1.442695, %v4980_v25  ;;  %v17832_v27 = vld [vmem:[#allocation55_spill] sm:$0xff] }
 0xcd7   :  { %v17836_v25 = vld [vmem:[#allocation117_spill] sm:$0xff] }
 0xcd8   :  { %5066 = vperm.xlu0 %10580, %v15286_v45   ;;  %v5791_v33 = vmul.f32 1.442695, %v5768_v35 }
 0xcd9   :  { %4669 = vperm.xlu1 %10579, %v15306_v30   ;;  %v6168_v30 = vsub.f32 %v17822_v26, %v15326_v54 }
 0xcda   :  { %11179 = vpow2.f32 %v5791_v33 }
 0xcdb   :  { %v6191_v26 = vmul.f32 1.442695, %v6168_v30  ;;  %11181 = vpow2.f32 %v5003_v20  ;;  %v17830_v30 = vld [vmem:[#allocation119_spill] sm:$0xff]  ;;  %v5762_v20 = vsub.f32 %v17832_v27, %v15226_v8  ;;  %v15390_v8 = vrot.slane %v15214_v3, %v15063_v59 }
 0xcdc   :  { %5072 = vperm.xlu0 %10580, %v15300_v28  }
 0xcdd   :  { %4675 = vperm.xlu1 %10579, %v15320_v0   ;;  %v17826_v0 = vld [vmem:[#allocation60_spill] sm:$0xff]  ;;  %11183 = vpow2.f32 %v6191_v26  ;;  %v15382_v26 = vrot.slane %v15244_v46, %v15009_v24 }
 0xcde   :  { %v5770_v35 = vsub.f32 %v17826_v0, %v15338_v52  ;;  %v15366_v0 = vrot.slane %v15214_v3, %v15009_v24  ;;  %11185 = vpow2.f32 %v5007_v55  ;;  %v5779_v55 = vmul.f32 1.442695, %v5762_v20 }
 0xcdf   :  { %v15408_v20 = vrot.slane %v15244_v46, %v15063_v59 }
 0xce0   :  { %5826 = vperm.xlu0 %10580, %v15314_v10   ;;  %v15342_v10 = vpop.eup %11163  ;;  %v5795_v33 = vmul.f32 1.442695, %v5770_v35 }
 0xce1   :  { %17823 = vst [vmem:[#allocation62_spill] sm:$0xff] %v15342_v10  ;;  %5033 = vperm.xlu1 %10579, %v15334_v22   ;;  %v15348_v23 = vpop.eup %11165 }
 0xce2   :  { %17825 = vst [vmem:[#allocation132_spill] sm:$0xff] %v15348_v23  ;;  %11187 = vpow2.f32 %v5795_v33 }
 0xce3   :  { %11189 = vpow2.f32 %v5011_v21  ;;  %v17840_v21 = vld [vmem:[#allocation122_spill] sm:$0xff] }
 0xce4   :  { %5835 = vperm.xlu0 %10580, %v15328_v32   ;;  %v15356_v32 = vpop.eup %11167 }
 0xce5   :  { %17827 = vst [vmem:[#allocation60_spill] sm:$0xff] %v15356_v32  ;;  %5039 = vperm.xlu1 %10579, %v15348_v23   ;;  %v15362_v38 = vpop.eup %11169 }
 0xce6   :  { %17829 = vst [vmem:[#allocation58_spill] sm:$0xff] %v15362_v38  ;;  %v15370_v28 = vpop.eup %11171 }
 0xce7   :  { %17831 = vst [vmem:[#allocation119_spill] sm:$0xff] %v15370_v28  ;;  %v15376_v60 = vpop.eup %11173 }
 0xce8   :  { %6229 = vperm.xlu0 %10580, %v15342_v10   ;;  %v6170_v10 = vsub.f32 %v17830_v30, %v15354_v4  ;;  %17833 = vst [vmem:[#allocation55_spill] sm:$0xff] %v15376_v60  ;;  %v15384_v62 = vpop.eup %11175 }
 0xce9   :  { %5045 = vperm.xlu1 %10579, %v15362_v38   ;;  %v15394_v33 = vpop.eup %11177 }
 0xcea   :  { %v6195_v30 = vmul.f32 1.442695, %v6170_v10  ;;  %17837 = vst [vmem:[#allocation117_spill] sm:$0xff] %v15394_v33  ;;  %v17838_v10 = vld [vmem:[#allocation53_spill] sm:$0xff]  ;;  %v15398_v38 = vpop.eup %11179 }
 0xceb   :  { %17839 = vst [vmem:[#allocation53_spill] sm:$0xff] %v15398_v38 }
 0xcec   :  { %6235 = vperm.xlu0 %10580, %v15356_v32   ;;  %v17834_v32 = vld [vmem:[#allocation73_spill] sm:$0xff]  ;;  %11191 = vpow2.f32 %v6195_v30 }
 0xced   :  { %v5772_v35 = vsub.f32 %v17834_v32, %v15366_v0  ;;  %17835 = vst [vmem:[#allocation73_spill] sm:$0xff] %v15384_v62  ;;  %5051 = vperm.xlu1 %10579, %v15376_v60   ;;  %v5763_v32 = vsub.f32 %v17836_v25, %v15238_v12  ;;  %11193 = vpow2.f32 %v5779_v55  ;;  %v15404_v12 = vpop.eup %11181 }
 0xcee   :  { %17841 = vst [vmem:[#allocation122_spill] sm:$0xff] %v15404_v12 }
 0xcef   :  { %v5799_v27 = vmul.f32 1.442695, %v5772_v35  ;;  %v5781_v60 = vmul.f32 1.442695, %v5763_v32  ;;  %v17842_v35 = vld [vmem:[#allocation65_spill] sm:$0xff]  ;;  %v17844_v32 = vld [vmem:[#allocation51_spill] sm:$0xff] }
 0xcf0   :  { %5841 = vperm.xlu0 %10580, %v15370_v28   ;;  %v6172_v28 = vsub.f32 %v17838_v10, %v15382_v26  ;;  %v6161_v30 = vsub.f32 %v17842_v35, %v15256_v31  ;;  %v15412_v10 = vpop.eup %11183  ;;  %v17846_v31 = vld [vmem:[#allocation78_spill] sm:$0xff] }
 0xcf1   :  { %5057 = vperm.xlu1 %10579, %v15394_v33   ;;  %11195 = vpow2.f32 %v5799_v27  ;;  %17843 = vst [vmem:[#allocation65_spill] sm:$0xff] %v15412_v10  ;;  %v15418_v27 = vpop.eup %11185 }
 0xcf2   :  { %v6199_v25 = vmul.f32 1.442695, %v6172_v28  ;;  %11197 = vpow2.f32 %v5781_v60  ;;  %17845 = vst [vmem:[#allocation51_spill] sm:$0xff] %v15418_v27  ;;  %v6174_v28 = vsub.f32 %v17846_v31, %v15408_v20  ;;  %v6177_v35 = vmul.f32 1.442695, %v6161_v30  ;;  %v15426_v33 = vpop.eup %11187 }
 0xcf3   :  { %17847 = vst [vmem:[#allocation78_spill] sm:$0xff] %v15426_v33  ;;  %v15438_v30 = vrot.slane %v15244_v46, %v15083_v63  ;;  %v17854_v46 = vld [vmem:[#allocation127_spill] sm:$0xff] }
 0xcf4   :  { %6241 = vperm.xlu0 %10580, %v15384_v62   ;;  %v5774_v62 = vsub.f32 %v17840_v21, %v15390_v8  ;;  %v6163_v21 = vsub.f32 %v17844_v32, %v15268_v13  ;;  %11199 = vpow2.f32 %v6199_v25  ;;  %v15432_v32 = vpop.eup %11189  ;;  %v6203_v25 = vmul.f32 1.442695, %v6174_v28 }
 0xcf5   :  { %5063 = vperm.xlu1 %10579, %v15404_v12  }
 0xcf6   :  { %v5803_v55 = vmul.f32 1.442695, %v5774_v62  ;;  %v17848_v62 = vld [vmem:[#allocation61_spill] sm:$0xff]  ;;  %v6181_v60 = vmul.f32 1.442695, %v6163_v21 }
 0xcf7   :  { %v5765_v13 = vsub.f32 %v17848_v62, %v15282_v11  ;;  %17849 = vst [vmem:[#allocation61_spill] sm:$0xff] %v15432_v32 }
 0xcf8   :  { %5847 = vperm.xlu0 %10580, %v15398_v38   ;;  %v15422_v38 = vrot.slane %v15214_v3, %v15083_v63  ;;  %11201 = vpow2.f32 %v5803_v55  ;;  %v17850_v3 = vld [vmem:[#allocation124_spill] sm:$0xff] }
 0xcf9   :  { %5069 = vperm.xlu1 %10579, %v15418_v27   ;;  %11203 = vpow2.f32 %v6177_v35  ;;  %v15440_v31 = vpop.eup %11191  ;;  %v15442_v27 = vpop.xlane.xlu0 %6914  ;;  %v5785_v11 = vmul.f32 1.442695, %v5765_v13  ;;  %v17852_v55 = vld [vmem:[#allocation116_spill] sm:$0xff]  ;;  %v6176_v35 = vsub.f32 %v17854_v46, %v15438_v30 }
 0xcfa   :  { %17851 = vst [vmem:[#allocation124_spill] sm:$0xff] %v15440_v31  ;;  %v6165_v21 = vsub.f32 %v17852_v55, %v15298_v40  ;;  %11205 = vpow2.f32 %v6181_v60  ;;  %v15448_v62 = vpop.eup %11193  ;;  %v15454_v28 = vrot.slane %v15442_v27, %v17772_v42  ;;  %v17856_v40 = vld [vmem:[#allocation123_spill] sm:$0xff] }
 0xcfb   :  { %17853 = vst [vmem:[#allocation116_spill] sm:$0xff] %v15448_v62  ;;  %11207 = vpow2.f32 %v6203_v25  ;;  %v5767_v13 = vsub.f32 %v17856_v40, %v15310_v53  ;;  %v6207_v55 = vmul.f32 1.442695, %v6176_v35  ;;  %v17858_v25 = vld [vmem:[#allocation75_spill] sm:$0xff] }
 0xcfc   :  { %6247 = vperm.xlu0 %10580, %v15412_v10   ;;  %v5776_v10 = vsub.f32 %v17850_v3, %v15422_v38  ;;  %11209 = vpow2.f32 %v5785_v11  ;;  %v6185_v60 = vmul.f32 1.442695, %v6165_v21  ;;  %v6958_v46 = vsub.f32 %v17858_v25, %v15454_v28  ;;  %v17861_v21 = vld [vmem:[#allocation74_spill] sm:$0xff] }
 0xcfd   :  { %5075 = vperm.xlu1 %10579, %v15432_v32   ;;  %v15470_v32 = vrot.slane %v15442_v27, %v17774_v29  ;;  %v5789_v53 = vmul.f32 1.442695, %v5767_v13  ;;  %v17863_v25 = vld [vmem:[#allocation86_spill] sm:$0xff] }
 0xcfe   :  { %v5807_v3 = vmul.f32 1.442695, %v5776_v10  ;;  %v6975_v35 = vmul.f32 1.442695, %v6958_v46 }
 0xd00   :  { %5853 = vperm.xlu0 %10580, %v15426_v33   ;;  %v15456_v33 = vpop.eup %11195  ;;  %11211 = vpow2.f32 %v5807_v3  ;;  %v6167_v3 = vsub.f32 %v17861_v21, %v15326_v54  ;;  %v17865_v54 = vld [vmem:[#allocation71_spill] sm:$0xff] }
 0xd01   :  { %17855 = vst [vmem:[#allocation127_spill] sm:$0xff] %v15456_v33  ;;  %5829 = vperm.xlu1 %10579, %v15448_v62   ;;  %v15462_v10 = vpop.eup %11197  ;;  %v15472_v62 = vpop.xlane.xlu1 %7314  ;;  %11213 = vpow2.f32 %v6185_v60  ;;  %v5769_v60 = vsub.f32 %v17865_v54, %v15338_v52  ;;  %v17868_v52 = vld [vmem:[#allocation50_spill] sm:$0xff] }
 0xd02   :  { %17857 = vst [vmem:[#allocation123_spill] sm:$0xff] %v15462_v10  ;;  %11215 = vpow2.f32 %v6207_v55  ;;  %v15486_v12 = vrot.slane %v15472_v62, %v17772_v42  ;;  %v6189_v55 = vmul.f32 1.442695, %v6167_v3  ;;  %v6169_v3 = vsub.f32 %v17868_v52, %v15354_v4  ;;  %v17872_v4 = vld [vmem:[#allocation64_spill] sm:$0xff] }
 0xd03   :  { %11217 = vpow2.f32 %v5789_v53 }
 0xd04   :  { %6253 = vperm.xlu0 %10580, %v15440_v31   ;;  %v15466_v31 = vpop.eup %11199  ;;  %11219 = vpow2.f32 %v6975_v35  ;;  %v6193_v52 = vmul.f32 1.442695, %v6169_v3 }
 0xd05   :  { %17859 = vst [vmem:[#allocation75_spill] sm:$0xff] %v15466_v31  ;;  %5832 = vperm.xlu1 %10579, %v15462_v10   ;;  %v15476_v11 = vpop.eup %11201  ;;  %11221 = vpow2.f32 %v6189_v55  ;;  %v5771_v55 = vsub.f32 %v17872_v4, %v15366_v0  ;;  %v17874_v10 = vld [vmem:[#allocation85_spill] sm:$0xff] }
 0xd06   :  { %17860 = vst [vmem:[#allocation164_spill] sm:$0xff] %v15476_v11  ;;  %v15480_v40 = vpop.eup %11203 }
 0xd07   :  { %17862 = vst [vmem:[#allocation74_spill] sm:$0xff] %v15480_v40  ;;  %v15490_v13 = vpop.eup %11205  ;;  %v5797_v0 = vmul.f32 1.442695, %v5771_v55 }
 0xd08   :  { %5859 = vperm.xlu0 %10580, %v15456_v33   ;;  %v6960_v33 = vsub.f32 %v17863_v25, %v15470_v32  ;;  %17864 = vst [vmem:[#allocation86_spill] sm:$0xff] %v15490_v13  ;;  %v15494_v46 = vpop.eup %11207  ;;  %v15498_v25 = vrot.slane %v15472_v62, %v17774_v29 }
 0xd09   :  { %6226 = vperm.xlu1 %10579, %v15480_v40   ;;  %17866 = vst [vmem:[#allocation71_spill] sm:$0xff] %v15494_v46  ;;  %v15504_v53 = vpop.eup %11209 }
 0xd0a   :  { %v6979_v21 = vmul.f32 1.442695, %v6960_v33  ;;  %17867 = vst [vmem:[#allocation165_spill] sm:$0xff] %v15504_v53  ;;  %v15512_v33 = vrot.slane %v15442_v27, %v17777_v2 }
 0xd0c   :  { %6259 = vperm.xlu0 %10580, %v15466_v31   ;;  %v7358_v31 = vsub.f32 %v14662_v56, %v15486_v12  ;;  %11223 = vpow2.f32 %v6979_v21  ;;  %v17870_v56 = vld [vmem:[#allocation88_spill] sm:$0xff]  ;;  %v6962_v21 = vsub.f32 %v17874_v10, %v15512_v33  ;;  %v15540_v10 = vrot.slane %v15442_v27, %v15135_v36 }
 0xd0d   :  { %6232 = vperm.xlu1 %10579, %v15490_v13   ;;  %v15508_v35 = vpop.eup %11211  ;;  %v7360_v54 = vsub.f32 %v17870_v56, %v15498_v25  ;;  %v15528_v56 = vrot.slane %v15472_v62, %v17777_v2 }
 0xd0e   :  { %17869 = vst [vmem:[#allocation50_spill] sm:$0xff] %v15508_v35  ;;  %v7375_v13 = vmul.f32 1.442695, %v7358_v31 }
 0xd0f   :  { %v7379_v31 = vmul.f32 1.442695, %v7360_v54  ;;  %v17878_v54 = vld [vmem:[#allocation52_spill] sm:$0xff] }
 0xd10   :  { %5865 = vperm.xlu0 %10580, %v15476_v11   ;;  %v5793_v11 = vmul.f32 1.442695, %v5769_v60  ;;  %v15518_v60 = vpop.eup %11213  ;;  %v5773_v55 = vsub.f32 %v17878_v54, %v15390_v8 }
 0xd11   :  { %5838 = vperm.xlu1 %10579, %v15504_v53   ;;  %17871 = vst [vmem:[#allocation88_spill] sm:$0xff] %v15518_v60  ;;  %v6983_v53 = vmul.f32 1.442695, %v6962_v21  ;;  %v15554_v21 = vrot.slane %v15472_v62, %v15135_v36 }
 0xd12   :  { %11225 = vpow2.f32 %v5793_v11  ;;  %v17876_v11 = vld [vmem:[#allocation68_spill] sm:$0xff]  ;;  %v5801_v8 = vmul.f32 1.442695, %v5773_v55 }
 0xd13   :  { %11227 = vpow2.f32 %v7375_v13  ;;  %v6171_v3 = vsub.f32 %v17876_v11, %v15382_v26  ;;  %v7362_v13 = vsub.f32 %v14799_v49, %v15528_v56  ;;  %v17880_v11 = vld [vmem:[#allocation96_spill] sm:$0xff] }
 0xd14   :  { %6265 = vperm.xlu0 %10580, %v15494_v46   ;;  %v15522_v46 = vpop.eup %11215  ;;  %11229 = vpow2.f32 %v6193_v52 }
 0xd15   :  { %17873 = vst [vmem:[#allocation64_spill] sm:$0xff] %v15522_v46  ;;  %6238 = vperm.xlu1 %10579, %v15518_v60   ;;  %11231 = vpow2.f32 %v7379_v31  ;;  %v6197_v26 = vmul.f32 1.442695, %v6171_v3  ;;  %v7383_v49 = vmul.f32 1.442695, %v7362_v13  ;;  %v17884_v13 = vld [vmem:[#allocation99_spill] sm:$0xff] }
 0xd16   :  { %11233 = vpow2.f32 %v5797_v0  ;;  %v17882_v0 = vld [vmem:[#allocation69_spill] sm:$0xff] }
 0xd17   :  { %11235 = vpow2.f32 %v6983_v53  ;;  %v6173_v3 = vsub.f32 %v17882_v0, %v15408_v20  ;;  %v15566_v53 = vrot.slane %v15442_v27, %v15159_v15  ;;  %v17886_v20 = vld [vmem:[#allocation79_spill] sm:$0xff] }
 0xd18   :  { %5871 = vperm.xlu0 %10580, %v15508_v35   ;;  %v15532_v35 = vpop.eup %11217  ;;  %11237 = vpow2.f32 %v6197_v26  ;;  %v5775_v55 = vsub.f32 %v17886_v20, %v15422_v38 }
 0xd19   :  { %17875 = vst [vmem:[#allocation85_spill] sm:$0xff] %v15532_v35  ;;  %v15536_v4 = vpop.eup %11219  ;;  %5844 = vperm.xlu1 %10579, %v15532_v35   ;;  %11239 = vpow2.f32 %v7383_v49  ;;  %v6201_v26 = vmul.f32 1.442695, %v6173_v3  ;;  %v15584_v49 = vrot.slane %v15472_v62, %v15159_v15 }
 0xd1a   :  { %17877 = vst [vmem:[#allocation68_spill] sm:$0xff] %v15536_v4  ;;  %v15548_v52 = vpop.eup %11221  ;;  %11241 = vpow2.f32 %v5801_v8  ;;  %v5805_v38 = vmul.f32 1.442695, %v5775_v55  ;;  %v17890_v8 = vld [vmem:[#allocation81_spill] sm:$0xff] }
 0xd1b   :  { %17879 = vst [vmem:[#allocation52_spill] sm:$0xff] %v15548_v52  ;;  %v15556_v31 = vpop.eup %11223  ;;  %v6175_v3 = vsub.f32 %v17890_v8, %v15438_v30 }
 0xd1c   :  { %6271 = vperm.xlu0 %10580, %v15522_v46   ;;  %v6964_v46 = vsub.f32 %v17880_v11, %v15540_v10  ;;  %17881 = vst [vmem:[#allocation96_spill] sm:$0xff] %v15556_v31 }
 0xd1d   :  { %6244 = vperm.xlu1 %10579, %v15548_v52   ;;  %v6205_v30 = vmul.f32 1.442695, %v6175_v3 }
 0xd1e   :  { %v6987_v11 = vmul.f32 1.442695, %v6964_v46  ;;  %v17888_v46 = vld [vmem:[#allocation125_spill] sm:$0xff] }
 0xd1f   :  { %v15562_v54 = vpop.eup %11225 }
 0xd20   :  { %7025 = vperm.xlu0 %10580, %v15536_v4   ;;  %17883 = vst [vmem:[#allocation69_spill] sm:$0xff] %v15562_v54  ;;  %v7364_v4 = vsub.f32 %v17884_v13, %v15554_v21  ;;  %v15572_v52 = vpop.eup %11227  ;;  %11243 = vpow2.f32 %v6987_v11  ;;  %v15598_v11 = vrot.slane %v15442_v27, %v15009_v24 }
 0xd21   :  { %17885 = vst [vmem:[#allocation99_spill] sm:$0xff] %v15572_v52  ;;  %5850 = vperm.xlu1 %10579, %v15562_v54   ;;  %v15578_v0 = vpop.eup %11229  ;;  %11245 = vpow2.f32 %v6201_v26  ;;  %v17893_v26 = vld [vmem:[#allocation121_spill] sm:$0xff] }
 0xd22   :  { %17887 = vst [vmem:[#allocation79_spill] sm:$0xff] %v15578_v0  ;;  %v7387_v13 = vmul.f32 1.442695, %v7364_v4  ;;  %v15588_v54 = vpop.eup %11231  ;;  %v6957_v8 = vsub.f32 %v17893_v26, %v15454_v28  ;;  %v17896_v28 = vld [vmem:[#allocation80_spill] sm:$0xff] }
 0xd23   :  { %v15570_v35 = vpop.xlane.xlu0 %8110  ;;  %17889 = vst [vmem:[#allocation125_spill] sm:$0xff] %v15588_v54  ;;  %v15594_v20 = vpop.eup %11233 }
 0xd24   :  { %7031 = vperm.xlu0 %10580, %v15556_v31   ;;  %v6966_v31 = vsub.f32 %v17888_v46, %v15566_v53  ;;  %17891 = vst [vmem:[#allocation81_spill] sm:$0xff] %v15594_v20  ;;  %v7366_v46 = vsub.f32 %v14732_v50, %v15584_v49  ;;  %11247 = vpow2.f32 %v7387_v13  ;;  %v6968_v50 = vsub.f32 %v14803_v61, %v15598_v11 }
 0xd25   :  { %6250 = vperm.xlu1 %10579, %v15578_v0   ;;  %v15604_v0 = vpop.eup %11235  ;;  %11249 = vpow2.f32 %v5805_v38  ;;  %v15618_v13 = vrot.slane %v15472_v62, %v15009_v24  ;;  %v6959_v61 = vsub.f32 %v17896_v28, %v15470_v32  ;;  %v6973_v3 = vmul.f32 1.442695, %v6957_v8  ;;  %v17899_v8 = vld [vmem:[#allocation120_spill] sm:$0xff] }
 0xd26   :  { %v6991_v4 = vmul.f32 1.442695, %v6966_v31  ;;  %17892 = vst [vmem:[#allocation166_spill] sm:$0xff] %v15604_v0  ;;  %v15612_v31 = vpop.eup %11237  ;;  %v6995_v26 = vmul.f32 1.442695, %v6968_v50  ;;  %v7357_v28 = vsub.f32 %v17899_v8, %v15486_v12  ;;  %v17903_v12 = vld [vmem:[#allocation126_spill] sm:$0xff] }
 0xd27   :  { %17894 = vst [vmem:[#allocation121_spill] sm:$0xff] %v15612_v31  ;;  %v6977_v32 = vmul.f32 1.442695, %v6959_v61  ;;  %v7359_v61 = vsub.f32 %v17903_v12, %v15498_v25  ;;  %v17907_v25 = vld [vmem:[#allocation84_spill] sm:$0xff]  ;;  %v15690_v12 = vrot.slane %v15472_v62, %v15083_v63 }
 0xd28   :  { %7425 = vperm.xlu0 %10580, %v15572_v52   ;;  %11251 = vpow2.f32 %v6991_v4 }
 0xd29   :  { %v15606_v55 = vpop.xlane.xlu1 %8510  ;;  %5856 = vperm.xlu1 %10579, %v15594_v20   ;;  %v15622_v20 = vpop.eup %11239  ;;  %11253 = vpow2.f32 %v6205_v30 }
 0xd2a   :  { %17895 = vst [vmem:[#allocation167_spill] sm:$0xff] %v15622_v20  ;;  %v15630_v4 = vpop.eup %11241  ;;  %v15744_v7 = vrot.slane %v15606_v55, %v17772_v42 }
 0xd2b   :  { %v15586_v60 = vpop.permute.xlu0 %4633  ;;  %17897 = vst [vmem:[#allocation80_spill] sm:$0xff] %v15630_v4 }
 0xd2c   :  { %7431 = vperm.xlu0 %10580, %v15588_v54   ;;  %v7391_v54 = vmul.f32 1.442695, %v7366_v46  ;;  %v15634_v46 = vrot.slane %v15442_v27, %v15063_v59 }
 0xd2d   :  { %v15624_v38 = vpop.permute.xlu1 %4630  ;;  %6256 = vperm.xlu1 %10579, %v15612_v31   ;;  %v15640_v31 = vpop.eup %11243 }
 0xd2e   :  { %11255 = vpow2.f32 %v7391_v54  ;;  %17898 = vst [vmem:[#allocation168_spill] sm:$0xff] %v15640_v31  ;;  %v15648_v50 = vpop.eup %11245 }
 0xd2f   :  { %v15602_v52 = vpop.permute.xlu0 %4660  ;;  %11257 = vpow2.f32 %v6973_v3  ;;  %17900 = vst [vmem:[#allocation120_spill] sm:$0xff] %v15648_v50 }
 0xd30   :  { %7037 = vperm.xlu0 %10580, %v15604_v0   ;;  %v7368_v0 = vsub.f32 %v14807_v57, %v15618_v13  ;;  %v17901_v57 = vld [vmem:[#allocation131_spill] sm:$0xff]  ;;  %11259 = vpow2.f32 %v6995_v26  ;;  %v7373_v26 = vmul.f32 1.442695, %v7357_v28  ;;  %v6961_v28 = vsub.f32 %v17907_v25, %v15512_v33 }
 0xd31   :  { %v15642_v30 = vpop.permute.xlu1 %4636  ;;  %5862 = vperm.xlu1 %10579, %v15630_v4   ;;  %v6970_v54 = vsub.f32 %v17901_v57, %v15634_v46  ;;  %v15658_v4 = vpop.eup %11247  ;;  %11261 = vpow2.f32 %v6977_v32 }
 0xd32   :  { %v7395_v23 = vmul.f32 1.442695, %v7368_v0  ;;  %17902 = vst [vmem:[#allocation131_spill] sm:$0xff] %v15658_v4  ;;  %v15666_v8 = vpop.eup %11249  ;;  %v15670_v0 = vrot.slane %v15442_v27, %v15083_v63  ;;  %v7377_v27 = vmul.f32 1.442695, %v7359_v61  ;;  %v17911_v61 = vld [vmem:[#allocation67_spill] sm:$0xff] }
 0xd33   :  { %v15620_v40 = vpop.permute.xlu0 %4666  ;;  %17904 = vst [vmem:[#allocation126_spill] sm:$0xff] %v15666_v8  ;;  %v6999_v57 = vmul.f32 1.442695, %v6970_v54  ;;  %v6981_v33 = vmul.f32 1.442695, %v6961_v28 }
 0xd34   :  { %7437 = vperm.xlu0 %10580, %v15622_v20   ;;  %v15654_v20 = vrot.slane %v15472_v62, %v15063_v59  ;;  %11263 = vpow2.f32 %v7395_v23 }
 0xd35   :  { %v15660_v3 = vpop.permute.xlu1 %4639  ;;  %6262 = vperm.xlu1 %10579, %v15648_v50   ;;  %v15676_v50 = vpop.eup %11251  ;;  %11265 = vpow2.f32 %v7373_v26  ;;  %v7361_v26 = vsub.f32 %v17911_v61, %v15528_v56  ;;  %v17915_v56 = vld [vmem:[#allocation128_spill] sm:$0xff] }
 0xd36   :  { %v15684_v54 = vpop.eup %11253  ;;  %11267 = vpow2.f32 %v6999_v57 }
 0xd37   :  { %v15638_v19 = vpop.permute.xlu0 %4672  ;;  %17908 = vst [vmem:[#allocation84_spill] sm:$0xff] %v15684_v54  ;;  %11269 = vpow2.f32 %v7377_v27  ;;  %v6963_v27 = vsub.f32 %v17915_v56, %v15540_v10 }
 0xd38   :  { %7043 = vperm.xlu0 %10580, %v15640_v31   ;;  %v17905_v31 = vld [vmem:[#allocation129_spill] sm:$0xff] }
 0xd39   :  { %v7370_v48 = vsub.f32 %v17905_v31, %v15654_v20  ;;  %17906 = vst [vmem:[#allocation129_spill] sm:$0xff] %v15676_v50  ;;  %v15678_v32 = vpop.permute.xlu1 %4642  ;;  %5868 = vperm.xlu1 %10579, %v15666_v8   ;;  %v17909_v31 = vld [vmem:[#allocation103_spill] sm:$0xff]  ;;  %v6985_v10 = vmul.f32 1.442695, %v6963_v27 }
 0xd3a   :  { %v6972_v23 = vsub.f32 %v17909_v31, %v15670_v0  ;;  %v15708_v31 = vrot.slane %v15570_v35, %v17772_v42 }
 0xd3b   :  { %v15656_v45 = vpop.permute.xlu0 %5030  ;;  %v15694_v8 = vpop.eup %11255 }
 0xd3c   :  { %7443 = vperm.xlu0 %10580, %v15658_v4   ;;  %v7399_v4 = vmul.f32 1.442695, %v7370_v48  ;;  %17910 = vst [vmem:[#allocation103_spill] sm:$0xff] %v15694_v8  ;;  %v15702_v57 = vpop.eup %11257  ;;  %v7003_v62 = vmul.f32 1.442695, %v6972_v23  ;;  %v17913_v48 = vld [vmem:[#allocation135_spill] sm:$0xff] }
 0xd3d   :  { %6268 = vperm.xlu1 %10579, %v15684_v54   ;;  %17912 = vst [vmem:[#allocation67_spill] sm:$0xff] %v15702_v57  ;;  %v7372_v25 = vsub.f32 %v17913_v48, %v15690_v12  ;;  %v15712_v54 = vpop.eup %11259  ;;  %v7381_v23 = vmul.f32 1.442695, %v7361_v26  ;;  %v15724_v48 = vrot.slane %v15570_v35, %v17774_v29 }
 0xd3e   :  { %11271 = vpow2.f32 %v7399_v4  ;;  %17914 = vst [vmem:[#allocation135_spill] sm:$0xff] %v15712_v54  ;;  %v15720_v4 = vpop.eup %11261 }
 0xd3f   :  { %v15674_v47 = vpop.permute.xlu0 %5036  ;;  %11273 = vpow2.f32 %v6981_v33  ;;  %17916 = vst [vmem:[#allocation128_spill] sm:$0xff] %v15720_v4  ;;  %v7403_v61 = vmul.f32 1.442695, %v7372_v25  ;;  %v17919_v33 = vld [vmem:[#allocation95_spill] sm:$0xff] }
 0xd40   :  { %7049 = vperm.xlu0 %10580, %v15676_v50   ;;  %v15696_v50 = vpop.permute.xlu1 %4645  ;;  %11275 = vpow2.f32 %v7003_v62  ;;  %v7363_v26 = vsub.f32 %v17919_v33, %v15554_v21  ;;  %v17923_v21 = vld [vmem:[#allocation76_spill] sm:$0xff] }
 0xd41   :  { %7022 = vperm.xlu1 %10579, %v15702_v57   ;;  %v15730_v57 = vpop.eup %11263  ;;  %11277 = vpow2.f32 %v7381_v23  ;;  %v6965_v23 = vsub.f32 %v17923_v21, %v15566_v53 }
 0xd42   :  { %v15738_v62 = vpop.eup %11265  ;;  %11279 = vpow2.f32 %v7403_v61  ;;  %v7385_v61 = vmul.f32 1.442695, %v7363_v26 }
 0xd43   :  { %v15692_v43 = vpop.permute.xlu0 %5042  ;;  %17920 = vst [vmem:[#allocation95_spill] sm:$0xff] %v15738_v62  ;;  %11281 = vpow2.f32 %v6985_v10  ;;  %v6989_v53 = vmul.f32 1.442695, %v6965_v23  ;;  %v17927_v10 = vld [vmem:[#allocation57_spill] sm:$0xff] }
 0xd44   :  { %7449 = vperm.xlu0 %10580, %v15694_v8   ;;  %v15714_v28 = vpop.permute.xlu1 %4648  ;;  %v17917_v8 = vld [vmem:[#allocation98_spill] sm:$0xff]  ;;  %v7365_v26 = vsub.f32 %v17927_v10, %v15584_v49 }
 0xd45   :  { %v8154_v6 = vsub.f32 %v17917_v8, %v15708_v31  ;;  %17918 = vst [vmem:[#allocation98_spill] sm:$0xff] %v15730_v57  ;;  %7028 = vperm.xlu1 %10579, %v15720_v4   ;;  %v17921_v8 = vld [vmem:[#allocation137_spill] sm:$0xff]  ;;  %v15748_v4 = vpop.eup %11267  ;;  %v17931_v49 = vld [vmem:[#allocation90_spill] sm:$0xff] }
 0xd46   :  { %v8156_v25 = vsub.f32 %v17921_v8, %v15724_v48  ;;  %17922 = vst [vmem:[#allocation137_spill] sm:$0xff] %v15748_v4  ;;  %v15760_v8 = vrot.slane %v15606_v55, %v17774_v29  ;;  %v7389_v10 = vmul.f32 1.442695, %v7365_v26 }
 0xd47   :  { %v15710_v1 = vpop.permute.xlu0 %5048  ;;  %v8171_v56 = vmul.f32 1.442695, %v8154_v6  ;;  %v15756_v6 = vpop.eup %11269 }
 0xd48   :  { %7055 = vperm.xlu0 %10580, %v15712_v54   ;;  %v15732_v54 = vpop.permute.xlu1 %4651  ;;  %17924 = vst [vmem:[#allocation76_spill] sm:$0xff] %v15756_v6  ;;  %v8175_v33 = vmul.f32 1.442695, %v8156_v25 }
 0xd49   :  { %7422 = vperm.xlu1 %10579, %v15738_v62   ;;  %11283 = vpow2.f32 %v8171_v56  ;;  %v8556_v56 = vsub.f32 %v14951_v37, %v15760_v8  ;;  %v17933_v37 = vld [vmem:[#allocation140_spill] sm:$0xff] }
 0xd4a   :  { %11285 = vpow2.f32 %v7385_v61  ;;  %v6967_v61 = vsub.f32 %v17931_v49, %v15598_v11 }
 0xd4b   :  { %v15728_v14 = vpop.permute.xlu0 %5054  ;;  %v15766_v62 = vpop.eup %11271  ;;  %11287 = vpow2.f32 %v8175_v33  ;;  %v8575_v29 = vmul.f32 1.442695, %v8556_v56  ;;  %v15814_v56 = vrot.slane %v15570_v35, %v15135_v36 }
 0xd4c   :  { %7455 = vperm.xlu0 %10580, %v15730_v57   ;;  %v15750_v27 = vpop.permute.xlu1 %4654  ;;  %v8554_v57 = vsub.f32 %v14823_v51, %v15744_v7  ;;  %17926 = vst [vmem:[#allocation170_spill] sm:$0xff] %v15766_v62  ;;  %v15774_v25 = vpop.eup %11273  ;;  %v15778_v51 = vrot.slane %v15570_v35, %v17777_v2  ;;  %11289 = vpow2.f32 %v6989_v53  ;;  %v6993_v11 = vmul.f32 1.442695, %v6967_v61  ;;  %v17936_v53 = vld [vmem:[#allocation91_spill] sm:$0xff] }
 0xd4d   :  { %7428 = vperm.xlu1 %10579, %v15756_v6   ;;  %17928 = vst [vmem:[#allocation57_spill] sm:$0xff] %v15774_v25  ;;  %v15784_v6 = vpop.eup %11275  ;;  %v7367_v26 = vsub.f32 %v17936_v53, %v15618_v13  ;;  %v17941_v13 = vld [vmem:[#allocation72_spill] sm:$0xff] }
 0xd4e   :  { %v8571_v21 = vmul.f32 1.442695, %v8554_v57  ;;  %17930 = vst [vmem:[#allocation172_spill] sm:$0xff] %v15784_v6  ;;  %v15792_v33 = vpop.eup %11277  ;;  %v8158_v57 = vsub.f32 %v17933_v37, %v15778_v51  ;;  %v17938_v37 = vld [vmem:[#allocation142_spill] sm:$0xff] }
 0xd4f   :  { %v15746_v22 = vpop.permute.xlu0 %5060  ;;  %17932 = vst [vmem:[#allocation90_spill] sm:$0xff] %v15792_v33  ;;  %v7393_v53 = vmul.f32 1.442695, %v7367_v26 }
 0xd50   :  { %7061 = vperm.xlu0 %10580, %v15748_v4   ;;  %v15768_v4 = vpop.permute.xlu1 %4657  ;;  %11291 = vpow2.f32 %v8571_v21  ;;  %v8179_v21 = vmul.f32 1.442695, %v8158_v57 }
 0xd51   :  { %7034 = vperm.xlu1 %10579, %v15774_v25   ;;  %v15802_v25 = vpop.eup %11279  ;;  %11293 = vpow2.f32 %v7389_v10  ;;  %v6969_v10 = vsub.f32 %v17941_v13, %v15634_v46 }
 0xd52   :  { %17935 = vst [vmem:[#allocation173_spill] sm:$0xff] %v15802_v25  ;;  %v15810_v49 = vpop.eup %11281  ;;  %11295 = vpow2.f32 %v8575_v29 }
 0xd53   :  { %v15764_v39 = vpop.permute.xlu0 %5066  ;;  %17937 = vst [vmem:[#allocation91_spill] sm:$0xff] %v15810_v49  ;;  %11297 = vpow2.f32 %v6993_v11  ;;  %v6997_v46 = vmul.f32 1.442695, %v6969_v10  ;;  %v17946_v11 = vld [vmem:[#allocation92_spill] sm:$0xff] }
 0xd54   :  { %17925 = vst [vmem:[#allocation169_spill] sm:$0xff] %v15764_v39  ;;  %7461 = vperm.xlu0 %10580, %v15766_v62   ;;  %v15786_v23 = vpop.permute.xlu1 %4663  ;;  %v15798_v62 = vrot.slane %v15606_v55, %v17777_v2  ;;  %11299 = vpow2.f32 %v8179_v21  ;;  %v7369_v26 = vsub.f32 %v17946_v11, %v15654_v20  ;;  %v15848_v21 = vrot.slane %v15570_v35, %v15159_v15  ;;  %v17951_v20 = vld [vmem:[#allocation77_spill] sm:$0xff] }
 0xd55   :  { %7434 = vperm.xlu1 %10579, %v15792_v33   ;;  %11301 = vpow2.f32 %v7393_v53  ;;  %v6971_v53 = vsub.f32 %v17951_v20, %v15670_v0  ;;  %v17956_v0 = vld [vmem:[#allocation102_spill] sm:$0xff] }
 0xd56   :  { %v8558_v2 = vsub.f32 %v17938_v37, %v15798_v62  ;;  %v15820_v33 = vpop.eup %11283  ;;  %v17943_v37 = vld [vmem:[#allocation147_spill] sm:$0xff]  ;;  %v7397_v11 = vmul.f32 1.442695, %v7369_v26  ;;  %v7371_v20 = vsub.f32 %v17956_v0, %v15690_v12 }
 0xd57   :  { %v15782_v17 = vpop.permute.xlu0 %5072  ;;  %17940 = vst [vmem:[#allocation174_spill] sm:$0xff] %v15820_v33  ;;  %v15828_v57 = vpop.eup %11285  ;;  %v8160_v29 = vsub.f32 %v17943_v37, %v15814_v56  ;;  %v17948_v37 = vld [vmem:[#allocation149_spill] sm:$0xff]  ;;  %v7001_v26 = vmul.f32 1.442695, %v6971_v53 }
 0xd58   :  { %17929 = vst [vmem:[#allocation171_spill] sm:$0xff] %v15782_v17  ;;  %7067 = vperm.xlu0 %10580, %v15784_v6   ;;  %v15804_v6 = vpop.permute.xlu1 %4669  ;;  %17942 = vst [vmem:[#allocation72_spill] sm:$0xff] %v15828_v57  ;;  %v7401_v0 = vmul.f32 1.442695, %v7371_v20 }
 0xd59   :  { %7040 = vperm.xlu1 %10579, %v15810_v49   ;;  %v15838_v49 = vpop.eup %11287  ;;  %v8183_v13 = vmul.f32 1.442695, %v8160_v29  ;;  %v17952_v29 = vld [vmem:[#allocation101_spill] sm:$0xff] }
 0xd5a   :  { %17945 = vst [vmem:[#allocation175_spill] sm:$0xff] %v15838_v49 }
 0xd5b   :  { %v15800_v42 = vpop.permute.xlu0 %5826 }
 0xd5c   :  { %17934 = vst [vmem:[#allocation140_spill] sm:$0xff] %v15800_v42  ;;  %7467 = vperm.xlu0 %10580, %v15802_v25   ;;  %v15822_v61 = vpop.permute.xlu1 %4675  ;;  %v15834_v25 = vrot.slane %v15606_v55, %v15135_v36 }
 0xd5d   :  { %7440 = vperm.xlu1 %10579, %v15828_v57  }
 0xd5e   :  { %v8560_v36 = vsub.f32 %v17948_v37, %v15834_v25 }
 0xd5f   :  { %v15818_v42 = vpop.permute.xlu0 %5835 }
 0xd60   :  { %17939 = vst [vmem:[#allocation142_spill] sm:$0xff] %v15818_v42  ;;  %8221 = vperm.xlu0 %10580, %v15820_v33   ;;  %v8579_v42 = vmul.f32 1.442695, %v8558_v2  ;;  %v15840_v33 = vpop.permute.xlu1 %5033  ;;  %v15850_v2 = vpop.eup %11289  ;;  %v8583_v37 = vmul.f32 1.442695, %v8560_v36 }
 0xd61   :  { %17947 = vst [vmem:[#allocation92_spill] sm:$0xff] %v15850_v2  ;;  %v15856_v57 = vpop.eup %11291  ;;  %7046 = vperm.xlu1 %10579, %v15850_v2  }
 0xd62   :  { %11303 = vpow2.f32 %v8579_v42  ;;  %17950 = vst [vmem:[#allocation176_spill] sm:$0xff] %v15856_v57  ;;  %v15864_v39 = vpop.eup %11293  ;;  %v15868_v42 = vrot.slane %v15606_v55, %v15159_v15 }
 0xd63   :  { %v15836_v17 = vpop.permute.xlu0 %6229  ;;  %11305 = vpow2.f32 %v6997_v46  ;;  %17953 = vst [vmem:[#allocation77_spill] sm:$0xff] %v15864_v39  ;;  %v15872_v2 = vpop.eup %11295 }
 0xd64   :  { %17944 = vst [vmem:[#allocation147_spill] sm:$0xff] %v15836_v17  ;;  %8227 = vperm.xlu0 %10580, %v15838_v49   ;;  %v5040_v10 = vpop.permute.xlu1 %5039  ;;  %v8162_v49 = vsub.f32 %v17952_v29, %v15848_v21  ;;  %11307 = vpow2.f32 %v8183_v13  ;;  %17955 = vst [vmem:[#allocation177_spill] sm:$0xff] %v15872_v2  ;;  %v15880_v13 = vrot.slane %v15570_v35, %v15009_v24  ;;  %v15882_v36 = vpop.eup %11297 }
 0xd65   :  { %7446 = vperm.xlu1 %10579, %v15864_v39   ;;  %11309 = vpow2.f32 %v7397_v11  ;;  %17957 = vst [vmem:[#allocation102_spill] sm:$0xff] %v15882_v36  ;;  %v15888_v12 = vpop.eup %11299  ;;  %v17959_v11 = vld [vmem:[#allocation130_spill] sm:$0xff]  ;;  %v17960_v39 = vld [vmem:[#allocation144_spill] sm:$0xff] }
 0xd66   :  { %v8187_v29 = vmul.f32 1.442695, %v8162_v49  ;;  %11311 = vpow2.f32 %v8583_v37  ;;  %17958 = vst [vmem:[#allocation178_spill] sm:$0xff] %v15888_v12  ;;  %v5093_v49 = vrot.slane %v5040_v10, %v14507_v41  ;;  %v15899_v37 = vrot.slane %v15606_v55, %v15009_v24 }
 0xd67   :  { %v15854_v17 = vpop.permute.xlu0 %6235  ;;  %11313 = vpow2.f32 %v7001_v26  ;;  %v5084_v10 = vrot.slane %v15840_v33, %v14507_v41  ;;  %v5080_v33 = vrot.slane %v15656_v45, %v14513_v58 }
 0xd68   :  { %17949 = vst [vmem:[#allocation149_spill] sm:$0xff] %v15854_v17  ;;  %8621 = vperm.xlu0 %10580, %v15856_v57   ;;  %v5046_v46 = vpop.permute.xlu1 %5045  ;;  %v8562_v57 = vsub.f32 %v14892_v5, %v15868_v42  ;;  %v8164_v5 = vsub.f32 %v17960_v39, %v15880_v13  ;;  %11315 = vpow2.f32 %v8187_v29  ;;  %v15915_v29 = vrot.slane %v15570_v35, %v15063_v59 }
 0xd69   :  { %7052 = vperm.xlu1 %10579, %v15882_v36   ;;  %v5102_v20 = vrot.slane %v5046_v46, %v14507_v41  ;;  %11317 = vpow2.f32 %v7401_v0  ;;  %v17964_v46 = vld [vmem:[#allocation100_spill] sm:$0xff]  ;;  %v8564_v45 = vsub.f32 %v14965_v9, %v15899_v37 }
 0xd6a   :  { %v8587_v26 = vmul.f32 1.442695, %v8562_v57  ;;  %v8155_v57 = vsub.f32 %v17964_v46, %v15724_v48  ;;  %v8191_v48 = vmul.f32 1.442695, %v8164_v5 }
 0xd6b   :  { %v15870_v17 = vpop.permute.xlu0 %5841 }
 0xd6c   :  { %17954 = vst [vmem:[#allocation101_spill] sm:$0xff] %v15870_v17  ;;  %8627 = vperm.xlu0 %10580, %v15872_v2   ;;  %v5052_v53 = vpop.permute.xlu1 %5051  ;;  %v8153_v2 = vsub.f32 %v17959_v11, %v15708_v31  ;;  %v15902_v17 = vpop.eup %11301  ;;  %v5089_v31 = vrot.slane %v15674_v47, %v14513_v58  ;;  %v5098_v47 = vrot.slane %v15692_v43, %v14513_v58  ;;  %11319 = vpow2.f32 %v8587_v26 }
 0xd6d   :  { %17961 = vst [vmem:[#allocation130_spill] sm:$0xff] %v15902_v17  ;;  %v5111_v11 = vrot.slane %v5052_v53, %v14507_v41  ;;  %7452 = vperm.xlu1 %10579, %v15902_v17   ;;  %v5107_v53 = vrot.slane %v15710_v1, %v14513_v58  ;;  %v5116_v43 = vrot.slane %v15728_v14, %v14513_v58  ;;  %v8173_v9 = vmul.f32 1.442695, %v8155_v57 }
 0xd6e   :  { %v5094_v0 = vsel %vm4440_vm0, %v5093_v49, %v5089_v31  ;;  %v5103_v46 = vsel %vm4440_vm0, %v5102_v20, %v5098_v47  ;;  %v5085_v1 = vsel %vm4440_vm0, %v5084_v10, %v5080_v33  ;;  %v5125_v26 = vrot.slane %v15746_v22, %v14513_v58 }
 0xd6f   :  { %v15886_v15 = vpop.permute.xlu0 %6241  ;;  %v15911_v39 = vpop.eup %11303  ;;  %v5112_v49 = vsel %vm4440_vm0, %v5111_v11, %v5107_v53  ;;  %v5149_v14 = vsel %vm4505_vm1, %v5094_v0, %v5085_v1  ;;  %v15954_v33 = vrot.slane %v15606_v55, %v15063_v59  ;;  %v8591_v22 = vmul.f32 1.442695, %v8564_v45 }
 0xd70   :  { %8233 = vperm.xlu0 %10580, %v15888_v12   ;;  %17963 = vst [vmem:[#allocation179_spill] sm:$0xff] %v15911_v39  ;;  %v5058_v36 = vpop.permute.xlu1 %5057  ;;  %v15932_v17 = vpop.eup %11305  ;;  %v5150_v10 = vsel %vm4507_vm2, %v5103_v46, %v5149_v14 }
 0xd71   :  { %v5120_v24 = vrot.slane %v5058_v36, %v14507_v41  ;;  %v15940_v31 = vpop.eup %11307  ;;  %7058 = vperm.xlu1 %10579, %v15932_v17   ;;  %v5151_v0 = vsel %vm4509_vm3, %v5112_v49, %v5150_v10  ;;  %v8566_v10 = vsub.f32 %v14973_v16, %v15954_v33  ;;  %v16000_v16 = vrot.slane %v15606_v55, %v15083_v63 }
 0xd72   :  { %17965 = vst [vmem:[#allocation100_spill] sm:$0xff] %v15940_v31  ;;  %v15959_v57 = vpop.eup %11309 }
 0xd73   :  { %v15909_v12 = vpop.permute.xlu0 %5847  ;;  %v5121_v20 = vsel %vm4440_vm0, %v5120_v24, %v5116_v43  ;;  %v17967_v24 = vld [vmem:[#allocation94_spill] sm:$0xff] }
 0xd74   :  { %17962 = vst [vmem:[#allocation144_spill] sm:$0xff] %v15909_v12  ;;  %8633 = vperm.xlu0 %10580, %v15911_v39   ;;  %v8169_v12 = vmul.f32 1.442695, %v8153_v2  ;;  %v17966_v2 = vld [vmem:[#allocation146_spill] sm:$0xff]  ;;  %v5064_v47 = vpop.permute.xlu1 %5063  ;;  %v8553_v53 = vsub.f32 %v17967_v24, %v15744_v7  ;;  %v5152_v43 = vsel %vm4511_vm4, %v5121_v20, %v5151_v0 }
 0xd75   :  { %v8166_v5 = vsub.f32 %v17966_v2, %v15915_v29  ;;  %v5129_v11 = vrot.slane %v5064_v47, %v14507_v41  ;;  %7458 = vperm.xlu1 %10579, %v15959_v57   ;;  %v15982_v47 = vrot.slane %v15570_v35, %v15083_v63 }
 0xd76   :  { %11321 = vpow2.f32 %v8169_v12  ;;  %v15965_v12 = vpop.eup %11311  ;;  %v8569_v14 = vmul.f32 1.442695, %v8553_v53 }
 0xd77   :  { %v15938_v36 = vpop.permute.xlu0 %6247  ;;  %11323 = vpow2.f32 %v8191_v48  ;;  %v5130_v46 = vsel %vm4440_vm0, %v5129_v11, %v5125_v26  ;;  %17968 = vst [vmem:[#allocation146_spill] sm:$0xff] %v15965_v12  ;;  %v15974_v49 = vpop.eup %11313  ;;  %v17970_v48 = vld [vmem:[#allocation82_spill] sm:$0xff]  ;;  %v8195_v26 = vmul.f32 1.442695, %v8166_v5  ;;  %v17973_v5 = vld [vmem:[#allocation152_spill] sm:$0xff] }
 0xd78   :  { %8239 = vperm.xlu0 %10580, %v15940_v31   ;;  %v15967_v2 = vpop.permute.xlu1 %5069  ;;  %v15971_v7 = vsel %vm4513_vm5, %v5130_v46, %v5152_v43  ;;  %17969 = vst [vmem:[#allocation94_spill] sm:$0xff] %v15974_v49  ;;  %11325 = vpow2.f32 %v8173_v9  ;;  %v8555_v45 = vsub.f32 %v17970_v48, %v15760_v8  ;;  %v15978_v20 = vpop.eup %11315  ;;  %v17972_v8 = vld [vmem:[#allocation134_spill] sm:$0xff]  ;;  %v8168_v0 = vsub.f32 %v17973_v5, %v15982_v47 }
 0xd79   :  { %17971 = vst [vmem:[#allocation82_spill] sm:$0xff] %v15978_v20  ;;  %11327 = vpow2.f32 %v8591_v22  ;;  %7064 = vperm.xlu1 %10579, %v15974_v49   ;;  %v15991_v9 = vpop.eup %11317  ;;  %v8157_v53 = vsub.f32 %v17972_v8, %v15778_v51  ;;  %v8595_v22 = vmul.f32 1.442695, %v8566_v10  ;;  %v8568_v10 = vsub.f32 %v15075_v34, %v16000_v16 }
 0xd7a   :  { %11329 = vpow2.f32 %v8569_v14  ;;  %v8573_v35 = vmul.f32 1.442695, %v8555_v45  ;;  %v16004_v46 = vpop.eup %11319  ;;  %v17975_v45 = vld [vmem:[#allocation136_spill] sm:$0xff]  ;;  %v8199_v55 = vmul.f32 1.442695, %v8168_v0 }
 0xd7b   :  { %v15963_v1 = vpop.permute.xlu0 %5853  ;;  %11331 = vpow2.f32 %v8195_v26  ;;  %17974 = vst [vmem:[#allocation134_spill] sm:$0xff] %v16004_v46  ;;  %v8177_v51 = vmul.f32 1.442695, %v8157_v53  ;;  %v8557_v14 = vsub.f32 %v17975_v45, %v15798_v62  ;;  %v17978_v62 = vld [vmem:[#allocation145_spill] sm:$0xff]  ;;  %v8599_v34 = vmul.f32 1.442695, %v8568_v10 }
 0xd7c   :  { %8639 = vperm.xlu0 %10580, %v15965_v12   ;;  %v15988_v24 = vpop.permute.xlu1 %5075  ;;  %11333 = vpow2.f32 %v8573_v35  ;;  %v8159_v53 = vsub.f32 %v17978_v62, %v15814_v56  ;;  %v8559_v56 = vsub.f32 %v14971_v18, %v15834_v25  ;;  %v17983_v62 = vld [vmem:[#allocation97_spill] sm:$0xff]  ;;  %v17988_v12 = vld [vmem:[#allocation138_spill] sm:$0xff] }
 0xd7d   :  { %7464 = vperm.xlu1 %10579, %v15991_v9   ;;  %11335 = vpow2.f32 %v8595_v22  ;;  %v8577_v35 = vmul.f32 1.442695, %v8557_v14 }
 0xd7e   :  { %11337 = vpow2.f32 %v8177_v51 }
 0xd7f   :  { %v15986_v11 = vpop.permute.xlu0 %6253  ;;  %11339 = vpow2.f32 %v8199_v55 }
 0xd80   :  { %8245 = vperm.xlu0 %10580, %v15978_v20   ;;  %v16006_v48 = vpop.permute.xlu1 %5829  ;;  %11341 = vpow2.f32 %v8577_v35 }
 0xd81   :  { %11343 = vpow2.f32 %v8599_v34 }
 0xd83   :  { %v16002_v43 = vpop.permute.xlu0 %5859  ;;  %v16012_v26 = vpop.eup %11321 }
 0xd84   :  { %8645 = vperm.xlu0 %10580, %v16004_v46   ;;  %17976 = vst [vmem:[#allocation152_spill] sm:$0xff] %v16012_v26  ;;  %v16018_v5 = vpop.eup %11323  ;;  %v16020_v20 = vpop.permute.xlu1 %5832  ;;  %8218 = vperm.xlu1 %10579, %v16012_v26  }
 0xd85   :  { %17977 = vst [vmem:[#allocation136_spill] sm:$0xff] %v16018_v5  ;;  %v16026_v0 = vpop.eup %11325 }
 0xd86   :  { %17979 = vst [vmem:[#allocation145_spill] sm:$0xff] %v16026_v0  ;;  %v16030_v45 = vpop.eup %11327 }
 0xd87   :  { %v16016_v8 = vpop.permute.xlu0 %6259  ;;  %17980 = vst [vmem:[#allocation180_spill] sm:$0xff] %v16030_v45  ;;  %v16038_v51 = vpop.eup %11329 }
 0xd88   :  { %8251 = vperm.xlu0 %10580, %v16018_v5   ;;  %v16032_v46 = vpop.permute.xlu1 %6226  ;;  %8224 = vperm.xlu1 %10579, %v16026_v0   ;;  %v8181_v5 = vmul.f32 1.442695, %v8159_v53  ;;  %17981 = vst [vmem:[#allocation181_spill] sm:$0xff] %v16038_v51  ;;  %v16042_v55 = vpop.eup %11331  ;;  %v8161_v53 = vsub.f32 %v17983_v62, %v15848_v21 }
 0xd89   :  { %17982 = vst [vmem:[#allocation182_spill] sm:$0xff] %v16042_v55  ;;  %v16050_v18 = vpop.eup %11333 }
 0xd8a   :  { %11345 = vpow2.f32 %v8181_v5  ;;  %17984 = vst [vmem:[#allocation97_spill] sm:$0xff] %v16050_v18  ;;  %v16054_v35 = vpop.eup %11335  ;;  %v8185_v31 = vmul.f32 1.442695, %v8161_v53 }
 0xd8b   :  { %v16028_v22 = vpop.permute.xlu0 %5865  ;;  %17985 = vst [vmem:[#allocation183_spill] sm:$0xff] %v16054_v35  ;;  %v16062_v21 = vpop.eup %11337 }
 0xd8c   :  { %8651 = vperm.xlu0 %10580, %v16030_v45   ;;  %v16044_v10 = vpop.permute.xlu1 %6232  ;;  %8618 = vperm.xlu1 %10579, %v16038_v51   ;;  %v8581_v45 = vmul.f32 1.442695, %v8559_v56  ;;  %17986 = vst [vmem:[#allocation184_spill] sm:$0xff] %v16062_v21  ;;  %v16066_v56 = vpop.eup %11339 }
 0xd8d   :  { %17987 = vst [vmem:[#allocation185_spill] sm:$0xff] %v16066_v56  ;;  %v16074_v39 = vpop.eup %11341 }
 0xd8e   :  { %11347 = vpow2.f32 %v8581_v45  ;;  %17989 = vst [vmem:[#allocation138_spill] sm:$0xff] %v16074_v39 }
 0xd8f   :  { %v16040_v14 = vpop.permute.xlu0 %6265  ;;  %11349 = vpow2.f32 %v8185_v31 }
 0xd90   :  { %8257 = vperm.xlu0 %10580, %v16042_v55   ;;  %v16056_v34 = vpop.permute.xlu1 %5838  ;;  %8624 = vperm.xlu1 %10579, %v16050_v18   ;;  %v8561_v55 = vsub.f32 %v14825_v44, %v15868_v42  ;;  %v16078_v42 = vpop.eup %11343 }
 0xd91   :  { %17990 = vst [vmem:[#allocation186_spill] sm:$0xff] %v16078_v42 }
 0xd92   :  { %v8585_v53 = vmul.f32 1.442695, %v8561_v55  ;;  %v17993_v55 = vld [vmem:[#allocation141_spill] sm:$0xff] }
 0xd93   :  { %v16052_v25 = vpop.permute.xlu0 %5871  ;;  %v8165_v18 = vsub.f32 %v17993_v55, %v15915_v29 }
 0xd94   :  { %8657 = vperm.xlu0 %10580, %v16054_v35   ;;  %v16068_v62 = vpop.permute.xlu1 %6238  ;;  %8230 = vperm.xlu1 %10579, %v16062_v21   ;;  %v8163_v35 = vsub.f32 %v17988_v12, %v15880_v13  ;;  %11351 = vpow2.f32 %v8585_v53  ;;  %v17995_v53 = vld [vmem:[#allocation143_spill] sm:$0xff] }
 0xd96   :  { %v8189_v21 = vmul.f32 1.442695, %v8163_v35 }
 0xd97   :  { %v16064_v5 = vpop.permute.xlu0 %6271  ;;  %v16086_v13 = vpop.eup %11345 }
 0xd98   :  { %8263 = vperm.xlu0 %10580, %v16066_v56   ;;  %v16080_v45 = vpop.permute.xlu1 %5844  ;;  %8630 = vperm.xlu1 %10579, %v16074_v39   ;;  %v17991_v56 = vld [vmem:[#allocation139_spill] sm:$0xff]  ;;  %11353 = vpow2.f32 %v8189_v21 }
 0xd99   :  { %v8563_v0 = vsub.f32 %v17991_v56, %v15899_v37  ;;  %17992 = vst [vmem:[#allocation139_spill] sm:$0xff] %v16086_v13  ;;  %v8193_v56 = vmul.f32 1.442695, %v8165_v18  ;;  %v4693_v18 = vrot.slane %v15660_v3, %v14507_v41 }
 0xd9b   :  { %v16076_v44 = vpop.permute.xlu0 %7025  ;;  %v8589_v39 = vmul.f32 1.442695, %v8563_v0  ;;  %v16095_v51 = vpop.eup %11347  ;;  %v17997_v0 = vld [vmem:[#allocation148_spill] sm:$0xff] }
 0xd9c   :  { %8663 = vperm.xlu0 %10580, %v16078_v42   ;;  %v16088_v31 = vpop.permute.xlu1 %6244  ;;  %8236 = vperm.xlu1 %10579, %v16086_v13   ;;  %17994 = vst [vmem:[#allocation141_spill] sm:$0xff] %v16095_v51  ;;  %v8565_v42 = vsub.f32 %v17995_v53, %v15954_v33  ;;  %v16104_v13 = vpop.eup %11349  ;;  %v8167_v21 = vsub.f32 %v17997_v0, %v15982_v47 }
 0xd9d   :  { %11355 = vpow2.f32 %v8589_v39  ;;  %17996 = vst [vmem:[#allocation143_spill] sm:$0xff] %v16104_v13  ;;  %v4702_v39 = vrot.slane %v15696_v50, %v14507_v41  ;;  %v4680_v33 = vrot.slane %v15624_v38, %v14513_v58  ;;  %v4684_v53 = vrot.slane %v15586_v60, %v14507_v41  ;;  %v17999_v50 = vld [vmem:[#allocation150_spill] sm:$0xff] }
 0xd9e   :  { %11357 = vpow2.f32 %v8193_v56  ;;  %v8593_v55 = vmul.f32 1.442695, %v8565_v42  ;;  %v4711_v47 = vrot.slane %v15732_v54, %v14507_v41  ;;  %v8197_v56 = vmul.f32 1.442695, %v8167_v21 }
 0xd9f   :  { %v16091_v12 = vpop.permute.xlu0 %7031  ;;  %v8567_v0 = vsub.f32 %v17999_v50, %v16000_v16  ;;  %v4698_v38 = vrot.slane %v15678_v32, %v14513_v58  ;;  %v4720_v60 = vrot.slane %v15768_v4, %v14507_v41  ;;  %v4707_v54 = vrot.slane %v15714_v28, %v14513_v58 }
 0xda0   :  { %v16097_v35 = vpop.permute.xlu1 %5850  ;;  %8636 = vperm.xlu1 %10579, %v16095_v51   ;;  %11359 = vpow2.f32 %v8593_v55  ;;  %v4716_v16 = vrot.slane %v15750_v27, %v14513_v58  ;;  %v4738_v32 = vrot.slane %v15804_v6, %v14507_v41  ;;  %v4685_v4 = vsel %vm4440_vm0, %v4684_v53, %v4680_v33 }
 0xda1   :  { %v16115_v51 = vpop.eup %11351  ;;  %v4703_v21 = vsel %vm4440_vm0, %v4702_v39, %v4698_v38  ;;  %v4712_v28 = vsel %vm4440_vm0, %v4711_v47, %v4707_v54  ;;  %11361 = vpow2.f32 %v8197_v56  ;;  %v4734_v6 = vrot.slane %v15620_v40, %v14513_v58  ;;  %v18000_v54 = vld [vmem:[#allocation169_spill] sm:$0xff] }
 0xda2   :  { %17998 = vst [vmem:[#allocation148_spill] sm:$0xff] %v16115_v51  ;;  %v4721_v39 = vsel %vm4440_vm0, %v4720_v60, %v4716_v16  ;;  %v4743_v33 = vrot.slane %v15638_v19, %v14513_v58  ;;  %v5138_v40 = vrot.slane %v15967_v2, %v14507_v41 }
 0xda3   :  { %v16100_v37 = vpop.permute.xlu0 %7425  ;;  %v4739_v56 = vsel %vm4440_vm0, %v4738_v32, %v4734_v6  ;;  %v18001_v32 = vld [vmem:[#allocation171_spill] sm:$0xff]  ;;  %v6294_v6 = vrot.slane %v16068_v62, %v14513_v58  ;;  %v6307_v62 = vrot.slane %v15938_v36, %v14507_v41 }
 0xda4   :  { %v16106_v26 = vpop.permute.xlu1 %6250  ;;  %8242 = vperm.xlu1 %10579, %v16104_v13   ;;  %v4689_v13 = vrot.slane %v15642_v30, %v14513_v58 }
 0xda5   :  { %v16143_v49 = vpop.eup %11353 }
 0xda6   :  { %v4694_v30 = vsel %vm4440_vm0, %v4693_v18, %v4689_v13  ;;  %v4725_v13 = vrot.slane %v15602_v52, %v14513_v58  ;;  %v8597_v52 = vmul.f32 1.442695, %v8567_v0 }
 0xda7   :  { %v16109_v29 = vpop.permute.xlu0 %7431  ;;  %v4749_v27 = vsel %vm4505_vm1, %v4694_v30, %v4685_v4  ;;  %v5143_v4 = vrot.slane %v18001_v32, %v14513_v58 }
 0xda8   :  { %v16127_v42 = vpop.permute.xlu1 %5856  ;;  %8642 = vperm.xlu1 %10579, %v16115_v51   ;;  %v4729_v51 = vrot.slane %v15786_v23, %v14507_v41  ;;  %v4747_v23 = vrot.slane %v15822_v61, %v14507_v41  ;;  %v4750_v61 = vsel %vm4507_vm2, %v4703_v21, %v4749_v27  ;;  %11363 = vpow2.f32 %v8597_v52 }
 0xda9   :  { %v4751_v50 = vsel %vm4509_vm3, %v4712_v28, %v4750_v61  ;;  %v5134_v21 = vrot.slane %v18000_v54, %v14513_v58 }
 0xdaa   :  { %v4730_v53 = vsel %vm4440_vm0, %v4729_v51, %v4725_v13  ;;  %v16169_v47 = vpop.eup %11355  ;;  %v4752_v38 = vsel %vm4511_vm4, %v4721_v39, %v4751_v50  ;;  %v4748_v0 = vsel %vm4440_vm0, %v4747_v23, %v4743_v33  ;;  %v5147_v51 = vrot.slane %v15988_v24, %v14507_v41  ;;  %v18002_v24 = vld [vmem:[#allocation147_spill] sm:$0xff]  ;;  %v18003_v33 = vld [vmem:[#allocation149_spill] sm:$0xff] }
 0xdab   :  { %v16130_v3 = vpop.permute.xlu0 %7037  ;;  %v4753_v30 = vsel %vm4513_vm5, %v4730_v53, %v4752_v38  ;;  %v16188_v2 = vpop.eup %11357  ;;  %v6285_v13 = vrot.slane %v16044_v10, %v14513_v58  ;;  %v6280_v23 = vrot.slane %v18002_v24, %v14507_v41  ;;  %v5139_v27 = vsel %vm4440_vm0, %v5138_v40, %v5134_v21 }
 0xdac   :  { %v16156_v55 = vpop.permute.xlu1 %6256  ;;  %8248 = vperm.xlu1 %10579, %v16143_v49   ;;  %v4754_v16 = vsel %vm4515_vm6, %v4739_v56, %v4753_v30  ;;  %v6289_v61 = vrot.slane %v18003_v33, %v14507_v41  ;;  %v6276_v10 = vrot.slane %v16032_v46, %v14513_v58  ;;  %v6303_v53 = vrot.slane %v16088_v31, %v14513_v58 }
 0xdad   :  { %v4755_v28 = vsel %vm4517_vm7, %v4748_v0, %v4754_v16  ;;  %v5148_v50 = vsel %vm4440_vm0, %v5147_v51, %v5143_v4  ;;  %v6298_v56 = vrot.slane %v15886_v15, %v14507_v41  ;;  %v6312_v38 = vrot.slane %v16106_v26, %v14513_v58  ;;  %v16217_v0 = vpop.eup %11359 }
 0xdae   :  { %v4757_v40 = vsel %vm4520_vm8, %v4755_v28, 0.0  ;;  %v6316_v46 = vrot.slane %v15986_v11, %v14507_v41  ;;  %v6290_v31 = vsel %vm4440_vm0, %v6289_v61, %v6285_v13  ;;  %v6321_v51 = vrot.slane %v16156_v55, %v14513_v58  ;;  %v16238_v16 = vpop.eup %11361 }
 0xdaf   :  { %v16159_v18 = vpop.permute.xlu0 %7437  ;;  %v5154_v15 = vsel %vm4515_vm6, %v5139_v27, %v15971_v7  ;;  %v6299_v36 = vsel %vm4440_vm0, %v6298_v56, %v6294_v6  ;;  %v6281_v21 = vsel %vm4440_vm0, %v6280_v23, %v6276_v10  ;;  %v6325_v55 = vrot.slane %v16016_v8, %v14507_v41 }
 0xdb0   :  { %v16176_v60 = vpop.permute.xlu1 %5862  ;;  %8648 = vperm.xlu1 %10579, %v16169_v47   ;;  %v5155_v11 = vsel %vm4517_vm7, %v5148_v50, %v5154_v15  ;;  %v6308_v7 = vsel %vm4440_vm0, %v6307_v62, %v6303_v53  ;;  %v6345_v32 = vsel %vm4505_vm1, %v6290_v31, %v6281_v21  ;;  %v6334_v4 = vrot.slane %v16040_v14, %v14507_v41 }
 0xdb1   :  { %v6317_v13 = vsel %vm4440_vm0, %v6316_v46, %v6312_v38  ;;  %v6346_v28 = vsel %vm4507_vm2, %v6299_v36, %v6345_v32  ;;  %v6326_v24 = vsel %vm4440_vm0, %v6325_v55, %v6321_v51  ;;  %v5157_v23 = vsel %vm4520_vm8, %v5155_v11, 0.0 }
 0xdb2   :  { %v6347_v27 = vsel %vm4509_vm3, %v6308_v7, %v6346_v28  ;;  %v6343_v14 = vrot.slane %v16064_v5, %v14507_v41  ;;  %v5885_v21 = vrot.slane %v16020_v20, %v14513_v58  ;;  %v5894_v55 = vrot.slane %v16056_v34, %v14513_v58  ;;  %v18006_v34 = vld [vmem:[#allocation140_spill] sm:$0xff] }
 0xdb3   :  { %v16179_v19 = vpop.permute.xlu0 %7043  ;;  %v6348_v33 = vsel %vm4511_vm4, %v6317_v13, %v6347_v27  ;;  %v5880_v28 = vrot.slane %v16006_v48, %v14507_v41  ;;  %v5912_v20 = vrot.slane %v16097_v35, %v14513_v58  ;;  %v5921_v48 = vrot.slane %v16127_v42, %v14513_v58 }
 0xdb4   :  { %v6263_v39 = vpop.permute.xlu1 %6262  ;;  %8254 = vperm.xlu1 %10579, %v16188_v2   ;;  %v6349_v10 = vsel %vm4513_vm5, %v6326_v24, %v6348_v33  ;;  %v5903_v24 = vrot.slane %v16080_v45, %v14513_v58  ;;  %v5916_v45 = vrot.slane %v15963_v1, %v14507_v41  ;;  %v5934_v1 = vrot.slane %v16028_v22, %v14507_v41 }
 0xdb5   :  { %v6330_v30 = vrot.slane %v6263_v39, %v14513_v58  ;;  %v16257_v53 = vpop.eup %11363 }
 0xdb7   :  { %v16201_v52 = vpop.permute.xlu0 %7443  ;;  %v6335_v8 = vsel %vm4440_vm0, %v6334_v4, %v6330_v30  ;;  %v18004_v4 = vld [vmem:[#allocation142_spill] sm:$0xff] }
 0xdb8   :  { %v16228_v26 = vpop.permute.xlu1 %5868  ;;  %8654 = vperm.xlu1 %10579, %v16217_v0   ;;  %v6350_v56 = vsel %vm4515_vm6, %v6335_v8, %v6349_v10  ;;  %v5889_v13 = vrot.slane %v18004_v4, %v14507_v41  ;;  %v5876_v8 = vrot.slane %v18006_v34, %v14513_v58  ;;  %v5930_v10 = vrot.slane %v16176_v60, %v14513_v58 }
 0xdb9   :  { %v5943_v4 = vrot.slane %v16052_v25, %v14507_v41 }
 0xdba   :  { %v5890_v33 = vsel %vm4440_vm0, %v5889_v13, %v5885_v21  ;;  %v5917_v21 = vsel %vm4440_vm0, %v5916_v45, %v5912_v20 }
 0xdbb   :  { %4758 = vadd.xlane.f32.xlu0 %v4757_v40  ;;  %v16231_v54 = vpop.permute.xlu0 %7049 }
 0xdbc   :  { %v6269_v6 = vpop.permute.xlu1 %6268  ;;  %8260 = vperm.xlu1 %10579, %v16238_v16  }
 0xdbd   :  { %v6339_v61 = vrot.slane %v6269_v6, %v14513_v58  ;;  %v18007_v6 = vld [vmem:[#allocation144_spill] sm:$0xff] }
 0xdbf   :  { %5158 = vadd.xlane.f32.xlu0 %v5157_v23  ;;  %v16250_v39 = vpop.permute.xlu0 %7449  ;;  %v6344_v50 = vsel %vm4440_vm0, %v6343_v14, %v6339_v61  ;;  %v18005_v23 = vld [vmem:[#allocation101_spill] sm:$0xff]  ;;  %v5907_v14 = vrot.slane %v18007_v6, %v14507_v41 }
 0xdc0   :  { %v16261_v62 = vpop.permute.xlu1 %7022  ;;  %8660 = vperm.xlu1 %10579, %v16257_v53   ;;  %v6351_v38 = vsel %vm4517_vm7, %v6344_v50, %v6350_v56  ;;  %v5898_v27 = vrot.slane %v18005_v23, %v14507_v41  ;;  %v5881_v50 = vsel %vm4440_vm0, %v5880_v28, %v5876_v8  ;;  %v5925_v56 = vrot.slane %v16002_v43, %v14507_v41 }
 0xdc1   :  { %v6353_v5 = vsel %vm4520_vm8, %v6351_v38, 0.0  ;;  %v5908_v38 = vsel %vm4440_vm0, %v5907_v14, %v5903_v24  ;;  %v5945_v42 = vsel %vm4505_vm1, %v5890_v33, %v5881_v50  ;;  %v7085_v50 = vrot.slane %v16091_v12, %v14507_v41 }
 0xdc2   :  { %v5899_v61 = vsel %vm4440_vm0, %v5898_v27, %v5894_v55  ;;  %v5926_v43 = vsel %vm4440_vm0, %v5925_v56, %v5921_v48  ;;  %v7476_v56 = vrot.slane %v16100_v37, %v14507_v41  ;;  %v7103_v12 = vrot.slane %v16179_v19, %v14507_v41 }
 0xdc3   :  { %v16265_v40 = vpop.permute.xlu0 %7055  ;;  %6354 = vadd.xlane.f32.xlu0 %v6353_v5  ;;  %v5939_v5 = vrot.slane %v16228_v26, %v14513_v58  ;;  %v5946_v60 = vsel %vm4507_vm2, %v5899_v61, %v5945_v42  ;;  %v5935_v26 = vsel %vm4440_vm0, %v5934_v1, %v5930_v10  ;;  %v7076_v10 = vrot.slane %v16076_v44, %v14507_v41 }
 0xdc4   :  { %v16268_v46 = vpop.permute.xlu1 %7028  ;;  %v5947_v13 = vsel %vm4509_vm3, %v5908_v38, %v5946_v60  ;;  %v7485_v38 = vrot.slane %v16109_v29, %v14507_v41  ;;  %v7072_v42 = vrot.slane %v16261_v62, %v14513_v58  ;;  %v7494_v44 = vrot.slane %v16159_v18, %v14507_v41 }
 0xdc5   :  { %v5948_v24 = vsel %vm4511_vm4, %v5917_v21, %v5947_v13  ;;  %v5944_v22 = vsel %vm4440_vm0, %v5943_v4, %v5939_v5  ;;  %v7081_v61 = vrot.slane %v16268_v46, %v14513_v58  ;;  %v7094_v5 = vrot.slane %v16130_v3, %v14507_v41 }
 0xdc6   :  { %v5949_v23 = vsel %vm4513_vm5, %v5926_v43, %v5948_v24  ;;  %v7503_v37 = vrot.slane %v16201_v52, %v14507_v41  ;;  %v7112_v3 = vrot.slane %v16231_v54, %v14507_v41  ;;  %v7512_v18 = vrot.slane %v16250_v39, %v14507_v41 }
 0xdc7   :  { %v16270_v31 = vpop.permute.xlu0 %7455  ;;  %v5950_v27 = vsel %vm4515_vm6, %v5935_v26, %v5949_v23  ;;  %v7086_v62 = vsel %vm4440_vm0, %v7085_v50, %v7081_v61  ;;  %v7121_v19 = vrot.slane %v16265_v40, %v14507_v41 }
 0xdc8   :  { %v16272_v51 = vpop.permute.xlu1 %7422  ;;  %v5951_v25 = vsel %vm4517_vm7, %v5944_v22, %v5950_v27  ;;  %v7521_v40 = vrot.slane %v16270_v31, %v14507_v41 }
 0xdc9   :  { %v5953_v8 = vsel %vm4520_vm8, %v5951_v25, 0.0 }
 0xdcb   :  { %v16274_v15 = vpop.permute.xlu0 %7061 }
 0xdcc   :  { %v16276_v36 = vpop.permute.xlu1 %7428  ;;  %v7130_v22 = vrot.slane %v16274_v15, %v14507_v41 }
 0xdcd   :  { %v7481_v52 = vrot.slane %v16276_v36, %v14513_v58 }
 0xdcf   :  { %v16278_v30 = vpop.permute.xlu0 %7461  ;;  %v7486_v27 = vsel %vm4440_vm0, %v7485_v38, %v7481_v52 }
 0xdd0   :  { %v16280_v11 = vpop.permute.xlu1 %7034 }
 0xdd1   :  { %v7090_v46 = vrot.slane %v16280_v11, %v14513_v58  ;;  %v7472_v11 = vrot.slane %v16272_v51, %v14513_v58 }
 0xdd3   :  { %v16288_v32 = vpop.permute.xlu0 %7067  ;;  %v7095_v4 = vsel %vm4440_vm0, %v7094_v5, %v7090_v46  ;;  %v7477_v24 = vsel %vm4440_vm0, %v7476_v56, %v7472_v11  ;;  %v7530_v5 = vrot.slane %v16278_v30, %v14507_v41 }
 0xdd4   :  { %v16286_v7 = vpop.permute.xlu1 %7434  ;;  %v7541_v38 = vsel %vm4505_vm1, %v7486_v27, %v7477_v24 }
 0xdd5   :  { %v7490_v51 = vrot.slane %v16286_v7, %v14513_v58 }
 0xdd7   :  { %v16322_v55 = vpop.permute.xlu0 %7467 }
 0xdd8   :  { %v7041_v35 = vpop.permute.xlu1 %7040  ;;  %v7539_v30 = vrot.slane %v16322_v55, %v14507_v41 }
 0xdd9   :  { %v7099_v29 = vrot.slane %v7041_v35, %v14513_v58  ;;  %v7077_v35 = vsel %vm4440_vm0, %v7076_v10, %v7072_v42 }
 0xdda   :  { %v7141_v39 = vsel %vm4505_vm1, %v7086_v62, %v7077_v35 }
 0xddb   :  { %v16336_v34 = vpop.permute.xlu0 %8221  ;;  %v7104_v26 = vsel %vm4440_vm0, %v7103_v12, %v7099_v29 }
 0xddc   :  { %v16330_v28 = vpop.permute.xlu1 %7440 }
 0xddd   :  { %v7499_v36 = vrot.slane %v16330_v28, %v14513_v58 }
 0xddf   :  { %v16340_v14 = vpop.permute.xlu0 %8227  ;;  %v7504_v50 = vsel %vm4440_vm0, %v7503_v37, %v7499_v36 }
 0xde0   :  { %v7047_v20 = vpop.permute.xlu1 %7046 }
 0xde1   :  { %v7108_v21 = vrot.slane %v7047_v20, %v14513_v58  ;;  %v7142_v20 = vsel %vm4507_vm2, %v7095_v4, %v7141_v39 }
 0xde2   :  { %v7143_v28 = vsel %vm4509_vm3, %v7104_v26, %v7142_v20 }
 0xde3   :  { %v16342_v48 = vpop.permute.xlu0 %8621  ;;  %v7113_v7 = vsel %vm4440_vm0, %v7112_v3, %v7108_v21 }
 0xde4   :  { %v7447_v6 = vpop.permute.xlu1 %7446  ;;  %5954 = vadd.xlane.f32.xlu1 %v5953_v8  ;;  %v7495_v8 = vsel %vm4440_vm0, %v7494_v44, %v7490_v51  ;;  %v7144_v56 = vsel %vm4511_vm4, %v7113_v7, %v7143_v28 }
 0xde5   :  { %v7508_v23 = vrot.slane %v7447_v6, %v14513_v58  ;;  %v7139_v6 = vrot.slane %v16288_v32, %v14507_v41 }
 0xde7   :  { %v16373_v60 = vpop.permute.xlu0 %8627  ;;  %v7513_v42 = vsel %vm4440_vm0, %v7512_v18, %v7508_v23 }
 0xde8   :  { %v7053_v33 = vpop.permute.xlu1 %7052 }
 0xde9   :  { %v7117_v54 = vrot.slane %v7053_v33, %v14513_v58 }
 0xdeb   :  { %v7122_v31 = vsel %vm4440_vm0, %v7121_v19, %v7117_v54  ;;  %v16405_v61 = vpop.permute.xlu0 %8233 }
 0xdec   :  { %v7453_v45 = vpop.permute.xlu1 %7452  ;;  %v7145_v46 = vsel %vm4513_vm5, %v7122_v31, %v7144_v56  ;;  %v8281_v56 = vrot.slane %v16340_v14, %v14507_v41 }
 0xded   :  { %v7517_v25 = vrot.slane %v7453_v45, %v14513_v58 }
 0xdef   :  { %v7522_v44 = vsel %vm4440_vm0, %v7521_v40, %v7517_v25  ;;  %v16430_v19 = vpop.permute.xlu0 %8633 }
 0xdf0   :  { %v7059_v1 = vpop.permute.xlu1 %7058 }
 0xdf1   :  { %v7126_v43 = vrot.slane %v7059_v1, %v14513_v58  ;;  %v7542_v1 = vsel %vm4507_vm2, %v7495_v8, %v7541_v38  ;;  %v8681_v38 = vrot.slane %v16373_v60, %v14507_v41 }
 0xdf2   :  { %v7543_v37 = vsel %vm4509_vm3, %v7504_v50, %v7542_v1  ;;  %v8272_v50 = vrot.slane %v16336_v34, %v14507_v41  ;;  %v8690_v34 = vrot.slane %v16430_v19, %v14507_v41 }
 0xdf3   :  { %v7131_v33 = vsel %vm4440_vm0, %v7130_v22, %v7126_v43  ;;  %v7544_v11 = vsel %vm4511_vm4, %v7513_v42, %v7543_v37  ;;  %v8240_v43 = vpop.permute.xlu0 %8239 }
 0xdf4   :  { %v7459_v13 = vpop.permute.xlu1 %7458  ;;  %v7146_v12 = vsel %vm4515_vm6, %v7131_v33, %v7145_v46  ;;  %v7545_v52 = vsel %vm4513_vm5, %v7522_v44, %v7544_v11  ;;  %v8299_v44 = vrot.slane %v8240_v43, %v14507_v41 }
 0xdf5   :  { %v7526_v15 = vrot.slane %v7459_v13, %v14513_v58 }
 0xdf7   :  { %v7531_v29 = vsel %vm4440_vm0, %v7530_v5, %v7526_v15  ;;  %v16437_v40 = vpop.permute.xlu0 %8639  ;;  %v8290_v5 = vrot.slane %v16405_v61, %v14507_v41 }
 0xdf8   :  { %v7065_v10 = vpop.permute.xlu1 %7064  ;;  %v7546_v35 = vsel %vm4515_vm6, %v7531_v29, %v7545_v52  ;;  %v8699_v14 = vrot.slane %v16437_v40, %v14507_v41 }
 0xdf9   :  { %v7135_v45 = vrot.slane %v7065_v10, %v14513_v58 }
 0xdfb   :  { %v7140_v32 = vsel %vm4440_vm0, %v7139_v6, %v7135_v45  ;;  %v8246_v36 = vpop.permute.xlu0 %8245  ;;  %v8672_v45 = vrot.slane %v16342_v48, %v14507_v41 }
 0xdfc   :  { %v7465_v3 = vpop.permute.xlu1 %7464  ;;  %v7147_v62 = vsel %vm4517_vm7, %v7140_v32, %v7146_v12  ;;  %v8308_v60 = vrot.slane %v8246_v36, %v14507_v41 }
 0xdfd   :  { %v7535_v21 = vrot.slane %v7465_v3, %v14513_v58  ;;  %v7149_v18 = vsel %vm4520_vm8, %v7147_v62, 0.0 }
 0xdfe   :  { %7150 = vadd.xlane.f32.xlu0 %v7149_v18 }
 0xdff   :  { %v7540_v54 = vsel %vm4440_vm0, %v7539_v30, %v7535_v21  ;;  %v16439_v7 = vpop.permute.xlu0 %8645 }
 0xe00   :  { %v8219_v4 = vpop.permute.xlu1 %8218  ;;  %v7547_v51 = vsel %vm4517_vm7, %v7540_v54, %v7546_v35  ;;  %v8708_v37 = vrot.slane %v16439_v7, %v14507_v41 }
 0xe01   :  { %v7549_v55 = vsel %vm4520_vm8, %v7547_v51, 0.0  ;;  %v8268_v42 = vrot.slane %v8219_v4, %v14513_v58 }
 0xe02   :  { %7550 = vadd.xlane.f32.xlu1 %v7549_v55 }
 0xe03   :  { %v8252_v27 = vpop.permute.xlu0 %8251  ;;  %v8273_v30 = vsel %vm4440_vm0, %v8272_v50, %v8268_v42 }
 0xe04   :  { %v8225_v13 = vpop.permute.xlu1 %8224  ;;  %v8317_v29 = vrot.slane %v8252_v27, %v14507_v41 }
 0xe05   :  { %v8277_v10 = vrot.slane %v8225_v13, %v14513_v58 }
 0xe07   :  { %v8652_v25 = vpop.permute.xlu0 %8651  ;;  %v8282_v32 = vsel %vm4440_vm0, %v8281_v56, %v8277_v10 }
 0xe08   :  { %v8619_v39 = vpop.permute.xlu1 %8618  ;;  %v8337_v54 = vsel %vm4505_vm1, %v8282_v32, %v8273_v30  ;;  %v8717_v35 = vrot.slane %v8652_v25, %v14507_v41 }
 0xe09   :  { %v8668_v61 = vrot.slane %v8619_v39, %v14513_v58 }
 0xe0b   :  { %v8258_v28 = vpop.permute.xlu0 %8257  ;;  %v8673_v55 = vsel %vm4440_vm0, %v8672_v45, %v8668_v61 }
 0xe0c   :  { %v8625_v26 = vpop.permute.xlu1 %8624  ;;  %v8326_v43 = vrot.slane %v8258_v28, %v14507_v41 }
 0xe0d   :  { %v8677_v3 = vrot.slane %v8625_v26, %v14513_v58 }
 0xe0f   :  { %v8658_v6 = vpop.permute.xlu0 %8657  ;;  %v8682_v40 = vsel %vm4440_vm0, %v8681_v38, %v8677_v3 }
 0xe10   :  { %v8231_v24 = vpop.permute.xlu1 %8230 }
 0xe11   :  { %v8286_v46 = vrot.slane %v8231_v24, %v14513_v58 }
 0xe13   :  { %v8291_v11 = vsel %vm4440_vm0, %v8290_v5, %v8286_v46  ;;  %v8264_v18 = vpop.permute.xlu0 %8263 }
 0xe14   :  { %v8631_v22 = vpop.permute.xlu1 %8630  ;;  %v8338_v26 = vsel %vm4507_vm2, %v8291_v11, %v8337_v54  ;;  %v18009_v11 = vld [vmem:[#allocation49_spill] sm:$0xff] }
 0xe15   :  { %v8686_v21 = vrot.slane %v8631_v22, %v14513_v58 }
 0xe17   :  { %v8691_v22 = vsel %vm4440_vm0, %v8690_v34, %v8686_v21  ;;  %v8664_v10 = vpop.permute.xlu0 %8663 }
 0xe18   :  { %v8237_v23 = vpop.permute.xlu1 %8236 }
 0xe19   :  { %v8295_v48 = vrot.slane %v8237_v23, %v14513_v58 }
 0xe1b   :  { %v8300_v4 = vsel %vm4440_vm0, %v8299_v44, %v8295_v48  ;;  %v8735_v44 = vrot.slane %v8664_v10, %v14507_v41 }
 0xe1c   :  { %v8637_v20 = vpop.permute.xlu1 %8636  ;;  %v8339_v7 = vsel %vm4509_vm3, %v8300_v4, %v8338_v26 }
 0xe1d   :  { %v8695_v51 = vrot.slane %v8637_v20, %v14513_v58 }
 0xe1f   :  { %v8700_v25 = vsel %vm4440_vm0, %v8699_v14, %v8695_v51 }
 0xe20   :  { %v8243_v31 = vpop.permute.xlu1 %8242 }
 0xe21   :  { %v8304_v12 = vrot.slane %v8243_v31, %v14513_v58  ;;  %v8335_v31 = vrot.slane %v8264_v18, %v14507_v41  ;;  %v18010_v18 = vld [vmem:[#allocation107_spill] sm:$0xff] }
 0xe23   :  { %v8309_v13 = vsel %vm4440_vm0, %v8308_v60, %v8304_v12 }
 0xe24   :  { %v8643_v8 = vpop.permute.xlu1 %8642 }
 0xe25   :  { %v8704_v39 = vrot.slane %v8643_v8, %v14513_v58  ;;  %v8340_v8 = vsel %vm4511_vm4, %v8309_v13, %v8339_v7 }
 0xe27   :  { %v8709_v50 = vsel %vm4440_vm0, %v8708_v37, %v8704_v39  ;;  %v18012_v39 = vld [vmem:[#allocation111_spill] sm:$0xff] }
 0xe28   :  { %v8249_v33 = vpop.permute.xlu1 %8248 }
 0xe29   :  { %v8313_v62 = vrot.slane %v8249_v33, %v14513_v58  ;;  %v8737_v33 = vsel %vm4505_vm1, %v8682_v40, %v8673_v55 }
 0xe2a   :  { %v8738_v45 = vsel %vm4507_vm2, %v8691_v22, %v8737_v33  ;;  %v18015_v33 = vld [vmem:[#allocation93_spill] sm:$0xff] }
 0xe2b   :  { %v8318_v36 = vsel %vm4440_vm0, %v8317_v29, %v8313_v62  ;;  %v8739_v46 = vsel %vm4509_vm3, %v8700_v25, %v8738_v45  ;;  %v18008_v62 = vld [vmem:[#allocation48_spill] sm:$0xff] }
 0xe2c   :  { %v8649_v15 = vpop.permute.xlu1 %8648  ;;  %v8341_v56 = vsel %vm4513_vm5, %v8318_v36, %v8340_v8  ;;  %v8740_v14 = vsel %vm4511_vm4, %v8709_v50, %v8739_v46  ;;  %v18016_v50 = vld [vmem:[#allocation106_spill] sm:$0xff] }
 0xe2d   :  { %v8713_v24 = vrot.slane %v8649_v15, %v14513_v58  ;;  %v8726_v15 = vrot.slane %v8658_v6, %v14507_v41 }
 0xe2f   :  { %v8718_v38 = vsel %vm4440_vm0, %v8717_v35, %v8713_v24  ;;  %v18011_v35 = vld [vmem:[#allocation151_spill] sm:$0xff] }
 0xe30   :  { %v8255_v1 = vpop.permute.xlu1 %8254  ;;  %v8741_v32 = vsel %vm4513_vm5, %v8718_v38, %v8740_v14  ;;  %v18017_v38 = vld [vmem:[#allocation162_spill] sm:$0xff] }
 0xe31   :  { %v8322_v19 = vrot.slane %v8255_v1, %v14513_v58 }
 0xe33   :  { %v8327_v23 = vsel %vm4440_vm0, %v8326_v43, %v8322_v19 }
 0xe34   :  { %v8655_v52 = vpop.permute.xlu1 %8654  ;;  %v8342_v42 = vsel %vm4515_vm6, %v8327_v23, %v8341_v56  ;;  %v18013_v23 = vld [vmem:[#allocation89_spill] sm:$0xff] }
 0xe35   :  { %v8722_v27 = vrot.slane %v8655_v52, %v14513_v58 }
 0xe37   :  { %v8727_v1 = vsel %vm4440_vm0, %v8726_v15, %v8722_v27 }
 0xe38   :  { %v8261_v20 = vpop.permute.xlu1 %8260  ;;  %v8742_v12 = vsel %vm4515_vm6, %v8727_v1, %v8741_v32  ;;  %v18019_v1 = vld [vmem:[#allocation105_spill] sm:$0xff] }
 0xe39   :  { %v8331_v28 = vrot.slane %v8261_v20, %v14513_v58  ;;  %v18014_v20 = vld [vmem:[#allocation154_spill] sm:$0xff] }
 0xe3b   :  { %v8336_v5 = vsel %vm4440_vm0, %v8335_v31, %v8331_v28 }
 0xe3c   :  { %v8661_v34 = vpop.permute.xlu1 %8660  ;;  %v8343_v6 = vsel %vm4517_vm7, %v8336_v5, %v8342_v42  ;;  %v18018_v42 = vld [vmem:[#allocation161_spill] sm:$0xff] }
 0xe3d   :  { %v8731_v48 = vrot.slane %v8661_v34, %v14513_v58  ;;  %v8345_v60 = vsel %vm4520_vm8, %v8343_v6, 0.0 }
 0xe3e   :  { %8346 = vadd.xlane.f32.xlu0 %v8345_v60 }
 0xe3f   :  { %v8736_v61 = vsel %vm4440_vm0, %v8735_v44, %v8731_v48  ;;  %v18020_v48 = vld [vmem:[#allocation163_spill] sm:$0xff] }
 0xe40   :  { %v8743_v37 = vsel %vm4517_vm7, %v8736_v61, %v8742_v12  ;;  %v18021_v61 = vld [vmem:[#allocation156_spill] sm:$0xff] }
 0xe41   :  { %v8745_v29 = vsel %vm4520_vm8, %v8743_v37, 0.0 }
 0xe42   :  { %8746 = vadd.xlane.f32.xlu1 %v8745_v29  ;;  %v18022_v29 = vld [vmem:[#allocation87_spill] sm:$0xff] }
 0xe44   :  { %v4759_v3 = vpop.xlane.xlu0 %4758 }
 0xe45   :  { %v4764_v30 = vrot.slane %v4759_v3, %v18008_v62  ;;  %v4768_v21 = vrot.slane %v4759_v3, %v18009_v11  ;;  %v4780_v19 = vrot.slane %v4759_v3, %v18010_v18  ;;  %v4784_v51 = vrot.slane %v4759_v3, %v18011_v35 }
 0xe46   :  { %v4788_v43 = vrot.slane %v4759_v3, %v15063_v59  ;;  %v4792_v26 = vrot.slane %v4759_v3, %v15083_v63  ;;  %v4772_v24 = vrot.slane %v4759_v3, %v18012_v39  ;;  %v4776_v44 = vrot.slane %v4759_v3, %v18016_v50 }
 0xe47   :  { %11365 = vrcp.f32 %v4764_v30  ;;  %v18023_v30 = vld [vmem:[#allocation54_spill] sm:$0xff] }
 0xe48   :  { %v5159_v41 = vpop.xlane.xlu0 %5158 }
 0xe49   :  { %v5164_v58 = vrot.slane %v5159_v41, %v18008_v62  ;;  %v5168_v52 = vrot.slane %v5159_v41, %v18009_v11  ;;  %v5180_v54 = vrot.slane %v5159_v41, %v18010_v18  ;;  %v5184_v4 = vrot.slane %v5159_v41, %v18011_v35 }
 0xe4a   :  { %v5188_v55 = vrot.slane %v5159_v41, %v15063_v59  ;;  %v5192_v13 = vrot.slane %v5159_v41, %v15083_v63  ;;  %v5172_v40 = vrot.slane %v5159_v41, %v18012_v39  ;;  %v5176_v56 = vrot.slane %v5159_v41, %v18016_v50 }
 0xe4b   :  { %11367 = vrcp.f32 %v5164_v58 }
 0xe4c   :  { %11369 = vrcp.f32 %v4768_v21 }
 0xe4d   :  { %11371 = vrcp.f32 %v4780_v19  ;;  %v18024_v19 = vld [vmem:[#allocation118_spill] sm:$0xff] }
 0xe4e   :  { %11373 = vrcp.f32 %v5168_v52 }
 0xe4f   :  { %11375 = vrcp.f32 %v5180_v54 }
 0xe50   :  { %11377 = vrcp.f32 %v5184_v4  ;;  %v18025_v4 = vld [vmem:[#allocation132_spill] sm:$0xff] }
 0xe51   :  { %11379 = vrcp.f32 %v4784_v51 }
 0xe52   :  { %11381 = vrcp.f32 %v5188_v55 }
 0xe53   :  { %11383 = vrcp.f32 %v4788_v43 }
 0xe54   :  { %v11366_v36 = vpop.eup %11365  ;;  %11385 = vrcp.f32 %v5192_v13  ;;  %v18026_v13 = vld [vmem:[#allocation108_spill] sm:$0xff] }
 0xe55   :  { %11387 = vrcp.f32 %v5172_v40  ;;  %v4802_v27 = vmul.f32 %v11366_v36, %v18013_v23  ;;  %v4803_v34 = vmul.f32 %v11366_v36, %v18019_v1 }
 0xe56   :  { %11389 = vrcp.f32 %v4792_v26  ;;  %v18027_v26 = vld [vmem:[#allocation153_spill] sm:$0xff] }
 0xe57   :  { %11391 = vrcp.f32 %v4772_v24 }
 0xe58   :  { %v11368_v22 = vpop.eup %11367  ;;  %11393 = vrcp.f32 %v5176_v56  ;;  %v18030_v56 = vld [vmem:[#allocation133_spill] sm:$0xff] }
 0xe59   :  { %v11370_v7 = vpop.eup %11369  ;;  %v5202_v31 = vmul.f32 %v11368_v22, %v18014_v20  ;;  %v5203_v15 = vmul.f32 %v11368_v22, %v18015_v33  ;;  %11395 = vrcp.f32 %v4776_v44  ;;  %v16565_v22 = vpop.xlane.xlu0 %6354  ;;  %v18028_v20 = vld [vmem:[#allocation66_spill] sm:$0xff] }
 0xe5a   :  { %v16529_v25 = vpop.eup %11371  ;;  %v4805_v58 = vmul.f32 %v11370_v7, %v18023_v30  ;;  %v4806_v36 = vmul.f32 %v11370_v7, %v18027_v26  ;;  %v18031_v7 = vld [vmem:[#allocation155_spill] sm:$0xff]  ;;  %v18037_v26 = vld [vmem:[#allocation56_spill] sm:$0xff] }
 0xe5b   :  { %v11374_v8 = vpop.eup %11373  ;;  %v5225_v28 = vadd.f32 %v5202_v31, %v4802_v27  ;;  %v4814_v5 = vmul.f32 %v16529_v25, %v18017_v38  ;;  %v5226_v32 = vadd.f32 %v5203_v15, %v4803_v34  ;;  %v6360_v15 = vrot.slane %v16565_v22, %v18008_v62  ;;  %v18032_v34 = vld [vmem:[#allocation58_spill] sm:$0xff] }
 0xe5c   :  { %v16532_v10 = vpop.eup %11375  ;;  %v5205_v12 = vmul.f32 %v11374_v8, %v18021_v61  ;;  %v5206_v51 = vmul.f32 %v11374_v8, %v18025_v4  ;;  %v18033_v61 = vld [vmem:[#allocation157_spill] sm:$0xff] }
 0xe5d   :  { %v16535_v45 = vpop.eup %11377  ;;  %v5214_v46 = vmul.f32 %v16532_v10, %v18018_v42  ;;  %5243 = vperm.xlu1 %10579, %v5225_v28   ;;  %v18029_v28 = vld [vmem:[#allocation158_spill] sm:$0xff]  ;;  %11397 = vrcp.f32 %v6360_v15 }
 0xe5e   :  { %v16542_v6 = vpop.eup %11379  ;;  %v5217_v60 = vmul.f32 %v16535_v45, %v18020_v48  ;;  %v5227_v54 = vadd.f32 %v5205_v12, %v4805_v58  ;;  %v5228_v8 = vadd.f32 %v5206_v51, %v4806_v36  ;;  %v6364_v48 = vrot.slane %v16565_v22, %v18009_v11  ;;  %v18034_v58 = vld [vmem:[#allocation160_spill] sm:$0xff] }
 0xe5f   :  { %v5233_v14 = vadd.f32 %v5214_v46, %v4814_v5  ;;  %v16548_v37 = vpop.eup %11381  ;;  %v4817_v41 = vmul.f32 %v16542_v6, %v18022_v29 }
 0xe60   :  { %v16553_v21 = vpop.eup %11383  ;;  %v5220_v52 = vmul.f32 %v16548_v37, %v18024_v19  ;;  %v6368_v19 = vrot.slane %v16565_v22, %v18012_v39 }
 0xe61   :  { %5283 = vperm.xlu0 %10580, %v5233_v14   ;;  %5248 = vperm.xlu1 %10579, %v5226_v32   ;;  %v5235_v3 = vadd.f32 %v5217_v60, %v4817_v41  ;;  %v16558_v55 = vpop.eup %11385  ;;  %v4820_v40 = vmul.f32 %v16553_v21, %v18026_v13 }
 0xe62   :  { %v11388_v43 = vpop.eup %11387  ;;  %v5223_v31 = vmul.f32 %v16558_v55, %v18028_v20  ;;  %v18038_v20 = vld [vmem:[#allocation117_spill] sm:$0xff] }
 0xe63   :  { %v16563_v24 = vpop.eup %11389  ;;  %v5237_v27 = vadd.f32 %v5220_v52, %v4820_v40  ;;  %v5208_v33 = vmul.f32 %v11388_v43, %v18029_v28  ;;  %v5209_v44 = vmul.f32 %v11388_v43, %v18032_v34  ;;  %v18035_v52 = vld [vmem:[#allocation159_spill] sm:$0xff]  ;;  %v6372_v40 = vrot.slane %v16565_v22, %v18016_v50  ;;  %v18041_v34 = vld [vmem:[#allocation70_spill] sm:$0xff] }
 0xe64   :  { %v11392_v23 = vpop.eup %11391  ;;  %v4823_v38 = vmul.f32 %v16563_v24, %v18030_v56  ;;  %v18036_v43 = vld [vmem:[#allocation55_spill] sm:$0xff] }
 0xe65   :  { %5293 = vperm.xlu0 %10580, %v5235_v3   ;;  %5253 = vperm.xlu1 %10579, %v5227_v54   ;;  %v4808_v5 = vmul.f32 %v11392_v23, %v18031_v7  ;;  %v11394_v14 = vpop.eup %11393  ;;  %v4809_v12 = vmul.f32 %v11392_v23, %v18033_v61 }
 0xe66   :  { %v5239_v42 = vadd.f32 %v5223_v31, %v4823_v38  ;;  %v11396_v29 = vpop.eup %11395  ;;  %v5211_v3 = vmul.f32 %v11394_v14, %v18034_v58  ;;  %v5212_v13 = vmul.f32 %v11394_v14, %v18036_v43  ;;  %v5215_v31 = vmul.f32 %v16532_v10, %v18038_v20  ;;  %v18042_v14 = vld [vmem:[#allocation74_spill] sm:$0xff]  ;;  %v18045_v58 = vld [vmem:[#allocation51_spill] sm:$0xff] }
 0xe67   :  { %v5229_v1 = vadd.f32 %v5208_v33, %v4808_v5  ;;  %v5230_v30 = vadd.f32 %v5209_v44, %v4809_v12  ;;  %v4811_v54 = vmul.f32 %v11396_v29, %v18035_v52  ;;  %v4812_v36 = vmul.f32 %v11396_v29, %v18037_v26  ;;  %v18039_v33 = vld [vmem:[#allocation109_spill] sm:$0xff]  ;;  %v18040_v5 = vld [vmem:[#allocation122_spill] sm:$0xff]  ;;  %v18046_v52 = vld [vmem:[#allocation60_spill] sm:$0xff] }
 0xe68   :  { %v4815_v15 = vmul.f32 %v16529_v25, %v18039_v33  ;;  %v6380_v10 = vrot.slane %v16565_v22, %v18011_v35  ;;  %v18043_v25 = vld [vmem:[#allocation110_spill] sm:$0xff]  ;;  %v6388_v20 = vrot.slane %v16565_v22, %v15083_v63  ;;  %v18051_v33 = vld [vmem:[#allocation104_spill] sm:$0xff] }
 0xe69   :  { %5303 = vperm.xlu0 %10580, %v5237_v27   ;;  %5258 = vperm.xlu1 %10579, %v5228_v8   ;;  %v5231_v51 = vadd.f32 %v5211_v3, %v4811_v54  ;;  %v5232_v27 = vadd.f32 %v5212_v13, %v4812_v36  ;;  %v6376_v8 = vrot.slane %v16565_v22, %v18010_v18 }
 0xe6a   :  { %v11398_v28 = vpop.eup %11397  ;;  %v5234_v7 = vadd.f32 %v5215_v31, %v4815_v15  ;;  %v5221_v3 = vmul.f32 %v16548_v37, %v18045_v58  ;;  %v18050_v31 = vld [vmem:[#allocation73_spill] sm:$0xff]  ;;  %v18057_v58 = vld [vmem:[#allocation123_spill] sm:$0xff] }
 0xe6d   :  { %v16575_v46 = vpop.xlane.xlu1 %5954  ;;  %5313 = vperm.xlu0 %10580, %v5239_v42   ;;  %5263 = vperm.xlu1 %10579, %v5229_v1   ;;  %v5218_v42 = vmul.f32 %v16535_v45, %v18040_v5  ;;  %v18044_v45 = vld [vmem:[#allocation83_spill] sm:$0xff] }
 0xe6e   :  { %v5960_v60 = vrot.slane %v16575_v46, %v18008_v62  ;;  %v5964_v32 = vrot.slane %v16575_v46, %v18009_v11  ;;  %v5968_v41 = vrot.slane %v16575_v46, %v18012_v39  ;;  %v5972_v4 = vrot.slane %v16575_v46, %v18016_v50 }
 0xe6f   :  { %v5976_v23 = vrot.slane %v16575_v46, %v18010_v18  ;;  %v5980_v56 = vrot.slane %v16575_v46, %v18011_v35  ;;  %v5984_v61 = vrot.slane %v16575_v46, %v15063_v59  ;;  %v5988_v43 = vrot.slane %v16575_v46, %v15083_v63 }
 0xe70   :  { %11399 = vrcp.f32 %v5960_v60  ;;  %v4824_v46 = vmul.f32 %v16563_v24, %v18051_v33 }
 0xe71   :  { %11401 = vrcp.f32 %v5964_v32  ;;  %5268 = vperm.xlu1 %10579, %v5230_v30   ;;  %v4818_v32 = vmul.f32 %v16542_v6, %v18043_v25  ;;  %v18055_v25 = vld [vmem:[#allocation62_spill] sm:$0xff] }
 0xe72   :  { %11403 = vrcp.f32 %v6364_v48  ;;  %v6398_v48 = vmul.f32 %v11398_v28, %v18042_v14  ;;  %v6399_v24 = vmul.f32 %v11398_v28, %v18055_v25  ;;  %v18066_v25 = vld [vmem:[#allocation120_spill] sm:$0xff] }
 0xe73   :  { %11405 = vrcp.f32 %v5968_v41  ;;  %v5236_v30 = vadd.f32 %v5218_v42, %v4818_v32 }
 0xe74   :  { %11407 = vrcp.f32 %v6368_v19  ;;  %v6384_v19 = vrot.slane %v16565_v22, %v15063_v59  ;;  %v18054_v22 = vld [vmem:[#allocation65_spill] sm:$0xff] }
 0xe75   :  { %5273 = vperm.xlu1 %10579, %v5231_v51   ;;  %11409 = vrcp.f32 %v5972_v4  ;;  %v18047_v4 = vld [vmem:[#allocation63_spill] sm:$0xff] }
 0xe76   :  { %11411 = vrcp.f32 %v6372_v40  ;;  %v4821_v51 = vmul.f32 %v16553_v21, %v18047_v4  ;;  %v18048_v40 = vld [vmem:[#allocation119_spill] sm:$0xff]  ;;  %v18059_v4 = vld [vmem:[#allocation86_spill] sm:$0xff] }
 0xe77   :  { %11413 = vrcp.f32 %v5976_v23  ;;  %v18049_v23 = vld [vmem:[#allocation61_spill] sm:$0xff] }
 0xe78   :  { %11415 = vrcp.f32 %v6376_v8  ;;  %v5238_v36 = vadd.f32 %v5221_v3, %v4821_v51 }
 0xe79   :  { %5278 = vperm.xlu1 %10579, %v5232_v27   ;;  %11417 = vrcp.f32 %v5980_v56  ;;  %v5224_v27 = vmul.f32 %v16558_v55, %v18049_v23  ;;  %v18052_v56 = vld [vmem:[#allocation53_spill] sm:$0xff] }
 0xe7a   :  { %11419 = vrcp.f32 %v6380_v10  ;;  %v18053_v10 = vld [vmem:[#allocation116_spill] sm:$0xff]  ;;  %v18061_v23 = vld [vmem:[#allocation165_spill] sm:$0xff] }
 0xe7b   :  { %11421 = vrcp.f32 %v5984_v61  ;;  %v5240_v55 = vadd.f32 %v5224_v27, %v4824_v46 }
 0xe7c   :  { %11423 = vrcp.f32 %v6384_v19  ;;  %v18058_v19 = vld [vmem:[#allocation79_spill] sm:$0xff] }
 0xe7d   :  { %v11400_v38 = vpop.eup %11399  ;;  %5288 = vperm.xlu1 %10579, %v5234_v7   ;;  %11425 = vrcp.f32 %v5988_v43 }
 0xe7e   :  { %v11402_v1 = vpop.eup %11401  ;;  %v5998_v44 = vmul.f32 %v11400_v38, %v18041_v34  ;;  %v5999_v34 = vmul.f32 %v11400_v38, %v18053_v10  ;;  %11427 = vrcp.f32 %v6388_v20 }
 0xe7f   :  { %v11404_v60 = vpop.eup %11403  ;;  %v6002_v29 = vmul.f32 %v11402_v1, %v18044_v45  ;;  %v6001_v38 = vmul.f32 %v11402_v1, %v18057_v58 }
 0xe80   :  { %v6421_v12 = vadd.f32 %v6398_v48, %v5998_v44  ;;  %v11406_v41 = vpop.eup %11405  ;;  %v6402_v54 = vmul.f32 %v11404_v60, %v18046_v52  ;;  %v6401_v51 = vmul.f32 %v11404_v60, %v18059_v4  ;;  %v18063_v60 = vld [vmem:[#allocation88_spill] sm:$0xff] }
 0xe81   :  { %v11408_v6 = vpop.eup %11407  ;;  %5298 = vperm.xlu1 %10579, %v5236_v30   ;;  %v6005_v26 = vmul.f32 %v11406_v41, %v18048_v40  ;;  %v6422_v30 = vadd.f32 %v6399_v24, %v5999_v34  ;;  %v18060_v40 = vld [vmem:[#allocation81_spill] sm:$0xff]  ;;  %v6004_v27 = vmul.f32 %v11406_v41, %v18061_v23  ;;  %v18071_v4 = vld [vmem:[#allocation124_spill] sm:$0xff] }
 0xe82   :  { %6439 = vperm.xlu0 %10580, %v6421_v12   ;;  %v6424_v13 = vadd.f32 %v6402_v54, %v6002_v29  ;;  %v11410_v37 = vpop.eup %11409  ;;  %v6405_v8 = vmul.f32 %v11408_v6, %v18050_v31  ;;  %v18056_v12 = vld [vmem:[#allocation69_spill] sm:$0xff]  ;;  %v6404_v46 = vmul.f32 %v11408_v6, %v18063_v60  ;;  %v18067_v6 = vld [vmem:[#allocation52_spill] sm:$0xff] }
 0xe83   :  { %v11412_v21 = vpop.eup %11411  ;;  %v6008_v7 = vmul.f32 %v11410_v37, %v18052_v56  ;;  %v18062_v31 = vld [vmem:[#allocation121_spill] sm:$0xff] }
 0xe84   :  { %v6426_v15 = vadd.f32 %v6405_v8, %v6005_v26  ;;  %v11414_v5 = vpop.eup %11413  ;;  %v6408_v44 = vmul.f32 %v11412_v21, %v18054_v22  ;;  %v6425_v10 = vadd.f32 %v6404_v46, %v6004_v27  ;;  %v18065_v34 = vld [vmem:[#allocation85_spill] sm:$0xff]  ;;  %v18073_v27 = vld [vmem:[#allocation75_spill] sm:$0xff] }
 0xe85   :  { %5308 = vperm.xlu1 %10579, %v5238_v36   ;;  %v11416_v14 = vpop.eup %11415  ;;  %v6010_v45 = vmul.f32 %v11414_v5, %v18056_v12  ;;  %v6423_v36 = vadd.f32 %v6401_v51, %v6001_v38  ;;  %v6007_v22 = vmul.f32 %v11410_v37, %v18065_v34  ;;  %v18069_v37 = vld [vmem:[#allocation78_spill] sm:$0xff]  ;;  %v18075_v46 = vld [vmem:[#allocation99_spill] sm:$0xff] }
 0xe86   :  { %6454 = vperm.xlu0 %10580, %v6424_v13   ;;  %v6428_v61 = vadd.f32 %v6408_v44, %v6008_v7  ;;  %v11418_v29 = vpop.eup %11417  ;;  %v6410_v52 = vmul.f32 %v11416_v14, %v18058_v19  ;;  %v18064_v7 = vld [vmem:[#allocation80_spill] sm:$0xff] }
 0xe87   :  { %v16636_v42 = vpop.xlane.xlu0 %7150  ;;  %v11420_v54 = vpop.eup %11419  ;;  %v6013_v1 = vmul.f32 %v11418_v29, %v18060_v40 }
 0xe88   :  { %v7156_v32 = vrot.slane %v16636_v42, %v18008_v62  ;;  %v7160_v43 = vrot.slane %v16636_v42, %v18009_v11  ;;  %v6429_v13 = vadd.f32 %v6410_v52, %v6010_v45  ;;  %v11422_v26 = vpop.eup %11421  ;;  %v6413_v8 = vmul.f32 %v11420_v54, %v18062_v31  ;;  %v18070_v52 = vld [vmem:[#allocation84_spill] sm:$0xff] }
 0xe89   :  { %5318 = vperm.xlu1 %10579, %v5240_v55   ;;  %v11424_v33 = vpop.eup %11423  ;;  %v6016_v55 = vmul.f32 %v11422_v26, %v18064_v7  ;;  %v7168_v12 = vrot.slane %v16636_v42, %v18016_v50  ;;  %v7172_v51 = vrot.slane %v16636_v42, %v18010_v18  ;;  %v18076_v7 = vld [vmem:[#allocation164_spill] sm:$0xff] }
 0xe8a   :  { %6464 = vperm.xlu0 %10580, %v6426_v15   ;;  %11429 = vrcp.f32 %v7156_v32  ;;  %v7164_v15 = vrot.slane %v16636_v42, %v18012_v39  ;;  %v6431_v56 = vadd.f32 %v6413_v8, %v6013_v1  ;;  %v11426_v41 = vpop.eup %11425  ;;  %v6416_v24 = vmul.f32 %v11424_v33, %v18066_v25  ;;  %v18072_v1 = vld [vmem:[#allocation127_spill] sm:$0xff]  ;;  %v18074_v8 = vld [vmem:[#allocation68_spill] sm:$0xff] }
 0xe8b   :  { %v16640_v48 = vpop.xlane.xlu1 %7550  ;;  %v11428_v32 = vpop.eup %11427  ;;  %v18078_v25 = vld [vmem:[#allocation71_spill] sm:$0xff] }
 0xe8c   :  { %v7556_v3 = vrot.slane %v16640_v48, %v18008_v62  ;;  %v7560_v28 = vrot.slane %v16640_v48, %v18009_v11  ;;  %v7564_v20 = vrot.slane %v16640_v48, %v18012_v39  ;;  %v7568_v44 = vrot.slane %v16640_v48, %v18016_v50 }
 0xe8d   :  { %6444 = vperm.xlu1 %10579, %v6422_v30   ;;  %v6433_v45 = vadd.f32 %v6416_v24, %v6016_v55  ;;  %v18068_v30 = vld [vmem:[#allocation126_spill] sm:$0xff]  ;;  %v7572_v19 = vrot.slane %v16640_v48, %v18010_v18  ;;  %v6017_v55 = vmul.f32 %v11422_v26, %v18076_v7  ;;  %v6417_v24 = vmul.f32 %v11424_v33, %v18078_v25  ;;  %v18082_v33 = vld [vmem:[#allocation64_spill] sm:$0xff]  ;;  %v18089_v7 = vld [vmem:[#allocation77_spill] sm:$0xff] }
 0xe8e   :  { %6474 = vperm.xlu0 %10580, %v6428_v61   ;;  %11431 = vrcp.f32 %v7556_v3  ;;  %v6407_v61 = vmul.f32 %v11412_v21, %v18067_v6  ;;  %v6019_v58 = vmul.f32 %v11426_v41, %v18068_v30  ;;  %v6011_v3 = vmul.f32 %v11414_v5, %v18069_v37  ;;  %v18080_v30 = vld [vmem:[#allocation50_spill] sm:$0xff] }
 0xe8f   :  { %11433 = vrcp.f32 %v7560_v28  ;;  %v6419_v28 = vmul.f32 %v11428_v32, %v18070_v52  ;;  %v6411_v21 = vmul.f32 %v11416_v14, %v18071_v4  ;;  %v7576_v5 = vrot.slane %v16640_v48, %v18011_v35 }
 0xe90   :  { %11435 = vrcp.f32 %v7160_v43  ;;  %v6427_v38 = vadd.f32 %v6407_v61, %v6007_v22  ;;  %v7176_v14 = vrot.slane %v16636_v42, %v18011_v35  ;;  %v18077_v22 = vld [vmem:[#allocation125_spill] sm:$0xff]  ;;  %v7180_v6 = vrot.slane %v16636_v42, %v15063_v59  ;;  %v18079_v61 = vld [vmem:[#allocation96_spill] sm:$0xff] }
 0xe91   :  { %6449 = vperm.xlu1 %10579, %v6423_v36   ;;  %11437 = vrcp.f32 %v7564_v20  ;;  %v6435_v43 = vadd.f32 %v6419_v28, %v6019_v58  ;;  %v6430_v40 = vadd.f32 %v6411_v21, %v6011_v3  ;;  %v6014_v36 = vmul.f32 %v11418_v29, %v18072_v1  ;;  %v18081_v3 = vld [vmem:[#allocation167_spill] sm:$0xff]  ;;  %v18083_v21 = vld [vmem:[#allocation166_spill] sm:$0xff] }
 0xe92   :  { %6479 = vperm.xlu0 %10580, %v6429_v13   ;;  %11439 = vrcp.f32 %v7164_v15  ;;  %v6414_v20 = vmul.f32 %v11420_v54, %v18073_v27  ;;  %v6434_v26 = vadd.f32 %v6417_v24, %v6017_v55  ;;  %v6020_v58 = vmul.f32 %v11426_v41, %v18080_v30  ;;  %v18092_v24 = vld [vmem:[#allocation90_spill] sm:$0xff] }
 0xe93   :  { %11441 = vrcp.f32 %v7568_v44  ;;  %v6420_v28 = vmul.f32 %v11428_v32, %v18082_v33  ;;  %v7184_v4 = vrot.slane %v16636_v42, %v15083_v63  ;;  %v18087_v32 = vld [vmem:[#allocation91_spill] sm:$0xff] }
 0xe94   :  { %11443 = vrcp.f32 %v7168_v12  ;;  %v6432_v29 = vadd.f32 %v6414_v20, %v6014_v36  ;;  %v18085_v36 = vld [vmem:[#allocation72_spill] sm:$0xff]  ;;  %v18086_v20 = vld [vmem:[#allocation67_spill] sm:$0xff] }
 0xe95   :  { %6459 = vperm.xlu1 %10579, %v6425_v10   ;;  %11445 = vrcp.f32 %v7572_v19  ;;  %v7580_v10 = vrot.slane %v16640_v48, %v15063_v59  ;;  %v6436_v41 = vadd.f32 %v6420_v28, %v6020_v58 }
 0xe96   :  { %6489 = vperm.xlu0 %10580, %v6431_v56   ;;  %11447 = vrcp.f32 %v7172_v51 }
 0xe97   :  { %v11430_v13 = vpop.eup %11429  ;;  %11449 = vrcp.f32 %v7576_v5 }
 0xe98   :  { %v7195_v60 = vmul.f32 %v11430_v13, %v18074_v8  ;;  %11451 = vrcp.f32 %v7176_v14  ;;  %v7194_v14 = vmul.f32 %v11430_v13, %v18086_v20  ;;  %v18099_v20 = vld [vmem:[#allocation129_spill] sm:$0xff] }
 0xe99   :  { %6469 = vperm.xlu1 %10579, %v6427_v38   ;;  %v7584_v38 = vrot.slane %v16640_v48, %v15083_v63  ;;  %11453 = vrcp.f32 %v7580_v10  ;;  %v18090_v10 = vld [vmem:[#allocation128_spill] sm:$0xff] }
 0xe9a   :  { %6499 = vperm.xlu0 %10580, %v6433_v45   ;;  %11455 = vrcp.f32 %v7180_v6 }
 0xe9b   :  { %v11432_v23 = vpop.eup %11431  ;;  %11457 = vrcp.f32 %v7584_v38  ;;  %v18095_v38 = vld [vmem:[#allocation102_spill] sm:$0xff] }
 0xe9c   :  { %v11434_v31 = vpop.eup %11433  ;;  %v7595_v15 = vmul.f32 %v11432_v23, %v18075_v46  ;;  %11459 = vrcp.f32 %v7184_v4  ;;  %v18088_v46 = vld [vmem:[#allocation76_spill] sm:$0xff] }
 0xe9d   :  { %6484 = vperm.xlu1 %10579, %v6430_v40   ;;  %v11436_v56 = vpop.eup %11435  ;;  %v7598_v54 = vmul.f32 %v11434_v31, %v18077_v22  ;;  %v18084_v40 = vld [vmem:[#allocation95_spill] sm:$0xff]  ;;  %v18091_v22 = vld [vmem:[#allocation92_spill] sm:$0xff] }
 0xe9e   :  { %6509 = vperm.xlu0 %10580, %v6435_v43   ;;  %v7618_v34 = vadd.f32 %v7595_v15, %v7195_v60  ;;  %v11438_v44 = vpop.eup %11437  ;;  %v7198_v12 = vmul.f32 %v11436_v56, %v18079_v61  ;;  %v7594_v1 = vmul.f32 %v11432_v23, %v18084_v40  ;;  %v7597_v15 = vmul.f32 %v11434_v31, %v18088_v46  ;;  %v18094_v31 = vld [vmem:[#allocation57_spill] sm:$0xff]  ;;  %v18102_v46 = vld [vmem:[#allocation135_spill] sm:$0xff] }
 0xe9f   :  { %v11440_v45 = vpop.eup %11439  ;;  %v7601_v19 = vmul.f32 %v11438_v44, %v18081_v3  ;;  %v7600_v6 = vmul.f32 %v11438_v44, %v18092_v24  ;;  %v18097_v44 = vld [vmem:[#allocation168_spill] sm:$0xff] }
 0xea0   :  { %v7620_v37 = vadd.f32 %v7598_v54, %v7198_v12  ;;  %v11442_v52 = vpop.eup %11441  ;;  %v7201_v51 = vmul.f32 %v11440_v45, %v18083_v21  ;;  %v7617_v60 = vadd.f32 %v7594_v1, %v7194_v14  ;;  %v18093_v12 = vld [vmem:[#allocation130_spill] sm:$0xff]  ;;  %v7200_v58 = vmul.f32 %v11440_v45, %v18094_v31  ;;  %v18098_v45 = vld [vmem:[#allocation103_spill] sm:$0xff] }
 0xea1   :  { %6494 = vperm.xlu1 %10579, %v6432_v29   ;;  %v11444_v43 = vpop.eup %11443  ;;  %v7603_v5 = vmul.f32 %v11442_v52, %v18085_v36  ;;  %v18100_v14 = vld [vmem:[#allocation94_spill] sm:$0xff] }
 0xea2   :  { %7640 = vperm.xlu0 %10580, %v7618_v34   ;;  %v7622_v48 = vadd.f32 %v7601_v19, %v7201_v51  ;;  %v11446_v27 = vpop.eup %11445  ;;  %v7203_v42 = vmul.f32 %v11444_v43, %v18087_v32  ;;  %v7197_v34 = vmul.f32 %v11436_v56, %v18090_v10  ;;  %v7621_v19 = vadd.f32 %v7600_v6, %v7200_v58  ;;  %v18096_v56 = vld [vmem:[#allocation131_spill] sm:$0xff]  ;;  %v18105_v10 = vld [vmem:[#allocation173_spill] sm:$0xff] }
 0xea3   :  { %v11448_v8 = vpop.eup %11447  ;;  %v7606_v55 = vmul.f32 %v11446_v27, %v18089_v7  ;;  %v7604_v33 = vmul.f32 %v11442_v52, %v18096_v56  ;;  %v7204_v51 = vmul.f32 %v11444_v43, %v18097_v44  ;;  %v18104_v7 = vld [vmem:[#allocation137_spill] sm:$0xff]  ;;  %v18108_v44 = vld [vmem:[#allocation176_spill] sm:$0xff] }
 0xea4   :  { %v7623_v29 = vadd.f32 %v7603_v5, %v7203_v42  ;;  %v11450_v23 = vpop.eup %11449  ;;  %v7206_v54 = vmul.f32 %v11448_v8, %v18091_v22  ;;  %v7619_v13 = vadd.f32 %v7597_v15, %v7197_v34  ;;  %v7207_v52 = vmul.f32 %v11448_v8, %v18099_v20  ;;  %v18101_v42 = vld [vmem:[#allocation98_spill] sm:$0xff]  ;;  %v18106_v34 = vld [vmem:[#allocation172_spill] sm:$0xff] }
 0xea5   :  { %6504 = vperm.xlu1 %10579, %v6434_v26   ;;  %v11452_v25 = vpop.eup %11451  ;;  %v7609_v26 = vmul.f32 %v11450_v23, %v18093_v12  ;;  %v7624_v1 = vadd.f32 %v7604_v33, %v7204_v51 }
 0xea6   :  { %7650 = vperm.xlu0 %10580, %v7620_v37   ;;  %v7625_v61 = vadd.f32 %v7606_v55, %v7206_v54  ;;  %v11454_v30 = vpop.eup %11453  ;;  %v7209_v37 = vmul.f32 %v11452_v25, %v18095_v38 }
 0xea7   :  { %v11456_v3 = vpop.eup %11455  ;;  %v7612_v4 = vmul.f32 %v11454_v30, %v15959_v57 }
 0xea8   :  { %v7627_v28 = vadd.f32 %v7609_v26, %v7209_v37  ;;  %v11458_v21 = vpop.eup %11457 }
 0xea9   :  { %6514 = vperm.xlu1 %10579, %v6436_v41   ;;  %v7212_v41 = vmul.f32 %v11456_v3, %v15932_v17  ;;  %v11460_v40 = vpop.eup %11459  ;;  %v7615_v5 = vmul.f32 %v11458_v21, %v15991_v9  ;;  %v7210_v17 = vmul.f32 %v11452_v25, %v18102_v46  ;;  %v7213_v9 = vmul.f32 %v11456_v3, %v18104_v7  ;;  %v18113_v46 = vld [vmem:[#allocation175_spill] sm:$0xff] }
 0xeaa   :  { %7660 = vperm.xlu0 %10580, %v7622_v48   ;;  %v7607_v48 = vmul.f32 %v11446_v27, %v18098_v45  ;;  %v7215_v57 = vmul.f32 %v11460_v40, %v18100_v14  ;;  %v7616_v8 = vmul.f32 %v11458_v21, %v18105_v10  ;;  %v7216_v22 = vmul.f32 %v11460_v40, %v18106_v34  ;;  %v18111_v14 = vld [vmem:[#allocation177_spill] sm:$0xff] }
 0xeab   :  { %v7629_v36 = vadd.f32 %v7612_v4, %v7212_v41  ;;  %v18109_v41 = vld [vmem:[#allocation152_spill] sm:$0xff] }
 0xeac   :  { %v7626_v32 = vadd.f32 %v7607_v48, %v7207_v52  ;;  %v7631_v43 = vadd.f32 %v7615_v5, %v7215_v57 }
 0xead   :  { %7635 = vperm.xlu1 %10579, %v7617_v60   ;;  %v7610_v60 = vmul.f32 %v11450_v23, %v18101_v42  ;;  %v7632_v23 = vadd.f32 %v7616_v8, %v7216_v22  ;;  %v18115_v8 = vld [vmem:[#allocation179_spill] sm:$0xff]  ;;  %v18116_v22 = vld [vmem:[#allocation138_spill] sm:$0xff] }
 0xeae   :  { %7665 = vperm.xlu0 %10580, %v7623_v29   ;;  %v18103_v29 = vld [vmem:[#allocation170_spill] sm:$0xff] }
 0xeaf   :  { %v7628_v15 = vadd.f32 %v7610_v60, %v7210_v17  ;;  %v7613_v27 = vmul.f32 %v11454_v30, %v18103_v29 }
 0xeb1   :  { %7645 = vperm.xlu1 %10579, %v7619_v13   ;;  %v7630_v55 = vadd.f32 %v7613_v27, %v7213_v9 }
 0xeb2   :  { %7675 = vperm.xlu0 %10580, %v7625_v61  }
 0xeb5   :  { %7655 = vperm.xlu1 %10579, %v7621_v19   ;;  %v16764_v19 = vld [vmem:[%s17507_s18 + $0x8] sm:$0xff] }
 0xeb6   :  { %7685 = vperm.xlu0 %10580, %v7627_v28   ;;  %v18107_v28 = vld [vmem:[#allocation174_spill] sm:$0xff] }
 0xeb9   :  { %7670 = vperm.xlu1 %10579, %v7624_v1   ;;  %v18110_v1 = vld [vmem:[#allocation181_spill] sm:$0xff] }
 0xeba   :  { %7695 = vperm.xlu0 %10580, %v7629_v36  }
 0xebd   :  { %7680 = vperm.xlu1 %10579, %v7626_v32   ;;  %v18112_v32 = vld [vmem:[#allocation97_spill] sm:$0xff] }
 0xebe   :  { %7705 = vperm.xlu0 %10580, %v7631_v43  }
 0xec1   :  { %7690 = vperm.xlu1 %10579, %v7628_v15   ;;  %v18114_v15 = vld [vmem:[#allocation145_spill] sm:$0xff] }
 0xec5   :  { %7700 = vperm.xlu1 %10579, %v7630_v55  }
 0xec7   :  { %v16729_v54 = vpop.xlane.xlu0 %8346 }
 0xec8   :  { %v8352_v13 = vrot.slane %v16729_v54, %v18008_v62  ;;  %v8356_v61 = vrot.slane %v16729_v54, %v18009_v11  ;;  %v8360_v26 = vrot.slane %v16729_v54, %v18012_v39  ;;  %v8368_v58 = vrot.slane %v16729_v54, %v18010_v18 }
 0xec9   :  { %7710 = vperm.xlu1 %10579, %v7632_v23   ;;  %v8372_v33 = vrot.slane %v16729_v54, %v18011_v35  ;;  %v8376_v43 = vrot.slane %v16729_v54, %v15063_v59 }
 0xeca   :  { %11461 = vrcp.f32 %v8352_v13 }
 0xecb   :  { %v16733_v25 = vpop.xlane.xlu1 %8746 }
 0xecc   :  { %v8752_v24 = vrot.slane %v16733_v25, %v18008_v62  ;;  %v8756_v6 = vrot.slane %v16733_v25, %v18009_v11  ;;  %v8760_v12 = vrot.slane %v16733_v25, %v18012_v39  ;;  %v8764_v30 = vrot.slane %v16733_v25, %v18016_v50 }
 0xecd   :  { %v8364_v62 = vrot.slane %v16729_v54, %v18016_v50  ;;  %v8768_v11 = vrot.slane %v16733_v25, %v18010_v18  ;;  %v8772_v39 = vrot.slane %v16733_v25, %v18011_v35  ;;  %v16758_v50 = vld [vmem:[%s17507_s18] sm:$0xff]  ;;  %v8776_v5 = vrot.slane %v16733_v25, %v15063_v59 }
 0xece   :  { %11463 = vrcp.f32 %v8752_v24  ;;  %v8780_v7 = vrot.slane %v16733_v25, %v15083_v63  ;;  %v8380_v24 = vrot.slane %v16729_v54, %v15083_v63  ;;  %v18121_v63 = vld [vmem:[#allocation139_spill] sm:$0xff] }
 0xecf   :  { %11465 = vrcp.f32 %v8756_v6  ;;  %v18117_v6 = vld [vmem:[#allocation178_spill] sm:$0xff] }
 0xed0   :  { %11467 = vrcp.f32 %v8356_v61  ;;  %v18118_v61 = vld [vmem:[#allocation184_spill] sm:$0xff] }
 0xed1   :  { %11469 = vrcp.f32 %v8760_v12 }
 0xed2   :  { %11471 = vrcp.f32 %v8360_v26 }
 0xed3   :  { %11473 = vrcp.f32 %v8764_v30 }
 0xed4   :  { %11475 = vrcp.f32 %v8364_v62 }
 0xed5   :  { %11477 = vrcp.f32 %v8768_v11 }
 0xed6   :  { %11479 = vrcp.f32 %v8368_v58  ;;  %v18120_v58 = vld [vmem:[#allocation146_spill] sm:$0xff] }
 0xed7   :  { %v11462_v38 = vpop.eup %11461  ;;  %11481 = vrcp.f32 %v8772_v39 }
 0xed8   :  { %v5244_v31 = vpop.permute.xlu1 %5243  ;;  %v8391_v4 = vmul.f32 %v11462_v38, %v18107_v28  ;;  %v8390_v40 = vmul.f32 %v11462_v38, %v18109_v41  ;;  %11483 = vrcp.f32 %v8372_v33  ;;  %v18124_v41 = vld [vmem:[#allocation134_spill] sm:$0xff] }
 0xed9   :  { %v5321_v3 = vmul.f32 %v16758_v50, %v5244_v31  ;;  %11485 = vrcp.f32 %v8776_v5  ;;  %v18119_v31 = vld [vmem:[#allocation141_spill] sm:$0xff]  ;;  %v18126_v5 = vld [vmem:[#allocation82_spill] sm:$0xff] }
 0xeda   :  { %11487 = vrcp.f32 %v8376_v43 }
 0xedb   :  { %v11464_v56 = vpop.eup %11463  ;;  %11489 = vrcp.f32 %v8780_v7 }
 0xedc   :  { %v5249_v37 = vpop.permute.xlu1 %5248  ;;  %v11466_v21 = vpop.eup %11465  ;;  %v8791_v51 = vmul.f32 %v11464_v56, %v18108_v44  ;;  %v8790_v45 = vmul.f32 %v11464_v56, %v18110_v1  ;;  %11491 = vrcp.f32 %v8380_v24  ;;  %v18123_v44 = vld [vmem:[#allocation148_spill] sm:$0xff]  ;;  %v18130_v24 = vld [vmem:[#allocation182_spill] sm:$0xff] }
 0xedd   :  { %v5322_v18 = vmul.f32 %v16764_v19, %v5249_v37  ;;  %v11468_v36 = vpop.eup %11467  ;;  %v8794_v57 = vmul.f32 %v11466_v21, %v18111_v14  ;;  %v8793_v42 = vmul.f32 %v11466_v21, %v18112_v32  ;;  %v16791_v13 = vpop.permute.xlu0 %5283 }
 0xede   :  { %v8814_v35 = vadd.f32 %v8791_v51, %v8391_v4  ;;  %v8813_v52 = vadd.f32 %v8790_v45, %v8390_v40  ;;  %v11470_v60 = vpop.eup %11469  ;;  %v8394_v17 = vmul.f32 %v11468_v36, %v18113_v46  ;;  %v8393_v29 = vmul.f32 %v11468_v36, %v18114_v15  ;;  %v18125_v45 = vld [vmem:[#allocation143_spill] sm:$0xff] }
 0xedf   :  { %v16773_v48 = vadd.f32 %v5322_v18, %v5321_v3  ;;  %v11472_v27 = vpop.eup %11471  ;;  %v8797_v34 = vmul.f32 %v11470_v60, %v18115_v8  ;;  %v8796_v59 = vmul.f32 %v11470_v60, %v18116_v22  ;;  %v18122_v18 = vld [vmem:[#allocation100_spill] sm:$0xff]  ;;  %v18129_v22 = vld [vmem:[#allocation183_spill] sm:$0xff] }
 0xee0   :  { %v16777_v20 = vpop.permute.xlu1 %5253  ;;  %8836 = vperm.xlu0 %10580, %v8814_v35   ;;  %8831 = vperm.xlu1 %10579, %v8813_v52   ;;  %v8816_v55 = vadd.f32 %v8794_v57, %v8394_v17  ;;  %v8815_v10 = vadd.f32 %v8793_v42, %v8393_v29  ;;  %v11474_v23 = vpop.eup %11473  ;;  %v8397_v25 = vmul.f32 %v11472_v27, %v18117_v6  ;;  %v18127_v60 = vld [vmem:[#allocation180_spill] sm:$0xff] }
 0xee1   :  { %v8396_v12 = vmul.f32 %v11472_v27, %v18118_v61  ;;  %v11476_v26 = vpop.eup %11475  ;;  %v8799_v11 = vmul.f32 %v11474_v23, %v18119_v31  ;;  %v8800_v38 = vmul.f32 %v11474_v23, %v18120_v58  ;;  %v16803_v33 = vpop.permute.xlu0 %5293  ;;  %v18128_v29 = vld [vmem:[#allocation136_spill] sm:$0xff] }
 0xee2   :  { %v8818_v30 = vadd.f32 %v8797_v34, %v8397_v25  ;;  %v11478_v37 = vpop.eup %11477  ;;  %v8399_v54 = vmul.f32 %v11476_v26, %v18121_v63  ;;  %v8400_v56 = vmul.f32 %v11476_v26, %v18122_v18 }
 0xee3   :  { %v8817_v62 = vadd.f32 %v8796_v59, %v8396_v12  ;;  %v11480_v3 = vpop.eup %11479  ;;  %v8802_v51 = vmul.f32 %v11478_v37, %v18123_v44  ;;  %v8803_v40 = vmul.f32 %v11478_v37, %v18124_v41  ;;  %v16843_v44 = vld [vmem:[%s17507_s18 + $0x18] sm:$0xff] }
 0xee4   :  { %v16787_v9 = vpop.permute.xlu1 %5258  ;;  %8846 = vperm.xlu0 %10580, %v8816_v55   ;;  %8841 = vperm.xlu1 %10579, %v8815_v10   ;;  %v11482_v28 = vpop.eup %11481  ;;  %v8819_v4 = vadd.f32 %v8799_v11, %v8399_v54  ;;  %v8820_v21 = vadd.f32 %v8800_v38, %v8400_v56  ;;  %v8402_v36 = vmul.f32 %v11480_v3, %v18125_v45  ;;  %v18132_v11 = vld [vmem:[#allocation185_spill] sm:$0xff] }
 0xee5   :  { %v8403_v35 = vmul.f32 %v11480_v3, %v18126_v5  ;;  %v11484_v52 = vpop.eup %11483  ;;  %v8805_v42 = vmul.f32 %v11482_v28, %v16169_v47  ;;  %v8806_v43 = vmul.f32 %v11482_v28, %v18127_v60  ;;  %v16815_v17 = vpop.permute.xlu0 %5303  ;;  %v10765_v38 = vld [vmem:[#allocation24 + $0x38] sm:$0xff]  }
 0xee6   :  { %v11486_v14 = vpop.eup %11485  ;;  %v8821_v57 = vadd.f32 %v8802_v51, %v8402_v36  ;;  %v8405_v15 = vmul.f32 %v11484_v52, %v16143_v49  ;;  %v8406_v27 = vmul.f32 %v11484_v52, %v18128_v29  ;;  %10470 = vmatprep.subr.bf16.mxu1 %v10765_v38  ;;  %v5324_v51 = vmul.f32 %v16843_v44, %v16787_v9  ;;  %v16858_v52 = vld [vmem:[%s17507_s18 + $0x28] sm:$0xff] }
 0xee7   :  { %v8822_v32 = vadd.f32 %v8803_v40, %v8403_v35  ;;  %v11488_v7 = vpop.eup %11487  ;;  %v8808_v34 = vmul.f32 %v11486_v14, %v16217_v0  ;;  %v8809_v47 = vmul.f32 %v11486_v14, %v18129_v22  ;;  %10471 = vmatpush3.bf16.msra.mxu1 %v10765_v38  ;;  %v16850_v40 = vld [vmem:[%s17507_s18 + $0x10] sm:$0xff]  ;;  %v10769_v14 = vld [vmem:[#allocation24 + $0x18] sm:$0xff]  }
 0xee8   :  { %v16799_v39 = vpop.permute.xlu1 %5263  ;;  %8856 = vperm.xlu0 %10580, %v8818_v30   ;;  %8851 = vperm.xlu1 %10579, %v8817_v62   ;;  %v11490_v55 = vpop.eup %11489  ;;  %v8823_v10 = vadd.f32 %v8805_v42, %v8405_v15  ;;  %v8824_v8 = vadd.f32 %v8806_v43, %v8406_v27  ;;  %v8408_v23 = vmul.f32 %v11488_v7, %v16188_v2  ;;  %v18131_v30 = vld [vmem:[#allocation186_spill] sm:$0xff]  ;;  %v16920_v38 = vld [vmem:[%s17507_s18 + $0x68] sm:$0xff] }
 0xee9   :  { %v8409_v6 = vmul.f32 %v11488_v7, %v18130_v24  ;;  %v11492_v25 = vpop.eup %11491  ;;  %v16823_v61 = vpop.permute.xlu0 %5313  ;;  %v8811_v26 = vmul.f32 %v11490_v55, %v16257_v53  ;;  %v8812_v62 = vmul.f32 %v11490_v55, %v18131_v30  ;;  %v10766_v53 = vld [vmem:[#allocation24 + $0x30] sm:$0xff]   ;;  %v5323_v45 = vmul.f32 %v16850_v40, %v16777_v20  ;;  %v10771_v55 = vld [vmem:[#allocation24 + $0x8] sm:$0xff]  }
 0xeea   :  { %v8825_v49 = vadd.f32 %v8808_v34, %v8408_v23  ;;  %v8411_v0 = vmul.f32 %v11492_v25, %v16238_v16  ;;  %v8412_v58 = vmul.f32 %v11492_v25, %v18132_v11  ;;  %10472 = vmatprep.subr.bf16.mxu1 %v10766_v53  ;;  %v10767_v16 = vld [vmem:[#allocation24 + $0x28] sm:$0xff]   ;;  %v16865_v20 = vld [vmem:[%s17507_s18 + $0x20] sm:$0xff] }
 0xeeb   :  { %v8826_v12 = vadd.f32 %v8809_v47, %v8409_v6  ;;  %10473 = vmatpush3.bf16.msra.mxu1 %v10766_v53  ;;  %v5344_v35 = vadd.f32 %v5324_v51, %v5323_v45  ;;  %v16913_v30 = vld [vmem:[%s17507_s18 + $0x58] sm:$0xff] }
 0xeec   :  { %v16807_v1 = vpop.permute.xlu1 %5268  ;;  %8861 = vperm.xlu0 %10580, %v8819_v4   ;;  %8866 = vperm.xlu1 %10579, %v8820_v21   ;;  %v8827_v37 = vadd.f32 %v8811_v26, %v8411_v0  ;;  %v8828_v3 = vadd.f32 %v8812_v62, %v8412_v58  ;;  %v5338_v4 = vrot.slane %v16773_v48, 4  ;;  %v10768_v21 = vld [vmem:[#allocation24 + $0x20] sm:$0xff]  }
 0xeed   :  { %10474 = vmatprep.subr.bf16.mxu1 %v10767_v16  ;;  %v5326_v9 = vmul.f32 %v16858_v52, %v16807_v1  ;;  %v5345_v60 = vrot.slane %v5344_v35, 4  ;;  %v16872_v1 = vld [vmem:[%s17507_s18 + $0x38] sm:$0xff]  ;;  %v10772_v58 = vld [vmem:[#allocation24] sm:$0xff]  }
 0xeee   :  { %v5339_v36 = vadd.f32 %v5338_v4, %v16773_v48  ;;  %v5325_v48 = vmul.f32 %v16865_v20, %v16799_v39  ;;  %v16879_v39 = vld [vmem:[%s17507_s18 + $0x40] sm:$0xff] }
 0xeef   :  { %10475 = vmatpush3.bf16.msra.mxu1 %v10767_v16  ;;  %v5346_v6 = vadd.f32 %v5345_v60, %v5344_v35  ;;  %v16936_v16 = vld [vmem:[%s17507_s18 + $0x70] sm:$0xff] }
 0xef0   :  { %v16813_v46 = vpop.permute.xlu1 %5273  ;;  %8871 = vperm.xlu0 %10580, %v8821_v57   ;;  %8876 = vperm.xlu1 %10579, %v8822_v32   ;;  %v10770_v32 = vld [vmem:[#allocation24 + $0x10] sm:$0xff]   ;;  %v5340_v42 = vrot.slane %v5339_v36, 2  ;;  %v5351_v43 = vadd.f32 %v5326_v9, %v5325_v48 }
 0xef1   :  { %10476 = vmatprep.subr.bf16.mxu1 %v10768_v21 }
 0xef2   :  { %v5341_v47 = vadd.f32 %v5340_v42, %v5339_v36  ;;  %v5352_v25 = vrot.slane %v5351_v43, 4 }
 0xef3   :  { %10477 = vmatpush3.bf16.msra.mxu1 %v10768_v21  ;;  %v5347_v21 = vrot.slane %v5346_v6, 2 }
 0xef4   :  { %v5279_v59 = vpop.permute.xlu1 %5278  ;;  %8881 = vperm.xlu0 %10580, %v8823_v10   ;;  %8886 = vperm.xlu1 %10579, %v8824_v8   ;;  %v5329_v10 = vmul.f32 %v16879_v39, %v16791_v13  ;;  %v16886_v8 = vld [vmem:[%s17507_s18 + $0x30] sm:$0xff]  ;;  %v5342_v53 = vrot.slane %v5341_v47, 1  ;;  %v5353_v36 = vadd.f32 %v5352_v25, %v5351_v43 }
 0xef5   :  { %10478 = vmatprep.subr.bf16.mxu1 %v10769_v14  ;;  %v5328_v15 = vmul.f32 %v16872_v1, %v5279_v59  ;;  %v5327_v34 = vmul.f32 %v16886_v8, %v16813_v46  ;;  %v16894_v59 = vld [vmem:[%s17507_s18 + $0x50] sm:$0xff] }
 0xef6   :  { %v5331_v23 = vmul.f32 %v16894_v59, %v16803_v33  ;;  %v16951_v43 = vadd.f32 %v5342_v53, %v5341_v47 }
 0xef7   :  { %10479 = vmatpush3.bf16.msra.mxu1 %v10769_v14 }
 0xef8   :  { %v16827_v31 = vpop.permute.xlu1 %5288  ;;  %8891 = vperm.xlu0 %10580, %v8825_v49   ;;  %8896 = vperm.xlu1 %10579, %v8826_v12   ;;  %v5358_v49 = vadd.f32 %v5328_v15, %v5327_v34  ;;  %v16904_v12 = vld [vmem:[%s17507_s18 + $0x48] sm:$0xff]  ;;  %v16949_v15 = vadd.f32 %v5347_v21, %v5346_v6 }
 0xef9   :  { %10480 = vmatprep.subr.bf16.mxu1 %v10770_v32  ;;  %v5330_v26 = vmul.f32 %v16904_v12, %v16827_v31 }
 0xefa   :  { %v5359_v51 = vrot.slane %v5358_v49, 4 }
 0xefb   :  { %10481 = vmatpush3.bf16.msra.mxu1 %v10770_v32 }
 0xefc   :  { %v16833_v63 = vpop.permute.xlu1 %5298  ;;  %8901 = vperm.xlu0 %10580, %v8827_v37   ;;  %8906 = vperm.xlu1 %10579, %v8828_v3  }
 0xefd   :  { %v16831_v2 = vpop.permute.xlu0 %6439  ;;  %v5332_v62 = vmul.f32 %v16913_v30, %v16833_v63  ;;  %10482 = vmatprep.subr.bf16.mxu1 %v10771_v55  ;;  %v16929_v63 = vld [vmem:[%s17507_s18 + $0x60] sm:$0xff] }
 0xefe   :  { %v6517_v33 = vmul.f32 %v16758_v50, %v16831_v2 }
 0xeff   :  { %10483 = vmatpush3.bf16.msra.mxu1 %v10771_v55  ;;  %v5372_v35 = vadd.f32 %v5332_v62, %v5331_v23 }
 0xf00   :  { %v16835_v18 = vpop.permute.xlu1 %5308  ;;  %10484 = vmatprep.subr.bf16.mxu1 %v10772_v58 }
 0xf01   :  { %v6455_v54 = vpop.permute.xlu0 %6454  ;;  %v5334_v31 = vmul.f32 %v16920_v38, %v16835_v18  ;;  %v5335_v18 = vmul.f32 %v16936_v16, %v16823_v61 }
 0xf02   :  { %v6520_v13 = vmul.f32 %v16843_v44, %v6455_v54  ;;  %v5333_v54 = vmul.f32 %v16929_v63, %v16815_v17 }
 0xf03   :  { %10485 = vmatpush3.bf16.msra.mxu1 %v10772_v58 }
 0xf04   :  { %v16837_v28 = vpop.permute.xlu1 %5318  ;;  %v5379_v61 = vadd.f32 %v5334_v31, %v5333_v54 }
 0xf05   :  { %v6465_v56 = vpop.permute.xlu0 %6464 }
 0xf06   :  { %v6522_v46 = vmul.f32 %v16858_v52, %v6465_v56 }
 0xf08   :  { %v6445_v41 = vpop.permute.xlu1 %6444 }
 0xf09   :  { %v6475_v5 = vpop.permute.xlu0 %6474  ;;  %v6518_v24 = vmul.f32 %v16764_v19, %v6445_v41  ;;  %v16943_v41 = vld [vmem:[%s17507_s18 + $0x78] sm:$0xff] }
 0xf0a   :  { %v6524_v2 = vmul.f32 %v16872_v1, %v6475_v5  ;;  %v5336_v17 = vmul.f32 %v16943_v41, %v16837_v28  ;;  %v5365_v5 = vadd.f32 %v5330_v26, %v5329_v10  ;;  %v5373_v10 = vrot.slane %v5372_v35, 4 }
 0xf0b   :  { %v6533_v56 = vadd.f32 %v6518_v24, %v6517_v33  ;;  %v5349_v33 = vrot.slane %v16949_v15, 1 }
 0xf0c   :  { %v6450_v57 = vpop.permute.xlu1 %6449  ;;  %v5386_v28 = vadd.f32 %v5336_v17, %v5335_v18  ;;  %v5366_v55 = vrot.slane %v5365_v5, 4  ;;  %v5374_v31 = vadd.f32 %v5373_v10, %v5372_v35 }
 0xf0d   :  { %v6480_v29 = vpop.permute.xlu0 %6479  ;;  %v6519_v27 = vmul.f32 %v16850_v40, %v6450_v57  ;;  %v6534_v42 = vrot.slane %v6533_v56, 4 }
 0xf0e   :  { %v6525_v57 = vmul.f32 %v16879_v39, %v6480_v29  ;;  %v5380_v29 = vrot.slane %v5379_v61, 4  ;;  %v5387_v47 = vrot.slane %v5386_v28, 4  ;;  %v5367_v58 = vadd.f32 %v5366_v55, %v5365_v5 }
 0xf0f   :  { %v6540_v0 = vadd.f32 %v6520_v13, %v6519_v27  ;;  %v5360_v27 = vadd.f32 %v5359_v51, %v5358_v49  ;;  %v5354_v13 = vrot.slane %v5353_v36, 2  ;;  %v5375_v35 = vrot.slane %v5374_v31, 2 }
 0xf10   :  { %v6460_v7 = vpop.permute.xlu1 %6459  ;;  %v5368_v5 = vrot.slane %v5367_v58, 2 }
 0xf11   :  { %v6521_v22 = vmul.f32 %v16865_v20, %v6460_v7  ;;  %v6490_v4 = vpop.permute.xlu0 %6489  ;;  %v6541_v9 = vrot.slane %v6540_v0, 4  ;;  %v5361_v62 = vrot.slane %v5360_v27, 2  ;;  %v5355_v53 = vadd.f32 %v5354_v13, %v5353_v36 }
 0xf12   :  { %v6527_v26 = vmul.f32 %v16894_v59, %v6490_v4 }
 0xf13   :  { %v6547_v37 = vadd.f32 %v6522_v46, %v6521_v22  ;;  %v6542_v34 = vadd.f32 %v6541_v9, %v6540_v0  ;;  %v6535_v46 = vadd.f32 %v6534_v42, %v6533_v56  ;;  %v5381_v56 = vadd.f32 %v5380_v29, %v5379_v61 }
 0xf14   :  { %v6470_v11 = vpop.permute.xlu1 %6469  ;;  %v5388_v9 = vadd.f32 %v5387_v47, %v5386_v28 }
 0xf15   :  { %v6523_v3 = vmul.f32 %v16886_v8, %v6470_v11  ;;  %v6548_v32 = vrot.slane %v6547_v37, 4  ;;  %v6500_v22 = vpop.permute.xlu0 %6499  ;;  %v6543_v0 = vrot.slane %v6542_v34, 2  ;;  %v6536_v4 = vrot.slane %v6535_v46, 2 }
 0xf16   :  { %v5382_v61 = vrot.slane %v5381_v56, 2  ;;  %v5389_v13 = vrot.slane %v5388_v9, 2 }
 0xf17   :  { %v6554_v45 = vadd.f32 %v6524_v2, %v6523_v3  ;;  %v6549_v24 = vadd.f32 %v6548_v32, %v6547_v37  ;;  %v6529_v37 = vmul.f32 %v16929_v63, %v6500_v22  ;;  %v6544_v32 = vadd.f32 %v6543_v0, %v6542_v34 }
 0xf18   :  { %v6485_v14 = vpop.permute.xlu1 %6484  ;;  %v6537_v10 = vadd.f32 %v6536_v4, %v6535_v46 }
 0xf19   :  { %v6526_v48 = vmul.f32 %v16904_v12, %v6485_v14  ;;  %v6555_v60 = vrot.slane %v6554_v45, 4  ;;  %v6550_v54 = vrot.slane %v6549_v24, 2  ;;  %v6510_v51 = vpop.permute.xlu0 %6509 }
 0xf1b   :  { %v6561_v7 = vadd.f32 %v6526_v48, %v6525_v57  ;;  %v6556_v6 = vadd.f32 %v6555_v60, %v6554_v45  ;;  %v5362_v45 = vadd.f32 %v5361_v62, %v5360_v27  ;;  %v6551_v36 = vadd.f32 %v6550_v54, %v6549_v24 }
 0xf1c   :  { %v6495_v23 = vpop.permute.xlu1 %6494  ;;  %v6531_v60 = vmul.f32 %v16936_v16, %v6510_v51  ;;  %v5376_v62 = vadd.f32 %v5375_v35, %v5374_v31  ;;  %v6538_v54 = vrot.slane %v6537_v10, 1 }
 0xf1d   :  { %v6562_v25 = vrot.slane %v6561_v7, 4  ;;  %v6528_v49 = vmul.f32 %v16913_v30, %v6495_v23  ;;  %v6557_v21 = vrot.slane %v6556_v6, 2  ;;  %v6552_v47 = vrot.slane %v6551_v36, 1 }
 0xf1f   :  { %v6563_v11 = vadd.f32 %v6562_v25, %v6561_v7  ;;  %v6568_v2 = vadd.f32 %v6528_v49, %v6527_v26  ;;  %v6558_v22 = vadd.f32 %v6557_v21, %v6556_v6  ;;  %v5356_v25 = vrot.slane %v5355_v53, 1 }
 0xf20   :  { %v6505_v3 = vpop.permute.xlu1 %6504  ;;  %v5369_v26 = vadd.f32 %v5368_v5, %v5367_v58  ;;  %v6545_v49 = vrot.slane %v6544_v32, 1  ;;  %v5377_v58 = vrot.slane %v5376_v62, 1 }
 0xf21   :  { %v6530_v18 = vmul.f32 %v16920_v38, %v6505_v3  ;;  %v6569_v17 = vrot.slane %v6568_v2, 4  ;;  %v6564_v14 = vrot.slane %v6563_v11, 2  ;;  %v5383_v3 = vadd.f32 %v5382_v61, %v5381_v56 }
 0xf22   :  { %v5370_v21 = vrot.slane %v5369_v26, 1  ;;  %v6546_v51 = vadd.f32 %v6545_v49, %v6544_v32  ;;  %v5357_v5 = vadd.f32 %v5356_v25, %v5355_v53 }
 0xf23   :  { %v6575_v57 = vadd.f32 %v6530_v18, %v6529_v37  ;;  %v6570_v48 = vadd.f32 %v6569_v17, %v6568_v2  ;;  %v6565_v27 = vadd.f32 %v6564_v14, %v6563_v11  ;;  %v5363_v2 = vrot.slane %v5362_v45, 1 }
 0xf24   :  { %v6515_v42 = vpop.permute.xlu1 %6514  ;;  %v6559_v37 = vrot.slane %v6558_v22, 1  ;;  %v5390_v18 = vadd.f32 %v5389_v13, %v5388_v9  ;;  %v5350_v11 = vadd.f32 %v5349_v33, %v16949_v15  ;;  %v6553_v14 = vadd.f32 %v6552_v47, %v6551_v36  ;;  %v7641_v9 = vpop.permute.xlu0 %7640 }
 0xf25   :  { %v6576_v7 = vrot.slane %v6575_v57, 4  ;;  %v6532_v55 = vmul.f32 %v16943_v41, %v6515_v42  ;;  %v6571_v23 = vrot.slane %v6570_v48, 2  ;;  %v6566_v46 = vrot.slane %v6565_v27, 1 }
 0xf26   :  { %v5384_v35 = vrot.slane %v5383_v3, 1  ;;  %v6560_v42 = vadd.f32 %v6559_v37, %v6558_v22  ;;  %v5364_v56 = vadd.f32 %v5363_v2, %v5362_v45  ;;  %v8989_v15 = vsel %vm4505_vm1, %v5350_v11, %v16951_v43 }
 0xf27   :  { %v6577_v28 = vadd.f32 %v6576_v7, %v6575_v57  ;;  %v6582_v29 = vadd.f32 %v6532_v55, %v6531_v60  ;;  %v6572_v34 = vadd.f32 %v6571_v23, %v6570_v48  ;;  %v6539_v48 = vadd.f32 %v6538_v54, %v6537_v10 }
 0xf28   :  { %v5391_v60 = vrot.slane %v5390_v18, 1  ;;  %v6567_v7 = vadd.f32 %v6566_v46, %v6565_v27  ;;  %v7636_v61 = vpop.permute.xlu1 %7635  ;;  %v5371_v33 = vadd.f32 %v5370_v21, %v5369_v26  ;;  %v5378_v36 = vadd.f32 %v5377_v58, %v5376_v62 }
 0xf29   :  { %v6578_v24 = vrot.slane %v6577_v28, 2  ;;  %v6583_v0 = vrot.slane %v6582_v29, 4  ;;  %v6573_v17 = vrot.slane %v6572_v34, 1  ;;  %v9005_v32 = vsel %vm4505_vm1, %v6546_v51, %v6539_v48 }
 0xf2a   :  { %v9006_v13 = vsel %vm4507_vm2, %v6553_v14, %v9005_v32  ;;  %v8990_v10 = vsel %vm4507_vm2, %v5357_v5, %v8989_v15  ;;  %v5385_v45 = vadd.f32 %v5384_v35, %v5383_v3  ;;  %v7713_v14 = vmul.f32 %v16758_v50, %v7636_v61 }
 0xf2b   :  { %v6579_v6 = vadd.f32 %v6578_v24, %v6577_v28  ;;  %v6584_v4 = vadd.f32 %v6583_v0, %v6582_v29  ;;  %v6574_v23 = vadd.f32 %v6573_v17, %v6572_v34  ;;  %v9007_v22 = vsel %vm4509_vm3, %v6560_v42, %v9006_v13  ;;  %v7651_v34 = vpop.permute.xlu0 %7650 }
 0xf2c   :  { %v8991_v27 = vsel %vm4509_vm3, %v5364_v56, %v8990_v10  ;;  %v5392_v29 = vadd.f32 %v5391_v60, %v5390_v18  ;;  %v9008_v43 = vsel %vm4511_vm4, %v6567_v7, %v9007_v22  ;;  %v7646_v62 = vpop.permute.xlu1 %7645  ;;  %v7716_v5 = vmul.f32 %v16843_v44, %v7651_v34 }
 0xf2d   :  { %v6580_v57 = vrot.slane %v6579_v6, 1  ;;  %v6585_v31 = vrot.slane %v6584_v4, 2  ;;  %v8992_v26 = vsel %vm4511_vm4, %v5371_v33, %v8991_v27  ;;  %v9009_v49 = vsel %vm4513_vm5, %v6574_v23, %v9008_v43 }
 0xf2e   :  { %v8993_v47 = vsel %vm4513_vm5, %v5378_v36, %v8992_v26 }
 0xf2f   :  { %v6586_v55 = vadd.f32 %v6585_v31, %v6584_v4  ;;  %v6581_v53 = vadd.f32 %v6580_v57, %v6579_v6  ;;  %v8994_v0 = vsel %vm4515_vm6, %v5385_v45, %v8993_v47  ;;  %v7661_v37 = vpop.permute.xlu0 %7660  ;;  %v7714_v57 = vmul.f32 %v16764_v19, %v7641_v9 }
 0xf30   :  { %v8995_v3 = vsel %vm4517_vm7, %v5392_v29, %v8994_v0  ;;  %v7656_v18 = vpop.permute.xlu1 %7655  ;;  %v7715_v31 = vmul.f32 %v16850_v40, %v7646_v62  ;;  %v7718_v32 = vmul.f32 %v16858_v52, %v7661_v37 }
 0xf31   :  { %v6587_v28 = vrot.slane %v6586_v55, 1  ;;  %v9010_v24 = vsel %vm4515_vm6, %v6581_v53, %v9009_v49  ;;  %v7729_v35 = vadd.f32 %v7714_v57, %v7713_v14  ;;  %v7717_v33 = vmul.f32 %v16865_v20, %v7656_v18 }
 0xf32   :  { %v7736_v56 = vadd.f32 %v7716_v5, %v7715_v31 }
 0xf33   :  { %v6588_v25 = vadd.f32 %v6587_v28, %v6586_v55  ;;  %v7666_v46 = vpop.permute.xlu0 %7665  ;;  %v7730_v60 = vrot.slane %v7729_v35, 4  ;;  %v7743_v13 = vadd.f32 %v7718_v32, %v7717_v33 }
 0xf34   :  { %v7671_v6 = vpop.permute.xlu1 %7670  ;;  %v7737_v15 = vrot.slane %v7736_v56, 4  ;;  %v7719_v22 = vmul.f32 %v16886_v8, %v7666_v46 }
 0xf35   :  { %v9011_v2 = vsel %vm4517_vm7, %v6588_v25, %v9010_v24  ;;  %v7731_v23 = vadd.f32 %v7730_v60, %v7729_v35  ;;  %v7720_v28 = vmul.f32 %v16872_v1, %v7671_v6  ;;  %v7744_v49 = vrot.slane %v7743_v13, 4 }
 0xf36   :  { %v9045_v54 = vpack.c.bf16 %v9011_v2, %v8995_v3  ;;  %v7738_v9 = vadd.f32 %v7737_v15, %v7736_v56 }
 0xf37   :  { %v7676_v4 = vpop.permute.xlu0 %7675  ;;  %v7732_v53 = vrot.slane %v7731_v23, 2  ;;  %v7750_v0 = vadd.f32 %v7720_v28, %v7719_v22  ;;  %v7745_v46 = vadd.f32 %v7744_v49, %v7743_v13 }
 0xf38   :  { %10486 = vmatprep.mubr.bf16.mxu1 %v9045_v54  ;;  %v7681_v11 = vpop.permute.xlu1 %7680  ;;  %v7739_v26 = vrot.slane %v7738_v9, 2  ;;  %v7721_v47 = vmul.f32 %v16879_v39, %v7676_v4 }
 0xf39   :  { %v7733_v24 = vadd.f32 %v7732_v53, %v7731_v23  ;;  %v7746_v15 = vrot.slane %v7745_v46, 2 }
 0xf3b   :  { %v7686_v21 = vpop.permute.xlu0 %7685  ;;  %v7734_v57 = vrot.slane %v7733_v24, 1 }
 0xf3c   :  { %v7691_v51 = vpop.permute.xlu1 %7690 }
 0xf3d   :  { %v17002_v13 = vadd.f32 %v7734_v57, %v7733_v24 }
 0xf3f   :  { %v7696_v17 = vpop.permute.xlu0 %7695 }
 0xf40   :  { %v7701_v58 = vpop.permute.xlu1 %7700  ;;  %v7725_v6 = vmul.f32 %v16929_v63, %v7696_v17 }
 0xf43   :  { %v7706_v48 = vpop.permute.xlu0 %7705 }
 0xf44   :  { %v7711_v42 = vpop.permute.xlu1 %7710 }
 0xf45   :  { %v7728_v3 = vmul.f32 %v16943_v41, %v7711_v42 }
 0xf5b   :  { %v8832_v7 = vpop.permute.xlu1 %8831  ;;  %v8837_v55 = vpop.permute.xlu0 %8836 }
 0xf5c   :  { %v8909_v27 = vmul.f32 %v16758_v50, %v8832_v7  ;;  %v8910_v29 = vmul.f32 %v16764_v19, %v8837_v55  ;;  %v7726_v50 = vmul.f32 %v16920_v38, %v7701_v58  ;;  %v7723_v19 = vmul.f32 %v16894_v59, %v7686_v21 }
 0xf5d   :  { %v7751_v21 = vrot.slane %v7750_v0, 4 }
 0xf5e   :  { %v8925_v54 = vadd.f32 %v8910_v29, %v8909_v27  ;;  %v7771_v31 = vadd.f32 %v7726_v50, %v7725_v6  ;;  %v7747_v27 = vadd.f32 %v7746_v15, %v7745_v46 }
 0xf5f   :  { %v8842_v61 = vpop.permute.xlu1 %8841  ;;  %v8847_v36 = vpop.permute.xlu0 %8846 }
 0xf60   :  { %v8911_v10 = vmul.f32 %v16850_v40, %v8842_v61  ;;  %v8912_v45 = vmul.f32 %v16843_v44, %v8847_v36  ;;  %v7722_v40 = vmul.f32 %v16904_v12, %v7681_v11  ;;  %v7724_v44 = vmul.f32 %v16913_v30, %v7691_v51 }
 0xf61   :  { %v7727_v11 = vmul.f32 %v16936_v16, %v7706_v48  ;;  %v8926_v42 = vrot.slane %v8925_v54, 4  ;;  %v7772_v61 = vrot.slane %v7771_v31, 4 }
 0xf62   :  { %v8932_v2 = vadd.f32 %v8912_v45, %v8911_v10  ;;  %v7757_v51 = vadd.f32 %v7722_v40, %v7721_v47  ;;  %v7764_v14 = vadd.f32 %v7724_v44, %v7723_v19 }
 0xf63   :  { %v8852_v25 = vpop.permute.xlu1 %8851  ;;  %v8857_v43 = vpop.permute.xlu0 %8856  ;;  %v7778_v35 = vadd.f32 %v7728_v3, %v7727_v11  ;;  %v8927_v28 = vadd.f32 %v8926_v42, %v8925_v54  ;;  %v7748_v3 = vrot.slane %v7747_v27, 1 }
 0xf64   :  { %v8913_v34 = vmul.f32 %v16865_v20, %v8852_v25  ;;  %v8914_v62 = vmul.f32 %v16858_v52, %v8857_v43  ;;  %v7740_v52 = vadd.f32 %v7739_v26, %v7738_v9  ;;  %v8933_v5 = vrot.slane %v8932_v2, 4 }
 0xf65   :  { %v7758_v33 = vrot.slane %v7757_v51, 4  ;;  %v7765_v32 = vrot.slane %v7764_v14, 4  ;;  %v7779_v53 = vrot.slane %v7778_v35, 4  ;;  %v8928_v24 = vrot.slane %v8927_v28, 2 }
 0xf66   :  { %v8939_v37 = vadd.f32 %v8914_v62, %v8913_v34  ;;  %v7741_v48 = vrot.slane %v7740_v52, 1  ;;  %v8934_v36 = vadd.f32 %v8933_v5, %v8932_v2  ;;  %v7773_v62 = vadd.f32 %v7772_v61, %v7771_v31 }
 0xf67   :  { %v8867_v20 = vpop.permute.xlu1 %8866  ;;  %v8862_v18 = vpop.permute.xlu0 %8861  ;;  %v7759_v43 = vadd.f32 %v7758_v33, %v7757_v51  ;;  %v7766_v26 = vadd.f32 %v7765_v32, %v7764_v14  ;;  %v7780_v44 = vadd.f32 %v7779_v53, %v7778_v35  ;;  %v8929_v14 = vadd.f32 %v8928_v24, %v8927_v28 }
 0xf68   :  { %v8916_v4 = vmul.f32 %v16872_v1, %v8867_v20  ;;  %v8915_v58 = vmul.f32 %v16886_v8, %v8862_v18  ;;  %v8940_v56 = vrot.slane %v8939_v37, 4  ;;  %v7752_v8 = vadd.f32 %v7751_v21, %v7750_v0 }
 0xf69   :  { %v17005_v25 = vadd.f32 %v7741_v48, %v7740_v52  ;;  %v8935_v47 = vrot.slane %v8934_v36, 2  ;;  %v7760_v20 = vrot.slane %v7759_v43, 2  ;;  %v7767_v18 = vrot.slane %v7766_v26, 2 }
 0xf6a   :  { %v8946_v60 = vadd.f32 %v8916_v4, %v8915_v58  ;;  %v8941_v10 = vadd.f32 %v8940_v56, %v8939_v37  ;;  %v7753_v34 = vrot.slane %v7752_v8, 2  ;;  %v7774_v6 = vrot.slane %v7773_v62, 2 }
 0xf6b   :  { %v8877_v7 = vpop.permute.xlu1 %8876  ;;  %v8872_v55 = vpop.permute.xlu0 %8871  ;;  %v8936_v4 = vadd.f32 %v8935_v47, %v8934_v36  ;;  %v7781_v51 = vrot.slane %v7780_v44, 2  ;;  %v7761_v42 = vadd.f32 %v7760_v20, %v7759_v43  ;;  %v7768_v56 = vadd.f32 %v7767_v18, %v7766_v26 }
 0xf6c   :  { %v8918_v17 = vmul.f32 %v16904_v12, %v8877_v7  ;;  %v8917_v1 = vmul.f32 %v16879_v39, %v8872_v55  ;;  %v8947_v23 = vrot.slane %v8946_v60, 4  ;;  %v8942_v0 = vrot.slane %v8941_v10, 2 }
 0xf6d   :  { %v7754_v46 = vadd.f32 %v7753_v34, %v7752_v8  ;;  %v8937_v15 = vrot.slane %v8936_v4, 1  ;;  %v7775_v48 = vadd.f32 %v7774_v6, %v7773_v62  ;;  %v7782_v33 = vadd.f32 %v7781_v51, %v7780_v44 }
 0xf6e   :  { %v8953_v9 = vadd.f32 %v8918_v17, %v8917_v1  ;;  %v8948_v29 = vadd.f32 %v8947_v23, %v8946_v60  ;;  %v8943_v58 = vadd.f32 %v8942_v0, %v8941_v10  ;;  %v8930_v8 = vrot.slane %v8929_v14, 1 }
 0xf6f   :  { %v8887_v45 = vpop.permute.xlu1 %8886  ;;  %v8882_v22 = vpop.permute.xlu0 %8881  ;;  %v7755_v55 = vrot.slane %v7754_v46, 1  ;;  %v7749_v53 = vadd.f32 %v7748_v3, %v7747_v27  ;;  %v7769_v28 = vrot.slane %v7768_v56, 1  ;;  %v8938_v10 = vadd.f32 %v8937_v15, %v8936_v4 }
 0xf70   :  { %v8954_v12 = vrot.slane %v8953_v9, 4  ;;  %v8920_v39 = vmul.f32 %v16913_v30, %v8887_v45  ;;  %v8919_v49 = vmul.f32 %v16894_v59, %v8882_v22  ;;  %v8949_v54 = vrot.slane %v8948_v29, 2 }
 0xf71   :  { %v8944_v32 = vrot.slane %v8943_v58, 1  ;;  %v7783_v43 = vrot.slane %v7782_v33, 1  ;;  %v7770_v24 = vadd.f32 %v7769_v28, %v7768_v56  ;;  %v9913_v56 = vld [vmem:[#allocation15] ss:$0 sm:$0xff] }
 0xf72   :  { %v8955_v40 = vadd.f32 %v8954_v12, %v8953_v9  ;;  %v8960_v50 = vadd.f32 %v8920_v39, %v8919_v49  ;;  %v8950_v5 = vadd.f32 %v8949_v54, %v8948_v29  ;;  %v7756_v12 = vadd.f32 %v7755_v55, %v7754_v46 }
 0xf73   :  { %v8897_v2 = vpop.permute.xlu1 %8896  ;;  %v8892_v19 = vpop.permute.xlu0 %8891  ;;  %v7776_v39 = vrot.slane %v7775_v48, 1  ;;  %v8945_v26 = vadd.f32 %v8944_v32, %v8943_v58  ;;  %v8931_v49 = vadd.f32 %v8930_v8, %v8929_v14  ;;  %v7784_v20 = vadd.f32 %v7783_v43, %v7782_v33  ;;  %v18135_v33 = vld [vmem:[#allocation112_spill] sm:$0xff] }
 0xf74   :  { %v8922_v30 = vmul.f32 %v16920_v38, %v8897_v2  ;;  %v8921_v37 = vmul.f32 %v16929_v63, %v8892_v19  ;;  %v8956_v52 = vrot.slane %v8955_v40, 2  ;;  %v8961_v59 = vrot.slane %v8960_v50, 4 }
 0xf75   :  { %v8951_v61 = vrot.slane %v8950_v5, 1  ;;  %v9037_v0 = vsel %vm4505_vm1, %v8938_v10, %v8931_v49  ;;  %v7777_v3 = vadd.f32 %v7776_v39, %v7775_v48  ;;  %v3712_v32 = vadd.f32 %v18135_v33, %v9913_v56 }
 0xf76   :  { %v8967_v11 = vadd.f32 %v8922_v30, %v8921_v37  ;;  %v8962_v57 = vadd.f32 %v8961_v59, %v8960_v50  ;;  %v8957_v60 = vadd.f32 %v8956_v52, %v8955_v40  ;;  %v9021_v40 = vsel %vm4505_vm1, %v17005_v25, %v17002_v13 }
 0xf77   :  { %v8907_v21 = vpop.permute.xlu1 %8906  ;;  %v8902_v31 = vpop.permute.xlu0 %8901  ;;  %v8952_v34 = vadd.f32 %v8951_v61, %v8950_v5  ;;  %v9022_v19 = vsel %vm4507_vm2, %v7749_v53, %v9021_v40  ;;  %v9038_v54 = vsel %vm4507_vm2, %v8945_v26, %v9037_v0  ;;  %v10776_v5 = vld [vmem:[#allocation27 + $0x20] sm:$0xff]  }
 0xf78   :  { %v8968_v35 = vrot.slane %v8967_v11, 4  ;;  %v8924_v38 = vmul.f32 %v16943_v41, %v8907_v21  ;;  %v8923_v63 = vmul.f32 %v16936_v16, %v8902_v31  ;;  %v8963_v7 = vrot.slane %v8962_v57, 2  ;;  %v10774_v21 = vld [vmem:[#allocation27 + $0x30] sm:$0xff]   ;;  %v10775_v31 = vld [vmem:[#allocation27 + $0x28] sm:$0xff]  }
 0xf79   :  { %v7762_v41 = vrot.slane %v7761_v42, 1  ;;  %v8958_v16 = vrot.slane %v8957_v60, 1  ;;  %v9023_v37 = vsel %vm4509_vm3, %v7756_v12, %v9022_v19  ;;  %v9039_v18 = vsel %vm4509_vm3, %v8952_v34, %v9038_v54 }
 0xf7a   :  { %v8969_v17 = vadd.f32 %v8968_v35, %v8967_v11  ;;  %v8974_v1 = vadd.f32 %v8924_v38, %v8923_v63  ;;  %v8964_v23 = vadd.f32 %v8963_v7, %v8962_v57  ;;  %v10773_v57 = vld [vmem:[#allocation27 + $0x38] sm:$0xff]   ;;  %v10778_v38 = vld [vmem:[#allocation27 + $0x10] sm:$0xff]   ;;  %v10779_v63 = vld [vmem:[#allocation27 + $0x8] sm:$0xff]   ;;  %vm9673_vm3 = vcmask 7168  }
 0xf7b   :  { %v7763_v27 = vadd.f32 %v7762_v41, %v7761_v42  ;;  %v8959_v44 = vadd.f32 %v8958_v16, %v8957_v60  ;;  %10490 = vmatprep.subr.bf16.mxu0 %v10773_v57  ;;  %v10777_v35 = vld [vmem:[#allocation27 + $0x18] sm:$0xff]   ;;  %v10780_v42 = vld [vmem:[#allocation27] sm:$0xff]  }
 0xf7c   :  { %v8970_v36 = vrot.slane %v8969_v17, 2  ;;  %v8975_v9 = vrot.slane %v8974_v1, 4  ;;  %v8965_v45 = vrot.slane %v8964_v23, 1  ;;  %10491 = vmatpush3.bf16.msra.mxu0 %v10773_v57  ;;  %v9954_v60 = vld [vmem:[#allocation25] ss:$0 sm:$0xff]  ;;  %v18133_v7 = vld [vmem:[#allocation113_spill] sm:$0xff] }
 0xf7d   :  { %v9024_v13 = vsel %vm4511_vm4, %v7763_v27, %v9023_v37  ;;  %v9040_v25 = vsel %vm4511_vm4, %v8959_v44, %v9039_v18  ;;  %10492 = vmatprep.subr.bf16.mxu0 %v10774_v21  ;;  %v3709_v55 = vadd.f32 %v18133_v7, %v9913_v56  ;;  %vm9685_vm4 = vcmask 0  }
 0xf7e   :  { %v8971_v22 = vadd.f32 %v8970_v36, %v8969_v17  ;;  %v8976_v29 = vadd.f32 %v8975_v9, %v8974_v1  ;;  %v8966_v50 = vadd.f32 %v8965_v45, %v8964_v23  ;;  %v9025_v59 = vsel %vm4513_vm5, %v7770_v24, %v9024_v13  ;;  %v18134_v17 = vld [vmem:[#allocation115_spill] sm:$0xff]  ;;  %v18136_v9 = vld [vmem:[#allocation114_spill] sm:$0xff] }
 0xf7f   :  { %v9026_v4 = vsel %vm4515_vm6, %v7777_v3, %v9025_v59  ;;  %v3701_v1 = vadd.f32 %v9913_v56, %v18134_v17  ;;  %v3717_v8 = vmax.f32 %v3709_v55, 0.0  ;;  %v3704_v53 = vadd.f32 %v9913_v56, %v18136_v9 }
 0xf80   :  { %v8972_v62 = vrot.slane %v8971_v22, 1  ;;  %v8977_v47 = vrot.slane %v8976_v29, 2  ;;  %v9041_v46 = vsel %vm4513_vm5, %v8966_v50, %v9040_v25  ;;  %v9027_v51 = vsel %vm4517_vm7, %v7784_v20, %v9026_v4  ;;  %10493 = vmatpush3.bf16.msra.mxu0 %v10774_v21 }
 0xf81   :  { %10494 = vmatprep.subr.bf16.mxu0 %v10775_v31  ;;  %v3715_v28 = vmax.f32 %v3701_v1, 0.0  ;;  %v3716_v49 = vmax.f32 %v3704_v53, 0.0 }
 0xf82   :  { %v8978_v2 = vadd.f32 %v8977_v47, %v8976_v29  ;;  %v8973_v30 = vadd.f32 %v8972_v62, %v8971_v22  ;;  %v3718_v22 = vmax.f32 %v3712_v32, 0.0 }
 0xf84   :  { %v8979_v52 = vrot.slane %v8978_v2, 1  ;;  %v9042_v11 = vsel %vm4515_vm6, %v8973_v30, %v9041_v46  ;;  %10495 = vmatpush3.bf16.msra.mxu0 %v10775_v31 }
 0xf85   :  { %10496 = vmatprep.subr.bf16.mxu0 %v10776_v5 }
 0xf86   :  { %v8980_v6 = vadd.f32 %v8979_v52, %v8978_v2 }
 0xf88   :  { %v9043_v14 = vsel %vm4517_vm7, %v8980_v6, %v9042_v11  ;;  %10497 = vmatpush3.bf16.msra.mxu0 %v10776_v5 }
 0xf89   :  { %v9046_v58 = vpack.c.bf16 %v9043_v14, %v9027_v51  ;;  %10498 = vmatprep.subr.bf16.mxu0 %v10777_v35 }
 0xf8b   :  { %10487 = vmatmul.mubr.bf16.vlgmr.msra.gmra.mxu1 %v9046_v58 }
 0xf8c   :  { %10499 = vmatpush3.bf16.msra.mxu0 %v10777_v35 }
 0xf8d   :  { %10500 = vmatprep.subr.bf16.mxu0 %v10778_v38 }
 0xf90   :  { %10501 = vmatpush3.bf16.msra.mxu0 %v10778_v38 }
 0xf91   :  { %10502 = vmatprep.subr.bf16.mxu0 %v10779_v63 }
 0xf94   :  { %10503 = vmatpush3.bf16.msra.mxu0 %v10779_v63 }
 0xf95   :  { %10504 = vmatprep.subr.bf16.mxu0 %v10780_v42 }
 0xf98   :  { %10505 = vmatpush3.bf16.msra.mxu0 %v10780_v42 }
0x104b   :  { %v10488_v15 = vpop.f32.mrf.mxu1 }
0x104c   :  { %v9161_v48 = vadd.f32 %v10488_v15, %v9954_v60 }
0x104d   :  { %v9152_v23 = vpop.f32.mrf.mxu1 }
0x104e   :  { %v9169_v61 = vmax.f32 %v9161_v48, 0.0  ;;  %v9153_v36 = vadd.f32 %v9954_v60, %v9152_v23 }
0x104f   :  { %v10489_v41 = vpop.f32.mrf.mxu1 }
0x1050   :  { %v9173_v16 = vmul.f32 %v9169_v61, %v3717_v8  ;;  %v9167_v10 = vmax.f32 %v9153_v36, 0.0  ;;  %v9164_v45 = vadd.f32 %v10489_v41, %v9954_v60 }
0x1051   :  { %v9155_v29 = vpop.f32.mrf.mxu1 }
0x1052   :  { %v9187_v12 = vrot.slane %v9173_v16, 4  ;;  %v9171_v39 = vmul.f32 %v9167_v10, %v3715_v28  ;;  %v9170_v43 = vmax.f32 %v9164_v45, 0.0  ;;  %v9156_v26 = vadd.f32 %v9954_v60, %v9155_v29 }
0x1054   :  { %v9188_v34 = vadd.f32 %v9187_v12, %v9173_v16  ;;  %v9175_v62 = vrot.slane %v9171_v39, 4  ;;  %v9174_v47 = vmul.f32 %v9170_v43, %v3718_v22  ;;  %v9168_v40 = vmax.f32 %v9156_v26, 0.0 }
0x1056   :  { %v9189_v27 = vrot.slane %v9188_v34, 2  ;;  %v9176_v44 = vadd.f32 %v9175_v62, %v9171_v39  ;;  %v9193_v24 = vrot.slane %v9174_v47, 4  ;;  %v9172_v0 = vmul.f32 %v9168_v40, %v3716_v49 }
0x1058   :  { %v9190_v50 = vadd.f32 %v9189_v27, %v9188_v34  ;;  %v9177_v2 = vrot.slane %v9176_v44, 2  ;;  %v9194_v19 = vadd.f32 %v9193_v24, %v9174_v47  ;;  %v9181_v3 = vrot.slane %v9172_v0, 4 }
0x105a   :  { %v9191_v54 = vrot.slane %v9190_v50, 1  ;;  %v9178_v30 = vadd.f32 %v9177_v2, %v9176_v44  ;;  %v9195_v37 = vrot.slane %v9194_v19, 2  ;;  %v9182_v20 = vadd.f32 %v9181_v3, %v9172_v0 }
0x105c   :  { %v9192_v18 = vadd.f32 %v9191_v54, %v9190_v50  ;;  %v9179_v52 = vrot.slane %v9178_v30, 1  ;;  %v9196_v13 = vadd.f32 %v9195_v37, %v9194_v19  ;;  %v9183_v25 = vrot.slane %v9182_v20, 2 }
0x105e   :  { %v9202_v59 = vmul.f32 0.125, %v9192_v18  ;;  %v9180_v46 = vadd.f32 %v9179_v52, %v9178_v30  ;;  %v9197_v6 = vrot.slane %v9196_v13, 1  ;;  %v9184_v4 = vadd.f32 %v9183_v25, %v9182_v20  ;;  %v10782_v25 = vld [vmem:[#allocation30 + $0x30] sm:$0xff]  }
0x1060   :  { %v9206_v11 = vsub.f32 %v9173_v16, %v9202_v59  ;;  %v9200_v51 = vmul.f32 0.125, %v9180_v46  ;;  %v9198_v14 = vadd.f32 %v9197_v6, %v9196_v13  ;;  %v9185_v58 = vrot.slane %v9184_v4, 1  ;;  %v10781_v13 = vld [vmem:[#allocation30 + $0x38] sm:$0xff]   ;;  %v10783_v59 = vld [vmem:[#allocation30 + $0x28] sm:$0xff]   ;;  %v10784_v46 = vld [vmem:[#allocation30 + $0x20] sm:$0xff]  }
0x1061   :  { %10510 = vmatprep.subr.bf16.mxu1 %v10781_v13  ;;  %v10785_v6 = vld [vmem:[#allocation30 + $0x18] sm:$0xff]  }
0x1062   :  { %v9210_v57 = vmul.f32 %v9206_v11, %v9206_v11  ;;  %v9204_v21 = vsub.f32 %v9171_v39, %v9200_v51  ;;  %v9203_v31 = vmul.f32 0.125, %v9198_v14  ;;  %v9186_v5 = vadd.f32 %v9185_v58, %v9184_v4  ;;  %10511 = vmatpush3.bf16.msra.mxu1 %v10781_v13  ;;  %v10786_v4 = vld [vmem:[#allocation30 + $0x10] sm:$0xff]   ;;  %v10788_v51 = vld [vmem:[#allocation30] sm:$0xff]  }
0x1063   :  { %10512 = vmatprep.subr.bf16.mxu1 %v10782_v25 }
0x1064   :  { %v9224_v35 = vrot.slane %v9210_v57, 4  ;;  %v9208_v38 = vmul.f32 %v9204_v21, %v9204_v21  ;;  %v9207_v63 = vsub.f32 %v9174_v47, %v9203_v31  ;;  %v9201_v42 = vmul.f32 0.125, %v9186_v5 }
0x1066   :  { %v9225_v56 = vadd.f32 %v9224_v35, %v9210_v57  ;;  %v9212_v60 = vrot.slane %v9208_v38, 4  ;;  %v9211_v7 = vmul.f32 %v9207_v63, %v9207_v63  ;;  %v9205_v55 = vsub.f32 %v9172_v0, %v9201_v42  ;;  %10513 = vmatpush3.bf16.msra.mxu1 %v10782_v25 }
0x1067   :  { %10514 = vmatprep.subr.bf16.mxu1 %v10783_v59 }
0x1068   :  { %v9226_v15 = vrot.slane %v9225_v56, 2  ;;  %v9213_v17 = vadd.f32 %v9212_v60, %v9208_v38  ;;  %v9230_v1 = vrot.slane %v9211_v7, 4  ;;  %v9209_v48 = vmul.f32 %v9205_v55, %v9205_v55 }
0x106a   :  { %v9227_v33 = vadd.f32 %v9226_v15, %v9225_v56  ;;  %v9214_v32 = vrot.slane %v9213_v17, 2  ;;  %v9231_v23 = vadd.f32 %v9230_v1, %v9211_v7  ;;  %v9218_v8 = vrot.slane %v9209_v48, 4  ;;  %10515 = vmatpush3.bf16.msra.mxu1 %v10783_v59 }
0x106b   :  { %10516 = vmatprep.subr.bf16.mxu1 %v10784_v46 }
0x106c   :  { %v9228_v61 = vrot.slane %v9227_v33, 1  ;;  %v9215_v36 = vadd.f32 %v9214_v32, %v9213_v17  ;;  %v9232_v9 = vrot.slane %v9231_v23, 2  ;;  %v9219_v53 = vadd.f32 %v9218_v8, %v9209_v48  ;;  %v9963_v8 = vld [vmem:[#allocation28] ss:$0 sm:$0xff] }
0x106e   :  { %v9229_v41 = vadd.f32 %v9228_v61, %v9227_v33  ;;  %v9216_v28 = vrot.slane %v9215_v36, 1  ;;  %v9233_v16 = vadd.f32 %v9232_v9, %v9231_v23  ;;  %v9220_v10 = vrot.slane %v9219_v53, 2  ;;  %10517 = vmatpush3.bf16.msra.mxu1 %v10784_v46 }
0x106f   :  { %10518 = vmatprep.subr.bf16.mxu1 %v10785_v6 }
0x1070   :  { %v9217_v45 = vadd.f32 %v9216_v28, %v9215_v36  ;;  %v9234_v22 = vrot.slane %v9233_v16, 1  ;;  %v9221_v29 = vadd.f32 %v9220_v10, %v9219_v53  ;;  %v9238_v12 = vmul.f32 0.125, %v9229_v41 }
0x1072   :  { %v9236_v39 = vmul.f32 0.125, %v9217_v45  ;;  %v9235_v43 = vadd.f32 %v9234_v22, %v9233_v16  ;;  %v9222_v26 = vrot.slane %v9221_v29, 1  ;;  %v9242_v47 = vadd.f32 1e-05, %v9238_v12  ;;  %10519 = vmatpush3.bf16.msra.mxu1 %v10785_v6 }
0x1073   :  { %10520 = vmatprep.subr.bf16.mxu1 %v10786_v4 }
0x1074   :  { %v9240_v49 = vadd.f32 1e-05, %v9236_v39  ;;  %v9239_v34 = vmul.f32 0.125, %v9235_v43  ;;  %v9223_v62 = vadd.f32 %v9222_v26, %v9221_v29  ;;  %v18137_v26 = vld [vmem:[#allocation47_spill] sm:$0xff] }
0x1076   :  { %11493 = vrsqrt.f32 %v9240_v49  ;;  %v9243_v40 = vadd.f32 1e-05, %v9239_v34  ;;  %v9237_v27 = vmul.f32 0.125, %v9223_v62  ;;  %10521 = vmatpush3.bf16.msra.mxu1 %v10786_v4  ;;  %v9614_v49 = vadd.s32 8, %v18137_v26 }
0x1078   :  { %11495 = vrsqrt.f32 %v9243_v40  ;;  %v9241_v44 = vadd.f32 1e-05, %v9237_v27  ;;  %v9626_v27 = vand.u32 7, %v9614_v49 }
0x1079   :  { %11497 = vrsqrt.f32 %v9242_v47 }
0x107a   :  { %11499 = vrsqrt.f32 %v9241_v44  ;;  %v9619_v44 = vand.u32 7, %v18137_v26 }
0x1083   :  { %v11494_v24 = vpop.eup %11493 }
0x1084   :  { %v9248_v0 = vmul.f32 %v11494_v24, %v9204_v21  ;;  %v9642_v24 = vadd.s32 8, %v9626_v27 }
0x1085   :  { %v11496_v50 = vpop.eup %11495 }
0x1086   :  { %v11498_v2 = vpop.eup %11497  ;;  %v9504_v19 = vmul.f32 %v9248_v0, %v9248_v0  ;;  %v9251_v3 = vmul.f32 %v11496_v50, %v9207_v63  ;;  %v18138_v50 = vld [vmem:[#allocation59_spill] sm:$0xff] }
0x1087   :  { %v11500_v54 = vpop.eup %11499  ;;  %v9250_v20 = vmul.f32 %v11498_v2, %v9206_v11  ;;  %v10787_v11 = vld [vmem:[#allocation30 + $0x8] sm:$0xff]   ;;  %vm9640_vm13 = vcmp.ne.s32.totalorder %v18138_v50, %v9626_v27  ;;  %vm9644_vm14 = vcmp.ne.s32.totalorder %v18138_v50, %v9642_v24  ;;  %vm9639_vm15 = vcmp.ne.s32.totalorder %v18138_v50, %v9619_v44 }
0x1088   :  { %9505 = vadd.xlane.f32.xlu1 %v9504_v19  ;;  %v9517_v30 = vmul.f32 %v9251_v3, %v9251_v3  ;;  %v9249_v37 = vmul.f32 %v11500_v54, %v9205_v55  ;;  %10522 = vmatprep.subr.bf16.mxu1 %v10787_v11  ;;  %vm9646_vm1 = vmand %vm9640_vm13, %vm9644_vm14 }
0x1089   :  { %v9253_v52 = vpack.c.bf16 %v9251_v3, %v9250_v20  ;;  %10523 = vmatpush3.bf16.msra.mxu1 %v10787_v11  ;;  %v9972_v20 = vld [vmem:[#allocation31] ss:$0 sm:$0xff] }
0x108a   :  { %9518 = vadd.xlane.f32.xlu0 %v9517_v30  ;;  %v9252_v18 = vpack.c.bf16 %v9249_v37, %v9248_v0  ;;  %10524 = vmatprep.subr.bf16.mxu1 %v10788_v51 }
0x108c   :  { %10506 = vmatprep.mubr.bf16.mxu0 %v9252_v18 }
0x108d   :  { %10507 = vmatmul.mubr.bf16.vlgmr.msra.gmra.mxu0 %v9253_v52  ;;  %10525 = vmatpush3.bf16.msra.mxu1 %v10788_v51 }
0x1111   :  { %v9506_v14 = vpop.xlane.xlu1 %9505 }
0x1112   :  { %11501 = vrsqrt.f32 %v9506_v14  ;;  %vm9509_vm9 = vcmp.eq.f32.partialorder %v9506_v14, inf  ;;  %v9512_v5 = vand.u32 2147483648, %v9506_v14  ;;  %vm9511_vm10 = vcmp.eq.f32.partialorder %v9506_v14, 0.0 }
0x1113   :  { %v9519_v58 = vpop.xlane.xlu0 %9518 }
0x1114   :  { %11503 = vrsqrt.f32 %v9519_v58  ;;  %vm9522_vm11 = vcmp.eq.f32.partialorder %v9519_v58, inf  ;;  %v9525_v42 = vand.u32 2147483648, %v9519_v58  ;;  %vm9524_vm12 = vcmp.eq.f32.partialorder %v9519_v58, 0.0 }
0x111f   :  { %v11502_v57 = vpop.eup %11501 }
0x1120   :  { %v9508_v21 = vmul.f32 %v11502_v57, %v9506_v14 }
0x1121   :  { %v11504_v31 = vpop.eup %11503 }
0x1122   :  { %v9510_v35 = vsel %vm9509_vm9, %v9506_v14, %v9508_v21  ;;  %v9521_v38 = vmul.f32 %v11504_v31, %v9519_v58 }
0x1123   :  { %v9513_v63 = vsel %vm9511_vm10, %v9512_v5, %v9510_v35 }
0x1124   :  { %v9514_v56 = vmax.f32 %v9513_v63, 1e-12  ;;  %v9523_v60 = vsel %vm9522_vm11, %v9519_v58, %v9521_v38 }
0x1125   :  { %v9526_v7 = vsel %vm9524_vm12, %v9525_v42, %v9523_v60 }
0x1126   :  { %11505 = vrcp.f32 %v9514_v56  ;;  %v9527_v55 = vmax.f32 %v9526_v7, 1e-12 }
0x1128   :  { %11507 = vrcp.f32 %v9527_v55 }
0x1133   :  { %v11506_v15 = vpop.eup %11505 }
0x1134   :  { %v9516_v17 = vmul.f32 %v11506_v15, %v9248_v0  ;;  %v9641_v0 = vadd.s32 8, %v9619_v44 }
0x1135   :  { %v11508_v1 = vpop.eup %11507 }
0x1136   :  { %10534 = vmatprep.mubr.f32.mxu0 %v9516_v17  ;;  %v9529_v48 = vmul.f32 %v11508_v1, %v9251_v3  ;;  %vm9643_vm0 = vcmp.ne.s32.totalorder %v18138_v50, %v9641_v0 }
0x1137   :  { %vm9645_vm2 = vmand %vm9639_vm15, %vm9643_vm0 }
0x1138   :  { %10530 = vmatprep.subr.mxu0 %v9529_v48  ;;  %v9647_v33 = vmul.f32 %v9529_v48, %v9516_v17 }
0x1139   :  { %10531 = vmatpush3.xpose.msra.mxu0 %v9529_v48 }
0x113a   :  { %9648 = vadd.xlane.f32.xlu0 %v9647_v33  ;;  %10532 = vmatprep.subr.mxu0 %v9516_v17 }
0x113d   :  { %10533 = vmatpush3.xpose.msra.mxu0 %v9516_v17 }
0x1140   :  { %10535 = vmatmul.mubr.f32.vlgmr.msra.gmra.mxu0 %v9529_v48 }
0x114d   :  { %v10508_v32 = vpop.f32.mrf.mxu0 }
0x114e   :  { %v9368_v53 = vadd.f32 %v10508_v32, %v9963_v8 }
0x114f   :  { %v9359_v23 = vpop.f32.mrf.mxu0 }
0x1150   :  { %v9360_v36 = vadd.f32 %v9963_v8, %v9359_v23  ;;  %v9376_v22 = vmax.f32 %v9368_v53, 0.0 }
0x1151   :  { %v10509_v61 = vpop.f32.mrf.mxu0 }
0x1152   :  { %v9371_v9 = vadd.f32 %v10509_v61, %v9963_v8  ;;  %v9374_v10 = vmax.f32 %v9360_v36, 0.0 }
0x1153   :  { %v9362_v41 = vpop.f32.mrf.mxu0 }
0x1154   :  { %v9363_v28 = vadd.f32 %v9963_v8, %v9362_v41  ;;  %v9377_v16 = vmax.f32 %v9371_v9, 0.0 }
0x1156   :  { %v9375_v45 = vmax.f32 %v9363_v28, 0.0  ;;  %v9379_v12 = vpack.c.bf16 %v9377_v16, %v9376_v22 }
0x1158   :  { %v9378_v29 = vpack.c.bf16 %v9375_v45, %v9374_v10 }
0x115a   :  { %10526 = vmatprep.mubr.bf16.mxu1 %v9378_v29 }
0x115b   :  { %10527 = vmatmul.mubr.bf16.vlgmr.msra.gmra.mxu1 %v9379_v12 }
0x11c3   :  { %v9649_v11 = vpop.xlane.xlu0 %9648 }
0x11c4   :  { %v9650_v51 = vmul.f32 2.0, %v9649_v11 }
0x11c6   :  { %v9651_v14 = vmul.f32 1.442695, %v9650_v51 }
0x1200   :  { %v10536_v39 = vpop.f32.mrf.mxu0 }
0x1201   :  { %v9607_v43 = vmul.f32 2.0, %v10536_v39 }
0x1202   :  { %v9596_v34 = vpop.f32.mrf.mxu0 }
0x1203   :  { %v9610_v62 = vmul.f32 1.442695, %v9607_v43  ;;  %v9606_v47 = vmul.f32 2.0, %v9596_v34 }
0x1205   :  { %11509 = vpow2.f32 %v9610_v62  ;;  %v9608_v40 = vmul.f32 1.442695, %v9606_v47 }
0x1207   :  { %11511 = vpow2.f32 %v9608_v40 }
0x1208   :  { %11513 = vpow2.f32 %v9651_v14 }
0x1212   :  { %v11510_v2 = vpop.eup %11509 }
0x1213   :  { %v9654_v19 = vsel %vm9646_vm1, %v11510_v2, 0.0 }
0x1214   :  { %v11512_v3 = vpop.eup %11511  ;;  %v9658_v54 = vsel %vm4520_vm8, %v9654_v19, 0.0 }
0x1215   :  { %9659 = vadd.xlane.f32.xlu1 %v9658_v54  ;;  %v9653_v30 = vsel %vm9645_vm2, %v11512_v3, 0.0  ;;  %v11514_v58 = vpop.eup %11513 }
0x1216   :  { %v9655_v37 = vsel %vm4520_vm8, %v9653_v30, 0.0 }
0x1217   :  { %9656 = vadd.xlane.f32.xlu0 %v9655_v37 }
0x121b   :  { %v10528_v18 = vpop.f32.mrf.mxu1 }
0x121c   :  { %v9494_v52 = vadd.f32 %v10528_v18, %v9972_v20 }
0x121d   :  { %v9485_v13 = vpop.f32.mrf.mxu1 }
0x121e   :  { %9502 = vst [vmem:[%s17075_s20 + $0x10] sm:$0xff] %v9494_v52  ;;  %v9486_v25 = vadd.f32 %v9972_v20, %v9485_v13 }
0x121f   :  { %v10529_v59 = vpop.f32.mrf.mxu1 }
0x1220   :  { %9500 = vst [vmem:[%s17075_s20] sm:$0xff] %v9486_v25  ;;  %v9497_v46 = vadd.f32 %v10529_v59, %v9972_v20 }
0x1221   :  { %v9488_v6 = vpop.f32.mrf.mxu1 }
0x1222   :  { %9503 = vst [vmem:[%s17075_s20 + $0x18] sm:$0xff] %v9497_v46  ;;  %v9489_v4 = vadd.f32 %v9972_v20, %v9488_v6 }
0x1224   :  { %9501 = vst [vmem:[%s17075_s20 + $0x8] sm:$0xff] %v9489_v4  ;;  %s12004_s20 = smov [#allocation33]  }
0x1225   :  { %s9695_s13 = sshll.u32 %s12004_s20, 4  ;;  %s9696_s13 = int_to_ptr.vmem [resolvable:$true] %s9695_s13 }
0x1226   :  { %s11919_s14 = scalar_lea.vmem %s9696_s13, 16  ;;  %s11923_s30 = scalar_lea.vmem %s9696_s13, 32 }
0x1227   :  { %p11920_p3 = scmp.ne.s32.totalorder %s9696_s13, %s11919_s14  ;;  %p11924_p4 = scmp.lt.s32.totalorder %s9696_s13, %s9696_s13 }
0x1228   :  { %p11925_p5 = scmp.lt.s32.totalorder %s11923_s30, %s11919_s14 }
0x122a   :  { %p11926_p6 = por %p11925_p5, %p11924_p4 }
0x122c   :  { %p11927_p7 = pnand %p11926_p6, %p11920_p3 }
0x129e   :  { %v9660_v57 = vpop.xlane.xlu1 %9659 }
0x129f   :  { %v9662_v21 = vadd.f32 %v11514_v58, %v9660_v57 }
0x12a0   :  { %v9657_v31 = vpop.xlane.xlu0 %9656 }
0x12a1   :  { %11515 = vrcp.f32 %v9662_v21  ;;  %v9661_v5 = vadd.f32 %v11514_v58, %v9657_v31 }
0x12a3   :  { %11517 = vrcp.f32 %v9661_v5 }
0x12ae   :  { %v11516_v35 = vpop.eup %11515 }
0x12af   :  { %v9666_v38 = vmul.f32 %v11516_v35, %v11514_v58 }
0x12b0   :  { %v11518_v63 = vpop.eup %11517 }
0x12b1   :  { %11519 = vlog2.f32 %v9666_v38  ;;  %v9664_v42 = vmul.f32 %v11518_v63, %v11514_v58 }
0x12b3   :  { %11521 = vlog2.f32 %v9664_v42 }
0x12be   :  { %v11520_v56 = vpop.eup %11519 }
0x12bf   :  { %v9670_v60 = vmul.f32 0.6931472, %v11520_v56 }
0x12c0   :  { %v11522_v7 = vpop.eup %11521 }
0x12c1   :  { %v9668_v55 = vmul.f32 0.6931472, %v11522_v7  ;;  %v9672_v15 = vsub.f32 0.0, %v9670_v60 }
0x12c3   :  { %v9671_v17 = vsub.f32 0.0, %v9668_v55  ;;  %v9675_v48 = vsel %vm9673_vm3, %v9672_v15, 0.0 }
0x12c5   :  { %v9674_v1 = vsel %vm9673_vm3, %v9671_v17, 0.0 }
0x12c6   :  { %v9676_v33 = vadd.f32 %v9675_v48, %v9674_v1 }
0x12c8   :  { %v9677_v32 = vrot.slane %v9676_v33, 4 }
0x12ca   :  { %v9678_v23 = vadd.f32 %v9677_v32, %v9676_v33 }
0x12cc   :  { %v9679_v8 = vrot.slane %v9678_v23, 2 }
0x12ce   :  { %v9680_v61 = vadd.f32 %v9679_v8, %v9678_v23 }
0x12d0   :  { %v9681_v36 = vrot.slane %v9680_v61, 1 }
0x12d2   :  { %v9682_v9 = vadd.f32 %v9681_v36, %v9680_v61 }
0x12d4   :  { %v9684_v53 = vmul.f32 0.0625, %v9682_v9 }
0x12d6   :  { %9686 = vst.msk [vmem:[#allocation33] sm:$0x1] %vm9685_vm4, %v9684_v53 }
0x12d7   :  { %11930 = shalt.err (!%p11927_p7)
}
0x12d8   :  { %9698 = dma.vmem_to_hbm [thread:$0]  %s9696_s13, 16, %s17076_s21, [#allocation9]  }
0x12d9   :  { %11969 = dma.done.wait [#allocation9], 16  }
0x12da   :  { %11970 = vsyncadd [#allocation9], 4294967280 }
0x12db   :  { %9704 = vsyncpa [#allocation8], 1 }
0x12dc   :  { %9705 = vsyncpa [#allocation11], 1 }
0x12dd   :  { %9706 = vsyncpa [#allocation14], 1 }
0x12de   :  { %9707 = vsyncpa [#allocation17], 1 }
0x12df   :  { %9708 = vsyncpa [#allocation20], 1 }
0x12e0   :  { %9709 = vsyncpa [#allocation23], 1 }
0x12e1   :  { %9710 = vsyncpa [#allocation26], 1 }
0x12e2   :  { %9711 = vsyncpa [#allocation29], 1 }
0x12e3   :  { %9712 = vsyncpa [#allocation32], 1 }
0x12e4   :  { %9713 = vsyncpa [#allocation9], 1 }
0x12e5   :  { %9714 = vsyncmov [#allocation4] }
0x12e8   :  { %s9715_s4 = vpop.sfrf %9714 }
0x12e9   :  { %p9981_p8 = scmp.ne.s32.totalorder %s9715_s4, 0 }
0x12eb   :  { %9719 = shalt.err (%p9981_p8)  }

</bundles_post_ra>
